<compile_context>
chip_gen: v6e
topology: v6e:2x2x1
jax: 0.10.0
libtpu: 0.0.40
codegen_flags: <defaults>
</compile_context>

<pallas_src>
import jax
import jax.numpy as jnp
from jax.experimental import pallas as pl
from jax.experimental.pallas import tpu as pltpu


def _round_up(x, m):
    return ((x + m - 1) // m) * m


def _pick_band_rows(H, W, max_m=256):
    """Largest even divisor of H with band matmul M = BH*W <= max_m
    (M = 256 fills the 256-wide MXU on v6e/v7x).  Falls back to 2."""
    best = 2
    for bh in range(2, H + 1, 2):
        if H % bh == 0 and bh * W <= max_m:
            best = bh
    return best


# ----------------------------------------------------------------------------
# Fused kernel: conv1(im2col) -> conv2 -> conv3 -> 2x2 max-pool, all in VMEM.
# ----------------------------------------------------------------------------
def _store_kw_blocks(dst_ref, row0, y_f32, store_dtype):
    """Store one band of activations into the next layer's kw-blocked scratch.

    dst_ref lanes are laid out as [kw=0 | kw=1 | kw=2] blocks of C channels:
      dst[r, w, 0*C + c] = y[r-row0, w-1, c]   (0 at w=0)
      dst[r, w, 1*C + c] = y[r-row0, w,   c]
      dst[r, w, 2*C + c] = y[r-row0, w+1, c]   (0 at w=W-1)
    All three stores are lane-aligned full-width stores; the +/-1 column shift
    is done in-register (sublane shift) before the cast/store.
    """
    bh, W, C = y_f32.shape
    z = jnp.zeros((bh, 1, C), y_f32.dtype)
    y_r = jnp.concatenate([z, y_f32[:, :W - 1, :]], axis=1)   # kw = 0 tap
    y_l = jnp.concatenate([y_f32[:, 1:, :], z], axis=1)       # kw = 2 tap
    dst_ref[row0:row0 + bh, :, 0:C] = y_r.astype(store_dtype)
    dst_ref[row0:row0 + bh, :, C:2 * C] = y_f32.astype(store_dtype)
    dst_ref[row0:row0 + bh, :, 2 * C:3 * C] = y_l.astype(store_dtype)


def _downconv_fused_kernel(cols_ref, w1_ref, b1_ref, w2_ref, b2_ref,
                           w3_ref, b3_ref, o_ref, a1_ref, a2_ref):
    # cols_ref: (1, H*W, 9*C0)  f32   im2col of the input (layer-1 LHS)
    # w1_ref  : (9*C0, C1)      f32   layer-1 weight (BN scale folded in)
    # w2_ref  : (3, 3*C1, C2)   bf16  layer-2 weight, rows = (kw, cin) per kh
    # w3_ref  : (3, 3*C2, C3)   bf16  layer-3 weight, rows = (kw, cin) per kh
    # b*_ref  : (1, C*)         f32   folded BN bias (includes conv bias)
    # o_ref   : (1, H//2, W//2, C3)   pooled output (f32)
    # a1_ref  : (H+2, W, 3*C1)  bf16  kw-blocked layer-1 activation scratch
    # a2_ref  : (H+2, W, 3*C2)  bf16  kw-blocked layer-2 activation scratch
    Hh, Wh, C3 = o_ref.shape[1], o_ref.shape[2], o_ref.shape[3]
    H, W = 2 * Hh, 2 * Wh
    C1 = a1_ref.shape[2] // 3
    C2 = a2_ref.shape[2] // 3
    BH = _pick_band_rows(H, W)          # band matmul M = BH*W (target 256)
    cdt = a1_ref.dtype                  # bf16 matmul-operand dtype

    # Zero only the top/bottom halo rows (conv zero padding); interiors are
    # fully overwritten every grid step and the left/right halo is baked into
    # the kw-shifted lane blocks at store time.
    for ref in (a1_ref, a2_ref):
        zrow = jnp.zeros((1,) + ref.shape[1:], ref.dtype)
        ref[0:1] = zrow
        ref[H + 1:H + 2] = zrow

    def conv3x3_band(src_ref, w_ref, b_ref, h0, bh):
        # One conv band = 3 MXU matmuls (K = 3*Cin, kw folded into the lane
        # axis of src_ref), f32 accumulation, bias + ReLU epilogue.
        k3 = src_ref.shape[2]
        acc = None
        for kh in range(3):
            patch = src_ref[h0 + kh:h0 + kh + bh].reshape(bh * W, k3)
            d = jnp.dot(patch, w_ref[kh], preferred_element_type=jnp.float32)
            acc = d if acc is None else acc + d
        return jnp.maximum(acc + b_ref[...], 0.0)

    # ---- layer 1: single im2col matmul (K = 9*C0) + bias + ReLU -------------
    y1 = jnp.dot(cols_ref[0], w1_ref[...], preferred_element_type=jnp.float32)
    y1 = jnp.maximum(y1 + b1_ref[...], 0.0).reshape(H, W, C1)
    _store_kw_blocks(a1_ref, 1, y1, cdt)

    # ---- layer 2: conv3x3 (Cin=128 -> C2 padded), row-banded ----------------
    for bi in range(H // BH):
        h0 = bi * BH
        y2 = conv3x3_band(a1_ref, w2_ref, b2_ref, h0, BH).reshape(BH, W, C2)
        _store_kw_blocks(a2_ref, 1 + h0, y2, cdt)

    # ---- layer 3: conv3x3 + bias + ReLU + 2x2 max-pool ----------------------
    for bi in range(H // BH):
        h0 = bi * BH
        y3 = conv3x3_band(a2_ref, w3_ref, b3_ref, h0, BH).reshape(BH, W, C3)
        p = jnp.max(y3.reshape(BH, Wh, 2, C3), axis=2)        # pool over W pairs
        p = jnp.max(p.reshape(BH // 2, 2, Wh, C3), axis=1)    # pool over H pairs
        o_ref[0, h0 // 2:h0 // 2 + BH // 2] = p


# ----------------------------------------------------------------------------
# Parameter construction (deterministic, synthetic) + BN folding.
# ----------------------------------------------------------------------------
def init_downconv_params(key, in_channels, out_channels):
    """Logical (unpadded) per-layer (w_hwio, scale, bias) with eval-mode BN
    (and the conv bias) folded into a per-channel scale/bias."""
    chans = [in_channels, 128, 196, out_channels]
    eps = 1e-5
    params = []
    for i in range(3):
        cin, cout = chans[i], chans[i + 1]
        key, k1, k2, k3, k4, k5, k6 = jax.random.split(key, 7)
        w = jax.random.normal(k1, (3, 3, cin, cout), jnp.float32) / jnp.sqrt(9.0 * cin)
        b = 0.1 * jax.random.normal(k2, (cout,), jnp.float32)
        gamma = 1.0 + 0.1 * jax.random.normal(k3, (cout,), jnp.float32)
        beta = 0.1 * jax.random.normal(k4, (cout,), jnp.float32)
        running_mean = 0.05 * jax.random.normal(k5, (cout,), jnp.float32)
        running_var = 1.0 + 0.1 * jax.random.uniform(k6, (cout,), jnp.float32)
        scale = gamma / jnp.sqrt(running_var + eps)
        bias_f = beta + (b - running_mean) * scale
        params.append((w, scale, bias_f))
    return params


def _prep_kernel_params(params):
    """Fold the BN scale into the conv weights, pad channels to lane-friendly
    sizes, reshape to the kernel's (kh, [kw, cin]) matmul layout, and cast the
    heavy-layer weights to bf16.  Padded weight columns / bias entries are 0,
    so ReLU keeps padded channels exactly zero through the whole pipeline."""
    (w1, s1, b1), (w2, s2, b2), (w3, s3, b3) = params
    c0, c1 = w1.shape[2], w1.shape[3]      # c1 = 128 (lane aligned)
    c2 = w2.shape[3]                       # 196
    c3 = w3.shape[3]                       # out_channels
    c2p = _round_up(c2, 128)               # 256
    c3p = _round_up(max(c3, 128), 128)     # >= 128

    w1f = (w1 * s1).reshape(9 * c0, c1)                      # rows = (kh, kw, cin)
    w2f = jnp.pad(w2 * s2, ((0, 0), (0, 0), (0, 0), (0, c2p - c2)))
    w3f = jnp.pad(w3 * s3, ((0, 0), (0, 0), (0, c2p - c2), (0, c3p - c3)))
    b2f = jnp.pad(b2, (0, c2p - c2))
    b3f = jnp.pad(b3, (0, c3p - c3))

    w2f = w2f.reshape(3, 3 * c1, c2p)      # per-kh rows = (kw, cin)
    w3f = w3f.reshape(3, 3 * c2p, c3p)

    return ((w1f.astype(jnp.float32), b1.reshape(1, c1).astype(jnp.float32)),
            (w2f.astype(jnp.bfloat16), b2f.reshape(1, c2p).astype(jnp.float32)),
            (w3f.astype(jnp.bfloat16), b3f.reshape(1, c3p).astype(jnp.float32)),
            c3)


def downconv_forward(x_nchw, params):
    """NCHW in, NCHW out (PyTorch convention); one fused Pallas kernel."""
    (w1m, b1), (w2p, b2), (w3p, b3), c_out = _prep_kernel_params(params)
    N, C0, H, W = x_nchw.shape
    assert H % 2 == 0 and W % 2 == 0, "MaxPool2d(2) needs even H, W"
    assert W % 8 == 0, "kernel assumes sublane-friendly W"
    K1, C1 = w1m.shape
    C2P = w2p.shape[2]
    C3P = w3p.shape[2]
    Hh, Wh = H // 2, W // 2

    x = jnp.transpose(x_nchw, (0, 2, 3, 1)).astype(jnp.float32)     # NHWC
    # Host-side im2col of the tiny C0-channel input only (K1 = 9*C0 columns);
    # all per-layer activation padding happens inside the kernel in VMEM.
    xp = jnp.pad(x, ((0, 0), (1, 1), (1, 1), (0, 0)))
    cols = jnp.concatenate(
        [xp[:, kh:kh + H, kw:kw + W, :] for kh in range(3) for kw in range(3)],
        axis=-1).reshape(N, H * W, K1)

    out_p = pl.pallas_call(
        _downconv_fused_kernel,
        out_shape=jax.ShapeDtypeStruct((N, Hh, Wh, C3P), jnp.float32),
        grid=(N,),
        in_specs=[
            pl.BlockSpec((1, H * W, K1), lambda n: (n, 0, 0)),
            pl.BlockSpec((K1, C1), lambda n: (0, 0)),
            pl.BlockSpec((1, C1), lambda n: (0, 0)),
            pl.BlockSpec((3, 3 * C1, C2P), lambda n: (0, 0, 0)),
            pl.BlockSpec((1, C2P), lambda n: (0, 0)),
            pl.BlockSpec((3, 3 * C2P, C3P), lambda n: (0, 0, 0)),
            pl.BlockSpec((1, C3P), lambda n: (0, 0)),
        ],
        out_specs=pl.BlockSpec((1, Hh, Wh, C3P), lambda n: (n, 0, 0, 0)),
        scratch_shapes=[
            pltpu.VMEM((H + 2, W, 3 * C1), jnp.bfloat16),
            pltpu.VMEM((H + 2, W, 3 * C2P), jnp.bfloat16),
        ],
        compiler_params=pltpu.CompilerParams(
            dimension_semantics=("parallel",)),
    )(cols, w1m, b1, w2p, b2, w3p, b3)

    out = out_p[..., :c_out]                 # drop padded output channels
    return jnp.transpose(out, (0, 3, 1, 2))  # back to NCHW


# ----------------------------------------------------------------------------
# Pure-JAX reference (for correctness check).
# ----------------------------------------------------------------------------
def downconv_reference(x_nchw, params):
    y = jnp.transpose(x_nchw, (0, 2, 3, 1)).astype(jnp.float32)
    for (w, scale, bias) in params:
        y = jax.lax.conv_general_dilated(
            y, w, window_strides=(1, 1), padding="SAME",
            dimension_numbers=("NHWC", "HWIO", "NHWC"))
        y = jnp.maximum(y * scale + bias, 0.0)
    y = jax.lax.reduce_window(y, -jnp.inf, jax.lax.max,
                              (1, 2, 2, 1), (1, 2, 2, 1), "VALID")
    return jnp.transpose(y, (0, 3, 1, 2))


if __name__ == "__main__":
    key = jax.random.PRNGKey(0)
    key_x, key_p = jax.random.split(key)

    N, Cin, H, W = 2, 4, 16, 16
    Cout = 32
    x = jax.random.normal(key_x, (N, Cin, H, W), jnp.float32)
    params = init_downconv_params(key_p, Cin, Cout)

    fwd = jax.jit(downconv_forward)
    out = jax.block_until_ready(fwd(x, params))
    assert out.shape == (N, Cout, H // 2, W // 2), out.shape

    ref = jax.block_until_ready(downconv_reference(x, params))
    # bf16 matmul operands in layers 2/3 (f32 accumulation) -> tolerance is
    # set for bf16 rounding, not the ~1e-5 an all-f32 path would achieve.
    max_err = float(jnp.max(jnp.abs(out - ref)))
    assert max_err < 6e-2, f"max abs error too large: {max_err}"

    print("KERNEL_OK")
</pallas_src>

<mosaic_0001>
module attributes {stable_mosaic.version = 11 : i64} {
  func.func @_downconv_fused_kernel(%arg0: i32, %arg1: memref<1x256x36xf32, #tpu.memory_space<vmem>>, %arg2: memref<36x128xf32, #tpu.memory_space<vmem>>, %arg3: memref<1x128xf32, #tpu.memory_space<vmem>>, %arg4: memref<3x384x256xbf16, #tpu.memory_space<vmem>>, %arg5: memref<1x256xf32, #tpu.memory_space<vmem>>, %arg6: memref<3x768x128xbf16, #tpu.memory_space<vmem>>, %arg7: memref<1x128xf32, #tpu.memory_space<vmem>>, %arg8: memref<1x8x8x128xf32, #tpu.memory_space<vmem>>, %arg9: memref<18x16x384xbf16, #tpu.memory_space<vmem>>, %arg10: memref<18x16x768xbf16, #tpu.memory_space<vmem>>) attributes {dimension_semantics = [#tpu.dimension_semantics<parallel>], iteration_bounds = array<i64: 2>, scalar_prefetch = 0 : i64, scratch_operands = 2 : i64, tpu.core_type = #tpu.core_type<tc>, window_params = [{transform_indices = @transform_0, window_bounds = array<i64: 1, 256, 36>}, {pipeline_mode = #tpu.pipeline_mode<synchronous>, transform_indices = @transform_1, window_bounds = array<i64: 36, 128>}, {pipeline_mode = #tpu.pipeline_mode<synchronous>, transform_indices = @transform_2, window_bounds = array<i64: 1, 128>}, {pipeline_mode = #tpu.pipeline_mode<synchronous>, transform_indices = @transform_3, window_bounds = array<i64: 3, 384, 256>}, {pipeline_mode = #tpu.pipeline_mode<synchronous>, transform_indices = @transform_4, window_bounds = array<i64: 1, 256>}, {pipeline_mode = #tpu.pipeline_mode<synchronous>, transform_indices = @transform_5, window_bounds = array<i64: 3, 768, 128>}, {pipeline_mode = #tpu.pipeline_mode<synchronous>, transform_indices = @transform_6, window_bounds = array<i64: 1, 128>}, {transform_indices = @transform_7, window_bounds = array<i64: 1, 8, 8, 128>}]} {
    %cst = arith.constant 0.000000e+00 : bf16
    %0 = vector.broadcast %cst : bf16 to vector<1x16x384xbf16>
    %c0 = arith.constant 0 : index
    %c0_0 = arith.constant 0 : index
    %c0_1 = arith.constant 0 : index
    %1 = vector.load %arg9[%c0, %c0_0, %c0_1] : memref<18x16x384xbf16, #tpu.memory_space<vmem>>, vector<1x16x384xbf16>
    tpu.vector_store %arg9[%c0, %c0_0, %c0_1], %0 {strides = array<i32>} : memref<18x16x384xbf16, #tpu.memory_space<vmem>>, vector<1x16x384xbf16>,
    %c17 = arith.constant 17 : index
    %c0_2 = arith.constant 0 : index
    %c0_3 = arith.constant 0 : index
    %2 = vector.load %arg9[%c17, %c0_2, %c0_3] : memref<18x16x384xbf16, #tpu.memory_space<vmem>>, vector<1x16x384xbf16>
    tpu.vector_store %arg9[%c17, %c0_2, %c0_3], %0 {strides = array<i32>} : memref<18x16x384xbf16, #tpu.memory_space<vmem>>, vector<1x16x384xbf16>,
    %cst_4 = arith.constant 0.000000e+00 : bf16
    %3 = vector.broadcast %cst_4 : bf16 to vector<1x16x768xbf16>
    %c0_5 = arith.constant 0 : index
    %c0_6 = arith.constant 0 : index
    %c0_7 = arith.constant 0 : index
    %4 = vector.load %arg10[%c0_5, %c0_6, %c0_7] : memref<18x16x768xbf16, #tpu.memory_space<vmem>>, vector<1x16x768xbf16>
    tpu.vector_store %arg10[%c0_5, %c0_6, %c0_7], %3 {strides = array<i32>} : memref<18x16x768xbf16, #tpu.memory_space<vmem>>, vector<1x16x768xbf16>,
    %c17_8 = arith.constant 17 : index
    %c0_9 = arith.constant 0 : index
    %c0_10 = arith.constant 0 : index
    %5 = vector.load %arg10[%c17_8, %c0_9, %c0_10] : memref<18x16x768xbf16, #tpu.memory_space<vmem>>, vector<1x16x768xbf16>
    tpu.vector_store %arg10[%c17_8, %c0_9, %c0_10], %3 {strides = array<i32>} : memref<18x16x768xbf16, #tpu.memory_space<vmem>>, vector<1x16x768xbf16>,
    %c0_11 = arith.constant 0 : index
    %c0_12 = arith.constant 0 : index
    %c0_13 = arith.constant 0 : index
    %6 = vector.load %arg1[%c0_11, %c0_12, %c0_13] : memref<1x256x36xf32, #tpu.memory_space<vmem>>, vector<1x256x36xf32>
    %7 = vector.shape_cast %6 : vector<1x256x36xf32> to vector<256x36xf32>
    %c0_14 = arith.constant 0 : index
    %c0_15 = arith.constant 0 : index
    %8 = vector.load %arg2[%c0_14, %c0_15] : memref<36x128xf32, #tpu.memory_space<vmem>>, vector<36x128xf32>
    %cst_16 = arith.constant dense<0.000000e+00> : vector<256x128xf32>
    %9 = tpu.matmul %7, %8, %cst_16 {dimension_numbers = #tpu.dot_dimension_numbers<[1], [0], [0], [1], [0, 0, 1, 1], [], []>} : vector<256x36xf32>, vector<36x128xf32>, vector<256x128xf32> -> vector<256x128xf32>
    %c0_17 = arith.constant 0 : index
    %c0_18 = arith.constant 0 : index
    %10 = vector.load %arg3[%c0_17, %c0_18] : memref<1x128xf32, #tpu.memory_space<vmem>>, vector<1x128xf32>
    %11 = vector.broadcast %10 : vector<1x128xf32> to vector<256x128xf32>
    %12 = arith.addf %9, %11 : vector<256x128xf32>
    %cst_19 = arith.constant 0.000000e+00 : f32
    %13 = vector.broadcast %cst_19 : f32 to vector<256x128xf32>
    %14 = arith.maximumf %12, %13 : vector<256x128xf32>
    %15 = vector.shape_cast %14 : vector<256x128xf32> to vector<16x16x128xf32>
    %cst_20 = arith.constant 0.000000e+00 : f32
    %16 = vector.broadcast %cst_20 : f32 to vector<16x1x128xf32>
    %17 = vector.extract_strided_slice %15 {offsets = [0, 0, 0], sizes = [16, 15, 128], strides = [1, 1, 1]} : vector<16x16x128xf32> to vector<16x15x128xf32>
    %18 = tpu.concatenate %16, %17 in 1 : vector<16x1x128xf32>, vector<16x15x128xf32> -> vector<16x16x128xf32>
    %19 = vector.extract_strided_slice %15 {offsets = [0, 1, 0], sizes = [16, 15, 128], strides = [1, 1, 1]} : vector<16x16x128xf32> to vector<16x15x128xf32>
    %20 = tpu.concatenate %19, %16 in 1 : vector<16x15x128xf32>, vector<16x1x128xf32> -> vector<16x16x128xf32>
    %21 = arith.truncf %18 : vector<16x16x128xf32> to vector<16x16x128xbf16>
    %c1 = arith.constant 1 : index
    %c0_21 = arith.constant 0 : index
    %c0_22 = arith.constant 0 : index
    %22 = vector.load %arg9[%c1, %c0_21, %c0_22] : memref<18x16x384xbf16, #tpu.memory_space<vmem>>, vector<16x16x128xbf16>
    tpu.vector_store %arg9[%c1, %c0_21, %c0_22], %21 {strides = array<i32>} : memref<18x16x384xbf16, #tpu.memory_space<vmem>>, vector<16x16x128xbf16>,
    %23 = arith.truncf %15 : vector<16x16x128xf32> to vector<16x16x128xbf16>
    %c1_23 = arith.constant 1 : index
    %c0_24 = arith.constant 0 : index
    %c128 = arith.constant 128 : index
    %24 = vector.load %arg9[%c1_23, %c0_24, %c128] : memref<18x16x384xbf16, #tpu.memory_space<vmem>>, vector<16x16x128xbf16>
    tpu.vector_store %arg9[%c1_23, %c0_24, %c128], %23 {strides = array<i32>} : memref<18x16x384xbf16, #tpu.memory_space<vmem>>, vector<16x16x128xbf16>,
    %25 = arith.truncf %20 : vector<16x16x128xf32> to vector<16x16x128xbf16>
    %c1_25 = arith.constant 1 : index
    %c0_26 = arith.constant 0 : index
    %c256 = arith.constant 256 : index
    %26 = vector.load %arg9[%c1_25, %c0_26, %c256] : memref<18x16x384xbf16, #tpu.memory_space<vmem>>, vector<16x16x128xbf16>
    tpu.vector_store %arg9[%c1_25, %c0_26, %c256], %25 {strides = array<i32>} : memref<18x16x384xbf16, #tpu.memory_space<vmem>>, vector<16x16x128xbf16>,
    %c0_27 = arith.constant 0 : index
    %c0_28 = arith.constant 0 : index
    %c0_29 = arith.constant 0 : index
    %27 = vector.load %arg9[%c0_27, %c0_28, %c0_29] : memref<18x16x384xbf16, #tpu.memory_space<vmem>>, vector<16x16x384xbf16>
    %28 = vector.shape_cast %27 : vector<16x16x384xbf16> to vector<256x384xbf16>
    %c0_30 = arith.constant 0 : index
    %c0_31 = arith.constant 0 : index
    %c0_32 = arith.constant 0 : index
    %29 = vector.load %arg4[%c0_30, %c0_31, %c0_32] : memref<3x384x256xbf16, #tpu.memory_space<vmem>>, vector<1x384x256xbf16>
    %30 = vector.shape_cast %29 : vector<1x384x256xbf16> to vector<384x256xbf16>
    %cst_33 = arith.constant dense<0.000000e+00> : vector<256x256xf32>
    %31 = tpu.matmul %28, %30, %cst_33 {dimension_numbers = #tpu.dot_dimension_numbers<[1], [0], [0], [1], [0, 0, 1, 1], [], []>} : vector<256x384xbf16>, vector<384x256xbf16>, vector<256x256xf32> -> vector<256x256xf32>
    %c1_34 = arith.constant 1 : index
    %c0_35 = arith.constant 0 : index
    %c0_36 = arith.constant 0 : index
    %32 = vector.load %arg9[%c1_34, %c0_35, %c0_36] : memref<18x16x384xbf16, #tpu.memory_space<vmem>>, vector<16x16x384xbf16>
    %33 = vector.shape_cast %32 : vector<16x16x384xbf16> to vector<256x384xbf16>
    %c1_37 = arith.constant 1 : index
    %c0_38 = arith.constant 0 : index
    %c0_39 = arith.constant 0 : index
    %34 = vector.load %arg4[%c1_37, %c0_38, %c0_39] : memref<3x384x256xbf16, #tpu.memory_space<vmem>>, vector<1x384x256xbf16>
    %35 = vector.shape_cast %34 : vector<1x384x256xbf16> to vector<384x256xbf16>
    %cst_40 = arith.constant dense<0.000000e+00> : vector<256x256xf32>
    %36 = tpu.matmul %33, %35, %cst_40 {dimension_numbers = #tpu.dot_dimension_numbers<[1], [0], [0], [1], [0, 0, 1, 1], [], []>} : vector<256x384xbf16>, vector<384x256xbf16>, vector<256x256xf32> -> vector<256x256xf32>
    %37 = arith.addf %31, %36 : vector<256x256xf32>
    %c2 = arith.constant 2 : index
    %c0_41 = arith.constant 0 : index
    %c0_42 = arith.constant 0 : index
    %38 = vector.load %arg9[%c2, %c0_41, %c0_42] : memref<18x16x384xbf16, #tpu.memory_space<vmem>>, vector<16x16x384xbf16>
    %39 = vector.shape_cast %38 : vector<16x16x384xbf16> to vector<256x384xbf16>
    %c2_43 = arith.constant 2 : index
    %c0_44 = arith.constant 0 : index
    %c0_45 = arith.constant 0 : index
    %40 = vector.load %arg4[%c2_43, %c0_44, %c0_45] : memref<3x384x256xbf16, #tpu.memory_space<vmem>>, vector<1x384x256xbf16>
    %41 = vector.shape_cast %40 : vector<1x384x256xbf16> to vector<384x256xbf16>
    %cst_46 = arith.constant dense<0.000000e+00> : vector<256x256xf32>
    %42 = tpu.matmul %39, %41, %cst_46 {dimension_numbers = #tpu.dot_dimension_numbers<[1], [0], [0], [1], [0, 0, 1, 1], [], []>} : vector<256x384xbf16>, vector<384x256xbf16>, vector<256x256xf32> -> vector<256x256xf32>
    %43 = arith.addf %37, %42 : vector<256x256xf32>
    %c0_47 = arith.constant 0 : index
    %c0_48 = arith.constant 0 : index
    %44 = vector.load %arg5[%c0_47, %c0_48] : memref<1x256xf32, #tpu.memory_space<vmem>>, vector<1x256xf32>
    %45 = vector.broadcast %44 : vector<1x256xf32> to vector<256x256xf32>
    %46 = arith.addf %43, %45 : vector<256x256xf32>
    %cst_49 = arith.constant 0.000000e+00 : f32
    %47 = vector.broadcast %cst_49 : f32 to vector<256x256xf32>
    %48 = arith.maximumf %46, %47 : vector<256x256xf32>
    %49 = vector.shape_cast %48 : vector<256x256xf32> to vector<16x16x256xf32>
    %cst_50 = arith.constant 0.000000e+00 : f32
    %50 = vector.broadcast %cst_50 : f32 to vector<16x1x256xf32>
    %51 = vector.extract_strided_slice %49 {offsets = [0, 0, 0], sizes = [16, 15, 256], strides = [1, 1, 1]} : vector<16x16x256xf32> to vector<16x15x256xf32>
    %52 = tpu.concatenate %50, %51 in 1 : vector<16x1x256xf32>, vector<16x15x256xf32> -> vector<16x16x256xf32>
    %53 = vector.extract_strided_slice %49 {offsets = [0, 1, 0], sizes = [16, 15, 256], strides = [1, 1, 1]} : vector<16x16x256xf32> to vector<16x15x256xf32>
    %54 = tpu.concatenate %53, %50 in 1 : vector<16x15x256xf32>, vector<16x1x256xf32> -> vector<16x16x256xf32>
    %55 = arith.truncf %52 : vector<16x16x256xf32> to vector<16x16x256xbf16>
    %c1_51 = arith.constant 1 : index
    %c0_52 = arith.constant 0 : index
    %c0_53 = arith.constant 0 : index
    %56 = vector.load %arg10[%c1_51, %c0_52, %c0_53] : memref<18x16x768xbf16, #tpu.memory_space<vmem>>, vector<16x16x256xbf16>
    tpu.vector_store %arg10[%c1_51, %c0_52, %c0_53], %55 {strides = array<i32>} : memref<18x16x768xbf16, #tpu.memory_space<vmem>>, vector<16x16x256xbf16>,
    %57 = arith.truncf %49 : vector<16x16x256xf32> to vector<16x16x256xbf16>
    %c1_54 = arith.constant 1 : index
    %c0_55 = arith.constant 0 : index
    %c256_56 = arith.constant 256 : index
    %58 = vector.load %arg10[%c1_54, %c0_55, %c256_56] : memref<18x16x768xbf16, #tpu.memory_space<vmem>>, vector<16x16x256xbf16>
    tpu.vector_store %arg10[%c1_54, %c0_55, %c256_56], %57 {strides = array<i32>} : memref<18x16x768xbf16, #tpu.memory_space<vmem>>, vector<16x16x256xbf16>,
    %59 = arith.truncf %54 : vector<16x16x256xf32> to vector<16x16x256xbf16>
    %c1_57 = arith.constant 1 : index
    %c0_58 = arith.constant 0 : index
    %c512 = arith.constant 512 : index
    %60 = vector.load %arg10[%c1_57, %c0_58, %c512] : memref<18x16x768xbf16, #tpu.memory_space<vmem>>, vector<16x16x256xbf16>
    tpu.vector_store %arg10[%c1_57, %c0_58, %c512], %59 {strides = array<i32>} : memref<18x16x768xbf16, #tpu.memory_space<vmem>>, vector<16x16x256xbf16>,
    %c0_59 = arith.constant 0 : index
    %c0_60 = arith.constant 0 : index
    %c0_61 = arith.constant 0 : index
    %61 = vector.load %arg10[%c0_59, %c0_60, %c0_61] : memref<18x16x768xbf16, #tpu.memory_space<vmem>>, vector<16x16x768xbf16>
    %62 = vector.shape_cast %61 : vector<16x16x768xbf16> to vector<256x768xbf16>
    %c0_62 = arith.constant 0 : index
    %c0_63 = arith.constant 0 : index
    %c0_64 = arith.constant 0 : index
    %63 = vector.load %arg6[%c0_62, %c0_63, %c0_64] : memref<3x768x128xbf16, #tpu.memory_space<vmem>>, vector<1x768x128xbf16>
    %64 = vector.shape_cast %63 : vector<1x768x128xbf16> to vector<768x128xbf16>
    %cst_65 = arith.constant dense<0.000000e+00> : vector<256x128xf32>
    %65 = tpu.matmul %62, %64, %cst_65 {dimension_numbers = #tpu.dot_dimension_numbers<[1], [0], [0], [1], [0, 0, 1, 1], [], []>} : vector<256x768xbf16>, vector<768x128xbf16>, vector<256x128xf32> -> vector<256x128xf32>
    %c1_66 = arith.constant 1 : index
    %c0_67 = arith.constant 0 : index
    %c0_68 = arith.constant 0 : index
    %66 = vector.load %arg10[%c1_66, %c0_67, %c0_68] : memref<18x16x768xbf16, #tpu.memory_space<vmem>>, vector<16x16x768xbf16>
    %67 = vector.shape_cast %66 : vector<16x16x768xbf16> to vector<256x768xbf16>
    %c1_69 = arith.constant 1 : index
    %c0_70 = arith.constant 0 : index
    %c0_71 = arith.constant 0 : index
    %68 = vector.load %arg6[%c1_69, %c0_70, %c0_71] : memref<3x768x128xbf16, #tpu.memory_space<vmem>>, vector<1x768x128xbf16>
    %69 = vector.shape_cast %68 : vector<1x768x128xbf16> to vector<768x128xbf16>
    %cst_72 = arith.constant dense<0.000000e+00> : vector<256x128xf32>
    %70 = tpu.matmul %67, %69, %cst_72 {dimension_numbers = #tpu.dot_dimension_numbers<[1], [0], [0], [1], [0, 0, 1, 1], [], []>} : vector<256x768xbf16>, vector<768x128xbf16>, vector<256x128xf32> -> vector<256x128xf32>
    %71 = arith.addf %65, %70 : vector<256x128xf32>
    %c2_73 = arith.constant 2 : index
    %c0_74 = arith.constant 0 : index
    %c0_75 = arith.constant 0 : index
    %72 = vector.load %arg10[%c2_73, %c0_74, %c0_75] : memref<18x16x768xbf16, #tpu.memory_space<vmem>>, vector<16x16x768xbf16>
    %73 = vector.shape_cast %72 : vector<16x16x768xbf16> to vector<256x768xbf16>
    %c2_76 = arith.constant 2 : index
    %c0_77 = arith.constant 0 : index
    %c0_78 = arith.constant 0 : index
    %74 = vector.load %arg6[%c2_76, %c0_77, %c0_78] : memref<3x768x128xbf16, #tpu.memory_space<vmem>>, vector<1x768x128xbf16>
    %75 = vector.shape_cast %74 : vector<1x768x128xbf16> to vector<768x128xbf16>
    %cst_79 = arith.constant dense<0.000000e+00> : vector<256x128xf32>
    %76 = tpu.matmul %73, %75, %cst_79 {dimension_numbers = #tpu.dot_dimension_numbers<[1], [0], [0], [1], [0, 0, 1, 1], [], []>} : vector<256x768xbf16>, vector<768x128xbf16>, vector<256x128xf32> -> vector<256x128xf32>
    %77 = arith.addf %71, %76 : vector<256x128xf32>
    %c0_80 = arith.constant 0 : index
    %c0_81 = arith.constant 0 : index
    %78 = vector.load %arg7[%c0_80, %c0_81] : memref<1x128xf32, #tpu.memory_space<vmem>>, vector<1x128xf32>
    %79 = vector.broadcast %78 : vector<1x128xf32> to vector<256x128xf32>
    %80 = arith.addf %77, %79 : vector<256x128xf32>
    %cst_82 = arith.constant 0.000000e+00 : f32
    %81 = vector.broadcast %cst_82 : f32 to vector<256x128xf32>
    %82 = arith.maximumf %80, %81 : vector<256x128xf32>
    %83 = vector.shape_cast %82 : vector<256x128xf32> to vector<16x16x128xf32>
    %84 = vector.shape_cast %83 : vector<16x16x128xf32> to vector<16x8x2x128xf32>
    %cst_83 = arith.constant dense<0xFF800000> : vector<16x8x128xf32>
    %85 = vector.multi_reduction <maximumf>, %84, %cst_83 [2] : vector<16x8x2x128xf32> to vector<16x8x128xf32>
    %86 = vector.shape_cast %85 : vector<16x8x128xf32> to vector<8x2x8x128xf32>
    %cst_84 = arith.constant dense<0xFF800000> : vector<8x8x128xf32>
    %87 = vector.multi_reduction <maximumf>, %86, %cst_84 [1] : vector<8x2x8x128xf32> to vector<8x8x128xf32>
    %c0_85 = arith.constant 0 : index
    %c0_86 = arith.constant 0 : index
    %c0_87 = arith.constant 0 : index
    %c0_88 = arith.constant 0 : index
    %88 = vector.load %arg8[%c0_85, %c0_86, %c0_87, %c0_88] : memref<1x8x8x128xf32, #tpu.memory_space<vmem>>, vector<1x8x8x128xf32>
    %89 = vector.shape_cast %88 : vector<1x8x8x128xf32> to vector<8x8x128xf32>
    %90 = vector.shape_cast %87 : vector<8x8x128xf32> to vector<1x8x8x128xf32>
    tpu.vector_store %arg8[%c0_85, %c0_86, %c0_87, %c0_88], %90 {strides = array<i32>} : memref<1x8x8x128xf32, #tpu.memory_space<vmem>>, vector<1x8x8x128xf32>,
    return
  }
  func.func @transform_0(%arg0: i32) -> (i32, i32, i32) {
    %c0_i32 = arith.constant 0 : i32
    %c0_i32_0 = arith.constant 0 : i32
    %c0_i32_1 = arith.constant 0 : i32
    return %arg0, %c0_i32, %c0_i32_0 : i32, i32, i32
  }
  func.func @transform_1(%arg0: i32) -> (i32, i32) {
    %c0_i32 = arith.constant 0 : i32
    %c0_i32_0 = arith.constant 0 : i32
    %c0_i32_1 = arith.constant 0 : i32
    return %c0_i32, %c0_i32_0 : i32, i32
  }
  func.func @transform_2(%arg0: i32) -> (i32, i32) {
    %c0_i32 = arith.constant 0 : i32
    %c0_i32_0 = arith.constant 0 : i32
    %c0_i32_1 = arith.constant 0 : i32
    return %c0_i32, %c0_i32_0 : i32, i32
  }
  func.func @transform_3(%arg0: i32) -> (i32, i32, i32) {
    %c0_i32 = arith.constant 0 : i32
    %c0_i32_0 = arith.constant 0 : i32
    %c0_i32_1 = arith.constant 0 : i32
    %c0_i32_2 = arith.constant 0 : i32
    return %c0_i32, %c0_i32_0, %c0_i32_1 : i32, i32, i32
  }
  func.func @transform_4(%arg0: i32) -> (i32, i32) {
    %c0_i32 = arith.constant 0 : i32
    %c0_i32_0 = arith.constant 0 : i32
    %c0_i32_1 = arith.constant 0 : i32
    return %c0_i32, %c0_i32_0 : i32, i32
  }
  func.func @transform_5(%arg0: i32) -> (i32, i32, i32) {
    %c0_i32 = arith.constant 0 : i32
    %c0_i32_0 = arith.constant 0 : i32
    %c0_i32_1 = arith.constant 0 : i32
    %c0_i32_2 = arith.constant 0 : i32
    return %c0_i32, %c0_i32_0, %c0_i32_1 : i32, i32, i32
  }
  func.func @transform_6(%arg0: i32) -> (i32, i32) {
    %c0_i32 = arith.constant 0 : i32
    %c0_i32_0 = arith.constant 0 : i32
    %c0_i32_1 = arith.constant 0 : i32
    return %c0_i32, %c0_i32_0 : i32, i32
  }
  func.func @transform_7(%arg0: i32) -> (i32, i32, i32, i32) {
    %c0_i32 = arith.constant 0 : i32
    %c0_i32_0 = arith.constant 0 : i32
    %c0_i32_1 = arith.constant 0 : i32
    %c0_i32_2 = arith.constant 0 : i32
    return %arg0, %c0_i32, %c0_i32_0, %c0_i32_1 : i32, i32, i32, i32
  }
}

</mosaic_0001>

<bundles_post_ra>
// kernel: downconv_forward.1
= control target key start
LH: loop header
LB: loop body
LE: loop exit
PB: predicated region body
PF: predicated region fallthrough
CT: control target
= control target key end

     0   :  { %s15908_s24 = smov 0   ;;  %s20641_s0 = inlined_call_operand.vmem [shape: f32[2,256,36], index: 0, kind: input, shape index: {}]   ;;  %s20642_s1 = inlined_call_operand.vmem [shape: f32[36,128], index: 1, kind: input, shape index: {}]   ;;  %s20643_s2 = inlined_call_operand.vmem [shape: f32[1,128], index: 2, kind: input, shape index: {}]   ;;  %s20644_s3 = inlined_call_operand.vmem [shape: bf16[3,384,256], index: 3, kind: input, shape index: {}]   ;;  %s20645_s4 = inlined_call_operand.vmem [shape: f32[1,256], index: 4, kind: input, shape index: {}]   ;;  %s20646_s5 = inlined_call_operand.vmem [shape: bf16[3,768,128], index: 5, kind: input, shape index: {}]   ;;  %s20647_s6 = inlined_call_operand.vmem [shape: f32[1,128], index: 6, kind: input, shape index: {}]   ;;  %s20648_s7 = inlined_call_operand.vmem [shape: f32[2,8,8,128], index: 7, kind: output, shape index: {}]  }
   0x1 LB: > { %s12019_s25 = sadd.s32 4294967295, %s15863_s24   ;;  %p12023_p0 = scmp.ge.s32.totalorder %s15863_s24, 1  ;;  %s15863_s24 = sphi %s15908_s24, %s17_s24  }
   0x2   : > { %p237_p1 = scmp.lt.s32.totalorder %s15863_s24, 3 }
   0x4   : > { %p238_p2 = pnand %p12023_p0, %p237_p1 }
   0x6   : > { %241 = sbr.rel (%p238_p2) target bundleno = 1828 (0x724), region = 48 }
   0xb   : > { %v338_v0 = vld [vmem:[%s20642_s1 + $0x20] sm:$0xf]  ;;  %vm443_vm0 = vcmask 1043456   ;;  %v337_v1 = vld [vmem:[%s20642_s1 + $0x18] sm:$0xff]  ;;  %p269_p3 = scmp.lt.s32.totalorder %s12019_s25, 1  ;;  %v336_v2 = vld [vmem:[%s20642_s1 + $0x10] sm:$0xff] }
   0xc   : > { %15244 = vmatprep.subr.msk.mxu0 %vm443_vm0, %v338_v0  ;;  %v335_v3 = vld [vmem:[%s20642_s1 + $0x8] sm:$0xff]  ;;  %v15347_v4 = vld [vmem:[%s20644_s3 + $0x1f4] ss:$8 sps:$4 sm:$0xff]   ;;  %v15345_v5 = vld [vmem:[%s20644_s3 + $0x1f0] ss:$8 sps:$4 sm:$0xff]   ;;  %vm346_vm1 = vcmask 293888  }
   0xd   : > { %15245 = vmatpush3.msk.msra.mxu0 %vm443_vm0, %v338_v0  ;;  %s21446_s25 = smov (!%p269_p3, %s12019_s25), 1  ;;  %v15350_v6 = vld [vmem:[%s20644_s3 + $0x1e4] ss:$8 sps:$4 sm:$0xff]   ;;  %15302 = vmatprep.subr.bf16.mxu1 %v15347_v4  ;;  %v15348_v9 = vld [vmem:[%s20644_s3 + $0x1e0] ss:$8 sps:$4 sm:$0xff]   ;;  %vm833_vm2 = vcmask 1046528  }
   0xe   : > { %15246 = vmatprep.subr.mxu0 %v337_v1  ;;  %s13265_s15 = sshll.u32 %s21446_s25, 8  ;;  %15318 = vmatpush1.bf16.msra.mxu1 %v15345_v5  ;;  %v334_v7 = vld [vmem:[%s20642_s1] sm:$0xff]  ;;  %v15353_v11 = vld [vmem:[%s20644_s3 + $0x1d4] ss:$8 sps:$4 sm:$0xff]   ;;  %v15351_v13 = vld [vmem:[%s20644_s3 + $0x1d0] ss:$8 sps:$4 sm:$0xff]  }
   0xf   : > { %15247 = vmatpush3.msra.mxu0 %v337_v1  ;;  %s15943_s20 = scalar_lea.vmem %s20641_s0, %s13265_s15  ;;  %15303 = vmatprep.subr.bf16.mxu1 %v15350_v6  ;;  %v15356_v18 = vld [vmem:[%s20644_s3 + $0x1c4] ss:$8 sps:$4 sm:$0xff]   ;;  %v15354_v20 = vld [vmem:[%s20644_s3 + $0x1c0] ss:$8 sps:$4 sm:$0xff]   ;;  %v15359_v21 = vld [vmem:[%s20644_s3 + $0x1b4] ss:$8 sps:$4 sm:$0xff]  }
  0x10   : > { %15248 = vmatprep.subr.mxu0 %v336_v2  ;;  %v302_v8 = vld [vmem:[%s15943_s20] sm:$0xff]  ;;  %v303_v10 = vld [vmem:[%s15943_s20 + $0x8] sm:$0xff]  ;;  %v304_v12 = vld [vmem:[%s15943_s20 + $0x10] sm:$0xff]  ;;  %vm736_vm3 = vcmask 1040384   ;;  %vm15866_vm5 = vmmov 1   ;;  %vm10860_vm8 = vcmask 1041408  }
  0x11   : > { %15249 = vmatpush3.msra.mxu0 %v336_v2  ;;  %15254 = vmatprep.mubr.msk.f32.mxu0 %vm346_vm1, %v302_v8  ;;  %v305_v14 = vld [vmem:[%s15943_s20 + $0x18] sm:$0xff]  ;;  %v306_v15 = vld [vmem:[%s15943_s20 + $0x20] sm:$0xff]  ;;  %v307_v16 = vld [vmem:[%s15943_s20 + $0x28] sm:$0xff]  ;;  %vm11885_vm9 = vcmask 1041409   ;;  %vm11887_vm10 = vcmask 1042434   ;;  %vm11889_vm11 = vcmask 1043459  }
  0x12   : > { %15250 = vmatprep.subr.mxu0 %v335_v3  ;;  %15319 = vmatpush1.bf16.msra.mxu1 %v15348_v9  ;;  %v308_v17 = vld [vmem:[%s15943_s20 + $0x30] sm:$0xff]  ;;  %v309_v19 = vld [vmem:[%s15943_s20 + $0x38] sm:$0xff]  ;;  %v310_v22 = vld [vmem:[%s15943_s20 + $0x40] sm:$0xff]  ;;  %vm11891_vm12 = vcmask 1044484   ;;  %vm11893_vm13 = vcmask 1045509   ;;  %vm11895_vm14 = vcmask 1046534  }
  0x13   : > { %15251 = vmatpush3.msra.mxu0 %v335_v3  ;;  %15304 = vmatprep.subr.bf16.mxu1 %v15353_v11  ;;  %v311_v23 = vld [vmem:[%s15943_s20 + $0x48] sm:$0xff]  ;;  %v15357_v24 = vld [vmem:[%s20644_s3 + $0x1b0] ss:$8 sps:$4 sm:$0xff]   ;;  %v15365_v29 = vld [vmem:[%s20644_s3 + $0x194] ss:$8 sps:$4 sm:$0xff]   ;;  %vm11897_vm15 = vcmask 1047559  }
  0x14   : > { %15252 = vmatprep.subr.mxu0 %v334_v7  ;;  %v15362_v25 = vld [vmem:[%s20644_s3 + $0x1a4] ss:$8 sps:$4 sm:$0xff]   ;;  %v312_v26 = vld [vmem:[%s15943_s20 + $0x50] sm:$0xff]  ;;  %v313_v27 = vld [vmem:[%s15943_s20 + $0x58] sm:$0xff]  ;;  %s13266_s12 = sshll.u32 %s21446_s25, 6 }
  0x15   : > { %15253 = vmatpush3.msra.mxu0 %v334_v7  ;;  %v15360_v28 = vld [vmem:[%s20644_s3 + $0x1a0] ss:$8 sps:$4 sm:$0xff]   ;;  %v15363_v31 = vld [vmem:[%s20644_s3 + $0x190] ss:$8 sps:$4 sm:$0xff]   ;;  %v15368_v33 = vld [vmem:[%s20644_s3 + $0x184] ss:$8 sps:$4 sm:$0xff]   ;;  %s20090_s14 = scalar_lea.vmem %s20648_s7, %s13266_s12 }
  0x16   : > { %15255 = vmatmul.mubr.msk.f32.vlgmr.msra.gmra.mxu0 %vm346_vm1, %v303_v10  ;;  %2132 = vmatprep.subr.bf16.mxu0 %v15347_v4  ;;  %v314_v30 = vld [vmem:[%s15943_s20 + $0x60] sm:$0xff]  ;;  %v315_v32 = vld [vmem:[%s15943_s20 + $0x68] sm:$0xff]  ;;  %v316_v34 = vld [vmem:[%s15943_s20 + $0x70] sm:$0xff]  ;;  %v15865_v7 = vmov 0  }
  0x17   : > { %15257 = vmatprep.mubr.msk.f32.mxu0 %vm346_vm1, %v304_v12  ;;  %2133 = vmatpush1.bf16.msra.mxu0 %v15345_v5  ;;  %v15366_v35 = vld [vmem:[%s20644_s3 + $0x180] ss:$8 sps:$4 sm:$0xff]   ;;  %v317_v36 = vld [vmem:[%s15943_s20 + $0x78] sm:$0xff]  ;;  %v15374_v41 = vld [vmem:[%s20644_s3 + $0x264] ss:$8 sps:$4 sm:$0xff]   ;;  %280 = vst [vmem:[#allocation2] sm:$0xff] %v15865_v7 }
  0x18   : > { %2134 = vmatprep.subr.bf16.mxu0 %v15350_v6  ;;  %15320 = vmatpush1.bf16.msra.mxu1 %v15351_v13  ;;  %v15371_v37 = vld [vmem:[%s20644_s3 + $0x274] ss:$8 sps:$4 sm:$0xff]   ;;  %v318_v38 = vld [vmem:[%s15943_s20 + $0x80] sm:$0xff]  ;;  %v15369_v39 = vld [vmem:[%s20644_s3 + $0x270] ss:$8 sps:$4 sm:$0xff]  }
  0x19   : > { %15305 = vmatprep.subr.bf16.mxu1 %v15356_v18  ;;  %v319_v40 = vld [vmem:[%s15943_s20 + $0x88] sm:$0xff]  ;;  %v320_v42 = vld [vmem:[%s15943_s20 + $0x90] sm:$0xff]  ;;  %v321_v44 = vld [vmem:[%s15943_s20 + $0x98] sm:$0xff]  ;;  %281 = vst [vmem:[#allocation2 + $0x8] sm:$0xf] %v15865_v7 }
  0x1a   : > { %15258 = vmatmul.mubr.msk.f32.gmra.mxu0 %vm346_vm1, %v305_v14  ;;  %v15372_v43 = vld [vmem:[%s20644_s3 + $0x260] ss:$8 sps:$4 sm:$0xff]   ;;  %v15377_v45 = vld [vmem:[%s20644_s3 + $0x254] ss:$8 sps:$4 sm:$0xff]   ;;  %v15375_v47 = vld [vmem:[%s20644_s3 + $0x250] ss:$8 sps:$4 sm:$0xff]  }
  0x1b   : > { %15260 = vmatprep.mubr.msk.f32.mxu0 %vm346_vm1, %v306_v15  ;;  %2135 = vmatpush1.bf16.msra.mxu0 %v15348_v9  ;;  %v322_v46 = vld [vmem:[%s15943_s20 + $0xa0] sm:$0xff]  ;;  %v323_v48 = vld [vmem:[%s15943_s20 + $0xa8] sm:$0xff]  ;;  %v324_v49 = vld [vmem:[%s15943_s20 + $0xb0] sm:$0xff]  ;;  %283 = vst [vmem:[#allocation2 + $0x14] sm:$0xf] %v15865_v7 }
  0x1c   : > { %2136 = vmatprep.subr.bf16.mxu0 %v15353_v11  ;;  %15321 = vmatpush1.bf16.msra.mxu1 %v15354_v20  ;;  %v325_v50 = vld [vmem:[%s15943_s20 + $0xb8] sm:$0xff]  ;;  %v326_v51 = vld [vmem:[%s15943_s20 + $0xc0] sm:$0xff]  ;;  %v327_v52 = vld [vmem:[%s15943_s20 + $0xc8] sm:$0xff]  ;;  %286 = vst [vmem:[#allocation2 + $0x1a0] sm:$0xf] %v15865_v7 }
  0x1d   : > { %15306 = vmatprep.subr.bf16.mxu1 %v15359_v21  ;;  %v328_v53 = vld [vmem:[%s15943_s20 + $0xd0] sm:$0xff]  ;;  %v329_v54 = vld [vmem:[%s15943_s20 + $0xd8] sm:$0xff]  ;;  %v330_v55 = vld [vmem:[%s15943_s20 + $0xe0] sm:$0xff]  ;;  %288 = vst [vmem:[#allocation2 + $0x1ac] sm:$0xf] %v15865_v7 }
  0x1e   : > { %15261 = vmatmul.mubr.msk.f32.gmra.mxu0 %vm346_vm1, %v307_v16  ;;  %v331_v56 = vld [vmem:[%s15943_s20 + $0xe8] sm:$0xff]  ;;  %v332_v57 = vld [vmem:[%s15943_s20 + $0xf0] sm:$0xff]  ;;  %v333_v58 = vld [vmem:[%s15943_s20 + $0xf8] sm:$0xff] }
  0x1f   : > { %15263 = vmatprep.mubr.msk.f32.mxu0 %vm346_vm1, %v308_v17  ;;  %2137 = vmatpush1.bf16.msra.mxu0 %v15351_v13  ;;  %v15380_v59 = vld [vmem:[%s20644_s3 + $0x244] ss:$8 sps:$4 sm:$0xff]   ;;  %v15378_v60 = vld [vmem:[%s20644_s3 + $0x240] ss:$8 sps:$4 sm:$0xff]   ;;  %v15383_v61 = vld [vmem:[%s20644_s3 + $0x234] ss:$8 sps:$4 sm:$0xff]  }
  0x20   : > { %2138 = vmatprep.subr.bf16.mxu0 %v15356_v18  ;;  %15322 = vmatpush1.bf16.msra.mxu1 %v15357_v24  ;;  %v15381_v62 = vld [vmem:[%s20644_s3 + $0x230] ss:$8 sps:$4 sm:$0xff]   ;;  %v15386_v63 = vld [vmem:[%s20644_s3 + $0x224] ss:$8 sps:$4 sm:$0xff]   ;;  %v15384_v0 = vld [vmem:[%s20644_s3 + $0x220] ss:$8 sps:$4 sm:$0xff]  }
  0x21   : > { %15307 = vmatprep.subr.bf16.mxu1 %v15362_v25  ;;  %v15389_v1 = vld [vmem:[%s20644_s3 + $0x214] ss:$8 sps:$4 sm:$0xff]   ;;  %v15387_v2 = vld [vmem:[%s20644_s3 + $0x210] ss:$8 sps:$4 sm:$0xff]   ;;  %v15392_v3 = vld [vmem:[%s20644_s3 + $0x204] ss:$8 sps:$4 sm:$0xff]  }
  0x22   : > { %15264 = vmatmul.mubr.msk.f32.gmra.mxu0 %vm346_vm1, %v309_v19  ;;  %v15390_v4 = vld [vmem:[%s20644_s3 + $0x200] ss:$8 sps:$4 sm:$0xff]   ;;  %v15398_v5 = vld [vmem:[%s20644_s3 + $0x2f4] ss:$8 sps:$4 sm:$0xff]   ;;  %vm17662_vm4 = vmneg %vm736_vm3 }
  0x23   : > { %15266 = vmatprep.mubr.msk.f32.mxu0 %vm346_vm1, %v310_v22  ;;  %2139 = vmatpush1.bf16.msra.mxu0 %v15354_v20  ;;  %v15435_v6 = vld [vmem:[%s20644_s3 + $0x74] ss:$8 sps:$4 sm:$0xff]   ;;  %v16108_v8 = vld [vmem:[%s20643_s2] ss:$0 sm:$0xff]  ;;  %vm17694_vm6 = vmpackc.low %vm15866_vm5, %vm17662_vm4 }
  0x24   : > { %2140 = vmatprep.subr.bf16.mxu0 %v15359_v21  ;;  %15323 = vmatpush1.bf16.msra.mxu1 %v15360_v28  ;;  %vm18591_vm7 = vmpackc.low %vm833_vm2, %vm15866_vm5 }
  0x25   : > { %15308 = vmatprep.subr.bf16.mxu1 %v15365_v29 }
  0x26   : > { %15267 = vmatmul.mubr.msk.f32.gmra.mxu0 %vm346_vm1, %v311_v23 }
  0x27   : > { %15269 = vmatprep.mubr.msk.f32.mxu0 %vm346_vm1, %v312_v26  ;;  %2141 = vmatpush1.bf16.msra.mxu0 %v15357_v24 }
  0x28   : > { %2142 = vmatprep.subr.bf16.mxu0 %v15362_v25  ;;  %15324 = vmatpush1.bf16.msra.mxu1 %v15363_v31 }
  0x29   : > { %15309 = vmatprep.subr.bf16.mxu1 %v15368_v33 }
  0x2a   : > { %15270 = vmatmul.mubr.msk.f32.gmra.mxu0 %vm346_vm1, %v313_v27 }
  0x2b   : > { %15272 = vmatprep.mubr.msk.f32.mxu0 %vm346_vm1, %v314_v30  ;;  %2143 = vmatpush1.bf16.msra.mxu0 %v15360_v28 }
  0x2c   : > { %2144 = vmatprep.subr.bf16.mxu0 %v15365_v29  ;;  %15325 = vmatpush1.bf16.msra.mxu1 %v15366_v35 }
  0x2d   : > { %15310 = vmatprep.subr.bf16.mxu1 %v15371_v37 }
  0x2e   : > { %15273 = vmatmul.mubr.msk.f32.gmra.mxu0 %vm346_vm1, %v315_v32 }
  0x2f   : > { %15275 = vmatprep.mubr.msk.f32.mxu0 %vm346_vm1, %v316_v34  ;;  %2145 = vmatpush1.bf16.msra.mxu0 %v15363_v31 }
  0x30   : > { %2146 = vmatprep.subr.bf16.mxu0 %v15368_v33  ;;  %15326 = vmatpush2.bf16.msra.mxu1 %v15369_v39 }
  0x31   : > { %15311 = vmatprep.subr.bf16.mxu1 %v15374_v41 }
  0x32   : > { %15276 = vmatmul.mubr.msk.f32.gmra.mxu0 %vm346_vm1, %v317_v36 }
  0x33   : > { %15278 = vmatprep.mubr.msk.f32.mxu0 %vm346_vm1, %v318_v38  ;;  %2147 = vmatpush1.bf16.msra.mxu0 %v15366_v35 }
  0x34   : > { %2148 = vmatprep.subr.bf16.mxu0 %v15371_v37  ;;  %15327 = vmatpush2.bf16.msra.mxu1 %v15372_v43 }
  0x35   : > { %15312 = vmatprep.subr.bf16.mxu1 %v15377_v45 }
  0x36   : > { %15279 = vmatmul.mubr.msk.f32.gmra.mxu0 %vm346_vm1, %v319_v40 }
  0x37   : > { %15281 = vmatprep.mubr.msk.f32.mxu0 %vm346_vm1, %v320_v42  ;;  %2149 = vmatpush2.bf16.msra.mxu0 %v15369_v39 }
  0x38   : > { %2150 = vmatprep.subr.bf16.mxu0 %v15374_v41  ;;  %15328 = vmatpush2.bf16.msra.mxu1 %v15375_v47 }
  0x39   : > { %15313 = vmatprep.subr.bf16.mxu1 %v15380_v59 }
  0x3a   : > { %15282 = vmatmul.mubr.msk.f32.gmra.mxu0 %vm346_vm1, %v321_v44 }
  0x3b   : > { %15284 = vmatprep.mubr.msk.f32.mxu0 %vm346_vm1, %v322_v46  ;;  %2151 = vmatpush2.bf16.msra.mxu0 %v15372_v43 }
  0x3c   : > { %2152 = vmatprep.subr.bf16.mxu0 %v15377_v45  ;;  %15329 = vmatpush2.bf16.msra.mxu1 %v15378_v60 }
  0x3d   : > { %15314 = vmatprep.subr.bf16.mxu1 %v15383_v61 }
  0x3e   : > { %15285 = vmatmul.mubr.msk.f32.gmra.mxu0 %vm346_vm1, %v323_v48 }
  0x3f   : > { %15287 = vmatprep.mubr.msk.f32.mxu0 %vm346_vm1, %v324_v49  ;;  %2153 = vmatpush2.bf16.msra.mxu0 %v15375_v47 }
  0x40   : > { %2154 = vmatprep.subr.bf16.mxu0 %v15380_v59  ;;  %15330 = vmatpush2.bf16.msra.mxu1 %v15381_v62 }
  0x41   : > { %15315 = vmatprep.subr.bf16.mxu1 %v15386_v63 }
  0x42   : > { %15288 = vmatmul.mubr.msk.f32.gmra.mxu0 %vm346_vm1, %v325_v50 }
  0x43   : > { %15290 = vmatprep.mubr.msk.f32.mxu0 %vm346_vm1, %v326_v51  ;;  %2155 = vmatpush2.bf16.msra.mxu0 %v15378_v60 }
  0x44   : > { %2156 = vmatprep.subr.bf16.mxu0 %v15383_v61  ;;  %15331 = vmatpush2.bf16.msra.mxu1 %v15384_v0 }
  0x45   : > { %15316 = vmatprep.subr.bf16.mxu1 %v15389_v1 }
  0x46   : > { %15291 = vmatmul.mubr.msk.f32.gmra.mxu0 %vm346_vm1, %v327_v52 }
  0x47   : > { %15293 = vmatprep.mubr.msk.f32.mxu0 %vm346_vm1, %v328_v53  ;;  %2157 = vmatpush2.bf16.msra.mxu0 %v15381_v62 }
  0x48   : > { %2158 = vmatprep.subr.bf16.mxu0 %v15386_v63  ;;  %15332 = vmatpush2.bf16.msra.mxu1 %v15387_v2 }
  0x49   : > { %15317 = vmatprep.subr.bf16.mxu1 %v15392_v3 }
  0x4a   : > { %15294 = vmatmul.mubr.msk.f32.gmra.mxu0 %vm346_vm1, %v329_v54 }
  0x4b   : > { %15296 = vmatprep.mubr.msk.f32.mxu0 %vm346_vm1, %v330_v55  ;;  %2159 = vmatpush2.bf16.msra.mxu0 %v15384_v0 }
  0x4c   : > { %2160 = vmatprep.subr.bf16.mxu0 %v15389_v1  ;;  %15333 = vmatpush2.bf16.msra.mxu1 %v15390_v4 }
  0x4d   : > { %3014 = vmatprep.subr.bf16.mxu1 %v15435_v6  ;;  %v15396_v6 = vld [vmem:[%s20644_s3 + $0x2f0] ss:$8 sps:$4 sm:$0xff]  }
  0x4e   : > { %15297 = vmatmul.mubr.msk.f32.gmra.mxu0 %vm346_vm1, %v331_v56 }
  0x4f   : > { %15299 = vmatprep.mubr.msk.f32.mxu0 %vm346_vm1, %v332_v57  ;;  %2161 = vmatpush2.bf16.msra.mxu0 %v15387_v2 }
  0x50   : > { %2162 = vmatprep.subr.bf16.mxu0 %v15392_v3 }
  0x52   : > { %15300 = vmatmul.mubr.msk.f32.gmra.mxu0 %vm346_vm1, %v333_v58 }
  0x53   : > { %2163 = vmatpush2.bf16.msra.mxu0 %v15390_v4 }
  0x54   : > { %2325 = vmatprep.subr.bf16.mxu0 %v15398_v5 }
  0xd6   : > { %v15256_v9 = vpop.f32.mrf.mxu0 }
  0xd7   : > { %v519_v10 = vadd.f32 %v15256_v9, %v16108_v8 }
  0xd8   : > { %v513_v11 = vpop.f32.mrf.mxu0 }
  0xd9   : > { %v673_v12 = vmax.f32 %v519_v10, 0.0  ;;  %v514_v13 = vadd.f32 %v16108_v8, %v513_v11 }
  0xda   : > { %v15259_v14 = vpop.f32.mrf.mxu0 }
  0xdb   : > { %v835_v15 = vrot.slane %v673_v12, 1  ;;  %v13300_v16 = vpack.c.bf16 %v673_v12, %v673_v12  ;;  %v672_v17 = vmax.f32 %v514_v13, 0.0  ;;  %v738_v18 = vrot.slane %v673_v12, 7 }
  0xdc   : > { %v529_v19 = vadd.f32 %v15259_v14, %v16108_v8  ;;  %v523_v20 = vpop.f32.mrf.mxu0 }
  0xdd   : > { %v914_v21 = vsel %vm833_vm2, %v835_v15, 0.0  ;;  %1220 = vst [vmem:[#allocation2 + $0x28] sm:$0xf] %v13300_v16  ;;  %v737_v22 = vrot.slane %v672_v17, 7  ;;  %v834_v23 = vrot.slane %v672_v17, 1  ;;  %v13299_v24 = vpack.c.bf16 %v672_v17, %v672_v17 }
  0xde   : > { %v13332_v25 = vpack.c.bf16 %v914_v21, %v914_v21  ;;  %v675_v26 = vmax.f32 %v529_v19, 0.0  ;;  %v524_v27 = vadd.f32 %v16108_v8, %v523_v20  ;;  %v15262_v28 = vpop.f32.mrf.mxu0 }
  0xdf   : > { %v739_v29 = vsel %vm736_vm3, %v737_v22, %v738_v18  ;;  %v817_v30 = vsel %vm736_vm3, 0.0, %v737_v22  ;;  %v836_v31 = vsel %vm833_vm2, %v834_v23, %v835_v15  ;;  %1219 = vst [vmem:[#allocation2 + $0x1c] sm:$0xf] %v13299_v24  ;;  %v539_v32 = vadd.f32 %v15262_v28, %v16108_v8  ;;  %v15403_v22 = vld [vmem:[%s20644_s3 + $0x2e4] ss:$8 sps:$4 sm:$0xff]  }
  0xe0   : > { %1380 = vst [vmem:[#allocation2 + $0x2c] sm:$0xf] %v13332_v25  ;;  %v13267_v33 = vpack.c.bf16 %v817_v30, %v817_v30  ;;  %v13268_v34 = vpack.c.bf16 %v739_v29, %v739_v29  ;;  %v13331_v35 = vpack.c.bf16 %v836_v31, %v836_v31  ;;  %v741_v36 = vrot.slane %v675_v26, 7  ;;  %v533_v37 = vpop.f32.mrf.mxu0  ;;  %v15401_v28 = vld [vmem:[%s20644_s3 + $0x2e0] ss:$8 sps:$4 sm:$0xff]  }
  0xe1   : > { %v838_v38 = vrot.slane %v675_v26, 1  ;;  %v13302_v39 = vpack.c.bf16 %v675_v26, %v675_v26  ;;  %v674_v40 = vmax.f32 %v524_v27, 0.0  ;;  %v677_v41 = vmax.f32 %v539_v32, 0.0 }
  0xe2   : > { %1059 = vst [vmem:[#allocation2 + $0x18] sm:$0xf] %v13267_v33  ;;  %1060 = vst [vmem:[#allocation2 + $0x24] sm:$0xf] %v13268_v34  ;;  %v534_v42 = vadd.f32 %v16108_v8, %v533_v37  ;;  %v15265_v43 = vpop.f32.mrf.mxu0  ;;  %v15409_v33 = vld [vmem:[%s20644_s3 + $0x2d4] ss:$8 sps:$4 sm:$0xff]  }
  0xe3   : > { %1379 = vst [vmem:[#allocation2 + $0x20] sm:$0xf] %v13331_v35  ;;  %v915_v44 = vsel %vm833_vm2, %v838_v38, 0.0  ;;  %1222 = vst [vmem:[#allocation2 + $0x40] sm:$0xf] %v13302_v39  ;;  %v740_v45 = vrot.slane %v674_v40, 7  ;;  %v13301_v47 = vpack.c.bf16 %v674_v40, %v674_v40  ;;  %v13304_v51 = vpack.c.bf16 %v677_v41, %v677_v41 }
  0xe4   : > { %v837_v46 = vrot.slane %v674_v40, 1  ;;  %v13334_v48 = vpack.c.bf16 %v915_v44, %v915_v44  ;;  %v744_v49 = vrot.slane %v677_v41, 7  ;;  %v841_v50 = vrot.slane %v677_v41, 1  ;;  %v543_v52 = vpop.f32.mrf.mxu0 }
  0xe5   : > { %v742_v53 = vsel %vm736_vm3, %v740_v45, %v741_v36  ;;  %v818_v54 = vsel %vm736_vm3, 0.0, %v740_v45  ;;  %1221 = vst [vmem:[#allocation2 + $0x34] sm:$0xf] %v13301_v47  ;;  %v676_v56 = vmax.f32 %v534_v42, 0.0  ;;  %1224 = vst [vmem:[#allocation2 + $0x58] sm:$0xf] %v13304_v51  ;;  %v549_v2 = vadd.f32 %v15265_v43, %v16108_v8 }
  0xe6   : > { %v839_v55 = vsel %vm833_vm2, %v837_v46, %v838_v38  ;;  %1382 = vst [vmem:[#allocation2 + $0x44] sm:$0xf] %v13334_v48  ;;  %v13269_v57 = vpack.c.bf16 %v818_v54, %v818_v54  ;;  %v13270_v58 = vpack.c.bf16 %v742_v53, %v742_v53  ;;  %v916_v60 = vsel %vm833_vm2, %v841_v50, 0.0  ;;  %v15268_v61 = vpop.f32.mrf.mxu0  ;;  %v15395_v18 = vld [vmem:[#allocation2 + $0x1c] ss:$12 sps:$4 sm:$0xff]  }
  0xe7   : > { %v13333_v59 = vpack.c.bf16 %v839_v55, %v839_v55  ;;  %v13336_v62 = vpack.c.bf16 %v916_v60, %v916_v60  ;;  %v743_v63 = vrot.slane %v676_v56, 7  ;;  %v840_v0 = vrot.slane %v676_v56, 1  ;;  %2164 = vmatprep.mubr.bf16.mxu0 %v15395_v18  ;;  %v15407_v53 = vld [vmem:[%s20644_s3 + $0x2d0] ss:$8 sps:$4 sm:$0xff]   ;;  %v15415_v60 = vld [vmem:[%s20644_s3 + $0x2c4] ss:$8 sps:$4 sm:$0xff]  }
  0xe8   : > { %v13303_v1 = vpack.c.bf16 %v676_v56, %v676_v56  ;;  %1061 = vst [vmem:[#allocation2 + $0x30] sm:$0xf] %v13269_v57  ;;  %1062 = vst [vmem:[#allocation2 + $0x3c] sm:$0xf] %v13270_v58  ;;  %v544_v3 = vadd.f32 %v16108_v8, %v543_v52  ;;  %v559_v4 = vadd.f32 %v15268_v61, %v16108_v8  ;;  %v553_v5 = vpop.f32.mrf.mxu0  ;;  %v679_v16 = vmax.f32 %v549_v2, 0.0 }
  0xe9   : > { %1381 = vst [vmem:[#allocation2 + $0x38] sm:$0xf] %v13333_v59  ;;  %1384 = vst [vmem:[#allocation2 + $0x5c] sm:$0xf] %v13336_v62  ;;  %v745_v7 = vsel %vm736_vm3, %v743_v63, %v744_v49  ;;  %v819_v9 = vsel %vm736_vm3, 0.0, %v743_v63  ;;  %v842_v10 = vsel %vm833_vm2, %v840_v0, %v841_v50  ;;  %v554_v11 = vadd.f32 %v16108_v8, %v553_v5 }
  0xea   : > { %1223 = vst [vmem:[#allocation2 + $0x4c] sm:$0xf] %v13303_v1  ;;  %v15393_v12 = vld [vmem:[#allocation2 + $0x18] ss:$12 sps:$4 sm:$0xff]   ;;  %v13271_v13 = vpack.c.bf16 %v819_v9, %v819_v9  ;;  %v13272_v14 = vpack.c.bf16 %v745_v7, %v745_v7  ;;  %v13335_v15 = vpack.c.bf16 %v842_v10, %v842_v10  ;;  %v15271_v17 = vpop.f32.mrf.mxu0  ;;  %v678_v19 = vmax.f32 %v544_v3, 0.0 }
  0xeb   : > { %v681_v20 = vmax.f32 %v559_v4, 0.0  ;;  %v16135_v21 = vmax.f32 %v554_v11, 0.0  ;;  %v747_v23 = vrot.slane %v679_v16, 7  ;;  %v844_v24 = vrot.slane %v679_v16, 1  ;;  %2165 = vmatmul.mubr.bf16.vlgmr.msra.gmra.mxu0 %v15393_v12 }
  0xec   : > { %1063 = vst [vmem:[#allocation2 + $0x48] sm:$0xf] %v13271_v13  ;;  %1064 = vst [vmem:[#allocation2 + $0x54] sm:$0xf] %v13272_v14  ;;  %v13306_v25 = vpack.c.bf16 %v679_v16, %v679_v16  ;;  %v569_v26 = vadd.f32 %v15271_v17, %v16108_v8  ;;  %v563_v27 = vpop.f32.mrf.mxu0  ;;  %v746_v29 = vrot.slane %v678_v19, 7  ;;  %v843_v30 = vrot.slane %v678_v19, 1  ;;  %2326 = vmatpush1.bf16.msra.mxu0 %v15396_v6 }
  0xed   : > { %1383 = vst [vmem:[#allocation2 + $0x50] sm:$0xf] %v13335_v15  ;;  %v13305_v31 = vpack.c.bf16 %v678_v19, %v678_v19  ;;  %v750_v32 = vrot.slane %v681_v20, 7  ;;  %v917_v34 = vsel %vm833_vm2, %v844_v24, 0.0  ;;  %v847_v35 = vrot.slane %v681_v20, 1  ;;  %2327 = vmatprep.subr.bf16.mxu0 %v15403_v22 }
  0xee   : > { %1226 = vst [vmem:[#allocation2 + $0x70] sm:$0xf] %v13306_v25  ;;  %v13308_v36 = vpack.c.bf16 %v681_v20, %v681_v20  ;;  %v749_v37 = vrot.slane %v16135_v21, 7  ;;  %v15274_v38 = vpop.f32.mrf.mxu0  ;;  %v13338_v39 = vpack.c.bf16 %v917_v34, %v917_v34  ;;  %v748_v40 = vsel %vm736_vm3, %v746_v29, %v747_v23  ;;  %v15399_v43 = vld [vmem:[#allocation2 + $0x34] ss:$12 sps:$4 sm:$0xff]  }
  0xef   : > { %v820_v41 = vsel %vm736_vm3, 0.0, %v746_v29  ;;  %v845_v42 = vsel %vm833_vm2, %v843_v30, %v844_v24  ;;  %1225 = vst [vmem:[#allocation2 + $0x64] sm:$0xf] %v13305_v31  ;;  %v13274_v45 = vpack.c.bf16 %v748_v40, %v748_v40  ;;  %v918_v47 = vsel %vm833_vm2, %v847_v35, 0.0  ;;  %2174 = vmatprep.mubr.bf16.mxu0 %v15399_v43  ;;  %v15404_v59 = vld [vmem:[#allocation2 + $0x30] ss:$12 sps:$4 sm:$0xff]  }
  0xf0   : > { %v13273_v44 = vpack.c.bf16 %v820_v41, %v820_v41  ;;  %v13337_v46 = vpack.c.bf16 %v845_v42, %v845_v42  ;;  %1228 = vst [vmem:[#allocation2 + $0x88] sm:$0xf] %v13308_v36  ;;  %v573_v48 = vpop.f32.mrf.mxu0  ;;  %1386 = vst [vmem:[#allocation2 + $0x74] sm:$0xf] %v13338_v39  ;;  %v13340_v49 = vpack.c.bf16 %v918_v47, %v918_v47  ;;  %v821_v51 = vsel %vm736_vm3, 0.0, %v749_v37 }
  0xf1   : > { %v751_v50 = vsel %vm736_vm3, %v749_v37, %v750_v32  ;;  %v846_v52 = vrot.slane %v16135_v21, 1  ;;  %1066 = vst [vmem:[#allocation2 + $0x6c] sm:$0xf] %v13274_v45  ;;  %v13275_v54 = vpack.c.bf16 %v821_v51, %v821_v51  ;;  %v13307_v56 = vpack.c.bf16 %v16135_v21, %v16135_v21  ;;  %2328 = vmatpush1.bf16.msra.mxu0 %v15401_v28  ;;  %v15405_v1 = vld [vmem:[#allocation2 + $0x4c] ss:$12 sps:$4 sm:$0xff]  }
  0xf2   : > { %1065 = vst [vmem:[#allocation2 + $0x60] sm:$0xf] %v13273_v44  ;;  %1385 = vst [vmem:[#allocation2 + $0x68] sm:$0xf] %v13337_v46  ;;  %v13276_v55 = vpack.c.bf16 %v751_v50, %v751_v50  ;;  %v683_v57 = vmax.f32 %v569_v26, 0.0  ;;  %v15277_v58 = vpop.f32.mrf.mxu0  ;;  %v564_v62 = vadd.f32 %v16108_v8, %v563_v27  ;;  %v579_v63 = vadd.f32 %v15274_v38, %v16108_v8 }
  0xf3   : > { %1388 = vst [vmem:[#allocation2 + $0x8c] sm:$0xf] %v13340_v49  ;;  %v848_v61 = vsel %vm833_vm2, %v846_v52, %v847_v35  ;;  %v574_v0 = vadd.f32 %v16108_v8, %v573_v48  ;;  %2329 = vmatprep.subr.bf16.mxu0 %v15409_v33  ;;  %1067 = vst [vmem:[#allocation2 + $0x78] sm:$0xf] %v13275_v54  ;;  %2175 = vmatmul.mubr.bf16.gmra.mxu0 %v15404_v59  ;;  %v15413_v15 = vld [vmem:[%s20644_s3 + $0x2c0] ss:$8 sps:$4 sm:$0xff]  }
  0xf4   : > { %1068 = vst [vmem:[#allocation2 + $0x84] sm:$0xf] %v13276_v55  ;;  %1227 = vst [vmem:[#allocation2 + $0x7c] sm:$0xf] %v13307_v56  ;;  %v13339_v2 = vpack.c.bf16 %v848_v61, %v848_v61  ;;  %v850_v3 = vrot.slane %v683_v57, 1  ;;  %v13310_v4 = vpack.c.bf16 %v683_v57, %v683_v57  ;;  %v583_v5 = vpop.f32.mrf.mxu0  ;;  %v753_v6 = vrot.slane %v683_v57, 7  ;;  %2184 = vmatprep.mubr.bf16.mxu0 %v15405_v1 }
  0xf5   : > { %v682_v7 = vmax.f32 %v564_v62, 0.0  ;;  %v685_v9 = vmax.f32 %v579_v63, 0.0  ;;  %v684_v10 = vmax.f32 %v574_v0, 0.0  ;;  %v589_v12 = vadd.f32 %v15277_v58, %v16108_v8  ;;  %2330 = vmatpush1.bf16.msra.mxu0 %v15407_v53  ;;  %v15423_v20 = vld [vmem:[%s20644_s3 + $0x2b4] ss:$8 sps:$4 sm:$0xff]  }
  0xf6   : > { %1387 = vst [vmem:[#allocation2 + $0x80] sm:$0xf] %v13339_v2  ;;  %v919_v11 = vsel %vm833_vm2, %v850_v3, 0.0  ;;  %1230 = vst [vmem:[#allocation2 + $0xa0] sm:$0xf] %v13310_v4  ;;  %v584_v13 = vadd.f32 %v16108_v8, %v583_v5  ;;  %v15280_v14 = vpop.f32.mrf.mxu0  ;;  %2331 = vmatprep.subr.bf16.mxu0 %v15415_v60 }
  0xf7   : > { %v13342_v16 = vpack.c.bf16 %v919_v11, %v919_v11  ;;  %v752_v17 = vrot.slane %v682_v7, 7  ;;  %v849_v18 = vrot.slane %v682_v7, 1  ;;  %v13309_v19 = vpack.c.bf16 %v682_v7, %v682_v7  ;;  %v15421_v26 = vld [vmem:[%s20644_s3 + $0x2b0] ss:$8 sps:$4 sm:$0xff]   ;;  %v15429_v31 = vld [vmem:[%s20644_s3 + $0x2a4] ss:$8 sps:$4 sm:$0xff]  }
  0xf8   : > { %v756_v21 = vrot.slane %v685_v9, 7  ;;  %v853_v22 = vrot.slane %v685_v9, 1  ;;  %v13312_v23 = vpack.c.bf16 %v685_v9, %v685_v9  ;;  %v755_v24 = vrot.slane %v684_v10, 7  ;;  %v593_v25 = vpop.f32.mrf.mxu0  ;;  %v15411_v36 = vld [vmem:[#allocation2 + $0x64] ss:$12 sps:$4 sm:$0xff]  }
  0xf9   : > { %1390 = vst [vmem:[#allocation2 + $0xa4] sm:$0xf] %v13342_v16  ;;  %v754_v27 = vsel %vm736_vm3, %v752_v17, %v753_v6  ;;  %v822_v28 = vsel %vm736_vm3, 0.0, %v752_v17  ;;  %v851_v29 = vsel %vm833_vm2, %v849_v18, %v850_v3  ;;  %1229 = vst [vmem:[#allocation2 + $0x94] sm:$0xf] %v13309_v19  ;;  %v852_v30 = vrot.slane %v684_v10, 1  ;;  %2332 = vmatpush1.bf16.msra.mxu0 %v15413_v15 }
  0xfa   : > { %v13277_v32 = vpack.c.bf16 %v822_v28, %v822_v28  ;;  %v13278_v33 = vpack.c.bf16 %v754_v27, %v754_v27  ;;  %v13341_v34 = vpack.c.bf16 %v851_v29, %v851_v29  ;;  %v920_v35 = vsel %vm833_vm2, %v853_v22, 0.0  ;;  %1232 = vst [vmem:[#allocation2 + $0xb8] sm:$0xf] %v13312_v23  ;;  %v15283_v37 = vpop.f32.mrf.mxu0  ;;  %v15410_v42 = vld [vmem:[#allocation2 + $0x48] ss:$12 sps:$4 sm:$0xff]   ;;  %2333 = vmatprep.subr.bf16.mxu0 %v15423_v20 }
  0xfb   : > { %v13344_v38 = vpack.c.bf16 %v920_v35, %v920_v35  ;;  %v757_v39 = vsel %vm736_vm3, %v755_v24, %v756_v21  ;;  %v823_v40 = vsel %vm736_vm3, 0.0, %v755_v24  ;;  %v854_v41 = vsel %vm833_vm2, %v852_v30, %v853_v22  ;;  %2185 = vmatmul.mubr.bf16.gmra.mxu0 %v15410_v42  ;;  %v15427_v55 = vld [vmem:[%s20644_s3 + $0x2a0] ss:$8 sps:$4 sm:$0xff]   ;;  %v15442_v60 = vld [vmem:[%s20644_s3 + $0x294] ss:$8 sps:$4 sm:$0xff]  }
  0xfc   : > { %1069 = vst [vmem:[#allocation2 + $0x90] sm:$0xf] %v13277_v32  ;;  %1070 = vst [vmem:[#allocation2 + $0x9c] sm:$0xf] %v13278_v33  ;;  %v13279_v43 = vpack.c.bf16 %v823_v40, %v823_v40  ;;  %v13280_v44 = vpack.c.bf16 %v757_v39, %v757_v39  ;;  %v13311_v45 = vpack.c.bf16 %v684_v10, %v684_v10  ;;  %v603_v47 = vpop.f32.mrf.mxu0  ;;  %v687_v48 = vmax.f32 %v589_v12, 0.0 }
  0xfd   : > { %1389 = vst [vmem:[#allocation2 + $0x98] sm:$0xf] %v13341_v34  ;;  %v13343_v46 = vpack.c.bf16 %v854_v41, %v854_v41  ;;  %1392 = vst [vmem:[#allocation2 + $0xbc] sm:$0xf] %v13344_v38  ;;  %v686_v49 = vmax.f32 %v584_v13, 0.0  ;;  %v599_v50 = vadd.f32 %v15280_v14, %v16108_v8  ;;  %v594_v51 = vadd.f32 %v16108_v8, %v593_v25 }
  0xfe   : > { %1071 = vst [vmem:[#allocation2 + $0xa8] sm:$0xf] %v13279_v43  ;;  %1072 = vst [vmem:[#allocation2 + $0xb4] sm:$0xf] %v13280_v44  ;;  %2194 = vmatprep.mubr.bf16.mxu0 %v15411_v36  ;;  %v609_v52 = vadd.f32 %v15283_v37, %v16108_v8  ;;  %v604_v53 = vadd.f32 %v16108_v8, %v603_v47  ;;  %2334 = vmatpush1.bf16.msra.mxu0 %v15421_v26  ;;  %v16194_v54 = vpop.f32.mrf.mxu0  ;;  %v759_v56 = vrot.slane %v687_v48, 7 }
  0xff   : > { %1231 = vst [vmem:[#allocation2 + $0xac] sm:$0xf] %v13311_v45  ;;  %1391 = vst [vmem:[#allocation2 + $0xb0] sm:$0xf] %v13343_v46  ;;  %v856_v57 = vrot.slane %v687_v48, 1  ;;  %v13314_v58 = vpack.c.bf16 %v687_v48, %v687_v48  ;;  %v758_v59 = vrot.slane %v686_v49, 7  ;;  %2335 = vmatprep.subr.bf16.mxu0 %v15429_v31  ;;  %v13313_v62 = vpack.c.bf16 %v686_v49, %v686_v49 }
 0x100   : > { %v855_v61 = vrot.slane %v686_v49, 1  ;;  %v689_v63 = vmax.f32 %v599_v50, 0.0  ;;  %v688_v0 = vmax.f32 %v594_v51, 0.0  ;;  %v16202_v1 = vpop.f32.mrf.mxu0  ;;  %v15440_v2 = vld [vmem:[%s20644_s3 + $0x290] ss:$8 sps:$4 sm:$0xff]   ;;  %v16210_v6 = vmax.f32 %v609_v52, 0.0 }
 0x101   : > { %v921_v3 = vsel %vm833_vm2, %v856_v57, 0.0  ;;  %1234 = vst [vmem:[#allocation2 + $0xd0] sm:$0xf] %v13314_v58  ;;  %v760_v4 = vsel %vm736_vm3, %v758_v59, %v759_v56  ;;  %v824_v5 = vsel %vm736_vm3, 0.0, %v758_v59  ;;  %v15454_v7 = vld [vmem:[%s20644_s3 + $0x284] ss:$8 sps:$4 sm:$0xff]   ;;  %v619_v45 = vadd.f32 %v16194_v54, %v16108_v8 }
 0x102   : > { %v13346_v9 = vpack.c.bf16 %v921_v3, %v921_v3  ;;  %v857_v10 = vsel %vm833_vm2, %v855_v61, %v856_v57  ;;  %v13281_v11 = vpack.c.bf16 %v824_v5, %v824_v5  ;;  %v13282_v12 = vpack.c.bf16 %v760_v4, %v760_v4  ;;  %1233 = vst [vmem:[#allocation2 + $0xc4] sm:$0xf] %v13313_v62  ;;  %v15417_v13 = vld [vmem:[#allocation2 + $0x7c] ss:$12 sps:$4 sm:$0xff]   ;;  %v15289_v14 = vpop.f32.mrf.mxu0  ;;  %v15416_v19 = vld [vmem:[#allocation2 + $0x60] ss:$12 sps:$4 sm:$0xff]  }
 0x103   : > { %2336 = vmatpush1.bf16.msra.mxu0 %v15427_v55  ;;  %v13345_v15 = vpack.c.bf16 %v857_v10, %v857_v10  ;;  %v762_v16 = vrot.slane %v689_v63, 7  ;;  %v859_v17 = vrot.slane %v689_v63, 1  ;;  %v13316_v18 = vpack.c.bf16 %v689_v63, %v689_v63  ;;  %v15452_v34 = vld [vmem:[%s20644_s3 + $0x280] ss:$8 sps:$4 sm:$0xff]   ;;  %v15466_v39 = vld [vmem:[%s20644_s3 + $0x174] ss:$8 sps:$4 sm:$0xff]  }
 0x104   : > { %2337 = vmatprep.subr.bf16.mxu0 %v15442_v60  ;;  %1394 = vst [vmem:[#allocation2 + $0xd4] sm:$0xf] %v13346_v9  ;;  %1073 = vst [vmem:[#allocation2 + $0xc0] sm:$0xf] %v13281_v11  ;;  %v761_v20 = vrot.slane %v688_v0, 7  ;;  %v858_v21 = vrot.slane %v688_v0, 1  ;;  %v13315_v22 = vpack.c.bf16 %v688_v0, %v688_v0  ;;  %v623_v24 = vpop.f32.mrf.mxu0  ;;  %v13318_v27 = vpack.c.bf16 %v16210_v6, %v16210_v6 }
 0x105   : > { %1074 = vst [vmem:[#allocation2 + $0xcc] sm:$0xf] %v13282_v12  ;;  %v765_v23 = vrot.slane %v16210_v6, 7  ;;  %1393 = vst [vmem:[#allocation2 + $0xc8] sm:$0xf] %v13345_v15  ;;  %v922_v25 = vsel %vm833_vm2, %v859_v17, 0.0  ;;  %2195 = vmatmul.mubr.bf16.gmra.mxu0 %v15416_v19  ;;  %v614_v46 = vadd.f32 %v16108_v8, %v16202_v1  ;;  %v629_v48 = vadd.f32 %v15289_v14, %v16108_v8 }
 0x106   : > { %1236 = vst [vmem:[#allocation2 + $0xe8] sm:$0xf] %v13316_v18  ;;  %v862_v26 = vrot.slane %v16210_v6, 1  ;;  %v690_v28 = vmax.f32 %v604_v53, 0.0  ;;  %v13348_v29 = vpack.c.bf16 %v922_v25, %v922_v25  ;;  %v763_v30 = vsel %vm736_vm3, %v761_v20, %v762_v16  ;;  %1235 = vst [vmem:[#allocation2 + $0xdc] sm:$0xf] %v13315_v22  ;;  %2204 = vmatprep.mubr.bf16.mxu0 %v15417_v13  ;;  %v15292_v33 = vpop.f32.mrf.mxu0 }
 0x107   : > { %v825_v31 = vsel %vm736_vm3, 0.0, %v761_v20  ;;  %v860_v32 = vsel %vm833_vm2, %v858_v21, %v859_v17  ;;  %2338 = vmatpush1.bf16.msra.mxu0 %v15440_v2  ;;  %v13284_v36 = vpack.c.bf16 %v763_v30, %v763_v30  ;;  %1238 = vst [vmem:[#allocation2 + $0x100] sm:$0xf] %v13318_v27  ;;  %v16237_v47 = vld [vmem:[#allocation2 + $0x78] ss:$12 sps:$4 sm:$0xff]   ;;  %v624_v49 = vadd.f32 %v16108_v8, %v623_v24 }
 0x108   : > { %v13283_v35 = vpack.c.bf16 %v825_v31, %v825_v31  ;;  %v13347_v37 = vpack.c.bf16 %v860_v32, %v860_v32  ;;  %v923_v38 = vsel %vm833_vm2, %v862_v26, 0.0  ;;  %2339 = vmatprep.subr.bf16.mxu0 %v15454_v7  ;;  %1396 = vst [vmem:[#allocation2 + $0xec] sm:$0xf] %v13348_v29  ;;  %v764_v41 = vrot.slane %v690_v28, 7  ;;  %v16231_v44 = vpop.f32.mrf.mxu0  ;;  %v16244_v53 = vld [vmem:[#allocation2 + $0x94] ss:$12 sps:$4 sm:$0xff]  }
 0x109   : > { %v13350_v40 = vpack.c.bf16 %v923_v38, %v923_v38  ;;  %v861_v42 = vrot.slane %v690_v28, 1  ;;  %v13317_v43 = vpack.c.bf16 %v690_v28, %v690_v28  ;;  %1076 = vst [vmem:[#allocation2 + $0xe4] sm:$0xf] %v13284_v36  ;;  %v15433_v54 = vld [vmem:[%s20644_s3 + $0x70] ss:$8 sps:$4 sm:$0xff]   ;;  %v16250_v55 = vadd.f32 %v15292_v33, %v16108_v8 }
 0x10a   : > { %1075 = vst [vmem:[#allocation2 + $0xd8] sm:$0xf] %v13283_v35  ;;  %1395 = vst [vmem:[#allocation2 + $0xe0] sm:$0xf] %v13347_v37  ;;  %v766_v50 = vsel %vm736_vm3, %v764_v41, %v765_v23  ;;  %v826_v51 = vsel %vm736_vm3, 0.0, %v764_v41  ;;  %v16252_v56 = vpop.f32.mrf.mxu0  ;;  %v693_v62 = vmax.f32 %v619_v45, 0.0 }
 0x10b   : > { %1398 = vst [vmem:[#allocation2 + $0x104] sm:$0xf] %v13350_v40  ;;  %v863_v52 = vsel %vm833_vm2, %v861_v42, %v862_v26  ;;  %1237 = vst [vmem:[#allocation2 + $0xf4] sm:$0xf] %v13317_v43  ;;  %2340 = vmatpush1.bf16.msra.mxu0 %v15452_v34  ;;  %v13285_v57 = vpack.c.bf16 %v826_v51, %v826_v51  ;;  %v13286_v58 = vpack.c.bf16 %v766_v50, %v766_v50  ;;  %v1551_v60 = vld [vmem:[#allocation2 + $0xc0] sm:$0xff] }
 0x10c   : > { %v13349_v59 = vpack.c.bf16 %v863_v52, %v863_v52  ;;  %v1553_v61 = vld [vmem:[#allocation2 + $0xcc] sm:$0xff]  ;;  %3207 = vmatprep.subr.bf16.mxu0 %v15466_v39  ;;  %v692_v1 = vmax.f32 %v614_v46, 0.0  ;;  %v695_v2 = vmax.f32 %v629_v48, 0.0  ;;  %v643_v4 = vpop.f32.mrf.mxu0  ;;  %v768_v5 = vrot.slane %v693_v62, 7  ;;  %v15437_v14 = vld [vmem:[%s20644_s3 + $0x60] ss:$8 sps:$4 sm:$0xff]  }
 0x10d   : > { %v16254_v63 = vcombine.low %v1551_v60, %v1553_v61  ;;  %v16256_v0 = vcombine.high %v1551_v60, %v1553_v61  ;;  %v15439_v3 = vld [vmem:[%s20644_s3 + $0x64] ss:$8 sps:$4 sm:$0xff]   ;;  %1077 = vst [vmem:[#allocation2 + $0xf0] sm:$0xf] %v13285_v57  ;;  %1078 = vst [vmem:[#allocation2 + $0xfc] sm:$0xf] %v13286_v58  ;;  %v13320_v7 = vpack.c.bf16 %v693_v62, %v693_v62  ;;  %2205 = vmatmul.mubr.bf16.gmra.mxu0 %v16237_v47 }
 0x10e   : > { %1397 = vst [vmem:[#allocation2 + $0xf8] sm:$0xf] %v13349_v59  ;;  %v865_v6 = vrot.slane %v693_v62, 1  ;;  %v694_v9 = vmax.f32 %v624_v49, 0.0  ;;  %v767_v10 = vrot.slane %v692_v1, 7  ;;  %v864_v11 = vrot.slane %v692_v1, 1  ;;  %2214 = vmatprep.mubr.bf16.mxu0 %v16244_v53  ;;  %v15298_v15 = vpop.f32.mrf.mxu0 }
 0x10f   : > { %2234 = vmatprep.mubr.bf16.mxu1 %v16256_v0  ;;  %v13319_v12 = vpack.c.bf16 %v692_v1, %v692_v1  ;;  %v771_v13 = vrot.slane %v695_v2, 7  ;;  %1240 = vst [vmem:[#allocation2 + $0x118] sm:$0xf] %v13320_v7  ;;  %v868_v17 = vrot.slane %v695_v2, 1  ;;  %v13322_v18 = vpack.c.bf16 %v695_v2, %v695_v2  ;;  %v15450_v20 = vld [vmem:[%s20644_s3 + $0x54] ss:$8 sps:$4 sm:$0xff]  }
 0x110   : > { %2235 = vmatmul.mubr.bf16.vlgmr.msra.gmra.mxu1 %v16254_v63  ;;  %v924_v16 = vsel %vm833_vm2, %v865_v6, 0.0  ;;  %v770_v19 = vrot.slane %v694_v9, 7  ;;  %v769_v22 = vsel %vm736_vm3, %v767_v10, %v768_v5  ;;  %v827_v23 = vsel %vm736_vm3, 0.0, %v767_v10  ;;  %v16275_v25 = vld [vmem:[#allocation2 + $0xdc] ss:$12 sps:$4 sm:$0xff]   ;;  %v653_v26 = vpop.f32.mrf.mxu0 }
 0x111   : > { %v13352_v21 = vpack.c.bf16 %v924_v16, %v924_v16  ;;  %v866_v24 = vsel %vm833_vm2, %v864_v11, %v865_v6  ;;  %1239 = vst [vmem:[#allocation2 + $0x10c] sm:$0xf] %v13319_v12  ;;  %3015 = vmatpush1.bf16.msra.mxu1 %v15433_v54  ;;  %v13287_v27 = vpack.c.bf16 %v827_v23, %v827_v23  ;;  %v925_v30 = vsel %vm833_vm2, %v868_v17, 0.0  ;;  %v16278_v31 = vld [vmem:[#allocation2 + $0x90] ss:$12 sps:$4 sm:$0xff]  }
 0x112   : > { %v13288_v28 = vpack.c.bf16 %v769_v22, %v769_v22  ;;  %v13351_v29 = vpack.c.bf16 %v866_v24, %v866_v24  ;;  %1242 = vst [vmem:[#allocation2 + $0x130] sm:$0xf] %v13322_v18  ;;  %3016 = vmatprep.subr.bf16.mxu1 %v15439_v3  ;;  %2244 = vmatprep.mubr.bf16.mxu1 %v16275_v25  ;;  %v828_v34 = vsel %vm736_vm3, 0.0, %v770_v19  ;;  %v867_v35 = vrot.slane %v694_v9, 1  ;;  %v16283_v36 = vld [vmem:[#allocation2 + $0xac] ss:$12 sps:$4 sm:$0xff]   ;;  %v15301_v38 = vpop.f32.mrf.mxu0 }
 0x113   : > { %1400 = vst [vmem:[#allocation2 + $0x11c] sm:$0xf] %v13352_v21  ;;  %v13354_v32 = vpack.c.bf16 %v925_v30, %v925_v30  ;;  %v772_v33 = vsel %vm736_vm3, %v770_v19, %v771_v13  ;;  %v15448_v37 = vld [vmem:[%s20644_s3 + $0x50] ss:$8 sps:$4 sm:$0xff]   ;;  %1079 = vst [vmem:[#allocation2 + $0x108] sm:$0xf] %v13287_v27  ;;  %v13289_v40 = vpack.c.bf16 %v828_v34, %v828_v34 }
 0x114   : > { %1080 = vst [vmem:[#allocation2 + $0x114] sm:$0xf] %v13288_v28  ;;  %1399 = vst [vmem:[#allocation2 + $0x110] sm:$0xf] %v13351_v29  ;;  %v16288_v39 = vld [vmem:[#allocation2 + $0xd8] ss:$12 sps:$4 sm:$0xff]   ;;  %v13290_v41 = vpack.c.bf16 %v772_v33, %v772_v33  ;;  %v13321_v42 = vpack.c.bf16 %v694_v9, %v694_v9  ;;  %v869_v45 = vsel %vm833_vm2, %v867_v35, %v868_v17  ;;  %v663_v51 = vpop.f32.mrf.mxu0 }
 0x115   : > { %v697_v43 = vmax.f32 %v16250_v55, 0.0  ;;  %1402 = vst [vmem:[#allocation2 + $0x134] sm:$0xf] %v13354_v32  ;;  %3017 = vmatpush1.bf16.msra.mxu1 %v15437_v14  ;;  %v16292_v46 = vld [vmem:[#allocation2 + $0xf4] ss:$12 sps:$4 sm:$0xff]   ;;  %v634_v48 = vadd.f32 %v16108_v8, %v16231_v44  ;;  %v649_v49 = vadd.f32 %v16252_v56, %v16108_v8  ;;  %v644_v50 = vadd.f32 %v16108_v8, %v643_v4 }
 0x116   : > { %1081 = vst [vmem:[#allocation2 + $0x120] sm:$0xf] %v13289_v40  ;;  %1082 = vst [vmem:[#allocation2 + $0x12c] sm:$0xf] %v13290_v41  ;;  %v13353_v52 = vpack.c.bf16 %v869_v45, %v869_v45  ;;  %2215 = vmatmul.mubr.bf16.gmra.mxu0 %v16278_v31  ;;  %3018 = vmatprep.subr.bf16.mxu1 %v15450_v20  ;;  %v15457_v44 = vld [vmem:[%s20644_s3 + $0x44] ss:$8 sps:$4 sm:$0xff]   ;;  %v659_v60 = vadd.f32 %v15298_v15, %v16108_v8 }
 0x117   : > { %1241 = vst [vmem:[#allocation2 + $0x124] sm:$0xf] %v13321_v42  ;;  %v774_v54 = vrot.slane %v697_v43, 7  ;;  %v871_v55 = vrot.slane %v697_v43, 1  ;;  %v13324_v57 = vpack.c.bf16 %v697_v43, %v697_v43  ;;  %2224 = vmatprep.mubr.bf16.mxu0 %v16283_v36  ;;  %v696_v56 = vmax.f32 %v634_v48, 0.0 }
 0x118   : > { %v699_v58 = vmax.f32 %v649_v49, 0.0  ;;  %v698_v59 = vmax.f32 %v644_v50, 0.0  ;;  %2245 = vmatmul.mubr.bf16.gmra.mxu1 %v16288_v39  ;;  %1401 = vst [vmem:[#allocation2 + $0x128] sm:$0xf] %v13353_v52  ;;  %v654_v62 = vadd.f32 %v16108_v8, %v653_v26  ;;  %v669_v1 = vadd.f32 %v15301_v38, %v16108_v8  ;;  %v15455_v7 = vld [vmem:[%s20644_s3 + $0x40] ss:$8 sps:$4 sm:$0xff]  }
 0x119   : > { %v926_v61 = vsel %vm833_vm2, %v871_v55, 0.0  ;;  %1244 = vst [vmem:[#allocation2 + $0x148] sm:$0xf] %v13324_v57  ;;  %v664_v2 = vadd.f32 %v16108_v8, %v663_v51  ;;  %2254 = vmatprep.mubr.bf16.mxu1 %v16292_v46  ;;  %3019 = vmatpush1.bf16.msra.mxu1 %v15448_v37  ;;  %v773_v4 = vrot.slane %v696_v56, 7  ;;  %v870_v5 = vrot.slane %v696_v56, 1  ;;  %v16337_v38 = vld [vmem:[#allocation2] sm:$0xff] }
 0x11a   : > { %v13356_v3 = vpack.c.bf16 %v926_v61, %v926_v61  ;;  %v13323_v6 = vpack.c.bf16 %v696_v56, %v696_v56  ;;  %v15463_v9 = vld [vmem:[%s20644_s3 + $0x34] ss:$8 sps:$4 sm:$0xff]   ;;  %3020 = vmatprep.subr.bf16.mxu1 %v15457_v44  ;;  %v777_v10 = vrot.slane %v699_v58, 7  ;;  %v874_v11 = vrot.slane %v699_v58, 1  ;;  %v15461_v17 = vld [vmem:[%s20644_s3 + $0x30] ss:$8 sps:$4 sm:$0xff]  }
 0x11b   : > { %v13326_v12 = vpack.c.bf16 %v699_v58, %v699_v58  ;;  %v776_v8 = vrot.slane %v698_v59, 7  ;;  %v775_v13 = vsel %vm736_vm3, %v773_v4, %v774_v54  ;;  %v829_v14 = vsel %vm736_vm3, 0.0, %v773_v4  ;;  %v16320_v16 = vld [vmem:[#allocation2 + $0xa8] ss:$12 sps:$4 sm:$0xff]   ;;  %v16325_v19 = vld [vmem:[#allocation2 + $0xf0] ss:$12 sps:$4 sm:$0xff]  }
 0x11c   : > { %1404 = vst [vmem:[#allocation2 + $0x14c] sm:$0xf] %v13356_v3  ;;  %v872_v15 = vsel %vm833_vm2, %v870_v5, %v871_v55  ;;  %1243 = vst [vmem:[#allocation2 + $0x13c] sm:$0xf] %v13323_v6  ;;  %v873_v18 = vrot.slane %v698_v59, 1  ;;  %v13291_v20 = vpack.c.bf16 %v829_v14, %v829_v14  ;;  %v13292_v21 = vpack.c.bf16 %v775_v13, %v775_v13 }
 0x11d   : > { %v13355_v22 = vpack.c.bf16 %v872_v15, %v872_v15  ;;  %v927_v23 = vsel %vm833_vm2, %v874_v11, 0.0  ;;  %1246 = vst [vmem:[#allocation2 + $0x160] sm:$0xf] %v13326_v12  ;;  %3021 = vmatpush1.bf16.msra.mxu1 %v15455_v7  ;;  %v16328_v24 = vld [vmem:[#allocation2 + $0x10c] ss:$12 sps:$4 sm:$0xff]   ;;  %v778_v27 = vsel %vm736_vm3, %v776_v8, %v777_v10  ;;  %v830_v28 = vsel %vm736_vm3, 0.0, %v776_v8 }
 0x11e   : > { %v13358_v26 = vpack.c.bf16 %v927_v23, %v927_v23  ;;  %v875_v29 = vsel %vm833_vm2, %v873_v18, %v874_v11  ;;  %1083 = vst [vmem:[#allocation2 + $0x138] sm:$0xf] %v13291_v20  ;;  %1084 = vst [vmem:[#allocation2 + $0x144] sm:$0xf] %v13292_v21  ;;  %2225 = vmatmul.mubr.bf16.gmra.mxu0 %v16320_v16  ;;  %3022 = vmatprep.subr.bf16.mxu1 %v15463_v9  ;;  %v15470_v34 = vld [vmem:[%s20644_s3 + $0x24] ss:$8 sps:$4 sm:$0xff]  }
 0x11f   : > { %1403 = vst [vmem:[#allocation2 + $0x140] sm:$0xf] %v13355_v22  ;;  %v13293_v30 = vpack.c.bf16 %v830_v28, %v830_v28  ;;  %v13294_v32 = vpack.c.bf16 %v778_v27, %v778_v27  ;;  %v13325_v33 = vpack.c.bf16 %v698_v59, %v698_v59  ;;  %v701_v35 = vmax.f32 %v659_v60, 0.0  ;;  %2357 = vmatprep.mubr.bf16.mxu0 %v16337_v38  ;;  %v15468_v43 = vld [vmem:[%s20644_s3 + $0x20] ss:$8 sps:$4 sm:$0xff]  }
 0x120   : > { %1406 = vst [vmem:[#allocation2 + $0x164] sm:$0xf] %v13358_v26  ;;  %v13357_v37 = vpack.c.bf16 %v875_v29, %v875_v29  ;;  %v700_v40 = vmax.f32 %v654_v62, 0.0  ;;  %v703_v41 = vmax.f32 %v669_v1, 0.0  ;;  %v702_v42 = vmax.f32 %v664_v2, 0.0  ;;  %2255 = vmatmul.mubr.bf16.gmra.mxu1 %v16325_v19 }
 0x121   : > { %1085 = vst [vmem:[#allocation2 + $0x150] sm:$0xf] %v13293_v30  ;;  %1086 = vst [vmem:[#allocation2 + $0x15c] sm:$0xf] %v13294_v32  ;;  %v780_v45 = vrot.slane %v701_v35, 7  ;;  %v877_v48 = vrot.slane %v701_v35, 1  ;;  %v13328_v49 = vpack.c.bf16 %v701_v35, %v701_v35  ;;  %2264 = vmatprep.mubr.bf16.mxu1 %v16328_v24  ;;  %3023 = vmatpush1.bf16.msra.mxu1 %v15461_v17 }
 0x122   : > { %1245 = vst [vmem:[#allocation2 + $0x154] sm:$0xf] %v13325_v33  ;;  %1405 = vst [vmem:[#allocation2 + $0x158] sm:$0xf] %v13357_v37  ;;  %v15464_v50 = vld [vmem:[%s20644_s3 + $0x170] ss:$8 sps:$4 sm:$0xff]   ;;  %v13327_v55 = vpack.c.bf16 %v700_v40, %v700_v40  ;;  %3024 = vmatprep.subr.bf16.mxu1 %v15470_v34  ;;  %v13330_v58 = vpack.c.bf16 %v703_v41, %v703_v41  ;;  %v13329_v20 = vpack.c.bf16 %v702_v42, %v702_v42 }
 0x123   : > { %v15476_v51 = vld [vmem:[%s20644_s3 + $0x14] ss:$8 sps:$4 sm:$0xff]   ;;  %v779_v52 = vrot.slane %v700_v40, 7  ;;  %v876_v54 = vrot.slane %v700_v40, 1  ;;  %v783_v57 = vrot.slane %v703_v41, 7  ;;  %v928_v44 = vsel %vm833_vm2, %v877_v48, 0.0 }
 0x124   : > { %1248 = vst [vmem:[#allocation2 + $0x178] sm:$0xf] %v13328_v49  ;;  %v880_v56 = vrot.slane %v703_v41, 1  ;;  %v782_v59 = vrot.slane %v702_v42, 7  ;;  %v15474_v60 = vld [vmem:[%s20644_s3 + $0x10] ss:$8 sps:$4 sm:$0xff]   ;;  %v13360_v61 = vpack.c.bf16 %v928_v44, %v928_v44 }
 0x125   : > { %v781_v62 = vsel %vm736_vm3, %v779_v52, %v780_v45  ;;  %v831_v1 = vsel %vm736_vm3, 0.0, %v779_v52  ;;  %v878_v2 = vsel %vm833_vm2, %v876_v54, %v877_v48  ;;  %1247 = vst [vmem:[#allocation2 + $0x16c] sm:$0xf] %v13327_v55  ;;  %v15489_v3 = vld [vmem:[%s20644_s3 + $0x164] ss:$8 sps:$4 sm:$0xff]   ;;  %3025 = vmatpush1.bf16.msra.mxu1 %v15468_v43  ;;  %v879_v14 = vrot.slane %v702_v42, 1 }
 0x126   : > { %v16361_v4 = vld [vmem:[#allocation2 + $0x108] ss:$12 sps:$4 sm:$0xff]   ;;  %v15467_v5 = vld [vmem:[#allocation2 + $0x20] ss:$12 sps:$4 sm:$0xff]   ;;  %v13295_v6 = vpack.c.bf16 %v831_v1, %v831_v1  ;;  %v13296_v7 = vpack.c.bf16 %v781_v62, %v781_v62  ;;  %v13359_v9 = vpack.c.bf16 %v878_v2, %v878_v2  ;;  %v929_v10 = vsel %vm833_vm2, %v880_v56, 0.0  ;;  %3026 = vmatprep.subr.bf16.mxu1 %v15476_v51 }
 0x127   : > { %1250 = vst [vmem:[#allocation2 + $0x190] sm:$0xf] %v13330_v58  ;;  %v16364_v11 = vld [vmem:[#allocation2 + $0x124] ss:$12 sps:$4 sm:$0xff]   ;;  %1408 = vst [vmem:[#allocation2 + $0x17c] sm:$0xf] %v13360_v61  ;;  %v13362_v12 = vpack.c.bf16 %v929_v10, %v929_v10  ;;  %v784_v8 = vsel %vm736_vm3, %v782_v59, %v783_v57  ;;  %2358 = vmatmul.mubr.bf16.vlgmr.msra.gmra.mxu0 %v15467_v5  ;;  %v881_v21 = vsel %vm833_vm2, %v879_v14, %v880_v56 }
 0x128   : > { %v832_v13 = vsel %vm736_vm3, 0.0, %v782_v59  ;;  %1087 = vst [vmem:[#allocation2 + $0x168] sm:$0xf] %v13295_v6  ;;  %1088 = vst [vmem:[#allocation2 + $0x174] sm:$0xf] %v13296_v7  ;;  %v13298_v18 = vpack.c.bf16 %v784_v8, %v784_v8  ;;  %3208 = vmatpush1.bf16.msra.mxu0 %v15464_v50  ;;  %2367 = vmatprep.mubr.bf16.mxu0 %v16337_v38  ;;  %v13361_v23 = vpack.c.bf16 %v881_v21, %v881_v21 }
 0x129   : > { %1407 = vst [vmem:[#allocation2 + $0x170] sm:$0xf] %v13359_v9  ;;  %v15480_v15 = vld [vmem:[%s20644_s3 + $0x4] ss:$8 sps:$4 sm:$0xff]   ;;  %v13297_v17 = vpack.c.bf16 %v832_v13, %v832_v13  ;;  %1410 = vst [vmem:[#allocation2 + $0x194] sm:$0xf] %v13362_v12  ;;  %2265 = vmatmul.mubr.bf16.gmra.mxu1 %v16361_v4  ;;  %3209 = vmatprep.subr.bf16.mxu0 %v15489_v3  ;;  %v12302_v21 = vcombine.low %v16337_v38, %v16337_v38 }
 0x12a   : > { %v15487_v22 = vld [vmem:[%s20644_s3 + $0x160] ss:$8 sps:$4 sm:$0xff]   ;;  %1090 = vst [vmem:[#allocation2 + $0x18c] sm:$0xf] %v13298_v18  ;;  %1249 = vst [vmem:[#allocation2 + $0x184] sm:$0xf] %v13329_v20  ;;  %2274 = vmatprep.mubr.bf16.mxu1 %v16364_v11  ;;  %3027 = vmatpush1.bf16.msra.mxu1 %v15474_v60  ;;  %v12303_v20 = vcombine.high %v16337_v38, %v16337_v38 }
 0x12b   : > { %1089 = vst [vmem:[#allocation2 + $0x180] sm:$0xf] %v13297_v17  ;;  %v15512_v26 = vld [vmem:[%s20644_s3 + $0x154] ss:$8 sps:$4 sm:$0xff]   ;;  %v15478_v27 = vld [vmem:[%s20644_s3] ss:$8 sps:$4 sm:$0xff]   ;;  %3028 = vmatprep.subr.bf16.mxu1 %v15480_v15 }
 0x12c   : > { %v15486_v28 = vld [vmem:[%s20644_s3 + $0xf4] ss:$8 sps:$4 sm:$0xff]   ;;  %1409 = vst [vmem:[#allocation2 + $0x188] sm:$0xf] %v13361_v23  ;;  %v15477_v29 = vld [vmem:[#allocation2 + $0x38] ss:$12 sps:$4 sm:$0xff]   ;;  %3210 = vmatpush1.bf16.msra.mxu0 %v15487_v22 }
 0x12d   : > { %v15484_v30 = vld [vmem:[%s20644_s3 + $0xf0] ss:$8 sps:$4 sm:$0xff]   ;;  %v15531_v33 = vld [vmem:[%s20644_s3 + $0x144] ss:$8 sps:$4 sm:$0xff]   ;;  %3211 = vmatprep.subr.bf16.mxu0 %v15512_v26  ;;  %v16398_v35 = vld [vmem:[#allocation2 + $0x13c] ss:$12 sps:$4 sm:$0xff]  }
 0x12e   : > { %v15510_v32 = vld [vmem:[%s20644_s3 + $0x150] ss:$8 sps:$4 sm:$0xff]   ;;  %v16396_v34 = vld [vmem:[#allocation2 + $0x120] ss:$12 sps:$4 sm:$0xff]   ;;  %3029 = vmatpush1.bf16.msra.mxu1 %v15478_v27  ;;  %v15542_v41 = vld [vmem:[%s20644_s3 + $0x134] ss:$8 sps:$4 sm:$0xff]  }
 0x12f   : > { %2368 = vmatmul.mubr.bf16.gmra.mxu0 %v15477_v29  ;;  %3030 = vmatprep.subr.bf16.mxu1 %v15486_v28  ;;  %v15493_v37 = vld [vmem:[%s20644_s3 + $0xe4] ss:$8 sps:$4 sm:$0xff]   ;;  %v15529_v40 = vld [vmem:[%s20644_s3 + $0x140] ss:$8 sps:$4 sm:$0xff]   ;;  %v15499_v43 = vld [vmem:[%s20644_s3 + $0xd4] ss:$8 sps:$4 sm:$0xff]  }
 0x130   : > { %2377 = vmatprep.mubr.bf16.mxu0 %v16337_v38  ;;  %3212 = vmatpush1.bf16.msra.mxu0 %v15510_v32  ;;  %v15491_v42 = vld [vmem:[%s20644_s3 + $0xe0] ss:$8 sps:$4 sm:$0xff]   ;;  %v15497_v45 = vld [vmem:[%s20644_s3 + $0xd0] ss:$8 sps:$4 sm:$0xff]   ;;  %v15548_v51 = vld [vmem:[%s20644_s3 + $0x124] ss:$8 sps:$4 sm:$0xff]  }
 0x131   : > { %2275 = vmatmul.mubr.bf16.gmra.mxu1 %v16396_v34  ;;  %3213 = vmatprep.subr.bf16.mxu0 %v15531_v33  ;;  %v15540_v48 = vld [vmem:[%s20644_s3 + $0x130] ss:$8 sps:$4 sm:$0xff]   ;;  %v16429_v52 = vld [vmem:[#allocation2 + $0x154] ss:$12 sps:$4 sm:$0xff]   ;;  %v15503_v54 = vld [vmem:[%s20644_s3 + $0xc4] ss:$8 sps:$4 sm:$0xff]  }
 0x132   : > { %2284 = vmatprep.mubr.bf16.mxu1 %v16398_v35  ;;  %3031 = vmatpush2.bf16.msra.mxu1 %v15484_v30  ;;  %v16424_v49 = vld [vmem:[#allocation2 + $0x138] ss:$12 sps:$4 sm:$0xff]   ;;  %v15490_v50 = vld [vmem:[#allocation2 + $0x50] ss:$12 sps:$4 sm:$0xff]   ;;  %v15546_v55 = vld [vmem:[%s20644_s3 + $0x120] ss:$8 sps:$4 sm:$0xff]  }
 0x133   : > { %3032 = vmatprep.subr.bf16.mxu1 %v15493_v37  ;;  %v15553_v57 = vld [vmem:[%s20644_s3 + $0x114] ss:$8 sps:$4 sm:$0xff]   ;;  %v15501_v44 = vld [vmem:[%s20644_s3 + $0xc0] ss:$8 sps:$4 sm:$0xff]   ;;  %v15551_v59 = vld [vmem:[%s20644_s3 + $0x110] ss:$8 sps:$4 sm:$0xff]  }
 0x134   : > { %3214 = vmatpush1.bf16.msra.mxu0 %v15529_v40  ;;  %v15509_v56 = vld [vmem:[%s20644_s3 + $0xb4] ss:$8 sps:$4 sm:$0xff]   ;;  %v15562_v60 = vld [vmem:[%s20644_s3 + $0x104] ss:$8 sps:$4 sm:$0xff]   ;;  %v15507_v1 = vld [vmem:[%s20644_s3 + $0xb0] ss:$8 sps:$4 sm:$0xff]  }
 0x135   : > { %3215 = vmatprep.subr.bf16.mxu0 %v15542_v41  ;;  %v15500_v58 = vld [vmem:[#allocation2 + $0x68] ss:$12 sps:$4 sm:$0xff]   ;;  %v16455_v61 = vld [vmem:[#allocation2 + $0x150] ss:$12 sps:$4 sm:$0xff]   ;;  %v16457_v62 = vld [vmem:[#allocation2 + $0x16c] ss:$12 sps:$4 sm:$0xff]  }
 0x136   : > { %3033 = vmatpush2.bf16.msra.mxu1 %v15491_v42  ;;  %v15516_v2 = vld [vmem:[%s20644_s3 + $0xa4] ss:$8 sps:$4 sm:$0xff]   ;;  %v15560_v3 = vld [vmem:[%s20644_s3 + $0x100] ss:$8 sps:$4 sm:$0xff]   ;;  %v15579_v5 = vld [vmem:[%s20644_s3 + $0x474] ss:$8 sps:$4 sm:$0xff]  }
 0x137   : > { %2378 = vmatmul.mubr.bf16.gmra.mxu0 %v15490_v50  ;;  %3034 = vmatprep.subr.bf16.mxu1 %v15499_v43  ;;  %v15514_v6 = vld [vmem:[%s20644_s3 + $0xa0] ss:$8 sps:$4 sm:$0xff]   ;;  %v15522_v7 = vld [vmem:[%s20644_s3 + $0x94] ss:$8 sps:$4 sm:$0xff]   ;;  %v15517_v12 = vld [vmem:[#allocation2 + $0x184] ss:$12 sps:$4 sm:$0xff]  }
 0x138   : > { %2387 = vmatprep.mubr.bf16.mxu0 %v16337_v38  ;;  %3216 = vmatpush1.bf16.msra.mxu0 %v15540_v48  ;;  %v16480_v9 = vld [vmem:[#allocation2 + $0x168] ss:$12 sps:$4 sm:$0xff]   ;;  %v15513_v10 = vld [vmem:[#allocation2 + $0x80] ss:$12 sps:$4 sm:$0xff]   ;;  %v15520_v8 = vld [vmem:[%s20644_s3 + $0x90] ss:$8 sps:$4 sm:$0xff]  }
 0x139   : > { %2285 = vmatmul.mubr.bf16.gmra.mxu1 %v16424_v49  ;;  %3217 = vmatprep.subr.bf16.mxu0 %v15548_v51  ;;  %v15526_v13 = vld [vmem:[%s20644_s3 + $0x84] ss:$8 sps:$4 sm:$0xff]   ;;  %v15524_v14 = vld [vmem:[%s20644_s3 + $0x80] ss:$8 sps:$4 sm:$0xff]   ;;  %v15559_v17 = vld [vmem:[%s20644_s3 + $0x374] ss:$8 sps:$4 sm:$0xff]  }
 0x13a   : > { %2294 = vmatprep.mubr.bf16.mxu1 %v16429_v52  ;;  %3035 = vmatpush2.bf16.msra.mxu1 %v15497_v45  ;;  %v15523_v15 = vld [vmem:[#allocation2 + $0x98] ss:$12 sps:$4 sm:$0xff]   ;;  %v15519_v18 = vld [vmem:[#allocation2 + $0x180] ss:$12 sps:$4 sm:$0xff]   ;;  %v15532_v22 = vld [vmem:[#allocation2 + $0xb0] ss:$12 sps:$4 sm:$0xff]  }
 0x13b   : > { %3036 = vmatprep.subr.bf16.mxu1 %v15503_v54  ;;  %v15557_v23 = vld [vmem:[%s20644_s3 + $0x370] ss:$8 sps:$4 sm:$0xff]   ;;  %v15566_v26 = vld [vmem:[%s20644_s3 + $0x364] ss:$8 sps:$4 sm:$0xff]   ;;  %v15527_v27 = vld [vmem:[#allocation2 + $0x1c] ss:$12 sps:$4 sm:$0xff]  }
 0x13c   : > { %3218 = vmatpush1.bf16.msra.mxu0 %v15546_v55  ;;  %v15564_v28 = vld [vmem:[%s20644_s3 + $0x360] ss:$8 sps:$4 sm:$0xff]   ;;  %v15569_v29 = vld [vmem:[%s20644_s3 + $0x354] ss:$8 sps:$4 sm:$0xff]   ;;  %v15567_v32 = vld [vmem:[%s20644_s3 + $0x350] ss:$8 sps:$4 sm:$0xff]  }
 0x13d   : > { %3219 = vmatprep.subr.bf16.mxu0 %v15553_v57  ;;  %v15536_v30 = vld [vmem:[#allocation2 + $0xc8] ss:$12 sps:$4 sm:$0xff]   ;;  %v15533_v33 = vld [vmem:[#allocation2 + $0x18] ss:$12 sps:$4 sm:$0xff]   ;;  %v15543_v43 = vld [vmem:[#allocation2 + $0xe0] ss:$12 sps:$4 sm:$0xff]  }
 0x13e   : > { %3037 = vmatpush2.bf16.msra.mxu1 %v15501_v44  ;;  %v15573_v37 = vld [vmem:[%s20644_s3 + $0x344] ss:$8 sps:$4 sm:$0xff]   ;;  %v16520_v40 = vld [vmem:[#allocation2 + $0x34] ss:$12 sps:$4 sm:$0xff]   ;;  %v15574_v45 = vld [vmem:[%s20644_s3 + $0x330] ss:$8 sps:$4 sm:$0xff]  }
 0x13f   : > { %2388 = vmatmul.mubr.bf16.gmra.mxu0 %v15500_v58  ;;  %3038 = vmatprep.subr.bf16.mxu1 %v15509_v56  ;;  %v15571_v41 = vld [vmem:[%s20644_s3 + $0x340] ss:$8 sps:$4 sm:$0xff]   ;;  %v15576_v42 = vld [vmem:[%s20644_s3 + $0x334] ss:$8 sps:$4 sm:$0xff]   ;;  %v15583_v50 = vld [vmem:[%s20644_s3 + $0x324] ss:$8 sps:$4 sm:$0xff]  }
 0x140   : > { %2397 = vmatprep.mubr.bf16.mxu0 %v16337_v38  ;;  %3220 = vmatpush1.bf16.msra.mxu0 %v15551_v59  ;;  %v16533_v48 = vld [vmem:[#allocation2 + $0x30] ss:$12 sps:$4 sm:$0xff]   ;;  %v16538_v51 = vld [vmem:[#allocation2 + $0x4c] ss:$12 sps:$4 sm:$0xff]   ;;  %v15581_v54 = vld [vmem:[%s20644_s3 + $0x320] ss:$8 sps:$4 sm:$0xff]  }
 0x141   : > { %2295 = vmatmul.mubr.bf16.gmra.mxu1 %v16455_v61  ;;  %3221 = vmatprep.subr.bf16.mxu0 %v15562_v60  ;;  %v15586_v55 = vld [vmem:[%s20644_s3 + $0x314] ss:$8 sps:$4 sm:$0xff]   ;;  %v15545_v57 = vld [vmem:[#allocation2 + $0xf8] ss:$12 sps:$4 sm:$0xff]   ;;  %v15588_v60 = vld [vmem:[%s20644_s3 + $0x300] ss:$8 sps:$4 sm:$0xff]  }
 0x142   : > { %2304 = vmatprep.mubr.bf16.mxu1 %v16457_v62  ;;  %3039 = vmatpush2.bf16.msra.mxu1 %v15507_v1  ;;  %v15584_v44 = vld [vmem:[%s20644_s3 + $0x310] ss:$8 sps:$4 sm:$0xff]   ;;  %v16552_v56 = vld [vmem:[#allocation2 + $0x48] ss:$12 sps:$4 sm:$0xff]   ;;  %v15590_v58 = vld [vmem:[%s20644_s3 + $0x304] ss:$8 sps:$4 sm:$0xff]  }
 0x143   : > { %3040 = vmatprep.subr.bf16.mxu1 %v15516_v2  ;;  %v15850_v59 = vld [vmem:[#allocation2 + $0x64] ss:$12 sps:$4 sm:$0xff]   ;;  %v15593_v1 = vld [vmem:[%s20644_s3 + $0x3f4] ss:$8 sps:$4 sm:$0xff]  }
 0x144   : > { %3222 = vmatpush1.bf16.msra.mxu0 %v15560_v3  ;;  %v15549_v2 = vld [vmem:[#allocation2 + $0x110] ss:$12 sps:$4 sm:$0xff]  }
 0x145   : > { %4203 = vmatprep.subr.bf16.mxu0 %v15579_v5  ;;  %v15591_v3 = vld [vmem:[%s20644_s3 + $0x3f0] ss:$8 sps:$4 sm:$0xff]   ;;  %v15600_v5 = vld [vmem:[%s20644_s3 + $0x3e4] ss:$8 sps:$4 sm:$0xff]  }
 0x146   : > { %3041 = vmatpush2.bf16.msra.mxu1 %v15514_v6  ;;  %v15851_v6 = vld [vmem:[#allocation2 + $0x60] ss:$12 sps:$4 sm:$0xff]  }
 0x147   : > { %2398 = vmatmul.mubr.bf16.gmra.mxu0 %v15513_v10  ;;  %3042 = vmatprep.subr.bf16.mxu1 %v15522_v7  ;;  %v15852_v7 = vld [vmem:[#allocation2 + $0x7c] ss:$12 sps:$4 sm:$0xff]  }
 0x148   : > { %2407 = vmatprep.mubr.bf16.mxu0 %v16337_v38  ;;  %v15598_v10 = vld [vmem:[%s20644_s3 + $0x3e0] ss:$8 sps:$4 sm:$0xff]  }
 0x149   : > { %2305 = vmatmul.mubr.bf16.gmra.mxu1 %v16480_v9 }
 0x14a   : > { %2314 = vmatprep.mubr.bf16.mxu1 %v15517_v12  ;;  %3043 = vmatpush2.bf16.msra.mxu1 %v15520_v8  ;;  %v15603_v12 = vld [vmem:[%s20644_s3 + $0x3d4] ss:$8 sps:$4 sm:$0xff]  }
 0x14b   : > { %3044 = vmatprep.subr.bf16.mxu1 %v15526_v13  ;;  %v15550_v8 = vld [vmem:[#allocation2 + $0x128] ss:$12 sps:$4 sm:$0xff]   ;;  %v15601_v13 = vld [vmem:[%s20644_s3 + $0x3d0] ss:$8 sps:$4 sm:$0xff]  }
 0x14e   : > { %3045 = vmatpush2.bf16.msra.mxu1 %v15524_v14  ;;  %v15607_v14 = vld [vmem:[%s20644_s3 + $0x3c4] ss:$8 sps:$4 sm:$0xff]  }
 0x14f   : > { %2408 = vmatmul.mubr.bf16.gmra.mxu0 %v15523_v15  ;;  %4010 = vmatprep.subr.bf16.mxu1 %v15559_v17  ;;  %v15605_v15 = vld [vmem:[%s20644_s3 + $0x3c0] ss:$8 sps:$4 sm:$0xff]   ;;  %v15610_v17 = vld [vmem:[%s20644_s3 + $0x3b4] ss:$8 sps:$4 sm:$0xff]  }
 0x150   : > { %2417 = vmatprep.mubr.bf16.mxu0 %v16337_v38 }
 0x151   : > { %2315 = vmatmul.mubr.bf16.gmra.mxu1 %v15519_v18  ;;  %v15554_v18 = vld [vmem:[#allocation2 + $0x140] ss:$12 sps:$4 sm:$0xff]  }
 0x152   : > { %3046 = vmatprep.mubr.bf16.mxu1 %v12303_v20  ;;  %v15608_v20 = vld [vmem:[%s20644_s3 + $0x3b0] ss:$8 sps:$4 sm:$0xff]  }
 0x157   : > { %2418 = vmatmul.mubr.bf16.gmra.mxu0 %v15532_v22  ;;  %v15555_v22 = vld [vmem:[#allocation2 + $0x158] ss:$12 sps:$4 sm:$0xff]  }
 0x158   : > { %2427 = vmatprep.mubr.bf16.mxu0 %v16337_v38 }
 0x159   : > { %3047 = vmatmul.mubr.bf16.vlgmr.msra.gmra.mxu1 %v12302_v21  ;;  %v15620_v21 = vld [vmem:[%s20644_s3 + $0x394] ss:$8 sps:$4 sm:$0xff]  }
 0x15a   : > { %3056 = vmatprep.mubr.bf16.mxu1 %v15527_v27  ;;  %4011 = vmatpush1.bf16.msra.mxu1 %v15557_v23  ;;  %v15618_v23 = vld [vmem:[%s20644_s3 + $0x390] ss:$8 sps:$4 sm:$0xff]   ;;  %v15570_v27 = vld [vmem:[#allocation2 + $0x188] ss:$12 sps:$4 sm:$0xff]  }
 0x15b   : > { %4012 = vmatprep.subr.bf16.mxu1 %v15566_v26  ;;  %v15563_v26 = vld [vmem:[#allocation2 + $0x170] ss:$12 sps:$4 sm:$0xff]  }
 0x15e   : > { %4013 = vmatpush1.bf16.msra.mxu1 %v15564_v28  ;;  %v15596_v28 = vld [vmem:[%s20644_s3 + $0x464] ss:$8 sps:$4 sm:$0xff]  }
 0x15f   : > { %2428 = vmatmul.mubr.bf16.gmra.mxu0 %v15536_v30  ;;  %4014 = vmatprep.subr.bf16.mxu1 %v15569_v29  ;;  %v15627_v29 = vld [vmem:[%s20644_s3 + $0x444] ss:$8 sps:$4 sm:$0xff]  }
 0x160   : > { %2437 = vmatprep.mubr.bf16.mxu0 %v16337_v38 }
 0x161   : > { %3057 = vmatmul.mubr.bf16.gmra.mxu1 %v15533_v33 }
 0x162   : > { %3066 = vmatprep.mubr.bf16.mxu1 %v16520_v40  ;;  %4015 = vmatpush1.bf16.msra.mxu1 %v15567_v32  ;;  %v15638_v32 = vld [vmem:[%s20644_s3 + $0x434] ss:$8 sps:$4 sm:$0xff]  }
 0x163   : > { %4016 = vmatprep.subr.bf16.mxu1 %v15573_v37  ;;  %v15636_v37 = vld [vmem:[%s20644_s3 + $0x430] ss:$8 sps:$4 sm:$0xff]  }
 0x166   : > { %4017 = vmatpush1.bf16.msra.mxu1 %v15571_v41 }
 0x167   : > { %2438 = vmatmul.mubr.bf16.gmra.mxu0 %v15543_v43  ;;  %4018 = vmatprep.subr.bf16.mxu1 %v15576_v42  ;;  %v15597_v42 = vld [vmem:[#allocation2 + $0x38] ss:$12 sps:$4 sm:$0xff]  }
 0x168   : > { %2447 = vmatprep.mubr.bf16.mxu0 %v16337_v38 }
 0x169   : > { %3067 = vmatmul.mubr.bf16.gmra.mxu1 %v16533_v48 }
 0x16a   : > { %3076 = vmatprep.mubr.bf16.mxu1 %v16538_v51  ;;  %4019 = vmatpush1.bf16.msra.mxu1 %v15574_v45 }
 0x16b   : > { %4020 = vmatprep.subr.bf16.mxu1 %v15583_v50  ;;  %v15660_v50 = vld [vmem:[%s20644_s3 + $0x414] ss:$8 sps:$4 sm:$0xff]  }
 0x16e   : > { %4021 = vmatpush1.bf16.msra.mxu1 %v15581_v54 }
 0x16f   : > { %2448 = vmatmul.mubr.bf16.gmra.mxu0 %v15545_v57  ;;  %4022 = vmatprep.subr.bf16.mxu1 %v15586_v55  ;;  %v15658_v55 = vld [vmem:[%s20644_s3 + $0x410] ss:$8 sps:$4 sm:$0xff]  }
 0x170   : > { %2457 = vmatprep.mubr.bf16.mxu0 %v16337_v38 }
 0x171   : > { %3077 = vmatmul.mubr.bf16.gmra.mxu1 %v16552_v56 }
 0x172   : > { %3086 = vmatprep.mubr.bf16.mxu1 %v15850_v59  ;;  %4023 = vmatpush1.bf16.msra.mxu1 %v15584_v44  ;;  %v15604_v44 = vld [vmem:[#allocation2 + $0x50] ss:$12 sps:$4 sm:$0xff]  }
 0x173   : > { %4024 = vmatprep.subr.bf16.mxu1 %v15590_v58 }
 0x176   : > { %4025 = vmatpush1.bf16.msra.mxu1 %v15588_v60 }
 0x177   : > { %2458 = vmatmul.mubr.bf16.gmra.mxu0 %v15549_v2  ;;  %4026 = vmatprep.subr.bf16.mxu1 %v15593_v1  ;;  %v15614_v2 = vld [vmem:[#allocation2 + $0x68] ss:$12 sps:$4 sm:$0xff]  }
 0x178   : > { %2467 = vmatprep.mubr.bf16.mxu0 %v16337_v38 }
 0x179   : > { %3087 = vmatmul.mubr.bf16.gmra.mxu1 %v15851_v6  ;;  %v15621_v6 = vld [vmem:[#allocation2 + $0x80] ss:$12 sps:$4 sm:$0xff]  }
 0x17a   : > { %3096 = vmatprep.mubr.bf16.mxu1 %v15852_v7  ;;  %4027 = vmatpush2.bf16.msra.mxu1 %v15591_v3 }
 0x17b   : > { %4028 = vmatprep.subr.bf16.mxu1 %v15600_v5 }
 0x17e   : > { %4029 = vmatpush2.bf16.msra.mxu1 %v15598_v10 }
 0x17f   : > { %2468 = vmatmul.mubr.bf16.gmra.mxu0 %v15550_v8  ;;  %4030 = vmatprep.subr.bf16.mxu1 %v15603_v12 }
 0x180   : > { %2477 = vmatprep.mubr.bf16.mxu0 %v16337_v38 }
 0x181   : > { %3097 = vmatmul.mubr.bf16.gmra.mxu1 %v16237_v47  ;;  %v15617_v47 = vld [vmem:[%s20644_s3 + $0x3a4] ss:$8 sps:$4 sm:$0xff]  }
 0x182   : > { %3106 = vmatprep.mubr.bf16.mxu1 %v16244_v53  ;;  %4031 = vmatpush2.bf16.msra.mxu1 %v15601_v13  ;;  %v15615_v53 = vld [vmem:[%s20644_s3 + $0x3a0] ss:$8 sps:$4 sm:$0xff]  }
 0x183   : > { %4032 = vmatprep.subr.bf16.mxu1 %v15607_v14  ;;  %v15628_v14 = vld [vmem:[#allocation2 + $0x98] ss:$12 sps:$4 sm:$0xff]  }
 0x186   : > { %4033 = vmatpush2.bf16.msra.mxu1 %v15605_v15 }
 0x187   : > { %2478 = vmatmul.mubr.bf16.gmra.mxu0 %v15554_v18  ;;  %4034 = vmatprep.subr.bf16.mxu1 %v15610_v17 }
 0x188   : > { %2487 = vmatprep.mubr.bf16.mxu0 %v16337_v38 }
 0x189   : > { %3107 = vmatmul.mubr.bf16.gmra.mxu1 %v16278_v31  ;;  %v15624_v31 = vld [vmem:[%s20644_s3 + $0x384] ss:$8 sps:$4 sm:$0xff]  }
 0x18a   : > { %3116 = vmatprep.mubr.bf16.mxu1 %v16283_v36  ;;  %4035 = vmatpush2.bf16.msra.mxu1 %v15608_v20  ;;  %v15622_v36 = vld [vmem:[%s20644_s3 + $0x380] ss:$8 sps:$4 sm:$0xff]  }
 0x18b   : > { %4036 = vmatprep.subr.bf16.mxu1 %v15617_v47 }
 0x18e   : > { %4037 = vmatpush2.bf16.msra.mxu1 %v15615_v53 }
 0x18f   : > { %2488 = vmatmul.mubr.bf16.gmra.mxu0 %v15555_v22  ;;  %4038 = vmatprep.subr.bf16.mxu1 %v15620_v21  ;;  %v15631_v21 = vld [vmem:[#allocation2 + $0xb0] ss:$12 sps:$4 sm:$0xff]  }
 0x190   : > { %2497 = vmatprep.mubr.bf16.mxu0 %v16337_v38 }
 0x191   : > { %3117 = vmatmul.mubr.bf16.gmra.mxu1 %v16320_v16  ;;  %v15577_v16 = vld [vmem:[%s20644_s3 + $0x470] ss:$8 sps:$4 sm:$0xff]  }
 0x192   : > { %3126 = vmatprep.mubr.bf16.mxu1 %v16256_v0  ;;  %4039 = vmatpush2.bf16.msra.mxu1 %v15618_v23  ;;  %v15580_v0 = vld [vmem:[#allocation2 + $0x8] ss:$12 sps:$4 sm:$0xff]  }
 0x193   : > { %4040 = vmatprep.subr.bf16.mxu1 %v15624_v31  ;;  %v15629_v31 = vld [vmem:[#allocation2 + $0x64] ss:$12 sps:$4 sm:$0xff]  }
 0x196   : > { %4041 = vmatpush2.bf16.msra.mxu1 %v15622_v36 }
 0x197   : > { %2498 = vmatmul.mubr.bf16.gmra.mxu0 %v15563_v26 }
 0x198   : > { %2507 = vmatprep.mubr.bf16.mxu0 %v16337_v38 }
 0x199   : > { %3127 = vmatmul.mubr.bf16.gmra.mxu1 %v16254_v63  ;;  %v15594_v63 = vld [vmem:[%s20644_s3 + $0x460] ss:$8 sps:$4 sm:$0xff]  }
 0x19a   : > { %3136 = vmatprep.mubr.bf16.mxu1 %v16275_v25  ;;  %v15613_v25 = vld [vmem:[%s20644_s3 + $0x454] ss:$8 sps:$4 sm:$0xff]  }
 0x19f   : > { %2508 = vmatmul.mubr.bf16.gmra.mxu0 %v15570_v27 }
 0x1a0   : > { %3239 = vmatprep.mubr.bf16.mxu0 %v16337_v38 }
 0x1a1   : > { %3137 = vmatmul.mubr.bf16.gmra.mxu1 %v16288_v39  ;;  %v15611_v39 = vld [vmem:[%s20644_s3 + $0x450] ss:$8 sps:$4 sm:$0xff]  }
 0x1a2   : > { %3146 = vmatprep.mubr.bf16.mxu1 %v16292_v46  ;;  %v15587_v46 = vld [vmem:[#allocation2 + $0x20] ss:$12 sps:$4 sm:$0xff]  }
 0x1a7   : > { %3240 = vmatmul.mubr.bf16.vlgmr.msra.gmra.mxu0 %v15580_v0 }
 0x1a8   : > { %4204 = vmatpush1.bf16.msra.mxu0 %v15577_v16  ;;  %3249 = vmatprep.mubr.bf16.mxu0 %v16337_v38  ;;  %v15639_v16 = vld [vmem:[#allocation2 + $0xc8] ss:$12 sps:$4 sm:$0xff]  }
 0x1a9   : > { %3147 = vmatmul.mubr.bf16.gmra.mxu1 %v16325_v19  ;;  %4205 = vmatprep.subr.bf16.mxu0 %v15596_v28  ;;  %v15625_v19 = vld [vmem:[%s20644_s3 + $0x440] ss:$8 sps:$4 sm:$0xff]  }
 0x1aa   : > { %3156 = vmatprep.mubr.bf16.mxu1 %v16328_v24 }
 0x1ab   : > { %v16647_v30 = vpop.f32.mrf.mxu0 }
 0x1ac   : > { %4206 = vmatpush1.bf16.msra.mxu0 %v15594_v63  ;;  %v15632_v63 = vld [vmem:[#allocation2 + $0x60] ss:$12 sps:$4 sm:$0xff]  }
 0x1ad   : > { %4207 = vmatprep.subr.bf16.mxu0 %v15613_v25  ;;  %v16654_v24 = vpop.f32.mrf.mxu0 }
 0x1af   : > { %3250 = vmatmul.mubr.bf16.gmra.mxu0 %v15587_v46  ;;  %v16660_v33 = vpop.f32.mrf.mxu0 }
 0x1b0   : > { %3259 = vmatprep.mubr.bf16.mxu0 %v16337_v38  ;;  %4208 = vmatpush1.bf16.msra.mxu0 %v15611_v39  ;;  %v15635_v39 = vld [vmem:[#allocation2 + $0x7c] ss:$12 sps:$4 sm:$0xff]  }
 0x1b1   : > { %3157 = vmatmul.mubr.bf16.gmra.mxu1 %v16361_v4  ;;  %4209 = vmatprep.subr.bf16.mxu0 %v15627_v29  ;;  %v16665_v41 = vpop.f32.mrf.mxu0  ;;  %v15649_v4 = vld [vmem:[%s20644_s3 + $0x424] ss:$8 sps:$4 sm:$0xff]  }
 0x1b2   : > { %3166 = vmatprep.mubr.bf16.mxu1 %v16364_v11  ;;  %v15647_v11 = vld [vmem:[%s20644_s3 + $0x420] ss:$8 sps:$4 sm:$0xff]  }
 0x1b3   : > { %v16670_v43 = vpop.f32.mrf.mxu0 }
 0x1b4   : > { %4210 = vmatpush1.bf16.msra.mxu0 %v15625_v19 }
 0x1b5   : > { %4211 = vmatprep.subr.bf16.mxu0 %v15638_v32  ;;  %v16677_v45 = vpop.f32.mrf.mxu0 }
 0x1b7   : > { %3260 = vmatmul.mubr.bf16.gmra.mxu0 %v15597_v42  ;;  %v16683_v54 = vpop.f32.mrf.mxu0 }
 0x1b8   : > { %3269 = vmatprep.mubr.bf16.mxu0 %v16337_v38  ;;  %4212 = vmatpush1.bf16.msra.mxu0 %v15636_v37 }
 0x1b9   : > { %3167 = vmatmul.mubr.bf16.gmra.mxu1 %v16396_v34  ;;  %4213 = vmatprep.subr.bf16.mxu0 %v15649_v4  ;;  %v16688_v57 = vpop.f32.mrf.mxu0  ;;  %v15671_v34 = vld [vmem:[%s20644_s3 + $0x404] ss:$8 sps:$4 sm:$0xff]  }
 0x1ba   : > { %3176 = vmatprep.mubr.bf16.mxu1 %v16398_v35  ;;  %v15669_v35 = vld [vmem:[%s20644_s3 + $0x400] ss:$8 sps:$4 sm:$0xff]  }
 0x1bb   : > { %v16693_v58 = vpop.f32.mrf.mxu0 }
 0x1bc   : > { %4214 = vmatpush1.bf16.msra.mxu0 %v15647_v11  ;;  %v15643_v11 = vld [vmem:[#allocation2 + $0xe0] ss:$12 sps:$4 sm:$0xff]  }
 0x1bd   : > { %4215 = vmatprep.subr.bf16.mxu0 %v15660_v50  ;;  %v16700_v59 = vpop.f32.mrf.mxu0 }
 0x1bf   : > { %3270 = vmatmul.mubr.bf16.gmra.mxu0 %v15604_v44  ;;  %v16703_v60 = vpop.f32.mrf.mxu0 }
 0x1c0   : > { %3279 = vmatprep.mubr.bf16.mxu0 %v16337_v38  ;;  %4216 = vmatpush1.bf16.msra.mxu0 %v15658_v55  ;;  %v15633_v55 = vld [vmem:[#allocation2 + $0x78] ss:$12 sps:$4 sm:$0xff]  }
 0x1c1   : > { %3177 = vmatmul.mubr.bf16.gmra.mxu1 %v16424_v49  ;;  %4217 = vmatprep.subr.bf16.mxu0 %v15671_v34  ;;  %v16705_v1 = vpop.f32.mrf.mxu0 }
 0x1c2   : > { %3186 = vmatprep.mubr.bf16.mxu1 %v16429_v52 }
 0x1c4   : > { %4218 = vmatpush1.bf16.msra.mxu0 %v15669_v35 }
 0x1c5   : > { %v16707_v3 = vpop.f32.mrf.mxu0 }
 0x1c7   : > { %3280 = vmatmul.mubr.bf16.gmra.mxu0 %v15614_v2  ;;  %v16711_v5 = vpop.f32.mrf.mxu0 }
 0x1c8   : > { %3289 = vmatprep.mubr.bf16.mxu0 %v16337_v38 }
 0x1c9   : > { %3187 = vmatmul.mubr.bf16.gmra.mxu1 %v16455_v61  ;;  %v16714_v49 = vpop.f32.mrf.mxu0 }
 0x1ca   : > { %3196 = vmatprep.mubr.bf16.mxu1 %v16457_v62 }
 0x1cb   : > { %v16716_v52 = vpop.f32.mrf.mxu0 }
 0x1cd   : > { %v16718_v7 = vpop.f32.mrf.mxu0 }
 0x1cf   : > { %3290 = vmatmul.mubr.bf16.gmra.mxu0 %v15621_v6  ;;  %v16724_v12 = vpop.f32.mrf.mxu0 }
 0x1d0   : > { %3299 = vmatprep.mubr.bf16.mxu0 %v16337_v38  ;;  %v16721_v10 = vpop.f32.mrf.mxu1 }
 0x1d1   : > { %3197 = vmatmul.mubr.bf16.gmra.mxu1 %v16480_v9  ;;  %v16729_v62 = vpop.f32.mrf.mxu0 }
 0x1d2   : > { %4042 = vmatprep.mubr.bf16.mxu1 %v16520_v40  ;;  %v16727_v61 = vpop.f32.mrf.mxu1 }
 0x1d3   : > { %v16733_v13 = vpop.f32.mrf.mxu0 }
 0x1d4   : > { %v16731_v8 = vpop.f32.mrf.mxu1 }
 0x1d6   : > { %v16735_v15 = vpop.f32.mrf.mxu1  ;;  %v16737_v17 = vpop.f32.mrf.mxu0 }
 0x1d7   : > { %20807 = vst [vmem:[#allocation4_spill] sm:$0xff] %v16735_v15  ;;  %3300 = vmatmul.mubr.bf16.gmra.mxu0 %v15628_v14 }
 0x1d8   : > { %3309 = vmatprep.mubr.bf16.mxu0 %v16337_v38  ;;  %v16740_v9 = vpop.f32.mrf.mxu1  ;;  %v16743_v40 = vpop.f32.mrf.mxu0 }
 0x1d9   : > { %4043 = vmatmul.mubr.bf16.vlgmr.msra.gmra.mxu1 %v16533_v48 }
 0x1da   : > { %4052 = vmatprep.mubr.bf16.mxu1 %v16538_v51  ;;  %v16746_v18 = vpop.f32.mrf.mxu1  ;;  %v16748_v20 = vpop.f32.mrf.mxu0 }
 0x1dc   : > { %v16750_v47 = vpop.f32.mrf.mxu1  ;;  %v16752_v53 = vpop.f32.mrf.mxu0 }
 0x1de   : > { %v16754_v22 = vpop.f32.mrf.mxu1  ;;  %v16756_v23 = vpop.f32.mrf.mxu0 }
 0x1df   : > { %20808 = vst [vmem:[#allocation5_spill] sm:$0xff] %v16754_v22  ;;  %3310 = vmatmul.mubr.bf16.gmra.mxu0 %v15631_v21  ;;  %v15655_v22 = vld [vmem:[#allocation2 + $0xd8] ss:$12 sps:$4 sm:$0xff]  }
 0x1e0   : > { %3319 = vmatprep.mubr.bf16.mxu0 %v16337_v38  ;;  %v16759_v48 = vpop.f32.mrf.mxu1  ;;  %v16762_v51 = vpop.f32.mrf.mxu0 }
 0x1e1   : > { %4053 = vmatmul.mubr.bf16.gmra.mxu1 %v16552_v56 }
 0x1e2   : > { %4062 = vmatprep.mubr.bf16.mxu1 %v15629_v31  ;;  %v16764_v36 = vpop.f32.mrf.mxu1  ;;  %v16766_v26 = vpop.f32.mrf.mxu0 }
 0x1e4   : > { %v16768_v27 = vpop.f32.mrf.mxu1  ;;  %v16770_v0 = vpop.f32.mrf.mxu0 }
 0x1e6   : > { %v16772_v28 = vpop.f32.mrf.mxu1 }
 0x1e7   : > { %20809 = vst [vmem:[#allocation6_spill] sm:$0xff] %v16772_v28  ;;  %v2359_v25 = vpop.f32.mrf.mxu0  ;;  %3320 = vmatmul.mubr.bf16.gmra.mxu0 %v15639_v16  ;;  %v15650_v16 = vld [vmem:[#allocation2 + $0xf8] ss:$12 sps:$4 sm:$0xff]  }
 0x1e8   : > { %v16775_v56 = vadd.f32 %v2359_v25, %v16647_v30  ;;  %3329 = vmatprep.mubr.bf16.mxu0 %v16337_v38 }
 0x1e9   : > { %v16778_v46 = vpop.f32.mrf.mxu1  ;;  %4063 = vmatmul.mubr.bf16.gmra.mxu1 %v15632_v63  ;;  %v2361_v29 = vpop.f32.mrf.mxu0  ;;  %v15640_v63 = vld [vmem:[#allocation2 + $0x90] ss:$12 sps:$4 sm:$0xff]  }
 0x1ea   : > { %4072 = vmatprep.mubr.bf16.mxu1 %v15635_v39  ;;  %v16781_v19 = vadd.f32 %v2361_v29, %v16654_v24  ;;  %v15642_v24 = vld [vmem:[#allocation2 + $0x94] ss:$12 sps:$4 sm:$0xff]  }
 0x1eb   : > { %v16783_v32 = vpop.f32.mrf.mxu1  ;;  %v2363_v37 = vpop.f32.mrf.mxu0 }
 0x1ec   : > { %v16786_v42 = vadd.f32 %v2363_v37, %v16660_v33  ;;  %v16819_v37 = vld [vmem:[#allocation2] sm:$0xff] }
 0x1ed   : > { %v16788_v4 = vpop.f32.mrf.mxu1  ;;  %v2365_v30 = vpop.f32.mrf.mxu0 }
 0x1ee   : > { %v16791_v50 = vadd.f32 %v2365_v30, %v16665_v41 }
 0x1ef   : > { %v16793_v44 = vpop.f32.mrf.mxu1  ;;  %v2369_v34 = vpop.f32.mrf.mxu0  ;;  %3330 = vmatmul.mubr.bf16.gmra.mxu0 %v15643_v11 }
 0x1f0   : > { %20810 = vst [vmem:[#allocation7_spill] sm:$0xff] %v16793_v44  ;;  %v16796_v35 = vadd.f32 %v2369_v34, %v16670_v43  ;;  %3339 = vmatprep.mubr.bf16.mxu0 %v16337_v38  ;;  %v15657_v44 = vld [vmem:[#allocation2 + $0xdc] ss:$12 sps:$4 sm:$0xff]  }
 0x1f1   : > { %v16799_v33 = vpop.f32.mrf.mxu1  ;;  %4073 = vmatmul.mubr.bf16.gmra.mxu1 %v15633_v55  ;;  %v2371_v2 = vpop.f32.mrf.mxu0 }
 0x1f2   : > { %4082 = vmatprep.mubr.bf16.mxu1 %v15642_v24  ;;  %v16802_v6 = vadd.f32 %v2371_v2, %v16677_v45  ;;  %v15646_v45 = vld [vmem:[#allocation2 + $0xac] ss:$12 sps:$4 sm:$0xff]   ;;  %v15654_v2 = vld [vmem:[#allocation2 + $0x110] ss:$12 sps:$4 sm:$0xff]  }
 0x1f3   : > { %v16804_v41 = vpop.f32.mrf.mxu1  ;;  %v2373_v14 = vpop.f32.mrf.mxu0 }
 0x1f4   : > { %v16807_v21 = vadd.f32 %v2373_v14, %v16683_v54 }
 0x1f5   : > { %v16809_v31 = vpop.f32.mrf.mxu1  ;;  %v2375_v43 = vpop.f32.mrf.mxu0 }
 0x1f6   : > { %v16812_v38 = vadd.f32 %v2375_v43, %v16688_v57  ;;  %v15644_v43 = vld [vmem:[#allocation2 + $0xa8] ss:$12 sps:$4 sm:$0xff]  }
 0x1f7   : > { %v16814_v25 = vpop.f32.mrf.mxu1  ;;  %v2379_v39 = vpop.f32.mrf.mxu0  ;;  %3340 = vmatmul.mubr.bf16.gmra.mxu0 %v15650_v16 }
 0x1f8   : > { %20811 = vst [vmem:[#allocation8_spill] sm:$0xff] %v16814_v25  ;;  %v16817_v29 = vadd.f32 %v2379_v39, %v16693_v58  ;;  %3349 = vmatprep.mubr.bf16.mxu0 %v16819_v37 }
 0x1f9   : > { %v16822_v54 = vpop.f32.mrf.mxu1  ;;  %4083 = vmatmul.mubr.bf16.gmra.mxu1 %v15640_v63  ;;  %v2381_v30 = vpop.f32.mrf.mxu0 }
 0x1fa   : > { %4092 = vmatprep.mubr.bf16.mxu1 %v15646_v45  ;;  %v16825_v57 = vadd.f32 %v2381_v30, %v16700_v59  ;;  %v15653_v59 = vld [vmem:[#allocation2 + $0xc4] ss:$12 sps:$4 sm:$0xff]  }
 0x1fb   : > { %v16827_v11 = vpop.f32.mrf.mxu1  ;;  %v2383_v55 = vpop.f32.mrf.mxu0 }
 0x1fc   : > { %v16830_v34 = vadd.f32 %v2383_v55, %v16703_v60  ;;  %v15701_v55 = vld [vmem:[%s20646_s5 + $0x1b8] sm:$0xff]  }
 0x1fd   : > { %v16832_v58 = vpop.f32.mrf.mxu1  ;;  %v2385_v24 = vpop.f32.mrf.mxu0 }
 0x1fe   : > { %v16835_v14 = vadd.f32 %v2385_v24, %v16705_v1  ;;  %v15700_v1 = vld [vmem:[%s20646_s5 + $0x1f8] sm:$0xff]  }
 0x1ff   : > { %v16837_v16 = vpop.f32.mrf.mxu1  ;;  %v2389_v63 = vpop.f32.mrf.mxu0  ;;  %3350 = vmatmul.mubr.bf16.gmra.mxu0 %v15654_v2  ;;  %14236 = vmatprep.subr.bf16.mxu1 %v15700_v1 }
 0x200   : > { %20812 = vst [vmem:[#allocation9_spill] sm:$0xff] %v16837_v16  ;;  %v16840_v39 = vadd.f32 %v2389_v63, %v16707_v3  ;;  %3359 = vmatprep.mubr.bf16.mxu0 %v16819_v37  ;;  %14237 = vmatpush3.bf16.msra.mxu1 %v15701_v55 }
 0x201   : > { %v16843_v60 = vpop.f32.mrf.mxu1  ;;  %4093 = vmatmul.mubr.bf16.gmra.mxu1 %v15644_v43  ;;  %v2391_v45 = vpop.f32.mrf.mxu0 }
 0x202   : > { %20813 = vst [vmem:[#allocation10_spill] sm:$0xff] %v16843_v60  ;;  %4102 = vmatprep.mubr.bf16.mxu1 %v15653_v59  ;;  %v16846_v30 = vadd.f32 %v2391_v45, %v16711_v5  ;;  %v15661_v5 = vld [vmem:[#allocation2 + $0x128] ss:$12 sps:$4 sm:$0xff]   ;;  %v15651_v45 = vld [vmem:[#allocation2 + $0xc0] ss:$12 sps:$4 sm:$0xff]  }
 0x203   : > { %v16854_v3 = vpop.f32.mrf.mxu1  ;;  %v2393_v24 = vpop.f32.mrf.mxu0 }
 0x204   : > { %20814 = vst [vmem:[#allocation11_spill] sm:$0xff] %v16854_v3  ;;  %v16857_v2 = vadd.f32 %v2393_v24, %v16714_v49  ;;  %v15688_v3 = vld [vmem:[#allocation2 + $0x68] ss:$12 sps:$4 sm:$0xff]  }
 0x205   : > { %v16859_v43 = vpop.f32.mrf.mxu1  ;;  %v2395_v63 = vpop.f32.mrf.mxu0 }
 0x206   : > { %20815 = vst [vmem:[#allocation12_spill] sm:$0xff] %v16859_v43  ;;  %v16862_v59 = vadd.f32 %v2395_v63, %v16716_v52 }
 0x207   : > { %v16864_v16 = vpop.f32.mrf.mxu1  ;;  %v2399_v25 = vpop.f32.mrf.mxu0  ;;  %3360 = vmatmul.mubr.bf16.gmra.mxu0 %v15661_v5 }
 0x208   : > { %20816 = vst [vmem:[#allocation13_spill] sm:$0xff] %v16864_v16  ;;  %v16867_v28 = vadd.f32 %v2399_v25, %v16718_v7  ;;  %3369 = vmatprep.mubr.bf16.mxu0 %v16819_v37  ;;  %v15665_v25 = vld [vmem:[#allocation2 + $0x140] ss:$12 sps:$4 sm:$0xff]  }
 0x209   : > { %v16870_v49 = vpop.f32.mrf.mxu1  ;;  %4103 = vmatmul.mubr.bf16.gmra.mxu1 %v15651_v45  ;;  %v2401_v1 = vpop.f32.mrf.mxu0 }
 0x20a   : > { %20817 = vst [vmem:[#allocation14_spill] sm:$0xff] %v16870_v49  ;;  %4112 = vmatprep.mubr.bf16.mxu1 %v15657_v44  ;;  %v16873_v55 = vadd.f32 %v2401_v1, %v16724_v12  ;;  %v15664_v12 = vld [vmem:[#allocation2 + $0xf4] ss:$12 sps:$4 sm:$0xff]  }
 0x20b   : > { %v16875_v52 = vpop.f32.mrf.mxu1  ;;  %v2403_v24 = vpop.f32.mrf.mxu0 }
 0x20c   : > { %20818 = vst [vmem:[#allocation15_spill] sm:$0xff] %v16875_v52  ;;  %v16878_v63 = vadd.f32 %v2403_v24, %v16729_v62 }
 0x20d   : > { %v16880_v5 = vpop.f32.mrf.mxu1  ;;  %v2405_v7 = vpop.f32.mrf.mxu0 }
 0x20e   : > { %20819 = vst [vmem:[#allocation16_spill] sm:$0xff] %v16880_v5  ;;  %v16883_v16 = vadd.f32 %v2405_v7, %v16733_v13  ;;  %v15704_v13 = vld [vmem:[%s20646_s5 + $0x1f0] sm:$0xff]   ;;  %v15668_v5 = vld [vmem:[#allocation2 + $0x10c] ss:$12 sps:$4 sm:$0xff]  }
 0x20f   : > { %v16885_v45 = vpop.f32.mrf.mxu1  ;;  %v2409_v44 = vpop.f32.mrf.mxu0  ;;  %3370 = vmatmul.mubr.bf16.gmra.mxu0 %v15665_v25  ;;  %v15705_v7 = vld [vmem:[%s20646_s5 + $0x1b0] sm:$0xff]   ;;  %14238 = vmatprep.subr.bf16.mxu1 %v15704_v13 }
 0x210   : > { %20820 = vst [vmem:[#allocation17_spill] sm:$0xff] %v16883_v16  ;;  %20821 = vst [vmem:[#allocation18_spill] sm:$0xff] %v16885_v45  ;;  %v16888_v1 = vadd.f32 %v2409_v44, %v16737_v17  ;;  %3379 = vmatprep.mubr.bf16.mxu0 %v16819_v37  ;;  %14239 = vmatpush3.bf16.msra.mxu1 %v15705_v7  ;;  %v15662_v45 = vld [vmem:[#allocation2 + $0xf0] ss:$12 sps:$4 sm:$0xff]  }
 0x211   : > { %v16891_v62 = vpop.f32.mrf.mxu1  ;;  %4113 = vmatmul.mubr.bf16.gmra.mxu1 %v15655_v22  ;;  %v2411_v24 = vpop.f32.mrf.mxu0 }
 0x212   : > { %20822 = vst [vmem:[#allocation19_spill] sm:$0xff] %v16891_v62  ;;  %4122 = vmatprep.mubr.bf16.mxu1 %v15664_v12  ;;  %v16894_v15 = vadd.f32 %v2411_v24, %v16743_v40  ;;  %v15672_v40 = vld [vmem:[#allocation2 + $0x158] ss:$12 sps:$4 sm:$0xff]  }
 0x213   : > { %v16902_v17 = vpop.f32.mrf.mxu1  ;;  %v2413_v25 = vpop.f32.mrf.mxu0 }
 0x214   : > { %20823 = vst [vmem:[#allocation20_spill] sm:$0xff] %v16902_v17  ;;  %v16905_v44 = vadd.f32 %v2413_v25, %v16748_v20 }
 0x215   : > { %v16907_v22 = vpop.f32.mrf.mxu1  ;;  %v2415_v12 = vpop.f32.mrf.mxu0 }
 0x216   : > { %20824 = vst [vmem:[#allocation21_spill] sm:$0xff] %v16907_v22  ;;  %v16910_v24 = vadd.f32 %v2415_v12, %v16752_v53  ;;  %v15673_v22 = vld [vmem:[#allocation2 + $0x120] ss:$12 sps:$4 sm:$0xff]  }
 0x217   : > { %v16912_v16 = vpop.f32.mrf.mxu1  ;;  %v2419_v62 = vpop.f32.mrf.mxu0  ;;  %3380 = vmatmul.mubr.bf16.gmra.mxu0 %v15672_v40 }
 0x218   : > { %20825 = vst [vmem:[#allocation22_spill] sm:$0xff] %v16910_v24  ;;  %20826 = vst [vmem:[#allocation23_spill] sm:$0xff] %v16912_v16  ;;  %v16915_v17 = vadd.f32 %v2419_v62, %v16756_v23  ;;  %3389 = vmatprep.mubr.bf16.mxu0 %v16819_v37  ;;  %v15676_v24 = vld [vmem:[#allocation2 + $0x170] ss:$12 sps:$4 sm:$0xff]  }
 0x219   : > { %v3048_v20 = vpop.f32.mrf.mxu1  ;;  %4123 = vmatmul.mubr.bf16.gmra.mxu1 %v15662_v45  ;;  %v2421_v13 = vpop.f32.mrf.mxu0 }
 0x21a   : > { %v16919_v25 = vadd.f32 %v3048_v20, %v16775_v56  ;;  %4132 = vmatprep.mubr.bf16.mxu1 %v15668_v5  ;;  %v16922_v53 = vadd.f32 %v2421_v13, %v16762_v51  ;;  %v15666_v5 = vld [vmem:[#allocation2 + $0x108] ss:$12 sps:$4 sm:$0xff]   ;;  %v15675_v13 = vld [vmem:[#allocation2 + $0x124] ss:$12 sps:$4 sm:$0xff]  }
 0x21b   : > { %v3050_v7 = vpop.f32.mrf.mxu1  ;;  %v2423_v12 = vpop.f32.mrf.mxu0 }
 0x21c   : > { %v16925_v40 = vadd.f32 %v3050_v7, %v16781_v19  ;;  %v16928_v23 = vadd.f32 %v2423_v12, %v16766_v26 }
 0x21d   : > { %v3052_v62 = vpop.f32.mrf.mxu1  ;;  %v2425_v16 = vpop.f32.mrf.mxu0 }
 0x21e   : > { %v16931_v45 = vadd.f32 %v3052_v62, %v16786_v42  ;;  %v16934_v56 = vadd.f32 %v2425_v16, %v16770_v0  ;;  %v15708_v0 = vld [vmem:[%s20646_s5 + $0x1e8] sm:$0xff]  }
 0x21f   : > { %v3054_v51 = vpop.f32.mrf.mxu1  ;;  %v16936_v20 = vpop.f32.mrf.mxu0  ;;  %3390 = vmatmul.mubr.bf16.gmra.mxu0 %v15676_v24  ;;  %v15709_v42 = vld [vmem:[%s20646_s5 + $0x1a8] sm:$0xff]   ;;  %14240 = vmatprep.subr.bf16.mxu1 %v15708_v0 }
 0x220   : > { %20827 = vst [vmem:[#allocation24_spill] sm:$0xff] %v16934_v56  ;;  %v16939_v19 = vadd.f32 %v3054_v51, %v16791_v50  ;;  %4235 = vmatprep.mubr.bf16.mxu0 %v16819_v37  ;;  %14241 = vmatpush3.bf16.msra.mxu1 %v15709_v42  ;;  %v15680_v51 = vld [vmem:[#allocation2 + $0x38] ss:$12 sps:$4 sm:$0xff]  }
 0x221   : > { %v3058_v26 = vpop.f32.mrf.mxu1  ;;  %4133 = vmatmul.mubr.bf16.gmra.mxu1 %v15666_v5  ;;  %v16942_v7 = vpop.f32.mrf.mxu0 }
 0x222   : > { %v16951_v16 = vadd.f32 %v3058_v26, %v16796_v35  ;;  %4142 = vmatprep.mubr.bf16.mxu1 %v15675_v13  ;;  %v15679_v26 = vld [vmem:[#allocation2 + $0x13c] ss:$12 sps:$4 sm:$0xff]  }
 0x223   : > { %v3060_v50 = vpop.f32.mrf.mxu1  ;;  %v16953_v24 = vpop.f32.mrf.mxu0 }
 0x224   : > { %v16956_v12 = vadd.f32 %v3060_v50, %v16802_v6 }
 0x225   : > { %v3062_v62 = vpop.f32.mrf.mxu1  ;;  %v16958_v5 = vpop.f32.mrf.mxu0 }
 0x226   : > { %20828 = vst [vmem:[#allocation25_spill] sm:$0xff] %v16958_v5  ;;  %v16961_v56 = vadd.f32 %v3062_v62, %v16807_v21 }
 0x227   : > { %v3064_v52 = vpop.f32.mrf.mxu1  ;;  %v16963_v35 = vpop.f32.mrf.mxu0  ;;  %4236 = vmatmul.mubr.bf16.vlgmr.msra.gmra.mxu0 %v15680_v51 }
 0x228   : > { %v16966_v13 = vadd.f32 %v3064_v52, %v16812_v38  ;;  %4245 = vmatprep.mubr.bf16.mxu0 %v16819_v37  ;;  %v15684_v52 = vld [vmem:[#allocation2 + $0x50] ss:$12 sps:$4 sm:$0xff]  }
 0x229   : > { %v3068_v6 = vpop.f32.mrf.mxu1  ;;  %4143 = vmatmul.mubr.bf16.gmra.mxu1 %v15673_v22  ;;  %v16969_v0 = vpop.f32.mrf.mxu0  ;;  %v15677_v22 = vld [vmem:[#allocation2 + $0x138] ss:$12 sps:$4 sm:$0xff]  }
 0x22a   : > { %v16972_v42 = vadd.f32 %v3068_v6, %v16817_v29  ;;  %4152 = vmatprep.mubr.bf16.mxu1 %v15679_v26  ;;  %v15683_v26 = vld [vmem:[#allocation2 + $0x154] ss:$12 sps:$4 sm:$0xff]  }
 0x22b   : > { %v3070_v21 = vpop.f32.mrf.mxu1  ;;  %v16974_v50 = vpop.f32.mrf.mxu0 }
 0x22c   : > { %v16977_v62 = vadd.f32 %v3070_v21, %v16825_v57  ;;  %v15712_v21 = vld [vmem:[%s20646_s5 + $0x1a0] sm:$0xff]  }
 0x22d   : > { %v3072_v51 = vpop.f32.mrf.mxu1  ;;  %v16979_v38 = vpop.f32.mrf.mxu0 }
 0x22e   : > { %20829 = vst [vmem:[#allocation26_spill] sm:$0xff] %v16979_v38  ;;  %v16982_v5 = vadd.f32 %v3072_v51, %v16830_v34  ;;  %v15711_v34 = vld [vmem:[%s20646_s5 + $0x1e0] sm:$0xff]  }
 0x22f   : > { %v3074_v49 = vpop.f32.mrf.mxu1  ;;  %v16984_v43 = vpop.f32.mrf.mxu0  ;;  %4246 = vmatmul.mubr.bf16.gmra.mxu0 %v15684_v52  ;;  %14242 = vmatprep.subr.bf16.mxu1 %v15711_v34 }
 0x230   : > { %20830 = vst [vmem:[#allocation27_spill] sm:$0xff] %v16982_v5  ;;  %v16987_v29 = vadd.f32 %v3074_v49, %v16835_v14  ;;  %4255 = vmatprep.mubr.bf16.mxu0 %v16819_v37  ;;  %14243 = vmatpush3.bf16.msra.mxu1 %v15712_v21 }
 0x231   : > { %v3078_v57 = vpop.f32.mrf.mxu1  ;;  %4153 = vmatmul.mubr.bf16.gmra.mxu1 %v15677_v22  ;;  %v16990_v6 = vpop.f32.mrf.mxu0 }
 0x232   : > { %20831 = vst [vmem:[#allocation28_spill] sm:$0xff] %v16987_v29  ;;  %v16999_v51 = vadd.f32 %v3078_v57, %v16840_v39  ;;  %4162 = vmatprep.mubr.bf16.mxu1 %v15683_v26  ;;  %v15681_v29 = vld [vmem:[#allocation2 + $0x150] ss:$12 sps:$4 sm:$0xff]   ;;  %v15687_v57 = vld [vmem:[#allocation2 + $0x16c] ss:$12 sps:$4 sm:$0xff]  }
 0x233   : > { %v3080_v14 = vpop.f32.mrf.mxu1  ;;  %v17001_v49 = vpop.f32.mrf.mxu0 }
 0x234   : > { %v17004_v52 = vadd.f32 %v3080_v14, %v16846_v30 }
 0x235   : > { %v3082_v22 = vpop.f32.mrf.mxu1  ;;  %v17006_v38 = vpop.f32.mrf.mxu0 }
 0x236   : > { %20832 = vst [vmem:[#allocation29_spill] sm:$0xff] %v17006_v38  ;;  %v17009_v60 = vadd.f32 %v3082_v22, %v16857_v2 }
 0x237   : > { %v3084_v5 = vpop.f32.mrf.mxu1  ;;  %v17011_v39 = vpop.f32.mrf.mxu0  ;;  %4256 = vmatmul.mubr.bf16.gmra.mxu0 %v15688_v3 }
 0x238   : > { %20833 = vst [vmem:[#allocation30_spill] sm:$0xff] %v17009_v60  ;;  %v17014_v26 = vadd.f32 %v3084_v5, %v16862_v59  ;;  %4265 = vmatprep.mubr.bf16.mxu0 %v16819_v37  ;;  %v15692_v5 = vld [vmem:[#allocation2 + $0x80] ss:$12 sps:$4 sm:$0xff]  }
 0x239   : > { %v3088_v30 = vpop.f32.mrf.mxu1  ;;  %4163 = vmatmul.mubr.bf16.gmra.mxu1 %v15681_v29  ;;  %v17017_v34 = vpop.f32.mrf.mxu0  ;;  %v15685_v29 = vld [vmem:[#allocation2 + $0x168] ss:$12 sps:$4 sm:$0xff]  }
 0x23a   : > { %20834 = vst [vmem:[#allocation31_spill] sm:$0xff] %v17014_v26  ;;  %v17020_v21 = vadd.f32 %v3088_v30, %v16867_v28  ;;  %4172 = vmatprep.mubr.bf16.mxu1 %v15687_v57  ;;  %v15691_v28 = vld [vmem:[#allocation2 + $0x184] ss:$12 sps:$4 sm:$0xff]   ;;  %v15713_v30 = vld [vmem:[%s20646_s5 + $0x1d8] sm:$0xff]  }
 0x23b   : > { %v3090_v2 = vpop.f32.mrf.mxu1  ;;  %v17022_v14 = vpop.f32.mrf.mxu0  ;;  %14244 = vmatprep.subr.bf16.mxu1 %v15713_v30 }
 0x23c   : > { %20835 = vst [vmem:[#allocation32_spill] sm:$0xff] %v17020_v21  ;;  %v17025_v22 = vadd.f32 %v3090_v2, %v16873_v55 }
 0x23d   : > { %v3092_v3 = vpop.f32.mrf.mxu1  ;;  %v17027_v59 = vpop.f32.mrf.mxu0 }
 0x23e   : > { %20836 = vst [vmem:[#allocation33_spill] sm:$0xff] %v17025_v22  ;;  %20837 = vst [vmem:[#allocation34_spill] sm:$0xff] %v17027_v59  ;;  %v17030_v38 = vadd.f32 %v3092_v3, %v16878_v63  ;;  %v15714_v63 = vld [vmem:[%s20646_s5 + $0x198] sm:$0xff]  }
 0x23f   : > { %v17032_v26 = vpop.f32.mrf.mxu1  ;;  %v17034_v60 = vpop.f32.mrf.mxu0  ;;  %4266 = vmatmul.mubr.bf16.gmra.mxu0 %v15692_v5  ;;  %14245 = vmatpush3.bf16.msra.mxu1 %v15714_v63 }
 0x240   : > { %20838 = vst [vmem:[#allocation35_spill] sm:$0xff] %v17030_v38  ;;  %20839 = vst [vmem:[#allocation36_spill] sm:$0xff] %v17032_v26  ;;  %4275 = vmatprep.mubr.bf16.mxu0 %v16819_v37  ;;  %v15693_v38 = vld [vmem:[#allocation2 + $0x98] ss:$12 sps:$4 sm:$0xff]  }
 0x241   : > { %v3098_v57 = vpop.f32.mrf.mxu1  ;;  %4173 = vmatmul.mubr.bf16.gmra.mxu1 %v15685_v29  ;;  %v17037_v55 = vpop.f32.mrf.mxu0 }
 0x242   : > { %v17046_v2 = vadd.f32 %v3098_v57, %v16888_v1  ;;  %4182 = vmatprep.mubr.bf16.mxu1 %v15691_v28  ;;  %v12492_v1 = vcombine.high %v16819_v37, %v16819_v37  ;;  %v15689_v57 = vld [vmem:[#allocation2 + $0x180] ss:$12 sps:$4 sm:$0xff]  }
 0x243   : > { %v3100_v3 = vpop.f32.mrf.mxu1  ;;  %v17048_v5 = vpop.f32.mrf.mxu0 }
 0x244   : > { %20840 = vst [vmem:[#allocation37_spill] sm:$0xff] %v17046_v2  ;;  %v17051_v29 = vadd.f32 %v3100_v3, %v16894_v15 }
 0x245   : > { %v3102_v26 = vpop.f32.mrf.mxu1  ;;  %v17053_v59 = vpop.f32.mrf.mxu0 }
 0x246   : > { %20841 = vst [vmem:[#allocation38_spill] sm:$0xff] %v17051_v29  ;;  %20842 = vst [vmem:[#allocation39_spill] sm:$0xff] %v17053_v59  ;;  %v17056_v22 = vadd.f32 %v3102_v26, %v16905_v44 }
 0x247   : > { %v17060_v28 = vpop.f32.mrf.mxu1  ;;  %v17062_v2 = vpop.f32.mrf.mxu0  ;;  %4276 = vmatmul.mubr.bf16.gmra.mxu0 %v15693_v38  ;;  %v15694_v38 = vld [vmem:[#allocation2 + $0xb0] ss:$12 sps:$4 sm:$0xff]  }
 0x248   : > { %20843 = vst [vmem:[#allocation40_spill] sm:$0xff] %v17056_v22  ;;  %20844 = vst [vmem:[#allocation41_spill] sm:$0xff] %v17060_v28  ;;  %4285 = vmatprep.mubr.bf16.mxu0 %v16819_v37  ;;  %v12491_v22 = vcombine.low %v16819_v37, %v16819_v37 }
 0x249   : > { %v3108_v15 = vpop.f32.mrf.mxu1  ;;  %4183 = vmatmul.mubr.bf16.gmra.mxu1 %v15689_v57  ;;  %v17065_v30 = vpop.f32.mrf.mxu0 }
 0x24a   : > { %v17068_v63 = vadd.f32 %v3108_v15, %v16915_v17  ;;  %4192 = vmatprep.mubr.bf16.mxu1 %v12492_v1  ;;  %v2430_v1 = vadd.f32 %v16936_v20, %v16721_v10 }
 0x24b   : > { %v3110_v44 = vpop.f32.mrf.mxu1  ;;  %v17070_v26 = vpop.f32.mrf.mxu0 }
 0x24c   : > { %20845 = vst [vmem:[#allocation42_spill] sm:$0xff] %v17068_v63  ;;  %v17073_v3 = vadd.f32 %v3110_v44, %v16922_v53  ;;  %v15715_v44 = vld [vmem:[%s20646_s5 + $0x1d0] sm:$0xff]  }
 0x24d   : > { %v3112_v59 = vpop.f32.mrf.mxu1  ;;  %v17075_v28 = vpop.f32.mrf.mxu0  ;;  %14246 = vmatprep.subr.bf16.mxu1 %v15715_v44 }
 0x24e   : > { %20846 = vst [vmem:[#allocation43_spill] sm:$0xff] %v17073_v3  ;;  %20847 = vst [vmem:[#allocation44_spill] sm:$0xff] %v17075_v28  ;;  %v17080_v57 = vadd.f32 %v3112_v59, %v16928_v23  ;;  %v15716_v23 = vld [vmem:[%s20646_s5 + $0x190] sm:$0xff]   ;;  %v2432_v59 = vadd.f32 %v16942_v7, %v16727_v61  ;;  %v2440_v7 = vadd.f32 %v16963_v35, %v16740_v9  ;;  %v15696_v35 = vld [vmem:[#allocation2 + $0xe0] ss:$12 sps:$4 sm:$0xff]  }
 0x24f   : > { %v17082_v29 = vpop.f32.mrf.mxu1  ;;  %v17084_v17 = vpop.f32.mrf.mxu0  ;;  %4286 = vmatmul.mubr.bf16.gmra.mxu0 %v15694_v38  ;;  %14247 = vmatpush3.bf16.msra.mxu1 %v15716_v23  ;;  %v15695_v3 = vld [vmem:[#allocation2 + $0xc8] ss:$12 sps:$4 sm:$0xff]   ;;  %v2444_v23 = vadd.f32 %v16974_v50, %v16750_v47  ;;  %v15718_v47 = vld [vmem:[%s20646_s5 + $0x238] sm:$0xff]  }
 0x250   : > { %20848 = vst [vmem:[#allocation45_spill] sm:$0xff] %v17080_v57  ;;  %20849 = vst [vmem:[#allocation46_spill] sm:$0xff] %v17082_v29  ;;  %4295 = vmatprep.mubr.bf16.mxu0 %v16819_v37 }
 0x251   : > { %v3118_v53 = vpop.f32.mrf.mxu1  ;;  %v17089_v15 = vpop.f32.mrf.mxu0  ;;  %4193 = vmatmul.mubr.bf16.gmra.mxu1 %v12491_v22  ;;  %v2434_v22 = vadd.f32 %v16953_v24, %v16731_v8 }
 0x252   : > { %v17099_v38 = vadd.f32 %v3118_v53, %v2430_v1  ;;  %v2442_v1 = vadd.f32 %v16969_v0, %v16746_v18  ;;  %v15717_v18 = vld [vmem:[%s20646_s5 + $0x278] sm:$0xff]   ;;  %v2450_v0 = vadd.f32 %v16984_v43, %v16759_v48 }
 0x253   : > { %v3120_v10 = vpop.f32.mrf.mxu1  ;;  %v17101_v20 = vpop.f32.mrf.mxu0  ;;  %14348 = vmatprep.subr.bf16.mxu0 %v15717_v18  ;;  %v2454_v18 = vadd.f32 %v17001_v49, %v16768_v27  ;;  %v15724_v27 = vld [vmem:[%s20646_s5 + $0x228] sm:$0xff]   ;;  %v2460_v49 = vadd.f32 %v17011_v39, %v16778_v46  ;;  %v15725_v46 = vld [vmem:[%s20646_s5 + $0x260] sm:$0xff]   ;;  %v2464_v39 = vadd.f32 %v17022_v14, %v16788_v4  ;;  %v2470_v4 = vadd.f32 %v17034_v60, %v16799_v33  ;;  %v15728_v33 = vld [vmem:[%s20646_s5 + $0x218] sm:$0xff]  }
 0x254   : > { %v17105_v29 = vadd.f32 %v3120_v10, %v2432_v59  ;;  %14349 = vmatpush3.bf16.msra.mxu0 %v15718_v47  ;;  %v15697_v47 = vld [vmem:[#allocation2 + $0xf8] ss:$12 sps:$4 sm:$0xff]  }
 0x255   : > { %v3122_v28 = vpop.f32.mrf.mxu1  ;;  %v17107_v57 = vpop.f32.mrf.mxu0 }
 0x256   : > { %20850 = vst [vmem:[#allocation47_spill] sm:$0xff] %v17107_v57  ;;  %v17109_v63 = vadd.f32 %v3122_v28, %v2434_v22 }
 0x257   : > { %v17111_v21 = vpop.f32.mrf.mxu1  ;;  %v17113_v61 = vpop.f32.mrf.mxu0  ;;  %4296 = vmatmul.mubr.bf16.gmra.mxu0 %v15695_v3 }
 0x258   : > { %4305 = vmatprep.mubr.bf16.mxu0 %v16819_v37 }
 0x259   : > { %v3128_v8 = vpop.f32.mrf.mxu1  ;;  %v17118_v24 = vpop.f32.mrf.mxu0 }
 0x25a   : > { %v17122_v53 = vadd.f32 %v3128_v8, %v2440_v7  ;;  %v15719_v8 = vld [vmem:[%s20646_s5 + $0x1c8] sm:$0xff]  }
 0x25b   : > { %v3130_v28 = vpop.f32.mrf.mxu1  ;;  %v17124_v44 = vpop.f32.mrf.mxu0  ;;  %14248 = vmatprep.subr.bf16.mxu1 %v15719_v8 }
 0x25c   : > { %v17128_v3 = vadd.f32 %v3130_v28, %v2442_v1  ;;  %v15720_v1 = vld [vmem:[%s20646_s5 + $0x188] sm:$0xff]   ;;  %v2452_v28 = vadd.f32 %v16990_v6, %v16764_v36 }
 0x25d   : > { %v3132_v59 = vpop.f32.mrf.mxu1  ;;  %v17130_v9 = vpop.f32.mrf.mxu0  ;;  %14249 = vmatpush3.bf16.msra.mxu1 %v15720_v1 }
 0x25e   : > { %20851 = vst [vmem:[#allocation48_spill] sm:$0xff] %v17130_v9  ;;  %v17132_v10 = vadd.f32 %v3132_v59, %v2444_v23  ;;  %v15721_v59 = vld [vmem:[%s20646_s5 + $0x270] sm:$0xff]   ;;  %v15723_v9 = vld [vmem:[%s20646_s5 + $0x268] sm:$0xff]  }
 0x25f   : > { %v17134_v22 = vpop.f32.mrf.mxu1  ;;  %v17136_v57 = vpop.f32.mrf.mxu0  ;;  %4306 = vmatmul.mubr.bf16.gmra.mxu0 %v15696_v35  ;;  %v15722_v35 = vld [vmem:[%s20646_s5 + $0x230] sm:$0xff]   ;;  %14350 = vmatprep.subr.bf16.mxu0 %v15721_v59  ;;  %v2462_v59 = vadd.f32 %v17017_v34, %v16783_v32 }
 0x260   : > { %20852 = vst [vmem:[#allocation49_spill] sm:$0xff] %v17134_v22  ;;  %4315 = vmatprep.mubr.bf16.mxu0 %v16819_v37  ;;  %14351 = vmatpush3.bf16.msra.mxu0 %v15722_v35 }
 0x261   : > { %v3138_v50 = vpop.f32.mrf.mxu1  ;;  %v17147_v7 = vpop.f32.mrf.mxu0  ;;  %14352 = vmatprep.subr.bf16.mxu0 %v15723_v9 }
 0x262   : > { %v17157_v23 = vadd.f32 %v3138_v50, %v2450_v0 }
 0x263   : > { %v3140_v48 = vpop.f32.mrf.mxu1  ;;  %v17159_v43 = vpop.f32.mrf.mxu0 }
 0x264   : > { %v17169_v22 = vadd.f32 %v3140_v48, %v2452_v28  ;;  %14353 = vmatpush3.bf16.msra.mxu0 %v15724_v27 }
 0x265   : > { %v3142_v36 = vpop.f32.mrf.mxu1  ;;  %v17171_v6 = vpop.f32.mrf.mxu0  ;;  %14354 = vmatprep.subr.bf16.mxu0 %v15725_v46  ;;  %v15727_v46 = vld [vmem:[%s20646_s5 + $0x258] sm:$0xff]  }
 0x266   : > { %v17173_v0 = vadd.f32 %v3142_v36, %v2454_v18 }
 0x267   : > { %v17175_v50 = vpop.f32.mrf.mxu1  ;;  %v3241_v8 = vpop.f32.mrf.mxu0  ;;  %4316 = vmatmul.mubr.bf16.gmra.mxu0 %v15697_v47 }
 0x268   : > { %v17186_v1 = vadd.f32 %v3241_v8, %v16919_v25  ;;  %4325 = vmatprep.mubr.bf16.mxu0 %v16819_v37  ;;  %v15726_v25 = vld [vmem:[%s20646_s5 + $0x220] sm:$0xff]   ;;  %v15698_v8 = vld [vmem:[#allocation2 + $0x110] ss:$12 sps:$4 sm:$0xff]  }
 0x269   : > { %v3148_v28 = vpop.f32.mrf.mxu1  ;;  %v3243_v48 = vpop.f32.mrf.mxu0  ;;  %14355 = vmatpush3.bf16.msra.mxu0 %v15726_v25  ;;  %v2474_v25 = vadd.f32 %v17048_v5, %v16809_v31  ;;  %v15729_v31 = vld [vmem:[%s20646_s5 + $0x1c0] sm:$0xff]   ;;  %v15731_v5 = vld [vmem:[%s20646_s5 + $0x250] sm:$0xff]  }
 0x26a   : > { %v17191_v35 = vadd.f32 %v3148_v28, %v2460_v49  ;;  %v17194_v18 = vadd.f32 %v3243_v48, %v16925_v40  ;;  %14356 = vmatprep.subr.bf16.mxu0 %v15727_v46  ;;  %14250 = vmatprep.subr.bf16.mxu1 %v15729_v31 }
 0x26b   : > { %v3150_v36 = vpop.f32.mrf.mxu1  ;;  %v3245_v47 = vpop.f32.mrf.mxu0 }
 0x26c   : > { %v17204_v32 = vadd.f32 %v3150_v36, %v2462_v59  ;;  %v17207_v34 = vadd.f32 %v3245_v47, %v16931_v45  ;;  %v2472_v36 = vadd.f32 %v17037_v55, %v16804_v41 }
 0x26d   : > { %v3152_v40 = vpop.f32.mrf.mxu1  ;;  %v3247_v9 = vpop.f32.mrf.mxu0  ;;  %14357 = vmatpush3.bf16.msra.mxu0 %v15728_v33  ;;  %v2482_v33 = vadd.f32 %v17065_v30, %v16827_v11  ;;  %v2484_v11 = vadd.f32 %v17070_v26, %v16832_v58  ;;  %v20856_v58 = vld [vmem:[#allocation10_spill] sm:$0xff] }
 0x26e   : > { %v17209_v27 = vadd.f32 %v3152_v40, %v2464_v39  ;;  %v17212_v49 = vadd.f32 %v3247_v9, %v16939_v19  ;;  %v15699_v40 = vld [vmem:[#allocation2 + $0x128] ss:$12 sps:$4 sm:$0xff]   ;;  %14358 = vmatprep.subr.bf16.mxu0 %v15731_v5  ;;  %v2490_v26 = vadd.f32 %v17084_v17, %v20856_v58 }
 0x26f   : > { %v17214_v28 = vpop.f32.mrf.mxu1  ;;  %v3251_v48 = vpop.f32.mrf.mxu0  ;;  %4326 = vmatmul.mubr.bf16.gmra.mxu0 %v15698_v8 }
 0x270   : > { %v17219_v45 = vadd.f32 %v3251_v48, %v16951_v16  ;;  %4335 = vmatprep.mubr.bf16.mxu0 %v16819_v37 }
 0x271   : > { %v3158_v14 = vpop.f32.mrf.mxu1  ;;  %v3253_v59 = vpop.f32.mrf.mxu0 }
 0x272   : > { %v17224_v19 = vadd.f32 %v3158_v14, %v2470_v4  ;;  %v17227_v47 = vadd.f32 %v3253_v59, %v16956_v12  ;;  %v15732_v59 = vld [vmem:[%s20646_s5 + $0x210] sm:$0xff]  }
 0x273   : > { %v3160_v60 = vpop.f32.mrf.mxu1  ;;  %v3255_v16 = vpop.f32.mrf.mxu0  ;;  %14359 = vmatpush3.bf16.msra.mxu0 %v15732_v59 }
 0x274   : > { %v17237_v39 = vadd.f32 %v3160_v60, %v2472_v36  ;;  %v17240_v41 = vadd.f32 %v3255_v16, %v16961_v56  ;;  %v15730_v56 = vld [vmem:[%s20646_s5 + $0x180] sm:$0xff]  }
 0x275   : > { %v3162_v12 = vpop.f32.mrf.mxu1  ;;  %v3257_v55 = vpop.f32.mrf.mxu0  ;;  %14251 = vmatpush3.bf16.msra.mxu1 %v15730_v56  ;;  %v20854_v56 = vld [vmem:[#allocation28_spill] sm:$0xff] }
 0x276   : > { %v17242_v9 = vadd.f32 %v3162_v12, %v2474_v25  ;;  %v17245_v8 = vadd.f32 %v3257_v55, %v16966_v13  ;;  %v2480_v13 = vadd.f32 %v17062_v2, %v16822_v54  ;;  %v15734_v2 = vld [vmem:[%s20646_s5 + $0x208] sm:$0xff]  }
 0x277   : > { %v17247_v48 = vpop.f32.mrf.mxu1  ;;  %v3261_v4 = vpop.f32.mrf.mxu0  ;;  %4336 = vmatmul.mubr.bf16.gmra.mxu0 %v15699_v40  ;;  %v20853_v12 = vld [vmem:[#allocation27_spill] sm:$0xff] }
 0x278   : > { %v17261_v14 = vadd.f32 %v3261_v4, %v16972_v42  ;;  %4345 = vmatprep.mubr.bf16.mxu0 %v16819_v37  ;;  %v15733_v42 = vld [vmem:[%s20646_s5 + $0x248] sm:$0xff]  }
 0x279   : > { %v3168_v36 = vpop.f32.mrf.mxu1  ;;  %v3263_v46 = vpop.f32.mrf.mxu0  ;;  %14360 = vmatprep.subr.bf16.mxu0 %v15733_v42  ;;  %v15702_v4 = vld [vmem:[#allocation2 + $0x140] ss:$12 sps:$4 sm:$0xff]  }
 0x27a   : > { %v17269_v60 = vadd.f32 %v3168_v36, %v2480_v13  ;;  %v17272_v54 = vadd.f32 %v3263_v46, %v16977_v62  ;;  %14361 = vmatpush3.bf16.msra.mxu0 %v15734_v2  ;;  %v15735_v42 = vld [vmem:[%s20646_s5 + $0x240] sm:$0xff]  }
 0x27b   : > { %v3170_v16 = vpop.f32.mrf.mxu1  ;;  %v3265_v25 = vpop.f32.mrf.mxu0  ;;  %v15736_v2 = vld [vmem:[%s20646_s5 + $0x200] sm:$0xff]   ;;  %14362 = vmatprep.subr.bf16.mxu0 %v15735_v42 }
 0x27c   : > { %v17282_v30 = vadd.f32 %v3170_v16, %v2482_v33  ;;  %v17285_v62 = vadd.f32 %v3265_v25, %v20853_v12  ;;  %v20858_v16 = vld [vmem:[#allocation11_spill] sm:$0xff] }
 0x27d   : > { %v3172_v55 = vpop.f32.mrf.mxu1  ;;  %v3267_v40 = vpop.f32.mrf.mxu0  ;;  %v2492_v25 = vadd.f32 %v17089_v15, %v20858_v16  ;;  %v15703_v15 = vld [vmem:[#allocation2 + $0x158] ss:$12 sps:$4 sm:$0xff]  }
 0x27e   : > { %v17287_v31 = vadd.f32 %v3172_v55, %v2484_v11  ;;  %v17290_v5 = vadd.f32 %v3267_v40, %v20854_v56  ;;  %v20860_v55 = vld [vmem:[#allocation12_spill] sm:$0xff]  ;;  %v20861_v56 = vld [vmem:[#allocation30_spill] sm:$0xff]  ;;  %14363 = vmatpush3.bf16.msra.mxu0 %v15736_v2  ;;  %v15737_v2 = vld [vmem:[%s20646_s5 + $0x2f8] sm:$0xff]  }
 0x27f   : > { %v17292_v13 = vpop.f32.mrf.mxu1  ;;  %v3271_v59 = vpop.f32.mrf.mxu0  ;;  %4346 = vmatmul.mubr.bf16.gmra.mxu0 %v15702_v4  ;;  %v2494_v40 = vadd.f32 %v17101_v20, %v20860_v55  ;;  %v20865_v16 = vld [vmem:[#allocation14_spill] sm:$0xff]  ;;  %14460 = vmatprep.subr.bf16.mxu1 %v15737_v2  ;;  %v20875_v2 = vld [vmem:[#allocation19_spill] sm:$0xff] }
 0x280   : > { %20855 = vst [vmem:[#allocation27_spill] sm:$0xff] %v17290_v5  ;;  %v17297_v36 = vadd.f32 %v3271_v59, %v16999_v51  ;;  %4355 = vmatprep.mubr.bf16.mxu0 %v16819_v37  ;;  %v2500_v20 = vadd.f32 %v17113_v61, %v20865_v16  ;;  %v15707_v5 = vld [vmem:[#allocation2 + $0x188] ss:$12 sps:$4 sm:$0xff]  }
 0x281   : > { %v3178_v46 = vpop.f32.mrf.mxu1  ;;  %v3273_v33 = vpop.f32.mrf.mxu0 }
 0x282   : > { %20857 = vst [vmem:[#allocation28_spill] sm:$0xff] %v17297_v36  ;;  %v17308_v11 = vadd.f32 %v3178_v46, %v2490_v26  ;;  %v17311_v51 = vadd.f32 %v3273_v33, %v17004_v52  ;;  %v20863_v46 = vld [vmem:[#allocation31_spill] sm:$0xff] }
 0x283   : > { %v3180_v17 = vpop.f32.mrf.mxu1  ;;  %v3275_v12 = vpop.f32.mrf.mxu0 }
 0x284   : > { %20859 = vst [vmem:[#allocation10_spill] sm:$0xff] %v17311_v51  ;;  %v17315_v4 = vadd.f32 %v3180_v17, %v2492_v25  ;;  %v17318_v59 = vadd.f32 %v3275_v12, %v20861_v56  ;;  %v20866_v25 = vld [vmem:[#allocation32_spill] sm:$0xff] }
 0x285   : > { %v3182_v58 = vpop.f32.mrf.mxu1  ;;  %v3277_v36 = vpop.f32.mrf.mxu0 }
 0x286   : > { %20862 = vst [vmem:[#allocation11_spill] sm:$0xff] %v17318_v59  ;;  %v17320_v26 = vadd.f32 %v3182_v58, %v2494_v40  ;;  %v17323_v52 = vadd.f32 %v3277_v36, %v20863_v46  ;;  %v20868_v36 = vld [vmem:[#allocation15_spill] sm:$0xff]  ;;  %v20869_v58 = vld [vmem:[#allocation33_spill] sm:$0xff] }
 0x287   : > { %v17325_v33 = vpop.f32.mrf.mxu1  ;;  %v3281_v42 = vpop.f32.mrf.mxu0  ;;  %4356 = vmatmul.mubr.bf16.gmra.mxu0 %v15703_v15  ;;  %v2502_v40 = vadd.f32 %v17118_v24, %v20868_v36  ;;  %v15706_v24 = vld [vmem:[#allocation2 + $0x170] ss:$12 sps:$4 sm:$0xff]   ;;  %v2510_v36 = vadd.f32 %v17136_v57, %v20875_v2 }
 0x288   : > { %20864 = vst [vmem:[#allocation12_spill] sm:$0xff] %v17323_v52  ;;  %v17330_v17 = vadd.f32 %v3281_v42, %v20866_v25  ;;  %4365 = vmatprep.mubr.bf16.mxu0 %v16819_v37  ;;  %v20871_v42 = vld [vmem:[#allocation16_spill] sm:$0xff] }
 0x289   : > { %v3188_v12 = vpop.f32.mrf.mxu1  ;;  %v3283_v55 = vpop.f32.mrf.mxu0  ;;  %v2504_v16 = vadd.f32 %v17124_v44, %v20871_v42 }
 0x28a   : > { %20867 = vst [vmem:[#allocation30_spill] sm:$0xff] %v17330_v17  ;;  %v17338_v56 = vadd.f32 %v3188_v12, %v2500_v20  ;;  %v17341_v15 = vadd.f32 %v3283_v55, %v20869_v58  ;;  %v20872_v17 = vld [vmem:[#allocation35_spill] sm:$0xff]  ;;  %v20876_v58 = vld [vmem:[#allocation37_spill] sm:$0xff] }
 0x28b   : > { %v3190_v61 = vpop.f32.mrf.mxu1  ;;  %v3285_v46 = vpop.f32.mrf.mxu0 }
 0x28c   : > { %20870 = vst [vmem:[#allocation31_spill] sm:$0xff] %v17341_v15  ;;  %v17345_v25 = vadd.f32 %v3190_v61, %v2502_v40  ;;  %v17348_v52 = vadd.f32 %v3285_v46, %v20872_v17  ;;  %v20878_v61 = vld [vmem:[#allocation20_spill] sm:$0xff] }
 0x28d   : > { %v3192_v59 = vpop.f32.mrf.mxu1  ;;  %v17350_v51 = vpop.f32.mrf.mxu0  ;;  %v2512_v46 = vadd.f32 %v17147_v7, %v20878_v61 }
 0x28e   : > { %20873 = vst [vmem:[#allocation14_spill] sm:$0xff] %v17348_v52  ;;  %v17352_v20 = vadd.f32 %v3192_v59, %v2504_v16  ;;  %v20879_v59 = vld [vmem:[#allocation38_spill] sm:$0xff]  ;;  %v20881_v52 = vld [vmem:[#allocation21_spill] sm:$0xff] }
 0x28f   : > { %v17354_v12 = vpop.f32.mrf.mxu1  ;;  %v3291_v55 = vpop.f32.mrf.mxu0  ;;  %4366 = vmatmul.mubr.bf16.gmra.mxu0 %v15706_v24  ;;  %v2514_v57 = vadd.f32 %v17159_v43, %v20881_v52 }
 0x290   : > { %20874 = vst [vmem:[#allocation32_spill] sm:$0xff] %v17354_v12  ;;  %v17359_v44 = vadd.f32 %v3291_v55, %v20876_v58  ;;  %4375 = vmatprep.mubr.bf16.mxu0 %v16819_v37  ;;  %v20882_v55 = vld [vmem:[#allocation40_spill] sm:$0xff] }
 0x291   : > { %v3198_v17 = vpop.f32.mrf.mxu1  ;;  %v3293_v40 = vpop.f32.mrf.mxu0 }
 0x292   : > { %20877 = vst [vmem:[#allocation15_spill] sm:$0xff] %v17359_v44  ;;  %v17364_v42 = vadd.f32 %v3198_v17, %v2510_v36  ;;  %v17367_v16 = vadd.f32 %v3293_v40, %v20879_v59  ;;  %v20885_v40 = vld [vmem:[#allocation42_spill] sm:$0xff] }
 0x293   : > { %v3200_v12 = vpop.f32.mrf.mxu1  ;;  %v3295_v24 = vpop.f32.mrf.mxu0 }
 0x294   : > { %20880 = vst [vmem:[#allocation33_spill] sm:$0xff] %v17367_v16  ;;  %v17371_v2 = vadd.f32 %v3200_v12, %v2512_v46  ;;  %v17374_v58 = vadd.f32 %v3295_v24, %v20882_v55  ;;  %v20887_v12 = vld [vmem:[#allocation43_spill] sm:$0xff] }
 0x295   : > { %v3202_v44 = vpop.f32.mrf.mxu1  ;;  %v17376_v15 = vpop.f32.mrf.mxu0 }
 0x296   : > { %20883 = vst [vmem:[#allocation16_spill] sm:$0xff] %v17374_v58  ;;  %v17378_v7 = vadd.f32 %v3202_v44, %v2514_v57  ;;  %v15710_v44 = vld [vmem:[#allocation2 + $0x1a0] ss:$12 sps:$4 sm:$0xff]   ;;  %v20889_v57 = vld [vmem:[#allocation45_spill] sm:$0xff] }
 0x297   : > { %v17380_v36 = vpop.f32.mrf.mxu1  ;;  %v3301_v17 = vpop.f32.mrf.mxu0  ;;  %4376 = vmatmul.mubr.bf16.gmra.mxu0 %v15707_v5 }
 0x298   : > { %20884 = vst [vmem:[#allocation35_spill] sm:$0xff] %v17380_v36  ;;  %v17383_v61 = vadd.f32 %v3301_v17, %v20885_v40  ;;  %4385 = vmatprep.mubr.bf16.mxu0 %v16819_v37 }
 0x299   : > { %v17386_v43 = vpop.f32.mrf.mxu1  ;;  %v3303_v52 = vpop.f32.mrf.mxu0 }
 0x29a   : > { %20886 = vst [vmem:[#allocation19_spill] sm:$0xff] %v17383_v61  ;;  %v17389_v46 = vadd.f32 %v3303_v52, %v20887_v12 }
 0x29b   : > { %v17391_v59 = vpop.f32.mrf.mxu1  ;;  %v3305_v24 = vpop.f32.mrf.mxu0 }
 0x29c   : > { %20888 = vst [vmem:[#allocation37_spill] sm:$0xff] %v17389_v46  ;;  %v17394_v55 = vadd.f32 %v3305_v24, %v20889_v57 }
 0x29d   : > { %v17396_v36 = vpop.f32.mrf.mxu1  ;;  %v17398_v5 = vpop.f32.mrf.mxu0 }
 0x29e   : > { %20890 = vst [vmem:[#allocation20_spill] sm:$0xff] %v17394_v55  ;;  %20891 = vst [vmem:[#allocation38_spill] sm:$0xff] %v17398_v5 }
 0x29f   : > { %v17400_v17 = vpop.f32.mrf.mxu1  ;;  %v3311_v37 = vpop.f32.mrf.mxu0  ;;  %4386 = vmatmul.mubr.bf16.gmra.mxu0 %v15710_v44 }
 0x2a0   : > { %v17403_v40 = vadd.f32 %v3311_v37, %v17099_v38 }
 0x2a1   : > { %v17405_v52 = vpop.f32.mrf.mxu1  ;;  %v3313_v12 = vpop.f32.mrf.mxu0 }
 0x2a2   : > { %20892 = vst [vmem:[#allocation21_spill] sm:$0xff] %v17403_v40  ;;  %v17408_v46 = vadd.f32 %v3313_v12, %v17105_v29 }
 0x2a3   : > { %v17410_v61 = vpop.f32.mrf.mxu1  ;;  %v3315_v24 = vpop.f32.mrf.mxu0 }
 0x2a4   : > { %20893 = vst [vmem:[#allocation40_spill] sm:$0xff] %v17408_v46  ;;  %v17413_v57 = vadd.f32 %v3315_v24, %v17109_v63 }
 0x2a5   : > { %v17415_v55 = vpop.f32.mrf.mxu1  ;;  %v17417_v58 = vpop.f32.mrf.mxu0 }
 0x2a6   : > { %20894 = vst [vmem:[#allocation42_spill] sm:$0xff] %v17413_v57  ;;  %20895 = vst [vmem:[#allocation43_spill] sm:$0xff] %v17417_v58 }
 0x2a7   : > { %v17419_v44 = vpop.f32.mrf.mxu1  ;;  %v3321_v38 = vpop.f32.mrf.mxu0 }
 0x2a8   : > { %v17422_v37 = vadd.f32 %v3321_v38, %v17122_v53 }
 0x2a9   : > { %v17424_v40 = vpop.f32.mrf.mxu1  ;;  %v3323_v29 = vpop.f32.mrf.mxu0 }
 0x2aa   : > { %20896 = vst [vmem:[#allocation45_spill] sm:$0xff] %v17422_v37  ;;  %v17427_v12 = vadd.f32 %v3323_v29, %v17128_v3 }
 0x2ab   : > { %v17429_v46 = vpop.f32.mrf.mxu1  ;;  %v3325_v63 = vpop.f32.mrf.mxu0 }
 0x2ac   : > { %20897 = vst [vmem:[#allocation50_spill] sm:$0xff] %v17427_v12  ;;  %v17432_v24 = vadd.f32 %v3325_v63, %v17132_v10 }
 0x2ad   : > { %v17434_v57 = vpop.f32.mrf.mxu1  ;;  %v17436_v16 = vpop.f32.mrf.mxu0 }
 0x2ae   : > { %20898 = vst [vmem:[#allocation51_spill] sm:$0xff] %v17432_v24  ;;  %20899 = vst [vmem:[#allocation52_spill] sm:$0xff] %v17436_v16 }
 0x2af   : > { %v17438_v58 = vpop.f32.mrf.mxu1  ;;  %v3331_v53 = vpop.f32.mrf.mxu0 }
 0x2b0   : > { %v17441_v38 = vadd.f32 %v3331_v53, %v17157_v23 }
 0x2b1   : > { %v17443_v37 = vpop.f32.mrf.mxu1  ;;  %v3333_v3 = vpop.f32.mrf.mxu0 }
 0x2b2   : > { %20900 = vst [vmem:[#allocation53_spill] sm:$0xff] %v17441_v38  ;;  %v17446_v29 = vadd.f32 %v3333_v3, %v17169_v22 }
 0x2b3   : > { %v17448_v12 = vpop.f32.mrf.mxu1  ;;  %v3335_v10 = vpop.f32.mrf.mxu0 }
 0x2b4   : > { %20901 = vst [vmem:[#allocation54_spill] sm:$0xff] %v17446_v29  ;;  %v17451_v63 = vadd.f32 %v3335_v10, %v17173_v0 }
 0x2b5   : > { %v17453_v24 = vpop.f32.mrf.mxu1  ;;  %v17455_v16 = vpop.f32.mrf.mxu0 }
 0x2b6   : > { %20902 = vst [vmem:[#allocation55_spill] sm:$0xff] %v17451_v63  ;;  %20903 = vst [vmem:[#allocation56_spill] sm:$0xff] %v17455_v16 }
 0x2b7   : > { %v17457_v5 = vpop.f32.mrf.mxu1  ;;  %v3341_v23 = vpop.f32.mrf.mxu0 }
 0x2b8   : > { %20904 = vst [vmem:[#allocation57_spill] sm:$0xff] %v17457_v5  ;;  %v17460_v53 = vadd.f32 %v3341_v23, %v17191_v35 }
 0x2b9   : > { %v17462_v38 = vpop.f32.mrf.mxu1  ;;  %v3343_v22 = vpop.f32.mrf.mxu0 }
 0x2ba   : > { %20905 = vst [vmem:[#allocation58_spill] sm:$0xff] %v17460_v53  ;;  %v17465_v3 = vadd.f32 %v3343_v22, %v17204_v32 }
 0x2bb   : > { %v17467_v29 = vpop.f32.mrf.mxu1  ;;  %v3345_v0 = vpop.f32.mrf.mxu0 }
 0x2bc   : > { %20906 = vst [vmem:[#allocation59_spill] sm:$0xff] %v17465_v3  ;;  %v17470_v10 = vadd.f32 %v3345_v0, %v17209_v27 }
 0x2bd   : > { %v17472_v63 = vpop.f32.mrf.mxu1  ;;  %v17474_v16 = vpop.f32.mrf.mxu0 }
 0x2be   : > { %20907 = vst [vmem:[#allocation60_spill] sm:$0xff] %v17470_v10  ;;  %20908 = vst [vmem:[#allocation61_spill] sm:$0xff] %v17472_v63 }
 0x2bf   : > { %20909 = vst [vmem:[#allocation62_spill] sm:$0xff] %v17474_v16  ;;  %v17476_v5 = vpop.f32.mrf.mxu1  ;;  %v3351_v35 = vpop.f32.mrf.mxu0 }
 0x2c0   : > { %20910 = vst [vmem:[#allocation63_spill] sm:$0xff] %v17476_v5  ;;  %v17479_v23 = vadd.f32 %v3351_v35, %v17224_v19 }
 0x2c1   : > { %v17481_v53 = vpop.f32.mrf.mxu1  ;;  %v3353_v32 = vpop.f32.mrf.mxu0 }
 0x2c2   : > { %20911 = vst [vmem:[#allocation64_spill] sm:$0xff] %v17479_v23  ;;  %v17484_v22 = vadd.f32 %v3353_v32, %v17237_v39 }
 0x2c3   : > { %v17486_v3 = vpop.f32.mrf.mxu1  ;;  %v3355_v27 = vpop.f32.mrf.mxu0 }
 0x2c4   : > { %20912 = vst [vmem:[#allocation65_spill] sm:$0xff] %v17484_v22  ;;  %v17489_v0 = vadd.f32 %v3355_v27, %v17242_v9 }
 0x2c5   : > { %v17491_v10 = vpop.f32.mrf.mxu1  ;;  %v17493_v16 = vpop.f32.mrf.mxu0 }
 0x2c6   : > { %20913 = vst [vmem:[#allocation66_spill] sm:$0xff] %v17489_v0  ;;  %20914 = vst [vmem:[#allocation67_spill] sm:$0xff] %v17493_v16 }
 0x2c7   : > { %v3361_v5 = vpop.f32.mrf.mxu0  ;;  %v17495_v63 = vpop.f32.mrf.mxu1 }
 0x2c8   : > { %20915 = vst [vmem:[#allocation68_spill] sm:$0xff] %v17495_v63  ;;  %v17498_v19 = vadd.f32 %v3361_v5, %v17269_v60 }
 0x2c9   : > { %v3363_v35 = vpop.f32.mrf.mxu0  ;;  %v17503_v22 = vpop.f32.mrf.mxu1 }
 0x2ca   : > { %20916 = vst [vmem:[#allocation69_spill] sm:$0xff] %v17498_v19  ;;  %v17501_v39 = vadd.f32 %v3363_v35, %v17282_v30  ;;  %20918 = vst [vmem:[#allocation71_spill] sm:$0xff] %v17503_v22  ;;  %v20958_v22 = vld [vmem:[#allocation24_spill] sm:$0xff] }
 0x2cb   : > { %v3365_v32 = vpop.f32.mrf.mxu0  ;;  %v17510_v23 = vpop.f32.mrf.mxu1 }
 0x2cc   : > { %20917 = vst [vmem:[#allocation70_spill] sm:$0xff] %v17501_v39  ;;  %v17506_v9 = vadd.f32 %v3365_v32, %v17287_v31  ;;  %20921 = vst [vmem:[#allocation74_spill] sm:$0xff] %v17510_v23  ;;  %v20956_v23 = vld [vmem:[#allocation9_spill] sm:$0xff] }
 0x2cd   : > { %v17508_v27 = vpop.f32.mrf.mxu0  ;;  %v17518_v35 = vpop.f32.mrf.mxu1 }
 0x2ce   : > { %20919 = vst [vmem:[#allocation72_spill] sm:$0xff] %v17506_v9  ;;  %20920 = vst [vmem:[#allocation73_spill] sm:$0xff] %v17508_v27  ;;  %v20943_v27 = vld [vmem:[#allocation5_spill] sm:$0xff] }
 0x2cf   : > { %v3371_v0 = vpop.f32.mrf.mxu0  ;;  %20924 = vst [vmem:[#allocation77_spill] sm:$0xff] %v17518_v35  ;;  %v17525_v9 = vpop.f32.mrf.mxu1 }
 0x2d0   : > { %v17513_v16 = vadd.f32 %v3371_v0, %v17308_v11  ;;  %20927 = vst [vmem:[#allocation80_spill] sm:$0xff] %v17525_v9 }
 0x2d1   : > { %v3373_v60 = vpop.f32.mrf.mxu0 }
 0x2d2   : > { %20922 = vst [vmem:[#allocation75_spill] sm:$0xff] %v17513_v16  ;;  %v17516_v5 = vadd.f32 %v3373_v60, %v17315_v4  ;;  %v17533_v60 = vpop.f32.mrf.mxu1 }
 0x2d3   : > { %v3375_v30 = vpop.f32.mrf.mxu0  ;;  %20930 = vst [vmem:[#allocation83_spill] sm:$0xff] %v17533_v60  ;;  %v20946_v60 = vld [vmem:[#allocation29_spill] sm:$0xff] }
 0x2d4   : > { %20923 = vst [vmem:[#allocation76_spill] sm:$0xff] %v17516_v5  ;;  %v17521_v39 = vadd.f32 %v3375_v30, %v17320_v26  ;;  %v4462_v26 = vlaneseq  ;;  %v17540_v16 = vpop.f32.mrf.mxu1 }
 0x2d5   : > { %v17523_v31 = vpop.f32.mrf.mxu0  ;;  %20933 = vst [vmem:[#allocation86_spill] sm:$0xff] %v17540_v16  ;;  %v20945_v16 = vld [vmem:[#allocation6_spill] sm:$0xff] }
 0x2d6   : > { %20925 = vst [vmem:[#allocation78_spill] sm:$0xff] %v17521_v39  ;;  %20926 = vst [vmem:[#allocation79_spill] sm:$0xff] %v17523_v31 }
 0x2d7   : > { %v3381_v32 = vpop.f32.mrf.mxu0 }
 0x2d8   : > { %v17528_v19 = vadd.f32 %v3381_v32, %v17338_v56  ;;  %v17545_v56 = vshrl.u32 %v4462_v26, 7 }
 0x2d9   : > { %v3383_v11 = vpop.f32.mrf.mxu0 }
 0x2da   : > { %20928 = vst [vmem:[#allocation81_spill] sm:$0xff] %v17528_v19  ;;  %v17531_v0 = vadd.f32 %v3383_v11, %v17345_v25  ;;  %20935 = vst [vmem:[#allocation88_spill] sm:$0xff] %v17545_v56  ;;  %v20942_v19 = vld [vmem:[#allocation25_spill] sm:$0xff] }
 0x2db   : > { %v3385_v4 = vpop.f32.mrf.mxu0 }
 0x2dc   : > { %20929 = vst [vmem:[#allocation82_spill] sm:$0xff] %v17531_v0  ;;  %v17536_v5 = vadd.f32 %v3385_v4, %v17352_v20  ;;  %v15749_v20 = vld [vmem:[%s20646_s5 + $0x78] sm:$0xff]   ;;  %v17553_v4 = vpop.f32.mrf.mxu1  ;;  %v4464_v0 = vsub.s32 0, %v17545_v56 }
 0x2dd   : > { %v17538_v30 = vpop.f32.mrf.mxu0  ;;  %20937 = vst [vmem:[#allocation90_spill] sm:$0xff] %v17553_v4  ;;  %14572 = vmatprep.subr.bf16.mxu0 %v15749_v20  ;;  %v20944_v4 = vld [vmem:[#allocation26_spill] sm:$0xff] }
 0x2de   : > { %20931 = vst [vmem:[#allocation84_spill] sm:$0xff] %v17536_v5  ;;  %20932 = vst [vmem:[#allocation85_spill] sm:$0xff] %v17538_v30 }
 0x2df   : > { %v3391_v39 = vpop.f32.mrf.mxu0 }
 0x2e0   : > { %v17543_v31 = vadd.f32 %v3391_v39, %v17364_v42  ;;  %v4468_v39 = vsub.s32 1, %v17545_v56  ;;  %v2446_v56 = vadd.f32 %v20944_v4, %v20943_v27  ;;  %v20953_v27 = vld [vmem:[#allocation41_spill] sm:$0xff] }
 0x2e1   : > { %v3393_v32 = vpop.f32.mrf.mxu0 }
 0x2e2   : > { %20934 = vst [vmem:[#allocation87_spill] sm:$0xff] %v17543_v31  ;;  %v17548_v25 = vadd.f32 %v3393_v32, %v17371_v2  ;;  %v4460_v2 = vld [vmem:[%s20645_s4] sm:$0x3]  ;;  %v17565_v32 = vpop.f32.mrf.mxu1 }
 0x2e3   : > { %v3395_v11 = vpop.f32.mrf.mxu0  ;;  %20940 = vst [vmem:[#allocation93_spill] sm:$0xff] %v17565_v32  ;;  %v17568_v31 = vrot.slane %v4460_v2, %v4464_v0  ;;  %v2456_v32 = vadd.f32 %v20946_v60, %v20945_v16  ;;  %v20948_v0 = vld [vmem:[#allocation34_spill] sm:$0xff]  ;;  %v20954_v16 = vld [vmem:[#allocation8_spill] sm:$0xff]  ;;  %v20955_v60 = vld [vmem:[#allocation39_spill] sm:$0xff] }
 0x2e4   : > { %20936 = vst [vmem:[#allocation89_spill] sm:$0xff] %v17548_v25  ;;  %v17556_v5 = vadd.f32 %v3395_v11, %v17378_v7  ;;  %v17582_v35 = vpop.f32.mrf.mxu1 }
 0x2e5   : > { %v17559_v42 = vpop.f32.mrf.mxu0 }
 0x2e6   : > { %20938 = vst [vmem:[#allocation91_spill] sm:$0xff] %v17556_v5  ;;  %20939 = vst [vmem:[#allocation92_spill] sm:$0xff] %v17559_v42  ;;  %v17572_v5 = vrot.slane %v4460_v2, %v4468_v39  ;;  %v20941_v42 = vld [vmem:[#allocation4_spill] sm:$0xff]  ;;  %v20950_v2 = vld [vmem:[#allocation17_spill] sm:$0xff] }
 0x2e7   : > { %v4237_v26 = vpop.f32.mrf.mxu0  ;;  %v2436_v30 = vadd.f32 %v20942_v19, %v20941_v42  ;;  %20949 = vst [vmem:[#allocation4_spill] sm:$0xff] %v17582_v35  ;;  %v20951_v19 = vld [vmem:[#allocation36_spill] sm:$0xff]  ;;  %v20952_v39 = vld [vmem:[#allocation22_spill] sm:$0xff] }
 0x2e8   : > { %v4238_v25 = vadd.f32 %v4237_v26, %v17386_v43  ;;  %v20947_v43 = vld [vmem:[#allocation7_spill] sm:$0xff]  ;;  %v3095_v42 = vadd.f32 %v20951_v19, %v20950_v2  ;;  %v17591_v4 = vadd.f32 %v20953_v27, %v20952_v39  ;;  %v20960_v2 = vld [vmem:[#allocation13_spill] sm:$0xff]  ;;  %v20962_v27 = vld [vmem:[#allocation18_spill] sm:$0xff] }
 0x2e9   : > { %v4239_v7 = vpop.f32.mrf.mxu0  ;;  %v2466_v26 = vadd.f32 %v20948_v0, %v20947_v43  ;;  %v20957_v43 = vld [vmem:[#allocation44_spill] sm:$0xff]  ;;  %v20961_v19 = vld [vmem:[#allocation47_spill] sm:$0xff] }
 0x2ea   : > { %v4396_v11 = vadd.f32 %v4238_v25, %v17186_v1  ;;  %v4240_v20 = vadd.f32 %v4239_v7, %v17391_v59  ;;  %v2476_v7 = vadd.f32 %v20955_v60, %v20954_v16  ;;  %v2486_v0 = vadd.f32 %v20957_v43, %v20956_v23  ;;  %v20963_v16 = vld [vmem:[#allocation48_spill] sm:$0xff] }
 0x2eb   : > { %v4241_v9 = vpop.f32.mrf.mxu0  ;;  %v2496_v39 = vadd.f32 %v20961_v19, %v20960_v2  ;;  %v17611_v23 = vadd.f32 %v20963_v16, %v20962_v27 }
 0x2ec   : > { %v4472_v1 = vadd.f32 %v17568_v31, %v4396_v11  ;;  %v4397_v59 = vadd.f32 %v4240_v20, %v17194_v18  ;;  %v4242_v25 = vadd.f32 %v4241_v9, %v17396_v36  ;;  %v20959_v11 = vld [vmem:[#allocation46_spill] sm:$0xff]  ;;  %v17605_v20 = vadd.f32 %v17111_v21, %v2436_v30  ;;  %v17623_v21 = vpop.f32.mrf.mxu1 }
 0x2ed   : > { %v4243_v35 = vpop.f32.mrf.mxu0  ;;  %v17599_v63 = vadd.f32 %v20959_v11, %v20958_v22  ;;  %v20964_v22 = vld [vmem:[#allocation49_spill] sm:$0xff]  ;;  %v17627_v30 = vadd.f32 %v17214_v28, %v2466_v26 }
 0x2ee   : > { %v4473_v18 = vadd.f32 %v17572_v5, %v4397_v59  ;;  %v4398_v36 = vadd.f32 %v4242_v25, %v17207_v34  ;;  %v4244_v9 = vadd.f32 %v4243_v35, %v17400_v17  ;;  %v4536_v60 = vmax.f32 %v4472_v1, 0.0  ;;  %v20965_v34 = vld [vmem:[#allocation23_spill] sm:$0xff] }
 0x2ef   : > { %v4247_v43 = vpop.f32.mrf.mxu0  ;;  %v17614_v11 = vadd.f32 %v20964_v22, %v2446_v56  ;;  %v17617_v59 = vadd.f32 %v17175_v50, %v2456_v32  ;;  %v17621_v17 = vadd.f32 %v17171_v6, %v20965_v34  ;;  %v17630_v1 = vadd.f32 %v17247_v48, %v2476_v7  ;;  %v17642_v7 = vpop.f32.mrf.mxu1 }
 0x2f0   : > { %v4474_v35 = vadd.f32 %v17568_v31, %v4398_v36  ;;  %v4399_v56 = vadd.f32 %v4244_v9, %v17212_v49  ;;  %v4248_v25 = vadd.f32 %v4247_v43, %v17405_v52  ;;  %v17635_v32 = vadd.f32 %v17292_v13, %v2486_v0 }
 0x2f1   : > { %v4249_v50 = vpop.f32.mrf.mxu0  ;;  %v17637_v6 = vmax.f32 %v4473_v18, 0.0  ;;  %v4664_v36 = vrot.slane %v4536_v60, 7  ;;  %v4856_v27 = vrot.slane %v4536_v60, 1 }
 0x2f2   : > { %v4538_v2 = vmax.f32 %v4474_v35, 0.0  ;;  %v4250_v19 = vadd.f32 %v4249_v50, %v17410_v61  ;;  %v4475_v28 = vadd.f32 %v17572_v5, %v4399_v56  ;;  %v4400_v48 = vadd.f32 %v4248_v25, %v17219_v45 }
 0x2f3   : > { %v4251_v26 = vpop.f32.mrf.mxu0  ;;  %v4665_v34 = vrot.slane %v17637_v6, 7  ;;  %v17667_v50 = vadd.f32 %v17325_v33, %v2496_v39 }
 0x2f4   : > { %v4666_v49 = vrot.slane %v4538_v2, 7  ;;  %v4857_v52 = vrot.slane %v4538_v2, 1  ;;  %v17644_v9 = vpack.c.bf16 %v4538_v2, %v4536_v60  ;;  %v4401_v13 = vadd.f32 %v4250_v19, %v17227_v47 }
 0x2f5   : > { %v17647_v0 = vmax.f32 %v4475_v28, 0.0  ;;  %v4476_v18 = vadd.f32 %v17568_v31, %v4400_v48  ;;  %v4252_v61 = vadd.f32 %v4251_v26, %v17415_v55  ;;  %v4253_v16 = vpop.f32.mrf.mxu0 }
 0x2f6   : > { %20966 = vst [vmem:[#allocation25_spill] sm:$0xff] %v17644_v9  ;;  %v4667_v43 = vsel %vm736_vm3, %v4664_v36, %v4666_v49  ;;  %v4858_v45 = vsel %vm833_vm2, %v4856_v27, %v4857_v52  ;;  %v4254_v22 = vadd.f32 %v4253_v16, %v17419_v44  ;;  %v4477_v56 = vadd.f32 %v17572_v5, %v4401_v13  ;;  %v17669_v44 = vpop.f32.mrf.mxu1  ;;  %v15753_v49 = vld [vmem:[%s20646_s5 + $0x70] sm:$0xff]  }
 0x2f7   : > { %v17655_v35 = vpack.c.bf16 %v4667_v43, %v4664_v36  ;;  %v17657_v60 = vpack.c.bf16 %v4857_v52, %v4858_v45  ;;  %v4668_v47 = vrot.slane %v17647_v0, 7  ;;  %v4257_v25 = vpop.f32.mrf.mxu0  ;;  %v4402_v2 = vadd.f32 %v4252_v61, %v17240_v41  ;;  %v15750_v41 = vld [vmem:[%s20646_s5 + $0x38] sm:$0xff]  }
 0x2f8   : > { %v4403_v19 = vadd.f32 %v4254_v22, %v17245_v8  ;;  %v4258_v36 = vadd.f32 %v4257_v25, %v17424_v40  ;;  %v17675_v27 = vadd.f32 %v17350_v51, %v3095_v42  ;;  %v17677_v28 = vmax.f32 %v4476_v18, 0.0  ;;  %v15738_v18 = vld [vmem:[%s20646_s5 + $0x2b8] sm:$0xff]   ;;  %v17711_v16 = vpop.f32.mrf.mxu1 }
 0x2f9   : > { %v17681_v48 = vpack.c.bf16 %v17647_v0, %v17637_v6  ;;  %v4259_v26 = vpop.f32.mrf.mxu0  ;;  %v4669_v33 = vsel %vm736_vm3, %v4665_v34, %v4668_v47  ;;  %v4859_v8 = vrot.slane %v17637_v6, 1  ;;  %v4478_v40 = vadd.f32 %v17568_v31, %v4402_v2 }
 0x2fa   : > { %v4479_v51 = vadd.f32 %v17572_v5, %v4403_v19  ;;  %v4404_v42 = vadd.f32 %v4258_v36, %v17261_v14  ;;  %v17701_v52 = vmax.f32 %v4477_v56, 0.0  ;;  %v4260_v6 = vadd.f32 %v4259_v26, %v17429_v46  ;;  %v15755_v36 = vld [vmem:[%s20646_s5 + $0x68] sm:$0xff]  }
 0x2fb   : > { %20969 = vst [vmem:[#allocation5_spill] sm:$0xff] %v17681_v48  ;;  %7067 = vmatprep.mubr.bf16.mxu0 %v17681_v48  ;;  %v4261_v13 = vpop.f32.mrf.mxu0  ;;  %v17705_v14 = vpack.c.bf16 %v4669_v33, %v4665_v34  ;;  %v20650_v61 = vrot.slane %v17647_v0, 1  ;;  %v4542_v43 = vmax.f32 %v4478_v40, 0.0  ;;  %v15739_v34 = vld [vmem:[%s20646_s5 + $0x2f0] sm:$0xff]   ;;  %v17723_v47 = vadd.f32 %v17376_v15, %v17591_v4 }
 0x2fc   : > { %v17713_v45 = vmax.f32 %v4479_v51, 0.0  ;;  %v4480_v22 = vadd.f32 %v17568_v31, %v4404_v42  ;;  %7068 = vmatmul.mubr.bf16.vlgmr.msra.gmra.mxu0 %v17644_v9  ;;  %v4262_v46 = vadd.f32 %v4261_v13, %v17434_v57  ;;  %v4670_v56 = vrot.slane %v17677_v28, 7  ;;  %v15754_v57 = vld [vmem:[%s20646_s5 + $0x30] sm:$0xff]   ;;  %v17758_v42 = vpop.f32.mrf.mxu1 }
 0x2fd   : > { %v4405_v25 = vadd.f32 %v4260_v6, %v17272_v54  ;;  %13558 = vmatprep.mubr.msk.bf16.mxu1 %vm17694_vm6, %v17705_v14  ;;  %v4263_v55 = vpop.f32.mrf.mxu0  ;;  %14573 = vmatpush3.bf16.msra.mxu0 %v15750_v41  ;;  %v17736_v2 = vsel %vm833_vm2, %v4859_v8, %v20650_v61  ;;  %v4862_v15 = vrot.slane %v17677_v28, 1  ;;  %v4863_v4 = vrot.slane %v4542_v43, 1  ;;  %v15740_v51 = vld [vmem:[%s20646_s5 + $0x2b0] sm:$0xff]  }
 0x2fe   : > { %v4674_v54 = vrot.slane %v17713_v45, 7  ;;  %v17740_v19 = vmax.f32 %v4480_v22, 0.0  ;;  %13562 = vmatmul.mubr.msk.bf16.vlgmr.msra.gmra.mxu1 %vm17694_vm6, %v17655_v35  ;;  %14574 = vmatprep.subr.bf16.mxu0 %v15753_v49  ;;  %v4406_v33 = vadd.f32 %v4262_v46, %v17285_v62  ;;  %v4264_v41 = vadd.f32 %v4263_v55, %v17438_v58  ;;  %v20974_v46 = vld [vmem:[#allocation27_spill] sm:$0xff] }
 0x2ff   : > { %v4481_v26 = vadd.f32 %v17572_v5, %v4405_v25  ;;  %14461 = vmatpush3.bf16.msra.mxu1 %v15738_v18  ;;  %v4267_v8 = vpop.f32.mrf.mxu0  ;;  %v17753_v40 = vpack.c.bf16 %v17713_v45, %v17701_v52  ;;  %v4672_v49 = vrot.slane %v4542_v43, 7  ;;  %v4864_v6 = vsel %vm833_vm2, %v4862_v15, %v4863_v4  ;;  %v15741_v15 = vld [vmem:[%s20646_s5 + $0x2e8] sm:$0xff]  }
 0x300   : > { %v4268_v13 = vadd.f32 %v4267_v8, %v17443_v37  ;;  %v4671_v62 = vrot.slane %v17701_v52, 7  ;;  %14462 = vmatprep.subr.bf16.mxu1 %v15739_v34  ;;  %v17763_v58 = vpack.c.bf16 %v4863_v4, %v4864_v6  ;;  %v4868_v18 = vrot.slane %v17740_v19, 1  ;;  %v20975_v37 = vld [vmem:[#allocation28_spill] sm:$0xff] }
 0x301   : > { %20972 = vst [vmem:[#allocation26_spill] sm:$0xff] %v17753_v40  ;;  %v4482_v22 = vadd.f32 %v17568_v31, %v4406_v33  ;;  %v4407_v25 = vadd.f32 %v4264_v41, %v20974_v46  ;;  %7075 = vmatprep.mubr.bf16.mxu0 %v17753_v40  ;;  %v4269_v55 = vpop.f32.mrf.mxu0  ;;  %14575 = vmatpush3.bf16.msra.mxu0 %v15754_v57  ;;  %v15756_v33 = vld [vmem:[%s20646_s5 + $0x28] sm:$0xff]   ;;  %v17781_v41 = vmax.f32 %v4481_v26, 0.0 }
 0x302   : > { %20973 = vst [vmem:[#allocation6_spill] sm:$0xff] %v17763_v58  ;;  %v4408_v8 = vadd.f32 %v4268_v13, %v20975_v37  ;;  %v4270_v34 = vadd.f32 %v4269_v55, %v17448_v12  ;;  %v17775_v4 = vpack.c.bf16 %v4542_v43, %v17677_v28  ;;  %v4675_v6 = vsel %vm736_vm3, %v4671_v62, %v4674_v54  ;;  %v15757_v12 = vld [vmem:[%s20646_s5 + $0x60] sm:$0xff]   ;;  %v17789_v28 = vpop.f32.mrf.mxu1 }
 0x303   : > { %14576 = vmatprep.subr.bf16.mxu0 %v15755_v36  ;;  %v4546_v46 = vmax.f32 %v4482_v22, 0.0  ;;  %v4483_v61 = vadd.f32 %v17572_v5, %v4407_v25  ;;  %v4271_v57 = vpop.f32.mrf.mxu0  ;;  %v17784_v40 = vpack.c.bf16 %v4675_v6, %v4671_v62  ;;  %14463 = vmatpush3.bf16.msra.mxu1 %v15740_v51  ;;  %v20978_v54 = vld [vmem:[#allocation10_spill] sm:$0xff]  ;;  %v4673_v13 = vsel %vm736_vm3, %v4670_v56, %v4672_v49  ;;  %v15742_v51 = vld [vmem:[%s20646_s5 + $0x2a8] sm:$0xff]  }
 0x304   : > { %20976 = vst [vmem:[#allocation29_spill] sm:$0xff] %v17775_v4  ;;  %v4484_v43 = vadd.f32 %v17568_v31, %v4408_v8  ;;  %v4409_v36 = vadd.f32 %v4270_v34, %v20978_v54  ;;  %7076 = vmatmul.mubr.bf16.gmra.mxu0 %v17775_v4  ;;  %v4272_v26 = vadd.f32 %v4271_v57, %v17453_v24  ;;  %v15743_v24 = vld [vmem:[%s20646_s5 + $0x2e0] sm:$0xff]   ;;  %v20980_v34 = vld [vmem:[#allocation11_spill] sm:$0xff] }
 0x305   : > { %20977 = vst [vmem:[#allocation7_spill] sm:$0xff] %v17784_v40  ;;  %v4678_v62 = vrot.slane %v4546_v46, 7  ;;  %v4869_v22 = vrot.slane %v4546_v46, 1  ;;  %v17799_v25 = vmax.f32 %v4483_v61, 0.0  ;;  %13566 = vmatprep.mubr.msk.bf16.mxu1 %vm17694_vm6, %v17784_v40  ;;  %v17804_v55 = vpack.c.bf16 %v4673_v13, %v4670_v56  ;;  %v4273_v37 = vpop.f32.mrf.mxu0  ;;  %14464 = vmatprep.subr.bf16.mxu1 %v15741_v15  ;;  %v20981_v61 = vld [vmem:[#allocation57_spill] sm:$0xff]  ;;  %v15758_v56 = vld [vmem:[%s20646_s5 + $0x20] sm:$0xff]  }
 0x306   : > { %v17809_v49 = vmax.f32 %v4484_v43, 0.0  ;;  %v4485_v8 = vadd.f32 %v17572_v5, %v4409_v36  ;;  %v4410_v6 = vadd.f32 %v4272_v26, %v20980_v34  ;;  %v4274_v57 = vadd.f32 %v4273_v37, %v20981_v61  ;;  %14577 = vmatpush3.bf16.msra.mxu0 %v15756_v33  ;;  %v15759_v33 = vld [vmem:[%s20646_s5 + $0x58] sm:$0xff]   ;;  %v17836_v37 = vpop.f32.mrf.mxu1 }
 0x307   : > { %20979 = vst [vmem:[#allocation34_spill] sm:$0xff] %v17804_v55  ;;  %v4870_v54 = vsel %vm833_vm2, %v4868_v18, %v4869_v22  ;;  %v4680_v15 = vrot.slane %v17799_v25, 7  ;;  %13570 = vmatmul.mubr.msk.bf16.gmra.mxu1 %vm17694_vm6, %v17804_v55  ;;  %v4277_v43 = vpop.f32.mrf.mxu0  ;;  %v17824_v36 = vpack.c.bf16 %v17799_v25, %v17781_v41  ;;  %v17827_v26 = vpack.c.bf16 %v4546_v46, %v17740_v19  ;;  %v20984_v18 = vld [vmem:[#allocation38_spill] sm:$0xff] }
 0x308   : > { %14578 = vmatprep.subr.bf16.mxu0 %v15757_v12  ;;  %v17834_v13 = vadd.f32 %v20984_v18, %v17599_v63  ;;  %v4676_v34 = vrot.slane %v17740_v19, 7  ;;  %v17839_v61 = vpack.c.bf16 %v4869_v22, %v4870_v54  ;;  %v17841_v4 = vmax.f32 %v4485_v8, 0.0  ;;  %14465 = vmatpush3.bf16.msra.mxu1 %v15742_v51  ;;  %v20987_v12 = vld [vmem:[#allocation12_spill] sm:$0xff]  ;;  %v15744_v19 = vld [vmem:[%s20646_s5 + $0x2a0] sm:$0xff]  }
 0x309   : > { %20982 = vst [vmem:[#allocation17_spill] sm:$0xff] %v17824_v36  ;;  %20983 = vst [vmem:[#allocation36_spill] sm:$0xff] %v17827_v26  ;;  %v4486_v46 = vadd.f32 %v17568_v31, %v4410_v6  ;;  %v4411_v9 = vadd.f32 %v4274_v57, %v20987_v12  ;;  %v4278_v48 = vadd.f32 %v4277_v43, %v17462_v38  ;;  %7083 = vmatprep.mubr.bf16.mxu0 %v17824_v36  ;;  %v4279_v55 = vpop.f32.mrf.mxu0  ;;  %v20988_v54 = vld [vmem:[#allocation30_spill] sm:$0xff]  ;;  %v15745_v12 = vld [vmem:[%s20646_s5 + $0x2d8] sm:$0xff]   ;;  %v17861_v36 = vpop.f32.mrf.mxu1 }
 0x30a   : > { %20985 = vst [vmem:[#allocation22_spill] sm:$0xff] %v17839_v61  ;;  %20986 = vst [vmem:[#allocation41_spill] sm:$0xff] %v17841_v4  ;;  %v4677_v63 = vrot.slane %v17781_v41, 7  ;;  %14466 = vmatprep.subr.bf16.mxu1 %v15743_v24  ;;  %v4874_v22 = vrot.slane %v17809_v49, 1  ;;  %v4280_v51 = vadd.f32 %v4279_v55, %v17467_v29  ;;  %v4679_v8 = vsel %vm736_vm3, %v4676_v34, %v4678_v62  ;;  %v20989_v29 = vld [vmem:[#allocation31_spill] sm:$0xff]  ;;  %v20990_v55 = vld [vmem:[#allocation61_spill] sm:$0xff] }
 0x30b   : > { %v4683_v6 = vrot.slane %v17841_v4, 7  ;;  %14579 = vmatpush3.bf16.msra.mxu0 %v15758_v56  ;;  %v4550_v38 = vmax.f32 %v4486_v46, 0.0  ;;  %v4487_v57 = vadd.f32 %v17572_v5, %v4411_v9  ;;  %v4412_v43 = vadd.f32 %v4278_v48, %v20988_v54  ;;  %v4281_v18 = vpop.f32.mrf.mxu0  ;;  %v15760_v48 = vld [vmem:[%s20646_s5 + $0x18] sm:$0xff]  }
 0x30c   : > { %v4681_v24 = vsel %vm736_vm3, %v4677_v63, %v4680_v15  ;;  %14580 = vmatprep.subr.bf16.mxu0 %v15759_v33  ;;  %v4413_v62 = vadd.f32 %v4280_v51, %v20989_v29  ;;  %7084 = vmatmul.mubr.bf16.gmra.mxu0 %v17827_v26  ;;  %v4282_v56 = vadd.f32 %v4281_v18, %v20990_v55  ;;  %v15746_v51 = vld [vmem:[%s20646_s5 + $0x298] sm:$0xff]   ;;  %v20994_v18 = vld [vmem:[#allocation63_spill] sm:$0xff] }
 0x30d   : > { %v17866_v46 = vpack.c.bf16 %v4681_v24, %v4677_v63  ;;  %v17868_v9 = vpack.c.bf16 %v4679_v8, %v4676_v34  ;;  %v4684_v15 = vrot.slane %v4550_v38, 7  ;;  %v4875_v54 = vrot.slane %v4550_v38, 1  ;;  %v4283_v58 = vpop.f32.mrf.mxu0  ;;  %14467 = vmatpush3.bf16.msra.mxu1 %v15744_v19  ;;  %v20993_v34 = vld [vmem:[#allocation14_spill] sm:$0xff]  ;;  %v15747_v19 = vld [vmem:[%s20646_s5 + $0x2d0] sm:$0xff]   ;;  %v20998_v26 = vld [vmem:[#allocation43_spill] sm:$0xff] }
 0x30e   : > { %v17873_v61 = vmax.f32 %v4487_v57, 0.0  ;;  %v4488_v33 = vadd.f32 %v17568_v31, %v4412_v43  ;;  %v4489_v63 = vadd.f32 %v17572_v5, %v4413_v62  ;;  %v4414_v8 = vadd.f32 %v4282_v56, %v20993_v34  ;;  %v15763_v43 = vld [vmem:[%s20646_s5 + $0x50] sm:$0xff]   ;;  %14468 = vmatprep.subr.bf16.mxu1 %v15745_v12  ;;  %v17905_v56 = vpop.f32.mrf.mxu1 }
 0x30f   : > { %20991 = vst [vmem:[#allocation8_spill] sm:$0xff] %v17866_v46  ;;  %20992 = vst [vmem:[#allocation39_spill] sm:$0xff] %v17868_v9  ;;  %13574 = vmatprep.mubr.msk.bf16.mxu1 %vm17694_vm6, %v17866_v46  ;;  %v4284_v24 = vadd.f32 %v4283_v58, %v20994_v18  ;;  %v17886_v57 = vpack.c.bf16 %v4550_v38, %v17809_v49  ;;  %v4876_v29 = vsel %vm833_vm2, %v4874_v22, %v4875_v54  ;;  %v4287_v58 = vpop.f32.mrf.mxu0 }
 0x310   : > { %v4686_v62 = vrot.slane %v17873_v61, 7  ;;  %v17896_v55 = vmax.f32 %v4488_v33, 0.0  ;;  %13578 = vmatmul.mubr.msk.bf16.gmra.mxu1 %vm17694_vm6, %v17868_v9  ;;  %v17903_v38 = vpack.c.bf16 %v17873_v61, %v17841_v4  ;;  %v17907_v34 = vpack.c.bf16 %v4875_v54, %v4876_v29  ;;  %14581 = vmatpush3.bf16.msra.mxu0 %v15760_v48 }
 0x311   : > { %20995 = vst [vmem:[#allocation9_spill] sm:$0xff] %v17886_v57  ;;  %v17909_v18 = vmax.f32 %v4489_v63, 0.0  ;;  %v4490_v22 = vadd.f32 %v17568_v31, %v4414_v8  ;;  %v4415_v33 = vadd.f32 %v4284_v24, %v17675_v27  ;;  %v17915_v9 = vadd.f32 %v20998_v26, %v17605_v20  ;;  %v4289_v12 = vpop.f32.mrf.mxu0  ;;  %14469 = vmatpush3.bf16.msra.mxu1 %v15746_v51  ;;  %v15748_v20 = vld [vmem:[%s20646_s5 + $0x290] sm:$0xff]  }
 0x312   : > { %20996 = vst [vmem:[#allocation44_spill] sm:$0xff] %v17903_v38  ;;  %20997 = vst [vmem:[#allocation24_spill] sm:$0xff] %v17907_v34  ;;  %v4682_v46 = vrot.slane %v17809_v49, 7  ;;  %v4288_v4 = vadd.f32 %v4287_v58, %v17481_v53  ;;  %7091 = vmatprep.mubr.bf16.mxu0 %v17903_v38  ;;  %v4687_v54 = vsel %vm736_vm3, %v4683_v6, %v4686_v62  ;;  %v4880_v63 = vrot.slane %v17896_v55, 1  ;;  %v15764_v53 = vld [vmem:[%s20646_s5 + $0x10] sm:$0xff]   ;;  %v20999_v49 = vld [vmem:[#allocation15_spill] sm:$0xff] }
 0x313   : > { %v17922_v8 = vmax.f32 %v4490_v22, 0.0  ;;  %v4491_v27 = vadd.f32 %v17572_v5, %v4415_v33  ;;  %v4290_v48 = vadd.f32 %v4289_v12, %v17486_v3  ;;  %14470 = vmatprep.subr.bf16.mxu1 %v15747_v19  ;;  %14582 = vmatprep.subr.bf16.mxu0 %v15763_v43  ;;  %v4291_v51 = vpop.f32.mrf.mxu0  ;;  %v17933_v24 = vpack.c.bf16 %v4687_v54, %v4683_v6  ;;  %v15751_v3 = vld [vmem:[%s20646_s5 + $0x2c8] sm:$0xff]   ;;  %v17940_v19 = vpop.f32.mrf.mxu1 }
 0x314   : > { %v4416_v26 = vadd.f32 %v4288_v4, %v20999_v49  ;;  %v4685_v29 = vsel %vm736_vm3, %v4682_v46, %v4684_v15  ;;  %v4689_v62 = vrot.slane %v17909_v18, 7  ;;  %v21001_v4 = vld [vmem:[#allocation33_spill] sm:$0xff]  ;;  %7092 = vmatmul.mubr.bf16.gmra.mxu0 %v17886_v57  ;;  %v15765_v6 = vld [vmem:[%s20646_s5 + $0x48] sm:$0xff]   ;;  %v4292_v12 = vadd.f32 %v4291_v51, %v17491_v10 }
 0x315   : > { %21000 = vst [vmem:[#allocation46_spill] sm:$0xff] %v17933_v24  ;;  %v4690_v43 = vrot.slane %v17922_v8, 7  ;;  %v4881_v58 = vrot.slane %v17922_v8, 1  ;;  %v17944_v22 = vmax.f32 %v4491_v27, 0.0  ;;  %v4417_v33 = vadd.f32 %v4290_v48, %v21001_v4  ;;  %13582 = vmatprep.mubr.msk.bf16.mxu1 %vm17694_vm6, %v17933_v24  ;;  %v4293_v27 = vpop.f32.mrf.mxu0  ;;  %14471 = vmatpush3.bf16.msra.mxu1 %v15748_v20  ;;  %v15752_v10 = vld [vmem:[%s20646_s5 + $0x288] sm:$0xff]  }
 0x316   : > { %v4492_v15 = vadd.f32 %v17568_v31, %v4416_v26  ;;  %v17956_v54 = vpack.c.bf16 %v4685_v29, %v4682_v46  ;;  %v17960_v48 = vpack.c.bf16 %v17922_v8, %v17896_v55  ;;  %v21004_v26 = vld [vmem:[#allocation68_spill] sm:$0xff]  ;;  %14583 = vmatpush3.bf16.msra.mxu0 %v15764_v53  ;;  %v15766_v46 = vld [vmem:[%s20646_s5 + $0x8] sm:$0xff]   ;;  %14472 = vmatprep.subr.bf16.mxu1 %v15751_v3  ;;  %v15761_v53 = vld [vmem:[%s20646_s5 + $0x2c0] sm:$0xff]  }
 0x317   : > { %v4882_v49 = vsel %vm833_vm2, %v4880_v63, %v4881_v58  ;;  %v4692_v4 = vrot.slane %v17944_v22, 7  ;;  %v4493_v57 = vadd.f32 %v17572_v5, %v4417_v33  ;;  %v4294_v38 = vadd.f32 %v4293_v27, %v21004_v26  ;;  %v21006_v63 = vld [vmem:[#allocation16_spill] sm:$0xff]  ;;  %v4297_v20 = vpop.f32.mrf.mxu0  ;;  %v17991_v27 = vpop.f32.mrf.mxu1  ;;  %14584 = vmatprep.subr.bf16.mxu0 %v15765_v6  ;;  %v15767_v3 = vld [vmem:[%s20646_s5 + $0x40] sm:$0xff]   ;;  %v21012_v6 = vld [vmem:[#allocation19_spill] sm:$0xff] }
 0x318   : > { %21002 = vst [vmem:[#allocation13_spill] sm:$0xff] %v17956_v54  ;;  %21003 = vst [vmem:[#allocation47_spill] sm:$0xff] %v17960_v48  ;;  %v17972_v8 = vpack.c.bf16 %v4881_v58, %v4882_v49  ;;  %v17974_v51 = vmax.f32 %v4492_v15, 0.0  ;;  %v4418_v29 = vadd.f32 %v4292_v12, %v21006_v63  ;;  %13586 = vmatmul.mubr.msk.bf16.gmra.mxu1 %vm17694_vm6, %v17956_v54  ;;  %v21008_v58 = vld [vmem:[#allocation52_spill] sm:$0xff]  ;;  %v21009_v49 = vld [vmem:[#allocation71_spill] sm:$0xff] }
 0x319   : > { %v17982_v33 = vpack.c.bf16 %v17944_v22, %v17909_v18  ;;  %v17989_v15 = vadd.f32 %v21008_v58, %v17614_v11  ;;  %v4419_v12 = vadd.f32 %v4294_v38, %v17723_v47  ;;  %v4298_v26 = vadd.f32 %v4297_v20, %v21009_v49  ;;  %v4299_v58 = vpop.f32.mrf.mxu0  ;;  %v21013_v20 = vld [vmem:[#allocation74_spill] sm:$0xff]  ;;  %14473 = vmatpush3.bf16.msra.mxu1 %v15752_v10 }
 0x31a   : > { %21005 = vst [vmem:[#allocation18_spill] sm:$0xff] %v17972_v8  ;;  %v4693_v63 = vsel %vm736_vm3, %v4689_v62, %v4692_v4  ;;  %v4688_v8 = vrot.slane %v17896_v55, 7  ;;  %v18000_v54 = vmax.f32 %v4493_v57, 0.0  ;;  %v4494_v11 = vadd.f32 %v17568_v31, %v4418_v29  ;;  %v15762_v57 = vld [vmem:[%s20646_s5 + $0x280] sm:$0xff]   ;;  %14585 = vmatpush3.bf16.msra.mxu0 %v15766_v46  ;;  %14474 = vmatprep.subr.bf16.mxu1 %v15761_v53  ;;  %v18026_v46 = vpop.f32.mrf.mxu1 }
 0x31b   : > { %21007 = vst [vmem:[#allocation48_spill] sm:$0xff] %v17982_v33  ;;  %7099 = vmatprep.mubr.bf16.mxu0 %v17982_v33  ;;  %v18004_v34 = vpack.c.bf16 %v4693_v63, %v4689_v62  ;;  %v4694_v47 = vrot.slane %v17974_v51, 7  ;;  %v4495_v38 = vadd.f32 %v17572_v5, %v4419_v12  ;;  %v4420_v4 = vadd.f32 %v4298_v26, %v21012_v6  ;;  %v15768_v55 = vld [vmem:[%s20646_s5] sm:$0xff]   ;;  %v4301_v63 = vpop.f32.mrf.mxu0  ;;  %v21017_v33 = vld [vmem:[#allocation77_spill] sm:$0xff] }
 0x31c   : > { %21010 = vst [vmem:[#allocation49_spill] sm:$0xff] %v18000_v54  ;;  %v4300_v49 = vadd.f32 %v4299_v58, %v21013_v20  ;;  %v4886_v62 = vrot.slane %v17974_v51, 1  ;;  %v4558_v29 = vmax.f32 %v4494_v11, 0.0  ;;  %v4691_v12 = vsel %vm736_vm3, %v4688_v8, %v4690_v43  ;;  %v21016_v11 = vld [vmem:[#allocation37_spill] sm:$0xff]  ;;  %7100 = vmatmul.mubr.bf16.gmra.mxu0 %v17960_v48  ;;  %14586 = vmatprep.subr.bf16.mxu0 %v15767_v3 }
 0x31d   : > { %21011 = vst [vmem:[#allocation23_spill] sm:$0xff] %v18004_v34  ;;  %13590 = vmatprep.mubr.msk.bf16.mxu1 %vm17694_vm6, %v18004_v34  ;;  %v21014_v10 = vrot.slane %v17647_v0, 1  ;;  %v18028_v58 = vmax.f32 %v4495_v38, 0.0  ;;  %v4496_v6 = vadd.f32 %v17568_v31, %v4420_v4  ;;  %v4302_v34 = vadd.f32 %v4301_v63, %v21017_v33  ;;  %v15769_v43 = vld [vmem:[%s20646_s5 + $0xf8] sm:$0xff]   ;;  %14475 = vmatpush3.bf16.msra.mxu1 %v15762_v57  ;;  %v18060_v57 = vpop.f32.mrf.mxu1 }
 0x31e   : > { %v4421_v20 = vadd.f32 %v4300_v49, %v21016_v11  ;;  %v4696_v0 = vrot.slane %v4558_v29, 7  ;;  %v18037_v53 = vpack.c.bf16 %v4691_v12, %v4688_v8  ;;  %v18040_v38 = vpack.c.bf16 %v4558_v29, %v17974_v51  ;;  %v21020_v11 = vld [vmem:[#allocation20_spill] sm:$0xff]  ;;  %14587 = vmatpush3.bf16.msra.mxu0 %v15768_v55  ;;  %14684 = vmatprep.subr.bf16.mxu1 %v15769_v43 }
 0x31f   : > { %v18024_v26 = vpack.c.bf16 %v21014_v10, %v17736_v2  ;;  %21015 = vst [vmem:[#allocation27_spill] sm:$0xff] %v18028_v58  ;;  %v4887_v2 = vrot.slane %v4558_v29, 1  ;;  %v4303_v10 = vpop.f32.mrf.mxu0  ;;  %v4698_v4 = vrot.slane %v18028_v58, 7  ;;  %v4422_v48 = vadd.f32 %v4302_v34, %v21020_v11  ;;  %v21021_v8 = vld [vmem:[#allocation80_spill] sm:$0xff] }
 0x320   : > { %21018 = vst [vmem:[#allocation28_spill] sm:$0xff] %v18037_v53  ;;  %21019 = vst [vmem:[#allocation10_spill] sm:$0xff] %v18040_v38  ;;  %v4497_v49 = vadd.f32 %v17572_v5, %v4421_v20  ;;  %v4695_v33 = vrot.slane %v18000_v54, 7  ;;  %13594 = vmatmul.mubr.msk.bf16.gmra.mxu1 %vm17694_vm6, %v18037_v53  ;;  %v4304_v63 = vadd.f32 %v4303_v10, %v21021_v8  ;;  %v21023_v34 = vld [vmem:[#allocation56_spill] sm:$0xff]  ;;  %v21026_v53 = vld [vmem:[#allocation83_spill] sm:$0xff] }
 0x321   : > { %v4888_v3 = vsel %vm833_vm2, %v4886_v62, %v4887_v2  ;;  %v4307_v51 = vpop.f32.mrf.mxu0  ;;  %v18053_v29 = vpack.c.bf16 %v18028_v58, %v18000_v54  ;;  %v4697_v12 = vsel %vm736_vm3, %v4694_v47, %v4696_v0  ;;  %v18058_v20 = vadd.f32 %v21023_v34, %v17617_v59  ;;  %v21027_v34 = vld [vmem:[#allocation62_spill] sm:$0xff] }
 0x322   : > { %v18062_v55 = vpack.c.bf16 %v4887_v2, %v4888_v3  ;;  %v18064_v62 = vmax.f32 %v4496_v6, 0.0  ;;  %v18066_v11 = vmax.f32 %v4497_v49, 0.0  ;;  %v4498_v10 = vadd.f32 %v17568_v31, %v4422_v48  ;;  %v21028_v6 = vld [vmem:[#allocation86_spill] sm:$0xff] }
 0x323   : > { %21022 = vst [vmem:[#allocation11_spill] sm:$0xff] %v18053_v29  ;;  %v4423_v8 = vadd.f32 %v4304_v63, %v17834_v13  ;;  %v4308_v54 = vadd.f32 %v4307_v51, %v21026_v53  ;;  %7107 = vmatprep.mubr.bf16.mxu0 %v18053_v29  ;;  %v4309_v0 = vpop.f32.mrf.mxu0  ;;  %v4699_v59 = vsel %vm736_vm3, %v4695_v33, %v4698_v4  ;;  %v21031_v63 = vld [vmem:[#allocation21_spill] sm:$0xff] }
 0x324   : > { %21024 = vst [vmem:[#allocation57_spill] sm:$0xff] %v18062_v55  ;;  %21025 = vst [vmem:[#allocation38_spill] sm:$0xff] %v18066_v11  ;;  %v18075_v2 = vadd.f32 %v21027_v34, %v17627_v30  ;;  %v4310_v3 = vadd.f32 %v4309_v0, %v21028_v6  ;;  %v18078_v49 = vpack.c.bf16 %v4699_v59, %v4695_v33  ;;  %v4562_v13 = vmax.f32 %v4498_v10, 0.0  ;;  %v18085_v55 = vpop.f32.mrf.mxu1  ;;  %v21032_v30 = vld [vmem:[#allocation40_spill] sm:$0xff]  ;;  %v21033_v33 = vld [vmem:[#allocation90_spill] sm:$0xff] }
 0x325   : > { %v18080_v43 = vpack.c.bf16 %v4697_v12, %v4694_v47  ;;  %v4499_v53 = vadd.f32 %v17572_v5, %v4423_v8  ;;  %v4424_v51 = vadd.f32 %v4308_v54, %v21031_v63  ;;  %v4311_v29 = vpop.f32.mrf.mxu0  ;;  %v4892_v4 = vrot.slane %v18064_v62, 1  ;;  %7108 = vmatmul.mubr.bf16.gmra.mxu0 %v18040_v38 }
 0x326   : > { %21029 = vst [vmem:[#allocation12_spill] sm:$0xff] %v18078_v49  ;;  %v4425_v34 = vadd.f32 %v4310_v3, %v21032_v30  ;;  %v4312_v0 = vadd.f32 %v4311_v29, %v21033_v33  ;;  %13598 = vmatprep.mubr.msk.bf16.mxu1 %vm17694_vm6, %v18078_v49  ;;  %v4701_v47 = vrot.slane %v18066_v11, 7  ;;  %v4702_v12 = vrot.slane %v4562_v13, 7  ;;  %v21035_v3 = vld [vmem:[#allocation42_spill] sm:$0xff]  ;;  %v21036_v30 = vld [vmem:[#allocation93_spill] sm:$0xff] }
 0x327   : > { %21030 = vst [vmem:[#allocation30_spill] sm:$0xff] %v18080_v43  ;;  %v4893_v10 = vrot.slane %v4562_v13, 1  ;;  %v18095_v54 = vmax.f32 %v4499_v53, 0.0  ;;  %v4500_v8 = vadd.f32 %v17568_v31, %v4424_v51  ;;  %v4313_v59 = vpop.f32.mrf.mxu0  ;;  %v18102_v29 = vpack.c.bf16 %v4562_v13, %v18064_v62 }
 0x328   : > { %v4501_v6 = vadd.f32 %v17572_v5, %v4425_v34  ;;  %v4426_v63 = vadd.f32 %v4312_v0, %v21035_v3  ;;  %v4314_v48 = vadd.f32 %v4313_v59, %v21036_v30  ;;  %13602 = vmatmul.mubr.msk.bf16.gmra.mxu1 %vm17694_vm6, %v18080_v43  ;;  %v18115_v34 = vpop.f32.mrf.mxu1  ;;  %v4700_v59 = vrot.slane %v18064_v62, 7  ;;  %v21040_v3 = vld [vmem:[#allocation4_spill] sm:$0xff] }
 0x329   : > { %21034 = vst [vmem:[#allocation31_spill] sm:$0xff] %v18095_v54  ;;  %21037 = vst [vmem:[#allocation61_spill] sm:$0xff] %v18102_v29  ;;  %v4894_v33 = vsel %vm833_vm2, %v4892_v4, %v4893_v10  ;;  %v4704_v38 = vrot.slane %v18095_v54, 7  ;;  %v18106_v49 = vmax.f32 %v4500_v8, 0.0  ;;  %v4317_v53 = vpop.f32.mrf.mxu0  ;;  %v18113_v51 = vpack.c.bf16 %v18095_v54, %v18066_v11 }
 0x32a   : > { %v18117_v0 = vpack.c.bf16 %v4893_v10, %v4894_v33  ;;  %v18119_v13 = vmax.f32 %v4501_v6, 0.0  ;;  %v4502_v4 = vadd.f32 %v17568_v31, %v4426_v63  ;;  %v4427_v8 = vadd.f32 %v4314_v48, %v17915_v9 }
 0x32b   : > { %21038 = vst [vmem:[#allocation14_spill] sm:$0xff] %v18113_v51  ;;  %v4318_v30 = vadd.f32 %v4317_v53, %v21040_v3  ;;  %7115 = vmatprep.mubr.bf16.mxu0 %v18113_v51  ;;  %v4319_v43 = vpop.f32.mrf.mxu0  ;;  %v4705_v11 = vsel %vm736_vm3, %v4701_v47, %v4704_v38  ;;  %v4898_v10 = vrot.slane %v18106_v49, 1  ;;  %v4703_v53 = vsel %vm736_vm3, %v4700_v59, %v4702_v12  ;;  %v18136_v51 = vpop.f32.mrf.mxu1 }
 0x32c   : > { %21039 = vst [vmem:[#allocation63_spill] sm:$0xff] %v18117_v0  ;;  %v4566_v33 = vmax.f32 %v4502_v4, 0.0  ;;  %v4503_v6 = vadd.f32 %v17572_v5, %v4427_v8  ;;  %v4320_v63 = vadd.f32 %v4319_v43, %v17623_v21  ;;  %v21041_v0 = vld [vmem:[#allocation45_spill] sm:$0xff]  ;;  %v18132_v62 = vpack.c.bf16 %v4705_v11, %v4701_v47  ;;  %v21043_v4 = vld [vmem:[#allocation50_spill] sm:$0xff] }
 0x32d   : > { %v4428_v9 = vadd.f32 %v4318_v30, %v21041_v0  ;;  %v4321_v48 = vpop.f32.mrf.mxu0  ;;  %v4707_v3 = vrot.slane %v18119_v13, 7  ;;  %7116 = vmatmul.mubr.bf16.gmra.mxu0 %v18102_v29  ;;  %v18147_v11 = vpack.c.bf16 %v4703_v53, %v4700_v59  ;;  %v21050_v29 = vld [vmem:[#allocation53_spill] sm:$0xff] }
 0x32e   : > { %21042 = vst [vmem:[#allocation43_spill] sm:$0xff] %v18132_v62  ;;  %v4708_v38 = vrot.slane %v4566_v33, 7  ;;  %v4899_v54 = vrot.slane %v4566_v33, 1  ;;  %v18138_v58 = vmax.f32 %v4503_v6, 0.0  ;;  %v4429_v24 = vadd.f32 %v4320_v63, %v21043_v4  ;;  %13606 = vmatprep.mubr.msk.bf16.mxu1 %vm17694_vm6, %v18132_v62 }
 0x32f   : > { %v4504_v21 = vadd.f32 %v17568_v31, %v4428_v9  ;;  %v4322_v43 = vadd.f32 %v4321_v48, %v17642_v7  ;;  %21044 = vst [vmem:[#allocation15_spill] sm:$0xff] %v18147_v11  ;;  %v4323_v47 = vpop.f32.mrf.mxu0  ;;  %v18150_v12 = vpack.c.bf16 %v4566_v33, %v18106_v49  ;;  %v21047_v9 = vld [vmem:[#allocation51_spill] sm:$0xff]  ;;  %v4706_v4 = vrot.slane %v18106_v49, 7 }
 0x330   : > { %v4900_v0 = vsel %vm833_vm2, %v4898_v10, %v4899_v54  ;;  %v4710_v8 = vrot.slane %v18138_v58, 7  ;;  %v4505_v30 = vadd.f32 %v17572_v5, %v4429_v24  ;;  %v4324_v6 = vadd.f32 %v4323_v47, %v17669_v44  ;;  %13610 = vmatmul.mubr.msk.bf16.gmra.mxu1 %vm17694_vm6, %v18147_v11  ;;  %v18166_v10 = vpop.f32.mrf.mxu1 }
 0x331   : > { %21045 = vst [vmem:[#allocation33_spill] sm:$0xff] %v18150_v12  ;;  %v18156_v63 = vpack.c.bf16 %v4899_v54, %v4900_v0  ;;  %v4568_v7 = vmax.f32 %v4504_v21, 0.0  ;;  %v4430_v48 = vadd.f32 %v4322_v43, %v21047_v9  ;;  %v4327_v59 = vpop.f32.mrf.mxu0  ;;  %v18164_v33 = vpack.c.bf16 %v18138_v58, %v18119_v13 }
 0x332   : > { %v18168_v53 = vmax.f32 %v4505_v30, 0.0  ;;  %v4431_v44 = vadd.f32 %v4324_v6, %v17989_v15  ;;  %v4328_v24 = vadd.f32 %v4327_v59, %v17711_v16  ;;  %v4711_v54 = vsel %vm736_vm3, %v4707_v3, %v4710_v8 }
 0x333   : > { %21046 = vst [vmem:[#allocation68_spill] sm:$0xff] %v18156_v63  ;;  %21048 = vst [vmem:[#allocation16_spill] sm:$0xff] %v18164_v33  ;;  %v4712_v21 = vrot.slane %v4568_v7, 7  ;;  %v4506_v43 = vadd.f32 %v17568_v31, %v4430_v48  ;;  %7123 = vmatprep.mubr.bf16.mxu0 %v18164_v33  ;;  %v4329_v47 = vpop.f32.mrf.mxu0  ;;  %v18176_v0 = vpack.c.bf16 %v4711_v54, %v4707_v3  ;;  %v4904_v9 = vrot.slane %v4568_v7, 1 }
 0x334   : > { %v4507_v30 = vadd.f32 %v17572_v5, %v4431_v44  ;;  %v4432_v63 = vadd.f32 %v4328_v24, %v21050_v29  ;;  %v4330_v15 = vadd.f32 %v4329_v47, %v17758_v42  ;;  %v4709_v49 = vsel %vm736_vm3, %v4706_v4, %v4708_v38  ;;  %v18191_v44 = vpop.f32.mrf.mxu1  ;;  %v21053_v24 = vld [vmem:[#allocation54_spill] sm:$0xff] }
 0x335   : > { %21049 = vst [vmem:[#allocation52_spill] sm:$0xff] %v18176_v0  ;;  %v4570_v16 = vmax.f32 %v4506_v43, 0.0  ;;  %v4331_v6 = vpop.f32.mrf.mxu0  ;;  %13614 = vmatprep.mubr.msk.bf16.mxu1 %vm17694_vm6, %v18176_v0  ;;  %v4713_v8 = vrot.slane %v18168_v53, 7  ;;  %v21051_v3 = vrot.slane %v17713_v45, 1  ;;  %v21052_v48 = vrot.slane %v17701_v52, 1  ;;  %7124 = vmatmul.mubr.bf16.gmra.mxu0 %v18150_v12  ;;  %v21071_v12 = vld [vmem:[#allocation64_spill] sm:$0xff] }
 0x336   : > { %v18193_v29 = vmax.f32 %v4507_v30, 0.0  ;;  %v4508_v42 = vadd.f32 %v17568_v31, %v4432_v63  ;;  %v4433_v54 = vadd.f32 %v4330_v15, %v21053_v24  ;;  %v4332_v38 = vadd.f32 %v4331_v6, %v17789_v28  ;;  %v21056_v63 = vld [vmem:[#allocation55_spill] sm:$0xff]  ;;  %v18226_v24 = vpop.f32.mrf.mxu1 }
 0x337   : > { %v4867_v59 = vsel %vm833_vm2, %v21052_v48, %v21051_v3  ;;  %v4714_v43 = vrot.slane %v4570_v16, 7  ;;  %v4905_v47 = vrot.slane %v4570_v16, 1  ;;  %v18199_v33 = vpack.c.bf16 %v4709_v49, %v4706_v4  ;;  %v4333_v0 = vpop.f32.mrf.mxu0  ;;  %v21058_v6 = vld [vmem:[#allocation67_spill] sm:$0xff] }
 0x338   : > { %v18201_v52 = vpack.c.bf16 %v4570_v16, %v4568_v7  ;;  %v4716_v3 = vrot.slane %v18193_v29, 7  ;;  %v18204_v48 = vmax.f32 %v4508_v42, 0.0  ;;  %v4509_v30 = vadd.f32 %v17572_v5, %v4433_v54  ;;  %v21059_v42 = vld [vmem:[#allocation73_spill] sm:$0xff] }
 0x339   : > { %21054 = vst [vmem:[#allocation71_spill] sm:$0xff] %v18199_v33  ;;  %v4434_v11 = vadd.f32 %v4332_v38, %v21056_v63  ;;  %v4906_v15 = vsel %vm833_vm2, %v4904_v9, %v4905_v47  ;;  %13618 = vmatmul.mubr.msk.bf16.gmra.mxu1 %vm17694_vm6, %v18199_v33  ;;  %v4334_v28 = vadd.f32 %v4333_v0, %v17836_v37  ;;  %v4337_v4 = vpop.f32.mrf.mxu0 }
 0x33a   : > { %21055 = vst [vmem:[#allocation19_spill] sm:$0xff] %v18201_v52  ;;  %v18215_v7 = vpack.c.bf16 %v18193_v29, %v18168_v53  ;;  %v4715_v16 = vsel %vm736_vm3, %v4712_v21, %v4714_v43  ;;  %v18220_v49 = vadd.f32 %v21058_v6, %v17630_v1  ;;  %v18224_v9 = vadd.f32 %v21059_v42, %v17635_v32 }
 0x33b   : > { %v18228_v54 = vpack.c.bf16 %v4905_v47, %v4906_v15  ;;  %v18230_v37 = vmax.f32 %v4509_v30, 0.0  ;;  %v4510_v0 = vadd.f32 %v17568_v31, %v4434_v11  ;;  %v4435_v38 = vadd.f32 %v4334_v28, %v18058_v20  ;;  %v4339_v1 = vpop.f32.mrf.mxu0  ;;  %v21063_v15 = vld [vmem:[#allocation58_spill] sm:$0xff] }
 0x33c   : > { %21057 = vst [vmem:[#allocation74_spill] sm:$0xff] %v18215_v7  ;;  %v4338_v43 = vadd.f32 %v4337_v4, %v17861_v36  ;;  %7131 = vmatprep.mubr.bf16.mxu0 %v18215_v7  ;;  %v4717_v63 = vsel %vm736_vm3, %v4713_v8, %v4716_v3  ;;  %v4340_v6 = vadd.f32 %v4339_v1, %v17905_v56  ;;  %v4910_v30 = vrot.slane %v18204_v48, 1  ;;  %v18246_v4 = vpop.f32.mrf.mxu1  ;;  %v21064_v7 = vld [vmem:[#allocation59_spill] sm:$0xff] }
 0x33d   : > { %21060 = vst [vmem:[#allocation37_spill] sm:$0xff] %v18228_v54  ;;  %v18239_v42 = vpack.c.bf16 %v4717_v63, %v4713_v8  ;;  %v18241_v47 = vpack.c.bf16 %v4715_v16, %v4712_v21  ;;  %v4574_v11 = vmax.f32 %v4510_v0, 0.0  ;;  %v4511_v20 = vadd.f32 %v17572_v5, %v4435_v38  ;;  %v4341_v28 = vpop.f32.mrf.mxu0  ;;  %7132 = vmatmul.mubr.bf16.gmra.mxu0 %v18201_v52 }
 0x33e   : > { %v4436_v36 = vadd.f32 %v4338_v43, %v21063_v15  ;;  %v4437_v3 = vadd.f32 %v4340_v6, %v21064_v7  ;;  %v4342_v56 = vadd.f32 %v4341_v28, %v17940_v19  ;;  %v4719_v21 = vrot.slane %v18230_v37, 7  ;;  %v21067_v19 = vld [vmem:[#allocation60_spill] sm:$0xff] }
 0x33f   : > { %21061 = vst [vmem:[#allocation77_spill] sm:$0xff] %v18239_v42  ;;  %21062 = vst [vmem:[#allocation20_spill] sm:$0xff] %v18241_v47  ;;  %13622 = vmatprep.mubr.msk.bf16.mxu1 %vm17694_vm6, %v18239_v42  ;;  %v21065_v8 = vrot.slane %v17713_v45, 1  ;;  %v4720_v0 = vrot.slane %v4574_v11, 7  ;;  %v4911_v38 = vrot.slane %v4574_v11, 1  ;;  %v18259_v43 = vmax.f32 %v4511_v20, 0.0  ;;  %v4343_v1 = vpop.f32.mrf.mxu0 }
 0x340   : > { %v4512_v7 = vadd.f32 %v17568_v31, %v4436_v36  ;;  %v4513_v63 = vadd.f32 %v17572_v5, %v4437_v3  ;;  %v4438_v6 = vadd.f32 %v4342_v56, %v21067_v19  ;;  %v4344_v15 = vadd.f32 %v4343_v1, %v17991_v27  ;;  %v18279_v3 = vpop.f32.mrf.mxu1 }
 0x341   : > { %v18257_v16 = vpack.c.bf16 %v21065_v8, %v4867_v59  ;;  %v18266_v28 = vpack.c.bf16 %v4574_v11, %v18204_v48  ;;  %v4912_v45 = vsel %vm833_vm2, %v4910_v30, %v4911_v38  ;;  %v4722_v59 = vrot.slane %v18259_v43, 7  ;;  %13626 = vmatmul.mubr.msk.bf16.gmra.mxu1 %vm17694_vm6, %v18241_v47  ;;  %v4347_v20 = vpop.f32.mrf.mxu0 }
 0x342   : > { %v18270_v8 = vmax.f32 %v4512_v7, 0.0  ;;  %v18277_v36 = vpack.c.bf16 %v18259_v43, %v18230_v37  ;;  %v18281_v27 = vpack.c.bf16 %v4911_v38, %v4912_v45  ;;  %v18283_v11 = vmax.f32 %v4513_v63, 0.0 }
 0x343   : > { %21066 = vst [vmem:[#allocation80_spill] sm:$0xff] %v18257_v16  ;;  %21068 = vst [vmem:[#allocation56_spill] sm:$0xff] %v18266_v28  ;;  %v4514_v30 = vadd.f32 %v17568_v31, %v4438_v6  ;;  %v4439_v56 = vadd.f32 %v4344_v15, %v18075_v2  ;;  %v4718_v7 = vrot.slane %v18204_v48, 7  ;;  %v4348_v1 = vadd.f32 %v4347_v20, %v18026_v46  ;;  %v4349_v19 = vpop.f32.mrf.mxu0 }
 0x344   : > { %21069 = vst [vmem:[#allocation83_spill] sm:$0xff] %v18277_v36  ;;  %21070 = vst [vmem:[#allocation62_spill] sm:$0xff] %v18281_v27  ;;  %7139 = vmatprep.mubr.bf16.mxu0 %v18277_v36  ;;  %v4723_v32 = vsel %vm736_vm3, %v4719_v21, %v4722_v59  ;;  %v4916_v38 = vrot.slane %v18270_v8, 1  ;;  %v4350_v6 = vadd.f32 %v4349_v19, %v18060_v57  ;;  %v4725_v20 = vrot.slane %v18283_v11, 7  ;;  %v18300_v36 = vpop.f32.mrf.mxu1 }
 0x345   : > { %v4578_v45 = vmax.f32 %v4514_v30, 0.0  ;;  %v4515_v63 = vadd.f32 %v17572_v5, %v4439_v56  ;;  %v4440_v2 = vadd.f32 %v4348_v1, %v21071_v12  ;;  %v4351_v15 = vpop.f32.mrf.mxu0  ;;  %v18296_v48 = vpack.c.bf16 %v4723_v32, %v4719_v21  ;;  %v21073_v30 = vld [vmem:[#allocation65_spill] sm:$0xff]  ;;  %7140 = vmatmul.mubr.bf16.gmra.mxu0 %v18266_v28 }
 0x346   : > { %v4721_v46 = vsel %vm736_vm3, %v4718_v7, %v4720_v0  ;;  %v4441_v47 = vadd.f32 %v4350_v6, %v21073_v30  ;;  %v4352_v12 = vadd.f32 %v4351_v15, %v18085_v55  ;;  %v4724_v30 = vrot.slane %v18270_v8, 7  ;;  %v21080_v28 = vld [vmem:[#allocation69_spill] sm:$0xff] }
 0x347   : > { %21072 = vst [vmem:[#allocation86_spill] sm:$0xff] %v18296_v48  ;;  %v4726_v59 = vrot.slane %v4578_v45, 7  ;;  %v4917_v52 = vrot.slane %v4578_v45, 1  ;;  %v18302_v27 = vmax.f32 %v4515_v63, 0.0  ;;  %v4516_v57 = vadd.f32 %v17568_v31, %v4440_v2  ;;  %13630 = vmatprep.mubr.msk.bf16.mxu1 %vm17694_vm6, %v18296_v48  ;;  %v4353_v21 = vpop.f32.mrf.mxu0  ;;  %v21077_v2 = vld [vmem:[#allocation66_spill] sm:$0xff] }
 0x348   : > { %v18311_v32 = vpack.c.bf16 %v4721_v46, %v4718_v7  ;;  %v18314_v0 = vpack.c.bf16 %v4578_v45, %v18270_v8  ;;  %v4517_v19 = vadd.f32 %v17572_v5, %v4441_v47  ;;  %v4354_v63 = vadd.f32 %v4353_v21, %v18115_v34 }
 0x349   : > { %v4918_v56 = vsel %vm833_vm2, %v4916_v38, %v4917_v52  ;;  %v4728_v1 = vrot.slane %v18302_v27, 7  ;;  %v4580_v55 = vmax.f32 %v4516_v57, 0.0  ;;  %v4442_v15 = vadd.f32 %v4352_v12, %v21077_v2  ;;  %v4357_v7 = vpop.f32.mrf.mxu0  ;;  %v18330_v38 = vpop.f32.mrf.mxu1 }
 0x34a   : > { %21074 = vst [vmem:[#allocation21_spill] sm:$0xff] %v18311_v32  ;;  %21075 = vst [vmem:[#allocation40_spill] sm:$0xff] %v18314_v0  ;;  %v18320_v6 = vpack.c.bf16 %v4917_v52, %v4918_v56  ;;  %13634 = vmatmul.mubr.msk.bf16.gmra.mxu1 %vm17694_vm6, %v18311_v32  ;;  %v18328_v45 = vpack.c.bf16 %v18302_v27, %v18283_v11  ;;  %v18332_v46 = vmax.f32 %v4517_v19, 0.0 }
 0x34b   : > { %v4443_v34 = vadd.f32 %v4354_v63, %v18220_v49  ;;  %v4358_v52 = vadd.f32 %v4357_v7, %v18136_v51  ;;  %v4729_v47 = vsel %vm736_vm3, %v4725_v20, %v4728_v1  ;;  %v4730_v57 = vrot.slane %v4580_v55, 7  ;;  %v4359_v21 = vpop.f32.mrf.mxu0 }
 0x34c   : > { %21076 = vst [vmem:[#allocation90_spill] sm:$0xff] %v18320_v6  ;;  %21078 = vst [vmem:[#allocation42_spill] sm:$0xff] %v18328_v45  ;;  %v4518_v12 = vadd.f32 %v17568_v31, %v4442_v15  ;;  %7147 = vmatprep.mubr.bf16.mxu0 %v18328_v45  ;;  %v18340_v56 = vpack.c.bf16 %v4729_v47, %v4725_v20  ;;  %v4922_v2 = vrot.slane %v4580_v55, 1  ;;  %v4731_v1 = vrot.slane %v18332_v46, 7 }
 0x34d   : > { %v4519_v19 = vadd.f32 %v17572_v5, %v4443_v34  ;;  %v4444_v6 = vadd.f32 %v4358_v52, %v21080_v28  ;;  %v4360_v49 = vadd.f32 %v4359_v21, %v18166_v10  ;;  %v4361_v63 = vpop.f32.mrf.mxu0  ;;  %v4727_v8 = vsel %vm736_vm3, %v4724_v30, %v4726_v59  ;;  %v18355_v34 = vpop.f32.mrf.mxu1  ;;  %v21083_v52 = vld [vmem:[#allocation70_spill] sm:$0xff]  ;;  %7148 = vmatmul.mubr.bf16.gmra.mxu0 %v18314_v0  ;;  %v21095_v0 = vld [vmem:[#allocation76_spill] sm:$0xff] }
 0x34e   : > { %21079 = vst [vmem:[#allocation93_spill] sm:$0xff] %v18340_v56  ;;  %v4582_v51 = vmax.f32 %v4518_v12, 0.0  ;;  %13638 = vmatprep.mubr.msk.bf16.mxu1 %vm17694_vm6, %v18340_v56  ;;  %v21081_v20 = vrot.slane %v17799_v25, 1  ;;  %v21082_v15 = vrot.slane %v17781_v41, 1  ;;  %v4362_v59 = vadd.f32 %v4361_v63, %v18191_v44  ;;  %v21088_v63 = vld [vmem:[#allocation32_spill] sm:$0xff] }
 0x34f   : > { %v18357_v28 = vmax.f32 %v4519_v19, 0.0  ;;  %v4520_v10 = vadd.f32 %v17568_v31, %v4444_v6  ;;  %v4445_v47 = vadd.f32 %v4360_v49, %v21083_v52  ;;  %v18363_v45 = vpack.c.bf16 %v4727_v8, %v4724_v30  ;;  %v4363_v56 = vpop.f32.mrf.mxu0  ;;  %v21086_v6 = vld [vmem:[#allocation72_spill] sm:$0xff] }
 0x350   : > { %v4873_v7 = vsel %vm833_vm2, %v21082_v15, %v21081_v20  ;;  %v4732_v12 = vrot.slane %v4582_v51, 7  ;;  %v4923_v21 = vrot.slane %v4582_v51, 1  ;;  %v18365_v41 = vpack.c.bf16 %v4582_v51, %v4580_v55 }
 0x351   : > { %21084 = vst [vmem:[#allocation4_spill] sm:$0xff] %v18363_v45  ;;  %v4734_v20 = vrot.slane %v18357_v28, 7  ;;  %v18368_v15 = vmax.f32 %v4520_v10, 0.0  ;;  %v4521_v19 = vadd.f32 %v17572_v5, %v4445_v47  ;;  %v4446_v32 = vadd.f32 %v4362_v59, %v21086_v6  ;;  %v4367_v30 = vpop.f32.mrf.mxu0  ;;  %v21089_v10 = vld [vmem:[#allocation35_spill] sm:$0xff] }
 0x352   : > { %21085 = vst [vmem:[#allocation45_spill] sm:$0xff] %v18365_v41  ;;  %v4924_v49 = vsel %vm833_vm2, %v4922_v2, %v4923_v21  ;;  %13642 = vmatmul.mubr.msk.bf16.gmra.mxu1 %vm17694_vm6, %v18363_v45  ;;  %v4364_v44 = vadd.f32 %v4363_v56, %v18226_v24  ;;  %v18379_v55 = vpack.c.bf16 %v18357_v28, %v18332_v46  ;;  %v4186_v2 = vpop.f32.mrf.mxu1 }
 0x353   : > { %v4733_v51 = vsel %vm736_vm3, %v4730_v57, %v4732_v12  ;;  %v3195_v8 = vadd.f32 %v21088_v63, %v17611_v23  ;;  %v18386_v52 = vadd.f32 %v21089_v10, %v17621_v17  ;;  %v18388_v47 = vpack.c.bf16 %v4923_v21, %v4924_v49  ;;  %v4369_v12 = vpop.f32.mrf.mxu0  ;;  %v21091_v63 = vld [vmem:[#allocation79_spill] sm:$0xff] }
 0x354   : > { %21087 = vst [vmem:[#allocation50_spill] sm:$0xff] %v18379_v55  ;;  %v18390_v59 = vmax.f32 %v4521_v19, 0.0  ;;  %v4522_v24 = vadd.f32 %v17568_v31, %v4446_v32  ;;  %v4447_v56 = vadd.f32 %v4364_v44, %v18224_v9  ;;  %v4368_v6 = vadd.f32 %v4367_v30, %v18246_v4  ;;  %7155 = vmatprep.mubr.bf16.mxu0 %v18379_v55  ;;  %v21094_v4 = vld [vmem:[#allocation75_spill] sm:$0xff]  ;;  %v4188_v55 = vpop.f32.mrf.mxu1 }
 0x355   : > { %21090 = vst [vmem:[#allocation51_spill] sm:$0xff] %v18388_v47  ;;  %v4735_v23 = vsel %vm736_vm3, %v4731_v1, %v4734_v20  ;;  %v3378_v17 = vadd.f32 %v21091_v63, %v17667_v50  ;;  %v4370_v10 = vadd.f32 %v4369_v12, %v18279_v3  ;;  %v18402_v19 = vpack.c.bf16 %v4733_v51, %v4730_v57  ;;  %v4371_v30 = vpop.f32.mrf.mxu0 }
 0x356   : > { %v18400_v21 = vpack.c.bf16 %v4735_v23, %v4731_v1  ;;  %v4928_v32 = vrot.slane %v18368_v15, 1  ;;  %v4586_v49 = vmax.f32 %v4522_v24, 0.0  ;;  %v4523_v9 = vadd.f32 %v17572_v5, %v4447_v56  ;;  %7156 = vmatmul.mubr.bf16.gmra.mxu0 %v18365_v41 }
 0x357   : > { %21093 = vst [vmem:[#allocation54_spill] sm:$0xff] %v18402_v19  ;;  %v4448_v44 = vadd.f32 %v4368_v6, %v21094_v4  ;;  %v4449_v20 = vadd.f32 %v4370_v10, %v21095_v0  ;;  %v4372_v50 = vadd.f32 %v4371_v30, %v18300_v36  ;;  %v4737_v3 = vrot.slane %v18390_v59, 7  ;;  %v4373_v6 = vpop.f32.mrf.mxu0  ;;  %v21098_v36 = vld [vmem:[#allocation78_spill] sm:$0xff]  ;;  %v4190_v30 = vpop.f32.mrf.mxu1 }
 0x358   : > { %21092 = vst [vmem:[#allocation53_spill] sm:$0xff] %v18400_v21  ;;  %13646 = vmatprep.mubr.msk.bf16.mxu1 %vm17694_vm6, %v18400_v21  ;;  %v21096_v57 = vrot.slane %v17799_v25, 1  ;;  %v4738_v51 = vrot.slane %v4586_v49, 7  ;;  %v4929_v24 = vrot.slane %v4586_v49, 1  ;;  %v18418_v56 = vmax.f32 %v4523_v9, 0.0 }
 0x359   : > { %v4524_v0 = vadd.f32 %v17568_v31, %v4448_v44  ;;  %v4525_v12 = vadd.f32 %v17572_v5, %v4449_v20  ;;  %v4450_v23 = vadd.f32 %v4372_v50, %v21098_v36  ;;  %v4374_v63 = vadd.f32 %v4373_v6, %v18330_v38  ;;  %v4377_v9 = vpop.f32.mrf.mxu0  ;;  %v21102_v50 = vld [vmem:[#allocation85_spill] sm:$0xff] }
 0x35a   : > { %v18416_v1 = vpack.c.bf16 %v21096_v57, %v4873_v7  ;;  %v18425_v10 = vpack.c.bf16 %v4586_v49, %v18368_v15  ;;  %v4930_v25 = vsel %vm833_vm2, %v4928_v32, %v4929_v24  ;;  %v4740_v7 = vrot.slane %v18418_v56, 7  ;;  %13650 = vmatmul.mubr.msk.bf16.gmra.mxu1 %vm17694_vm6, %v18402_v19 }
 0x35b   : > { %v18429_v4 = vmax.f32 %v4524_v0, 0.0  ;;  %v18436_v44 = vpack.c.bf16 %v18418_v56, %v18390_v59  ;;  %v18438_v38 = vpack.c.bf16 %v4929_v24, %v4930_v25  ;;  %v18440_v49 = vmax.f32 %v4525_v12, 0.0  ;;  %v4379_v36 = vpop.f32.mrf.mxu0  ;;  %v4194_v25 = vpop.f32.mrf.mxu1 }
 0x35c   : > { %21097 = vst [vmem:[#allocation55_spill] sm:$0xff] %v18416_v1  ;;  %21099 = vst [vmem:[#allocation67_spill] sm:$0xff] %v18425_v10  ;;  %v4526_v32 = vadd.f32 %v17568_v31, %v4450_v23  ;;  %v4451_v20 = vadd.f32 %v4374_v63, %v3378_v17  ;;  %v3388_v57 = vadd.f32 %v21102_v50, %v3195_v8  ;;  %v4736_v0 = vrot.slane %v18368_v15, 7  ;;  %v21103_v23 = vld [vmem:[#allocation81_spill] sm:$0xff] }
 0x35d   : > { %21100 = vst [vmem:[#allocation73_spill] sm:$0xff] %v18436_v44  ;;  %21101 = vst [vmem:[#allocation58_spill] sm:$0xff] %v18438_v38  ;;  %v4378_v6 = vadd.f32 %v4377_v9, %v18355_v34  ;;  %7163 = vmatprep.mubr.bf16.mxu0 %v18436_v44  ;;  %v4741_v41 = vsel %vm736_vm3, %v4737_v3, %v4740_v7  ;;  %v4934_v19 = vrot.slane %v18429_v4, 1  ;;  %v4381_v63 = vpop.f32.mrf.mxu0  ;;  %v4743_v34 = vrot.slane %v18440_v49, 7  ;;  %v21105_v7 = vld [vmem:[#allocation82_spill] sm:$0xff] }
 0x35e   : > { %v4590_v24 = vmax.f32 %v4526_v32, 0.0  ;;  %v4527_v12 = vadd.f32 %v17572_v5, %v4451_v20  ;;  %v4380_v38 = vadd.f32 %v4379_v36, %v4186_v2  ;;  %v18451_v8 = vpack.c.bf16 %v4741_v41, %v4737_v3  ;;  %7164 = vmatmul.mubr.bf16.gmra.mxu0 %v18425_v10  ;;  %v15781_v2 = vld [vmem:[%s20646_s5 + $0x178] sm:$0xff]  }
 0x35f   : > { %v4452_v17 = vadd.f32 %v4378_v6, %v21103_v23  ;;  %v4739_v15 = vsel %vm736_vm3, %v4736_v0, %v4738_v51  ;;  %v4382_v41 = vadd.f32 %v4381_v63, %v4188_v55  ;;  %v4383_v51 = vpop.f32.mrf.mxu0  ;;  %14796 = vmatprep.subr.bf16.mxu0 %v15781_v2  ;;  %v21109_v63 = vld [vmem:[#allocation84_spill] sm:$0xff]  ;;  %v4742_v2 = vrot.slane %v18429_v4, 7 }
 0x360   : > { %21104 = vst [vmem:[#allocation59_spill] sm:$0xff] %v18451_v8  ;;  %v4744_v9 = vrot.slane %v4590_v24, 7  ;;  %v4935_v50 = vrot.slane %v4590_v24, 1  ;;  %v18455_v44 = vmax.f32 %v4527_v12, 0.0  ;;  %v4453_v47 = vadd.f32 %v4380_v38, %v21105_v7  ;;  %13654 = vmatprep.mubr.msk.bf16.mxu1 %vm17694_vm6, %v18451_v8  ;;  %v4196_v12 = vpop.f32.mrf.mxu1 }
 0x361   : > { %v4528_v32 = vadd.f32 %v17568_v31, %v4452_v17  ;;  %v18466_v3 = vpack.c.bf16 %v4739_v15, %v4736_v0  ;;  %v18469_v20 = vpack.c.bf16 %v4590_v24, %v18429_v4  ;;  %v4384_v23 = vadd.f32 %v4383_v51, %v4190_v30  ;;  %v4387_v0 = vpop.f32.mrf.mxu0  ;;  %v21111_v30 = vld [vmem:[#allocation92_spill] sm:$0xff] }
 0x362   : > { %v4936_v38 = vsel %vm833_vm2, %v4934_v19, %v4935_v50  ;;  %v4746_v6 = vrot.slane %v18455_v44, 7  ;;  %v4529_v36 = vadd.f32 %v17572_v5, %v4453_v47  ;;  %v4454_v7 = vadd.f32 %v4382_v41, %v21109_v63  ;;  %v4198_v63 = vpop.f32.mrf.mxu1 }
 0x363   : > { %21106 = vst [vmem:[#allocation60_spill] sm:$0xff] %v18466_v3  ;;  %21107 = vst [vmem:[#allocation64_spill] sm:$0xff] %v18469_v20  ;;  %v18474_v55 = vpack.c.bf16 %v4935_v50, %v4936_v38  ;;  %v4592_v17 = vmax.f32 %v4528_v32, 0.0  ;;  %13658 = vmatmul.mubr.msk.bf16.gmra.mxu1 %vm17694_vm6, %v18466_v3  ;;  %v18482_v19 = vpack.c.bf16 %v18455_v44, %v18440_v49  ;;  %v4389_v41 = vpop.f32.mrf.mxu0 }
 0x364   : > { %v4455_v24 = vadd.f32 %v4384_v23, %v3388_v57  ;;  %v4388_v15 = vadd.f32 %v4387_v0, %v4194_v25  ;;  %v4747_v47 = vsel %vm736_vm3, %v4743_v34, %v4746_v6  ;;  %v3398_v50 = vadd.f32 %v21111_v30, %v18386_v52  ;;  %v21113_v25 = vld [vmem:[#allocation87_spill] sm:$0xff] }
 0x365   : > { %21108 = vst [vmem:[#allocation65_spill] sm:$0xff] %v18474_v55  ;;  %21110 = vst [vmem:[#allocation66_spill] sm:$0xff] %v18482_v19  ;;  %v4530_v32 = vadd.f32 %v17568_v31, %v4454_v7  ;;  %7171 = vmatprep.mubr.bf16.mxu0 %v18482_v19  ;;  %v18490_v51 = vpack.c.bf16 %v4747_v47, %v4743_v34  ;;  %v18492_v38 = vmax.f32 %v4529_v36, 0.0  ;;  %v4748_v0 = vrot.slane %v4592_v17, 7  ;;  %v4391_v30 = vpop.f32.mrf.mxu0  ;;  %v21114_v7 = vld [vmem:[#allocation89_spill] sm:$0xff]  ;;  %v4200_v55 = vpop.f32.mrf.mxu1 }
 0x366   : > { %v4531_v57 = vadd.f32 %v17572_v5, %v4455_v24  ;;  %v4456_v23 = vadd.f32 %v4388_v15, %v21113_v25  ;;  %v4390_v6 = vadd.f32 %v4389_v41, %v4196_v12  ;;  %v4940_v10 = vrot.slane %v4592_v17, 1  ;;  %7172 = vmatmul.mubr.bf16.gmra.mxu0 %v18469_v20 }
 0x367   : > { %21112 = vst [vmem:[#allocation69_spill] sm:$0xff] %v18490_v51  ;;  %v4594_v52 = vmax.f32 %v4530_v32, 0.0  ;;  %13662 = vmatprep.mubr.msk.bf16.mxu1 %vm17694_vm6, %v18490_v51  ;;  %v4745_v4 = vsel %vm736_vm3, %v4742_v2, %v4744_v9  ;;  %v4392_v24 = vadd.f32 %v4391_v30, %v4198_v63  ;;  %v4393_v32 = vpop.f32.mrf.mxu0 }
 0x368   : > { %v18500_v34 = vmax.f32 %v4531_v57, 0.0  ;;  %v4532_v36 = vadd.f32 %v17568_v31, %v4456_v23  ;;  %v4457_v47 = vadd.f32 %v4390_v6, %v21114_v7  ;;  %v18505_v41 = vpack.c.bf16 %v4745_v4, %v4742_v2  ;;  %v21117_v57 = vld [vmem:[#allocation91_spill] sm:$0xff]  ;;  %v18524_v4 = vld [vmem:[#allocation2] sm:$0xff] }
 0x369   : > { %v4750_v12 = vrot.slane %v4594_v52, 7  ;;  %v4941_v15 = vrot.slane %v4594_v52, 1  ;;  %v18507_v25 = vpack.c.bf16 %v4594_v52, %v4592_v17  ;;  %v4458_v51 = vadd.f32 %v4392_v24, %v21117_v57 }
 0x36a   : > { %21115 = vst [vmem:[#allocation70_spill] sm:$0xff] %v18505_v41  ;;  %v4752_v19 = vrot.slane %v18500_v34, 7  ;;  %v4533_v9 = vadd.f32 %v17572_v5, %v4457_v47  ;;  %v4749_v23 = vrot.slane %v18492_v38, 7  ;;  %v4394_v2 = vadd.f32 %v4393_v32, %v4200_v55 }
 0x36b   : > { %21116 = vst [vmem:[#allocation72_spill] sm:$0xff] %v18507_v25  ;;  %v4942_v6 = vsel %vm833_vm2, %v4940_v10, %v4941_v15  ;;  %13666 = vmatmul.mubr.msk.bf16.gmra.mxu1 %vm17694_vm6, %v18505_v41  ;;  %v18519_v17 = vpack.c.bf16 %v18500_v34, %v18492_v38  ;;  %v4751_v63 = vsel %vm736_vm3, %v4748_v0, %v4750_v12  ;;  %v4596_v30 = vmax.f32 %v4532_v36, 0.0 }
 0x36c   : > { %v18522_v52 = vpack.c.bf16 %v4941_v15, %v4942_v6  ;;  %v18528_v7 = vcombine.high %v18524_v4, %v18524_v4  ;;  %v4534_v10 = vadd.f32 %v17568_v31, %v4458_v51  ;;  %v4459_v47 = vadd.f32 %v4394_v2, %v3398_v50 }
 0x36d   : > { %21118 = vst [vmem:[#allocation32_spill] sm:$0xff] %v18519_v17  ;;  %7179 = vmatprep.mubr.bf16.mxu0 %v18519_v17  ;;  %v4753_v55 = vsel %vm736_vm3, %v4749_v23, %v4752_v19  ;;  %v18533_v24 = vpack.c.bf16 %v4751_v63, %v4748_v0  ;;  %v4901_v12 = vrot.slane %v18119_v13, 1  ;;  %v4907_v15 = vrot.slane %v18168_v53, 1 }
 0x36e   : > { %21119 = vst [vmem:[#allocation35_spill] sm:$0xff] %v18528_v7  ;;  %v4597_v36 = vmax.f32 %v4533_v9, 0.0  ;;  %v18537_v32 = vpack.c.bf16 %v4753_v55, %v4749_v23  ;;  %v4913_v57 = vrot.slane %v18230_v37, 1  ;;  %v4919_v6 = vrot.slane %v18283_v11, 1  ;;  %7180 = vmatmul.mubr.bf16.gmra.mxu0 %v18507_v25 }
 0x36f   : > { %21120 = vst [vmem:[#allocation79_spill] sm:$0xff] %v18533_v24  ;;  %v4598_v20 = vmax.f32 %v4534_v10, 0.0  ;;  %v4535_v31 = vadd.f32 %v17572_v5, %v4459_v47  ;;  %v4754_v50 = vrot.slane %v4596_v30, 7  ;;  %v4946_v51 = vrot.slane %v4596_v30, 1 }
 0x370   : > { %21121 = vst [vmem:[#allocation75_spill] sm:$0xff] %v18537_v32  ;;  %13670 = vmatprep.mubr.msk.bf16.mxu1 %vm17694_vm6, %v18537_v32  ;;  %v4902_v13 = vrot.slane %v18138_v58, 1  ;;  %v4908_v53 = vrot.slane %v18193_v29, 1  ;;  %v4925_v11 = vrot.slane %v18332_v46, 1  ;;  %v4755_v5 = vrot.slane %v4597_v36, 7 }
 0x371   : > { %v4756_v19 = vrot.slane %v4598_v20, 7  ;;  %v4947_v0 = vrot.slane %v4598_v20, 1  ;;  %v4599_v37 = vmax.f32 %v4535_v31, 0.0  ;;  %v18548_v9 = vpack.c.bf16 %v4598_v20, %v4596_v30 }
 0x372   : > { %v4903_v23 = vsel %vm833_vm2, %v4901_v12, %v4902_v13  ;;  %v4914_v2 = vrot.slane %v18259_v43, 1  ;;  %v4931_v20 = vrot.slane %v18390_v59, 1  ;;  %v4937_v46 = vrot.slane %v18440_v49, 1 }
 0x373   : > { %21122 = vst [vmem:[#allocation76_spill] sm:$0xff] %v18548_v9  ;;  %v4948_v63 = vsel %vm833_vm2, %v4946_v51, %v4947_v0  ;;  %v4758_v10 = vrot.slane %v4599_v37, 7  ;;  %13674 = vmatmul.mubr.msk.bf16.gmra.mxu1 %vm17694_vm6, %v18533_v24  ;;  %v18557_v58 = vpack.c.bf16 %v4599_v37, %v4597_v36  ;;  %v4757_v29 = vsel %vm736_vm3, %v4754_v50, %v4756_v19 }
 0x374   : > { %v18562_v30 = vpack.c.bf16 %v4947_v0, %v4948_v63  ;;  %v18564_v47 = vpack.c.bf16 %v4757_v29, %v4754_v50  ;;  %v4943_v43 = vrot.slane %v18492_v38, 1  ;;  %v18569_v12 = vpack.c.bf16 %v4902_v13, %v4903_v23  ;;  %v15782_v29 = vld [vmem:[%s20646_s5 + $0x138] sm:$0xff]  }
 0x375   : > { %21123 = vst [vmem:[#allocation78_spill] sm:$0xff] %v18557_v58  ;;  %7187 = vmatprep.mubr.bf16.mxu0 %v18557_v58  ;;  %v4759_v55 = vsel %vm736_vm3, %v4755_v5, %v4758_v10  ;;  %v4909_v31 = vsel %vm833_vm2, %v4907_v15, %v4908_v53  ;;  %v4915_v59 = vsel %vm833_vm2, %v4913_v57, %v4914_v2  ;;  %v4920_v49 = vrot.slane %v18302_v27, 1 }
 0x376   : > { %21124 = vst [vmem:[#allocation85_spill] sm:$0xff] %v18562_v30  ;;  %21125 = vst [vmem:[#allocation81_spill] sm:$0xff] %v18564_v47  ;;  %v18572_v51 = vpack.c.bf16 %v4759_v55, %v4755_v5  ;;  %v18574_v19 = vpack.c.bf16 %v4908_v53, %v4909_v31  ;;  %v18578_v50 = vpack.c.bf16 %v4914_v2, %v4915_v59  ;;  %v4926_v38 = vrot.slane %v18357_v28, 1  ;;  %v15787_v55 = vld [vmem:[%s20646_s5 + $0x168] sm:$0xff]  }
 0x377   : > { %21126 = vst [vmem:[#allocation82_spill] sm:$0xff] %v18569_v12  ;;  %v4932_v0 = vrot.slane %v18418_v56, 1  ;;  %v4938_v63 = vrot.slane %v18455_v44, 1  ;;  %v4949_v13 = vrot.slane %v4597_v36, 1  ;;  %7188 = vmatmul.mubr.bf16.gmra.mxu0 %v18548_v9  ;;  %v4921_v15 = vsel %vm833_vm2, %v4919_v6, %v4920_v49  ;;  %v15773_v31 = vld [vmem:[%s20646_s5 + $0xe8] sm:$0xff]  }
 0x378   : > { %21127 = vst [vmem:[#allocation84_spill] sm:$0xff] %v18572_v51  ;;  %21128 = vst [vmem:[#allocation92_spill] sm:$0xff] %v18574_v19  ;;  %13678 = vmatprep.mubr.msk.bf16.mxu1 %vm17694_vm6, %v18572_v51  ;;  %v4944_v57 = vrot.slane %v18500_v34, 1  ;;  %v4950_v27 = vrot.slane %v4599_v37, 1  ;;  %8157 = vmatprep.mubr.bf16.mxu0 %v18528_v7  ;;  %v18596_v56 = vpack.c.bf16 %v4920_v49, %v4921_v15  ;;  %v15788_v59 = vld [vmem:[%s20646_s5 + $0x128] sm:$0xff]   ;;  %v15789_v49 = vld [vmem:[%s20646_s5 + $0x160] sm:$0xff]  }
 0x379   : > { %21129 = vst [vmem:[#allocation87_spill] sm:$0xff] %v18578_v50  ;;  %v4927_v44 = vsel %vm833_vm2, %v4925_v11, %v4926_v38  ;;  %v4933_v36 = vsel %vm833_vm2, %v4931_v20, %v4932_v0  ;;  %v4939_v53 = vsel %vm833_vm2, %v4937_v46, %v4938_v63  ;;  %v18619_v2 = vcombine.low %v18524_v4, %v18524_v4  ;;  %v15785_v20 = vld [vmem:[%s20646_s5 + $0x170] sm:$0xff]   ;;  %v15770_v46 = vld [vmem:[%s20646_s5 + $0xb8] sm:$0xff]  }
 0x37a   : > { %21132 = vst [vmem:[#allocation89_spill] sm:$0xff] %v18596_v56  ;;  %v18601_v6 = vpack.c.bf16 %v4926_v38, %v4927_v44  ;;  %v18603_v34 = vpack.c.bf16 %v4932_v0, %v4933_v36  ;;  %v18605_v37 = vpack.c.bf16 %v4938_v63, %v4939_v53  ;;  %v4945_v5 = vsel %vm833_vm2, %v4943_v43, %v4944_v57  ;;  %v15771_v4 = vld [vmem:[%s20646_s5 + $0xf0] sm:$0xff]   ;;  %v15774_v38 = vld [vmem:[%s20646_s5 + $0xa8] sm:$0xff]   ;;  %v15775_v0 = vld [vmem:[%s20646_s5 + $0xe0] sm:$0xff]  }
 0x37b   : > { %13682 = vmatmul.mubr.msk.bf16.gmra.mxu1 %vm17694_vm6, %v18564_v47  ;;  %v18611_v23 = vpack.c.bf16 %v4944_v57, %v4945_v5  ;;  %v4951_v11 = vsel %vm833_vm2, %v4949_v13, %v4950_v27  ;;  %21137 = vst [vmem:[#allocation97_spill] sm:$0xff] %v18619_v2  ;;  %v15786_v43 = vld [vmem:[%s20646_s5 + $0x130] sm:$0xff]   ;;  %v15790_v63 = vld [vmem:[%s20646_s5 + $0x120] sm:$0xff]   ;;  %v4878_v13 = vrot.slane %v17873_v61, 1  ;;  %v15791_v15 = vld [vmem:[%s20646_s5 + $0x158] sm:$0xff]  }
 0x37c   : > { %21133 = vst [vmem:[#allocation91_spill] sm:$0xff] %v18601_v6  ;;  %21134 = vst [vmem:[#allocation94_spill] sm:$0xff] %v18603_v34  ;;  %13685 = vmatprep.mubr.msk.bf16.mxu1 %vm18591_vm7, %v18024_v26  ;;  %v18621_v10 = vpack.c.bf16 %v4950_v27, %v4951_v11  ;;  %v15776_v57 = vld [vmem:[%s20646_s5 + $0xa0] sm:$0xff]   ;;  %v21140_v27 = vld [vmem:[#allocation41_spill] sm:$0xff] }
 0x37d   : > { %21135 = vst [vmem:[#allocation95_spill] sm:$0xff] %v18605_v37  ;;  %21136 = vst [vmem:[#allocation96_spill] sm:$0xff] %v18611_v23  ;;  %v4877_v44 = vrot.slane %v21140_v27, 1  ;;  %v15777_v61 = vld [vmem:[%s20646_s5 + $0xd8] sm:$0xff]   ;;  %v15795_v5 = vld [vmem:[%s20646_s5 + $0x150] sm:$0xff]  }
 0x37e   : > { %21138 = vst [vmem:[#allocation98_spill] sm:$0xff] %v18621_v10  ;;  %v15792_v36 = vld [vmem:[%s20646_s5 + $0x118] sm:$0xff]   ;;  %v21141_v11 = vld [vmem:[#allocation34_spill] sm:$0xff] }
 0x37f   : > { %8158 = vmatmul.mubr.bf16.vlgmr.msra.gmra.mxu0 %v18619_v2  ;;  %v4879_v53 = vsel %vm833_vm2, %v4877_v44, %v4878_v13  ;;  %v15800_v44 = vld [vmem:[%s20646_s5 + $0x100] sm:$0xff]  }
 0x380   : > { %13782 = vmatprep.mubr.msk.bf16.mxu0 %vm17694_vm6, %v17705_v14  ;;  %14797 = vmatpush3.bf16.msra.mxu0 %v15782_v29  ;;  %v15772_v14 = vld [vmem:[%s20646_s5 + $0xb0] sm:$0xff]   ;;  %v15778_v29 = vld [vmem:[%s20646_s5 + $0x98] sm:$0xff]  }
 0x381   : > { %14798 = vmatprep.subr.bf16.mxu0 %v15785_v20  ;;  %v21142_v20 = vld [vmem:[#allocation8_spill] sm:$0xff] }
 0x383   : > { %13688 = vmatmul.mubr.msk.bf16.vlgmr.msra.gmra.mxu1 %vm18591_vm7, %v17657_v60 }
 0x384   : > { %14685 = vmatpush3.bf16.msra.mxu1 %v15770_v46  ;;  %13691 = vmatprep.mubr.msk.bf16.mxu1 %vm18591_vm7, %v18257_v16  ;;  %v15779_v46 = vld [vmem:[%s20646_s5 + $0xd0] sm:$0xff]  }
 0x385   : > { %14686 = vmatprep.subr.bf16.mxu1 %v15771_v4  ;;  %14799 = vmatpush3.bf16.msra.mxu0 %v15786_v43  ;;  %v18714_v4 = vpack.c.bf16 %v4878_v13, %v4879_v53  ;;  %v15796_v43 = vld [vmem:[%s20646_s5 + $0x110] sm:$0xff]   ;;  %v21145_v13 = vld [vmem:[#allocation39_spill] sm:$0xff] }
 0x386   : > { %14800 = vmatprep.subr.bf16.mxu0 %v15787_v55  ;;  %v21144_v55 = vld [vmem:[#allocation22_spill] sm:$0xff] }
 0x387   : > { %13786 = vmatmul.mubr.msk.bf16.gmra.mxu0 %vm17694_vm6, %v17655_v35  ;;  %v21139_v35 = vld [vmem:[#allocation6_spill] sm:$0xff]  ;;  %21143 = vst [vmem:[#allocation41_spill] sm:$0xff] %v18714_v4 }
 0x388   : > { %14687 = vmatpush3.bf16.msra.mxu1 %v15772_v14  ;;  %13790 = vmatprep.mubr.msk.bf16.mxu0 %vm17694_vm6, %v17784_v40  ;;  %v4884_v14 = vrot.slane %v17944_v22, 1  ;;  %v15783_v22 = vld [vmem:[%s20646_s5 + $0xc8] sm:$0xff]  }
 0x389   : > { %14688 = vmatprep.subr.bf16.mxu1 %v15773_v31  ;;  %14801 = vmatpush3.bf16.msra.mxu0 %v15788_v59  ;;  %v15797_v31 = vld [vmem:[%s20646_s5 + $0x148] sm:$0xff]   ;;  %v15780_v59 = vld [vmem:[%s20646_s5 + $0x90] sm:$0xff]  }
 0x38a   : > { %14802 = vmatprep.subr.bf16.mxu0 %v15789_v49  ;;  %v4883_v49 = vrot.slane %v17909_v18, 1  ;;  %v15784_v18 = vld [vmem:[%s20646_s5 + $0x88] sm:$0xff]  }
 0x38b   : > { %13694 = vmatmul.mubr.msk.bf16.gmra.mxu1 %vm18591_vm7, %v21139_v35 }
 0x38c   : > { %13697 = vmatprep.mubr.msk.bf16.mxu1 %vm18591_vm7, %v18416_v1  ;;  %14689 = vmatpush3.bf16.msra.mxu1 %v15774_v38  ;;  %v15798_v38 = vld [vmem:[%s20646_s5 + $0x108] sm:$0xff]  }
 0x38d   : > { %14690 = vmatprep.subr.bf16.mxu1 %v15775_v0  ;;  %14803 = vmatpush3.bf16.msra.mxu0 %v15790_v63  ;;  %v4885_v0 = vsel %vm833_vm2, %v4883_v49, %v4884_v14  ;;  %v15799_v63 = vld [vmem:[%s20646_s5 + $0x140] sm:$0xff]  }
 0x38e   : > { %14804 = vmatprep.subr.bf16.mxu0 %v15791_v15  ;;  %v21146_v15 = vld [vmem:[#allocation46_spill] sm:$0xff]  ;;  %v18755_v27 = vpack.c.bf16 %v4884_v14, %v4885_v0 }
 0x38f   : > { %13794 = vmatmul.mubr.msk.bf16.gmra.mxu0 %vm17694_vm6, %v21141_v11 }
 0x390   : > { %14691 = vmatpush3.bf16.msra.mxu1 %v15776_v57  ;;  %13798 = vmatprep.mubr.msk.bf16.mxu0 %vm17694_vm6, %v21142_v20  ;;  %v15793_v57 = vld [vmem:[%s20646_s5 + $0xc0] sm:$0xff]   ;;  %21147 = vst [vmem:[#allocation99_spill] sm:$0xff] %v18755_v27 }
 0x391   : > { %14692 = vmatprep.subr.bf16.mxu1 %v15777_v61  ;;  %14805 = vmatpush3.bf16.msra.mxu0 %v15792_v36  ;;  %v21148_v61 = vld [vmem:[#allocation24_spill] sm:$0xff]  ;;  %v21149_v36 = vld [vmem:[#allocation27_spill] sm:$0xff] }
 0x392   : > { %14806 = vmatprep.subr.bf16.mxu0 %v15795_v5  ;;  %v4890_v53 = vrot.slane %v21149_v36, 1  ;;  %v15794_v5 = vld [vmem:[%s20646_s5 + $0x80] sm:$0xff]   ;;  %v21158_v36 = vld [vmem:[#allocation12_spill] sm:$0xff] }
 0x393   : > { %13700 = vmatmul.mubr.msk.bf16.gmra.mxu1 %vm18591_vm7, %v21144_v55 }
 0x394   : > { %13703 = vmatprep.mubr.msk.bf16.mxu1 %vm18591_vm7, %v18714_v4  ;;  %14693 = vmatpush3.bf16.msra.mxu1 %v15778_v29  ;;  %v21150_v29 = vld [vmem:[#allocation49_spill] sm:$0xff] }
 0x395   : > { %14694 = vmatprep.subr.bf16.mxu1 %v15779_v46  ;;  %14807 = vmatpush3.bf16.msra.mxu0 %v15796_v43  ;;  %v4889_v46 = vrot.slane %v21150_v29, 1  ;;  %v15801_v43 = vld [vmem:[%s20646_s5 + $0x378] sm:$0xff]   ;;  %v21161_v29 = vld [vmem:[#allocation30_spill] sm:$0xff] }
 0x396   : > { %14808 = vmatprep.subr.bf16.mxu0 %v15797_v31  ;;  %v21151_v31 = vld [vmem:[#allocation13_spill] sm:$0xff] }
 0x397   : > { %13802 = vmatmul.mubr.msk.bf16.gmra.mxu0 %vm17694_vm6, %v21145_v13  ;;  %v4891_v14 = vsel %vm833_vm2, %v4889_v46, %v4890_v53  ;;  %v21162_v46 = vld [vmem:[#allocation63_spill] sm:$0xff] }
 0x398   : > { %14695 = vmatpush3.bf16.msra.mxu1 %v15780_v59  ;;  %13806 = vmatprep.mubr.msk.bf16.mxu0 %vm17694_vm6, %v21146_v15  ;;  %v21152_v59 = vld [vmem:[#allocation23_spill] sm:$0xff]  ;;  %v18781_v49 = vpack.c.bf16 %v4890_v53, %v4891_v14  ;;  %v21164_v14 = vld [vmem:[#allocation52_spill] sm:$0xff] }
 0x399   : > { %14696 = vmatprep.subr.bf16.mxu1 %v15783_v22  ;;  %14809 = vmatpush3.bf16.msra.mxu0 %v15798_v38  ;;  %v21154_v22 = vld [vmem:[#allocation18_spill] sm:$0xff]  ;;  %v21155_v38 = vld [vmem:[#allocation31_spill] sm:$0xff] }
 0x39a   : > { %14810 = vmatprep.subr.bf16.mxu0 %v15799_v63  ;;  %21153 = vst [vmem:[#allocation27_spill] sm:$0xff] %v18781_v49  ;;  %v4896_v0 = vrot.slane %v21155_v38, 1  ;;  %v21156_v63 = vld [vmem:[#allocation38_spill] sm:$0xff]  ;;  %v21165_v38 = vld [vmem:[#allocation68_spill] sm:$0xff] }
 0x39b   : > { %13706 = vmatmul.mubr.msk.bf16.gmra.mxu1 %vm18591_vm7, %v21148_v61 }
 0x39c   : > { %13709 = vmatprep.mubr.msk.bf16.mxu1 %vm18591_vm7, %v18755_v27  ;;  %14697 = vmatpush3.bf16.msra.mxu1 %v15784_v18  ;;  %v4895_v18 = vrot.slane %v21156_v63, 1 }
 0x39d   : > { %14698 = vmatprep.subr.bf16.mxu1 %v15793_v57  ;;  %14811 = vmatpush3.bf16.msra.mxu0 %v15800_v44  ;;  %v21157_v44 = vld [vmem:[#allocation28_spill] sm:$0xff] }
 0x39e   : > { %v4897_v57 = vsel %vm833_vm2, %v4895_v18, %v4896_v0 }
 0x39f   : > { %13810 = vmatmul.mubr.msk.bf16.gmra.mxu0 %vm17694_vm6, %v21151_v31  ;;  %v18798_v53 = vpack.c.bf16 %v4896_v0, %v4897_v57 }
 0x3a0   : > { %14699 = vmatpush3.bf16.msra.mxu1 %v15794_v5  ;;  %13814 = vmatprep.mubr.msk.bf16.mxu0 %vm17694_vm6, %v21152_v59  ;;  %v21160_v5 = vld [vmem:[#allocation57_spill] sm:$0xff] }
 0x3a1   : > { %14908 = vmatprep.subr.bf16.mxu1 %v15801_v43  ;;  %21159 = vst [vmem:[#allocation49_spill] sm:$0xff] %v18798_v53  ;;  %v21163_v43 = vld [vmem:[#allocation15_spill] sm:$0xff] }
 0x3a3   : > { %13712 = vmatmul.mubr.msk.bf16.gmra.mxu1 %vm18591_vm7, %v21154_v22 }
 0x3a4   : > { %13715 = vmatprep.mubr.msk.bf16.mxu1 %vm18591_vm7, %v18781_v49 }
 0x3a7   : > { %13818 = vmatmul.mubr.msk.bf16.gmra.mxu0 %vm17694_vm6, %v21157_v44  ;;  %v21167_v44 = vld [vmem:[#allocation62_spill] sm:$0xff] }
 0x3a8   : > { %13822 = vmatprep.mubr.msk.bf16.mxu0 %vm17694_vm6, %v21158_v36 }
 0x3ab   : > { %13718 = vmatmul.mubr.msk.bf16.gmra.mxu1 %vm18591_vm7, %v21160_v5 }
 0x3ac   : > { %13721 = vmatprep.mubr.msk.bf16.mxu1 %vm18591_vm7, %v18798_v53 }
 0x3af   : > { %13826 = vmatmul.mubr.msk.bf16.gmra.mxu0 %vm17694_vm6, %v21161_v29 }
 0x3b0   : > { %13830 = vmatprep.mubr.msk.bf16.mxu0 %vm17694_vm6, %v18132_v62  ;;  %v21166_v62 = vld [vmem:[#allocation20_spill] sm:$0xff] }
 0x3b3   : > { %13724 = vmatmul.mubr.msk.bf16.gmra.mxu1 %vm18591_vm7, %v21162_v46 }
 0x3b4   : > { %13727 = vmatprep.mubr.msk.bf16.mxu1 %vm18591_vm7, %v18569_v12 }
 0x3b7   : > { %13834 = vmatmul.mubr.msk.bf16.gmra.mxu0 %vm17694_vm6, %v21163_v43 }
 0x3b8   : > { %13838 = vmatprep.mubr.msk.bf16.mxu0 %vm17694_vm6, %v21164_v14 }
 0x3bb   : > { %13730 = vmatmul.mubr.msk.bf16.gmra.mxu1 %vm18591_vm7, %v21165_v38 }
 0x3bc   : > { %13733 = vmatprep.mubr.msk.bf16.mxu1 %vm18591_vm7, %v18574_v19  ;;  %v14364_v0 = vpop.f32.mrf.mxu0 }
 0x3be   : > { %v14365_v63 = vpop.f32.mrf.mxu0  ;;  %v14252_v18 = vpop.f32.mrf.mxu1 }
 0x3bf   : > { %13842 = vmatmul.mubr.msk.bf16.gmra.mxu0 %vm17694_vm6, %v18199_v33  ;;  %v14366_v57 = vadd.f32 %v14365_v63, %v14364_v0 }
 0x3c0   : > { %13846 = vmatprep.mubr.msk.bf16.mxu0 %vm17694_vm6, %v18239_v42  ;;  %v14367_v47 = vpop.f32.mrf.mxu0  ;;  %v14253_v9 = vpop.f32.mrf.mxu1 }
 0x3c1   : > { %v14254_v51 = vadd.f32 %v14253_v9, %v14252_v18 }
 0x3c2   : > { %v14368_v58 = vpop.f32.mrf.mxu0  ;;  %v14255_v33 = vpop.f32.mrf.mxu1 }
 0x3c3   : > { %13736 = vmatmul.mubr.msk.bf16.gmra.mxu1 %vm18591_vm7, %v18228_v54  ;;  %v18842_v14 = vadd.f32 %v14366_v57, %v14254_v51  ;;  %v14369_v43 = vadd.f32 %v14368_v58, %v14367_v47 }
 0x3c4   : > { %13739 = vmatprep.mubr.msk.bf16.mxu1 %vm18591_vm7, %v18578_v50  ;;  %v14370_v42 = vpop.f32.mrf.mxu0  ;;  %v14256_v0 = vpop.f32.mrf.mxu1 }
 0x3c5   : > { %v14257_v63 = vadd.f32 %v14256_v0, %v14255_v33 }
 0x3c6   : > { %v14371_v29 = vpop.f32.mrf.mxu0 }
 0x3c7   : > { %13850 = vmatmul.mubr.msk.bf16.gmra.mxu0 %vm17694_vm6, %v21166_v62  ;;  %v18850_v36 = vadd.f32 %v14369_v43, %v14257_v63  ;;  %v14372_v9 = vadd.f32 %v14371_v29, %v14370_v42  ;;  %v14258_v18 = vpop.f32.mrf.mxu1  ;;  %v21168_v63 = vld [vmem:[#allocation21_spill] sm:$0xff] }
 0x3c8   : > { %13854 = vmatprep.mubr.msk.bf16.mxu0 %vm17694_vm6, %v18296_v48  ;;  %v14373_v58 = vpop.f32.mrf.mxu0  ;;  %v21169_v29 = vld [vmem:[#allocation93_spill] sm:$0xff] }
 0x3c9   : > { %v14259_v47 = vpop.f32.mrf.mxu1 }
 0x3ca   : > { %v14260_v33 = vadd.f32 %v14259_v47, %v14258_v18  ;;  %v14374_v51 = vpop.f32.mrf.mxu0  ;;  %v21170_v18 = vld [vmem:[#allocation90_spill] sm:$0xff] }
 0x3cb   : > { %13742 = vmatmul.mubr.msk.bf16.gmra.mxu1 %vm18591_vm7, %v21167_v44  ;;  %v14375_v57 = vadd.f32 %v14374_v51, %v14373_v58  ;;  %v14261_v0 = vpop.f32.mrf.mxu1 }
 0x3cc   : > { %13745 = vmatprep.mubr.msk.bf16.mxu1 %vm18591_vm7, %v18596_v56  ;;  %v18858_v48 = vadd.f32 %v14372_v9, %v14260_v33  ;;  %v14376_v43 = vpop.f32.mrf.mxu0 }
 0x3cd   : > { %v14262_v42 = vpop.f32.mrf.mxu1 }
 0x3ce   : > { %v14263_v62 = vadd.f32 %v14262_v42, %v14261_v0  ;;  %v14377_v59 = vpop.f32.mrf.mxu0 }
 0x3cf   : > { %13858 = vmatmul.mubr.msk.bf16.gmra.mxu0 %vm17694_vm6, %v21168_v63  ;;  %v14378_v31 = vadd.f32 %v14377_v59, %v14376_v43 }
 0x3d0   : > { %13862 = vmatprep.mubr.msk.bf16.mxu0 %vm17694_vm6, %v21169_v29  ;;  %v14264_v15 = vpop.f32.mrf.mxu1  ;;  %v18869_v9 = vadd.f32 %v14375_v57, %v14263_v62  ;;  %v14379_v58 = vpop.f32.mrf.mxu0 }
 0x3d2   : > { %v14265_v47 = vpop.f32.mrf.mxu1  ;;  %v14380_v51 = vpop.f32.mrf.mxu0 }
 0x3d3   : > { %13748 = vmatmul.mubr.msk.bf16.gmra.mxu1 %vm18591_vm7, %v21170_v18  ;;  %v14266_v33 = vadd.f32 %v14265_v47, %v14264_v15  ;;  %v14381_v63 = vadd.f32 %v14380_v51, %v14379_v58  ;;  %v21171_v15 = vld [vmem:[#allocation51_spill] sm:$0xff] }
 0x3d4   : > { %13751 = vmatprep.mubr.msk.bf16.mxu1 %vm18591_vm7, %v18601_v6  ;;  %v14267_v29 = vpop.f32.mrf.mxu1  ;;  %v14382_v59 = vpop.f32.mrf.mxu0 }
 0x3d5   : > { %v18874_v0 = vadd.f32 %v14378_v31, %v14266_v33 }
 0x3d6   : > { %v14268_v43 = vpop.f32.mrf.mxu1  ;;  %v14383_v57 = vpop.f32.mrf.mxu0 }
 0x3d7   : > { %13866 = vmatmul.mubr.msk.bf16.gmra.mxu0 %vm17694_vm6, %v18363_v45  ;;  %v14269_v62 = vadd.f32 %v14268_v43, %v14267_v29  ;;  %v14384_v42 = vadd.f32 %v14383_v57, %v14382_v59  ;;  %v21172_v43 = vld [vmem:[#allocation54_spill] sm:$0xff] }
 0x3d8   : > { %13870 = vmatprep.mubr.msk.bf16.mxu0 %vm17694_vm6, %v18400_v21  ;;  %v14270_v13 = vpop.f32.mrf.mxu1  ;;  %v14385_v58 = vpop.f32.mrf.mxu0 }
 0x3d9   : > { %v18885_v31 = vadd.f32 %v14381_v63, %v14269_v62  ;;  %v15813_v63 = vld [vmem:[%s20646_s5 + $0x3f8] sm:$0xff]  }
 0x3da   : > { %v14271_v47 = vpop.f32.mrf.mxu1  ;;  %v14386_v51 = vpop.f32.mrf.mxu0  ;;  %15020 = vmatprep.subr.bf16.mxu0 %v15813_v63 }
 0x3db   : > { %13754 = vmatmul.mubr.msk.bf16.gmra.mxu1 %vm18591_vm7, %v21171_v15  ;;  %v14272_v33 = vadd.f32 %v14271_v47, %v14270_v13  ;;  %v14387_v45 = vadd.f32 %v14386_v51, %v14385_v58  ;;  %v21173_v47 = vld [vmem:[#allocation58_spill] sm:$0xff] }
 0x3dc   : > { %13757 = vmatprep.mubr.msk.bf16.mxu1 %vm18591_vm7, %v18603_v34  ;;  %v14273_v21 = vpop.f32.mrf.mxu1  ;;  %v14388_v59 = vpop.f32.mrf.mxu0 }
 0x3dd   : > { %v18890_v29 = vadd.f32 %v14384_v42, %v14272_v33 }
 0x3de   : > { %v14274_v62 = vpop.f32.mrf.mxu1  ;;  %v14389_v57 = vpop.f32.mrf.mxu0 }
 0x3df   : > { %13874 = vmatmul.mubr.msk.bf16.gmra.mxu0 %vm17694_vm6, %v21172_v43  ;;  %v14275_v13 = vadd.f32 %v14274_v62, %v14273_v21  ;;  %v14390_v58 = vadd.f32 %v14389_v57, %v14388_v59 }
 0x3e0   : > { %13878 = vmatprep.mubr.msk.bf16.mxu0 %vm17694_vm6, %v18451_v8  ;;  %v14276_v42 = vpop.f32.mrf.mxu1  ;;  %v14391_v51 = vpop.f32.mrf.mxu0 }
 0x3e1   : > { %v18904_v33 = vadd.f32 %v14387_v45, %v14275_v13  ;;  %v21174_v45 = vld [vmem:[#allocation69_spill] sm:$0xff] }
 0x3e2   : > { %v14277_v43 = vpop.f32.mrf.mxu1  ;;  %v14392_v11 = vpop.f32.mrf.mxu0 }
 0x3e3   : > { %13760 = vmatmul.mubr.msk.bf16.gmra.mxu1 %vm18591_vm7, %v21173_v47  ;;  %v14278_v20 = vadd.f32 %v14277_v43, %v14276_v42  ;;  %v14393_v8 = vadd.f32 %v14392_v11, %v14391_v51  ;;  %v21175_v43 = vld [vmem:[#allocation65_spill] sm:$0xff] }
 0x3e4   : > { %13763 = vmatprep.mubr.msk.bf16.mxu1 %vm18591_vm7, %v18605_v37  ;;  %v14279_v21 = vpop.f32.mrf.mxu1 }
 0x3e5   : > { %v18909_v62 = vadd.f32 %v14390_v58, %v14278_v20  ;;  %v14394_v59 = vpop.f32.mrf.mxu0 }
 0x3e6   : > { %v14280_v63 = vpop.f32.mrf.mxu1 }
 0x3e7   : > { %13882 = vmatmul.mubr.msk.bf16.gmra.mxu0 %vm17694_vm6, %v18466_v3  ;;  %v14281_v13 = vadd.f32 %v14280_v63, %v14279_v21  ;;  %v14395_v57 = vpop.f32.mrf.mxu0 }
 0x3e8   : > { %13886 = vmatprep.mubr.msk.bf16.mxu0 %vm17694_vm6, %v21174_v45  ;;  %v14396_v40 = vadd.f32 %v14395_v57, %v14394_v59  ;;  %v14282_v25 = vpop.f32.mrf.mxu1 }
 0x3e9   : > { %v18920_v11 = vadd.f32 %v14393_v8, %v14281_v13  ;;  %v14397_v20 = vpop.f32.mrf.mxu0 }
 0x3ea   : > { %v14283_v58 = vpop.f32.mrf.mxu1 }
 0x3eb   : > { %13766 = vmatmul.mubr.msk.bf16.gmra.mxu1 %vm18591_vm7, %v21175_v43  ;;  %v14284_v42 = vadd.f32 %v14283_v58, %v14282_v25  ;;  %v14398_v51 = vpop.f32.mrf.mxu0 }
 0x3ec   : > { %13769 = vmatprep.mubr.msk.bf16.mxu1 %vm18591_vm7, %v18611_v23  ;;  %v14399_v3 = vadd.f32 %v14398_v51, %v14397_v20  ;;  %v14285_v45 = vpop.f32.mrf.mxu1 }
 0x3ed   : > { %v18925_v21 = vadd.f32 %v14396_v40, %v14284_v42  ;;  %v14400_v59 = vpop.f32.mrf.mxu0 }
 0x3ee   : > { %v14286_v63 = vpop.f32.mrf.mxu1 }
 0x3ef   : > { %13890 = vmatmul.mubr.msk.bf16.gmra.mxu0 %vm17694_vm6, %v18505_v41  ;;  %v14287_v8 = vadd.f32 %v14286_v63, %v14285_v45  ;;  %v14401_v13 = vpop.f32.mrf.mxu0 }
 0x3f0   : > { %13894 = vmatprep.mubr.msk.bf16.mxu0 %vm17694_vm6, %v18537_v32  ;;  %v14402_v57 = vadd.f32 %v14401_v13, %v14400_v59  ;;  %v14288_v17 = vpop.f32.mrf.mxu1 }
 0x3f1   : > { %v18936_v40 = vadd.f32 %v14399_v3, %v14287_v8  ;;  %v14403_v25 = vpop.f32.mrf.mxu0 }
 0x3f2   : > { %v14289_v20 = vpop.f32.mrf.mxu1 }
 0x3f3   : > { %13772 = vmatmul.mubr.msk.bf16.gmra.mxu1 %vm18591_vm7, %v18522_v52  ;;  %v14290_v58 = vadd.f32 %v14289_v20, %v14288_v17  ;;  %v14404_v42 = vpop.f32.mrf.mxu0  ;;  %v15814_v20 = vld [vmem:[%s20646_s5 + $0x3b8] sm:$0xff]  }
 0x3f4   : > { %13775 = vmatprep.mubr.msk.bf16.mxu1 %vm18591_vm7, %v18621_v10  ;;  %v14405_v51 = vadd.f32 %v14404_v42, %v14403_v25  ;;  %v14291_v32 = vpop.f32.mrf.mxu1 }
 0x3f5   : > { %v18941_v45 = vadd.f32 %v14402_v57, %v14290_v58  ;;  %v14406_v59 = vpop.f32.mrf.mxu0 }
 0x3f6   : > { %v14292_v63 = vpop.f32.mrf.mxu1 }
 0x3f7   : > { %13898 = vmatmul.mubr.msk.bf16.gmra.mxu0 %vm17694_vm6, %v18533_v24  ;;  %v14293_v3 = vadd.f32 %v14292_v63, %v14291_v32  ;;  %v14407_v8 = vpop.f32.mrf.mxu0  ;;  %v15817_v32 = vld [vmem:[%s20646_s5 + $0x3f0] sm:$0xff]   ;;  %v21179_v24 = vld [vmem:[#allocation26_spill] sm:$0xff] }
 0x3f8   : > { %8479 = vmatprep.mubr.bf16.mxu0 %v18528_v7  ;;  %v14408_v13 = vadd.f32 %v14407_v8, %v14406_v59 }
 0x3f9   : > { %v14294_v41 = vpop.f32.mrf.mxu1  ;;  %v18950_v17 = vadd.f32 %v14405_v51, %v14293_v3  ;;  %v14409_v57 = vpop.f32.mrf.mxu0  ;;  %v15802_v3 = vld [vmem:[%s20646_s5 + $0x338] sm:$0xff]  }
 0x3fb   : > { %13778 = vmatmul.mubr.msk.bf16.gmra.mxu1 %vm18591_vm7, %v18562_v30  ;;  %v14295_v25 = vpop.f32.mrf.mxu1  ;;  %v14410_v42 = vpop.f32.mrf.mxu0 }
 0x3fc   : > { %8318 = vmatprep.mubr.bf16.mxu1 %v18528_v7  ;;  %v14296_v58 = vadd.f32 %v14295_v25, %v14294_v41  ;;  %v14411_v59 = vadd.f32 %v14410_v42, %v14409_v57  ;;  %v15803_v41 = vld [vmem:[%s20646_s5 + $0x370] sm:$0xff]  }
 0x3fd   : > { %v14297_v63 = vpop.f32.mrf.mxu1  ;;  %v14412_v51 = vpop.f32.mrf.mxu0 }
 0x3fe   : > { %v18959_v8 = vadd.f32 %v14408_v13, %v14296_v58  ;;  %v15818_v13 = vld [vmem:[%s20646_s5 + $0x3b0] sm:$0xff]   ;;  %v15819_v58 = vld [vmem:[%s20646_s5 + $0x3e8] sm:$0xff]  }
 0x3ff   : > { %8480 = vmatmul.mubr.bf16.vlgmr.msra.gmra.mxu0 %v18619_v2  ;;  %v14298_v30 = vpop.f32.mrf.mxu1  ;;  %v14413_v25 = vpop.f32.mrf.mxu0 }
 0x400   : > { %13901 = vmatprep.mubr.msk.bf16.mxu0 %vm18591_vm7, %v18024_v26  ;;  %15021 = vmatpush3.bf16.msra.mxu0 %v15814_v20  ;;  %v14299_v57 = vadd.f32 %v14298_v30, %v14297_v63  ;;  %v14414_v42 = vadd.f32 %v14413_v25, %v14412_v51  ;;  %v21176_v20 = vld [vmem:[#allocation5_spill] sm:$0xff]  ;;  %v15804_v30 = vld [vmem:[%s20646_s5 + $0x330] sm:$0xff]  }
 0x401   : > { %15022 = vmatprep.subr.bf16.mxu0 %v15817_v32  ;;  %v14300_v10 = vpop.f32.mrf.mxu1  ;;  %v14415_v7 = vpop.f32.mrf.mxu0  ;;  %v15805_v32 = vld [vmem:[%s20646_s5 + $0x368] sm:$0xff]  }
 0x402   : > { %v18978_v26 = vadd.f32 %v14411_v59, %v14299_v57  ;;  %v15820_v59 = vld [vmem:[%s20646_s5 + $0x3a8] sm:$0xff]  }
 0x403   : > { %8319 = vmatmul.mubr.bf16.vlgmr.msra.gmra.mxu1 %v18619_v2  ;;  %v14301_v63 = vpop.f32.mrf.mxu1  ;;  %v14416_v25 = vpop.f32.mrf.mxu0 }
 0x404   : > { %14909 = vmatpush3.bf16.msra.mxu1 %v15802_v3  ;;  %8326 = vmatprep.mubr.bf16.mxu1 %v21176_v20  ;;  %v14302_v51 = vadd.f32 %v14301_v63, %v14300_v10  ;;  %v14417_v3 = vadd.f32 %v14416_v25, %v14415_v7  ;;  %v15821_v20 = vld [vmem:[%s20646_s5 + $0x3e0] sm:$0xff]   ;;  %v15806_v10 = vld [vmem:[%s20646_s5 + $0x328] sm:$0xff]  }
 0x405   : > { %14910 = vmatprep.subr.bf16.mxu1 %v15803_v41  ;;  %15023 = vmatpush3.bf16.msra.mxu0 %v15818_v13  ;;  %v14303_v57 = vpop.f32.mrf.mxu1  ;;  %v14418_v41 = vpop.f32.mrf.mxu0  ;;  %v15807_v7 = vld [vmem:[%s20646_s5 + $0x360] sm:$0xff]  }
 0x406   : > { %15024 = vmatprep.subr.bf16.mxu0 %v15819_v58  ;;  %v18993_v2 = vadd.f32 %v14414_v42, %v14302_v51  ;;  %v21177_v51 = vld [vmem:[#allocation25_spill] sm:$0xff] }
 0x407   : > { %13904 = vmatmul.mubr.msk.bf16.gmra.mxu0 %vm18591_vm7, %v17657_v60  ;;  %v14304_v13 = vpop.f32.mrf.mxu1  ;;  %v14419_v42 = vpop.f32.mrf.mxu0  ;;  %v15822_v60 = vld [vmem:[%s20646_s5 + $0x3a0] sm:$0xff]  }
 0x408   : > { %14911 = vmatpush3.bf16.msra.mxu1 %v15804_v30  ;;  %13907 = vmatprep.mubr.msk.bf16.mxu0 %vm18591_vm7, %v18257_v16  ;;  %v14305_v58 = vadd.f32 %v14304_v13, %v14303_v57  ;;  %v14420_v30 = vadd.f32 %v14419_v42, %v14418_v41 }
 0x409   : > { %14912 = vmatprep.subr.bf16.mxu1 %v15805_v32  ;;  %15025 = vmatpush3.bf16.msra.mxu0 %v15820_v59  ;;  %v15823_v32 = vld [vmem:[%s20646_s5 + $0x3d8] sm:$0xff]   ;;  %v14421_v16 = vpop.f32.mrf.mxu0  ;;  %v15808_v59 = vld [vmem:[%s20646_s5 + $0x320] sm:$0xff]  }
 0x40a   : > { %v14306_v63 = vpop.f32.mrf.mxu1  ;;  %15026 = vmatprep.subr.bf16.mxu0 %v15821_v20  ;;  %v19014_v25 = vadd.f32 %v14417_v3, %v14305_v58  ;;  %v15809_v20 = vld [vmem:[%s20646_s5 + $0x358] sm:$0xff]  }
 0x40b   : > { %8327 = vmatmul.mubr.bf16.gmra.mxu1 %v21177_v51  ;;  %v14422_v13 = vpop.f32.mrf.mxu0  ;;  %v15824_v3 = vld [vmem:[%s20646_s5 + $0x398] sm:$0xff]  }
 0x40c   : > { %21178 = vst [vmem:[#allocation31_spill] sm:$0xff] %v19014_v25  ;;  %8334 = vmatprep.mubr.bf16.mxu1 %v21179_v24  ;;  %14913 = vmatpush3.bf16.msra.mxu1 %v15806_v10  ;;  %v14307_v57 = vpop.f32.mrf.mxu1  ;;  %v14423_v58 = vadd.f32 %v14422_v13, %v14421_v16  ;;  %v15827_v10 = vld [vmem:[%s20646_s5 + $0x3d0] sm:$0xff]   ;;  %v21181_v13 = vld [vmem:[#allocation29_spill] sm:$0xff] }
 0x40d   : > { %14914 = vmatprep.subr.bf16.mxu1 %v15807_v7  ;;  %v14308_v41 = vadd.f32 %v14307_v57, %v14306_v63  ;;  %15027 = vmatpush3.bf16.msra.mxu0 %v15822_v60  ;;  %v14424_v7 = vpop.f32.mrf.mxu0  ;;  %v15810_v60 = vld [vmem:[%s20646_s5 + $0x318] sm:$0xff]   ;;  %v15811_v16 = vld [vmem:[%s20646_s5 + $0x350] sm:$0xff]  }
 0x40e   : > { %v14309_v42 = vpop.f32.mrf.mxu1  ;;  %15028 = vmatprep.subr.bf16.mxu0 %v15823_v32 }
 0x40f   : > { %v19029_v51 = vadd.f32 %v14420_v30, %v14308_v41  ;;  %13910 = vmatmul.mubr.msk.bf16.gmra.mxu0 %vm18591_vm7, %v21139_v35  ;;  %v14425_v32 = vpop.f32.mrf.mxu0 }
 0x410   : > { %14915 = vmatpush3.bf16.msra.mxu1 %v15808_v59  ;;  %v14310_v63 = vpop.f32.mrf.mxu1  ;;  %13913 = vmatprep.mubr.msk.bf16.mxu0 %vm18591_vm7, %v18416_v1  ;;  %v15828_v59 = vld [vmem:[%s20646_s5 + $0x390] sm:$0xff]   ;;  %v14426_v57 = vadd.f32 %v14425_v32, %v14424_v7 }
 0x411   : > { %21180 = vst [vmem:[#allocation38_spill] sm:$0xff] %v19029_v51  ;;  %14916 = vmatprep.subr.bf16.mxu1 %v15809_v20  ;;  %v14311_v30 = vadd.f32 %v14310_v63, %v14309_v42  ;;  %15029 = vmatpush3.bf16.msra.mxu0 %v15824_v3  ;;  %v15829_v20 = vld [vmem:[%s20646_s5 + $0x3c8] sm:$0xff]   ;;  %v14427_v35 = vpop.f32.mrf.mxu0  ;;  %v21183_v51 = vld [vmem:[#allocation17_spill] sm:$0xff]  ;;  %v15812_v3 = vld [vmem:[%s20646_s5 + $0x310] sm:$0xff]  }
 0x412   : > { %v14312_v41 = vpop.f32.mrf.mxu1  ;;  %15030 = vmatprep.subr.bf16.mxu0 %v15827_v10  ;;  %v15815_v10 = vld [vmem:[%s20646_s5 + $0x348] sm:$0xff]  }
 0x413   : > { %8335 = vmatmul.mubr.bf16.gmra.mxu1 %v21181_v13  ;;  %v19050_v1 = vadd.f32 %v14423_v58, %v14311_v30  ;;  %v14428_v63 = vpop.f32.mrf.mxu0  ;;  %v15830_v58 = vld [vmem:[%s20646_s5 + $0x388] sm:$0xff]  }
 0x414   : > { %8342 = vmatprep.mubr.bf16.mxu1 %v21183_v51  ;;  %14917 = vmatpush3.bf16.msra.mxu1 %v15810_v60  ;;  %v14313_v42 = vpop.f32.mrf.mxu1  ;;  %v14429_v30 = vadd.f32 %v14428_v63, %v14427_v35  ;;  %v15831_v60 = vld [vmem:[%s20646_s5 + $0x3c0] sm:$0xff]   ;;  %v21185_v63 = vld [vmem:[#allocation36_spill] sm:$0xff] }
 0x415   : > { %21182 = vst [vmem:[#allocation5_spill] sm:$0xff] %v19050_v1  ;;  %14918 = vmatprep.subr.bf16.mxu1 %v15811_v16  ;;  %v14314_v7 = vadd.f32 %v14313_v42, %v14312_v41  ;;  %15031 = vmatpush3.bf16.msra.mxu0 %v15828_v59  ;;  %v15816_v59 = vld [vmem:[%s20646_s5 + $0x308] sm:$0xff]   ;;  %v15825_v35 = vld [vmem:[%s20646_s5 + $0x340] sm:$0xff]  }
 0x416   : > { %v14315_v32 = vpop.f32.mrf.mxu1  ;;  %15032 = vmatprep.subr.bf16.mxu0 %v15829_v20  ;;  %v14430_v16 = vpop.f32.mrf.mxu0 }
 0x417   : > { %v19065_v1 = vadd.f32 %v14426_v57, %v14314_v7  ;;  %13916 = vmatmul.mubr.msk.bf16.gmra.mxu0 %vm18591_vm7, %v21144_v55 }
 0x418   : > { %14919 = vmatpush3.bf16.msra.mxu1 %v15812_v3  ;;  %v14316_v41 = vpop.f32.mrf.mxu1  ;;  %13919 = vmatprep.mubr.msk.bf16.mxu0 %vm18591_vm7, %v18714_v4  ;;  %v14431_v20 = vpop.f32.mrf.mxu0  ;;  %v15832_v3 = vld [vmem:[%s20646_s5 + $0x380] sm:$0xff]  }
 0x419   : > { %21184 = vst [vmem:[#allocation25_spill] sm:$0xff] %v19065_v1  ;;  %14920 = vmatprep.subr.bf16.mxu1 %v15815_v10  ;;  %v14317_v57 = vadd.f32 %v14316_v41, %v14315_v32  ;;  %15033 = vmatpush3.bf16.msra.mxu0 %v15830_v58  ;;  %v14432_v42 = vadd.f32 %v14431_v20, %v14430_v16  ;;  %v21187_v10 = vld [vmem:[#allocation44_spill] sm:$0xff]  ;;  %v15826_v32 = vld [vmem:[%s20646_s5 + $0x300] sm:$0xff]   ;;  %v15833_v16 = vld [vmem:[%s20646_s5 + $0x478] sm:$0xff]  }
 0x41a   : > { %v14318_v7 = vpop.f32.mrf.mxu1  ;;  %15034 = vmatprep.subr.bf16.mxu0 %v15831_v60  ;;  %v14433_v4 = vpop.f32.mrf.mxu0 }
 0x41b   : > { %8343 = vmatmul.mubr.bf16.gmra.mxu1 %v21185_v63  ;;  %v19083_v55 = vadd.f32 %v14429_v30, %v14317_v57 }
 0x41c   : > { %8350 = vmatprep.mubr.bf16.mxu1 %v21187_v10  ;;  %14921 = vmatpush3.bf16.msra.mxu1 %v15816_v59  ;;  %v14319_v58 = vpop.f32.mrf.mxu1  ;;  %v14434_v20 = vpop.f32.mrf.mxu0 }
 0x41d   : > { %21186 = vst [vmem:[#allocation26_spill] sm:$0xff] %v19083_v55  ;;  %14922 = vmatprep.subr.bf16.mxu1 %v15825_v35  ;;  %v14320_v41 = vadd.f32 %v14319_v58, %v14318_v7  ;;  %15035 = vmatpush3.bf16.msra.mxu0 %v15832_v3  ;;  %v14435_v60 = vadd.f32 %v14434_v20, %v14433_v4  ;;  %v21189_v4 = vld [vmem:[#allocation9_spill] sm:$0xff]  ;;  %v21191_v20 = vld [vmem:[#allocation48_spill] sm:$0xff] }
 0x41e   : > { %v14321_v30 = vpop.f32.mrf.mxu1  ;;  %v14436_v55 = vpop.f32.mrf.mxu0 }
 0x41f   : > { %v19092_v57 = vadd.f32 %v14432_v42, %v14320_v41  ;;  %13922 = vmatmul.mubr.msk.bf16.gmra.mxu0 %vm18591_vm7, %v21148_v61 }
 0x420   : > { %14923 = vmatpush3.bf16.msra.mxu1 %v15826_v32  ;;  %v14322_v59 = vpop.f32.mrf.mxu1  ;;  %13925 = vmatprep.mubr.msk.bf16.mxu0 %vm18591_vm7, %v18755_v27  ;;  %v14437_v7 = vpop.f32.mrf.mxu0 }
 0x421   : > { %21188 = vst [vmem:[#allocation29_spill] sm:$0xff] %v19092_v57  ;;  %15132 = vmatprep.subr.bf16.mxu1 %v15833_v16  ;;  %v14323_v35 = vadd.f32 %v14322_v59, %v14321_v30  ;;  %v14438_v58 = vadd.f32 %v14437_v7, %v14436_v55  ;;  %v21195_v7 = vld [vmem:[#allocation11_spill] sm:$0xff] }
 0x422   : > { %v14439_v41 = vpop.f32.mrf.mxu0 }
 0x423   : > { %v14324_v3 = vpop.f32.mrf.mxu1  ;;  %8351 = vmatmul.mubr.bf16.gmra.mxu1 %v21189_v4  ;;  %v19101_v42 = vadd.f32 %v14435_v60, %v14323_v35 }
 0x424   : > { %8358 = vmatprep.mubr.bf16.mxu1 %v21191_v20  ;;  %v14440_v32 = vpop.f32.mrf.mxu0 }
 0x425   : > { %21190 = vst [vmem:[#allocation17_spill] sm:$0xff] %v19101_v42  ;;  %v14325_v57 = vpop.f32.mrf.mxu1  ;;  %v14441_v1 = vadd.f32 %v14440_v32, %v14439_v41 }
 0x426   : > { %v14326_v61 = vadd.f32 %v14325_v57, %v14324_v3  ;;  %v14442_v27 = vpop.f32.mrf.mxu0  ;;  %v21193_v57 = vld [vmem:[#allocation47_spill] sm:$0xff] }
 0x427   : > { %v14327_v25 = vpop.f32.mrf.mxu1  ;;  %13928 = vmatmul.mubr.msk.bf16.gmra.mxu0 %vm18591_vm7, %v21154_v22 }
 0x428   : > { %v19104_v10 = vadd.f32 %v14438_v58, %v14326_v61  ;;  %13931 = vmatprep.mubr.msk.bf16.mxu0 %vm18591_vm7, %v18781_v49  ;;  %v14443_v60 = vpop.f32.mrf.mxu0 }
 0x429   : > { %v14328_v55 = vpop.f32.mrf.mxu1  ;;  %v14444_v30 = vadd.f32 %v14443_v60, %v14442_v27  ;;  %v21197_v60 = vld [vmem:[#allocation10_spill] sm:$0xff] }
 0x42a   : > { %21192 = vst [vmem:[#allocation36_spill] sm:$0xff] %v19104_v10  ;;  %v14329_v16 = vadd.f32 %v14328_v55, %v14327_v25  ;;  %v14445_v61 = vpop.f32.mrf.mxu0 }
 0x42b   : > { %v14330_v59 = vpop.f32.mrf.mxu1  ;;  %8359 = vmatmul.mubr.bf16.gmra.mxu1 %v21193_v57 }
 0x42c   : > { %v19113_v35 = vadd.f32 %v14441_v1, %v14329_v16  ;;  %8366 = vmatprep.mubr.bf16.mxu1 %v21195_v7  ;;  %v14446_v41 = vpop.f32.mrf.mxu0 }
 0x42d   : > { %v14331_v58 = vpop.f32.mrf.mxu1  ;;  %v14447_v32 = vadd.f32 %v14446_v41, %v14445_v61  ;;  %v21199_v61 = vld [vmem:[#allocation14_spill] sm:$0xff] }
 0x42e   : > { %21194 = vst [vmem:[#allocation9_spill] sm:$0xff] %v19113_v35  ;;  %v14332_v3 = vadd.f32 %v14331_v58, %v14330_v59  ;;  %v14448_v42 = vpop.f32.mrf.mxu0 }
 0x42f   : > { %v14333_v22 = vpop.f32.mrf.mxu1  ;;  %13934 = vmatmul.mubr.msk.bf16.gmra.mxu0 %vm18591_vm7, %v21160_v5 }
 0x430   : > { %v19116_v10 = vadd.f32 %v14444_v30, %v14332_v3  ;;  %13937 = vmatprep.mubr.msk.bf16.mxu0 %vm18591_vm7, %v18798_v53  ;;  %v14449_v25 = vpop.f32.mrf.mxu0 }
 0x431   : > { %v14334_v27 = vpop.f32.mrf.mxu1  ;;  %v14450_v55 = vadd.f32 %v14449_v25, %v14448_v42  ;;  %v21201_v25 = vld [vmem:[#allocation61_spill] sm:$0xff] }
 0x432   : > { %21196 = vst [vmem:[#allocation48_spill] sm:$0xff] %v19116_v10  ;;  %v14335_v1 = vadd.f32 %v14334_v27, %v14333_v22  ;;  %v14451_v30 = vpop.f32.mrf.mxu0 }
 0x433   : > { %v14336_v16 = vpop.f32.mrf.mxu1  ;;  %8367 = vmatmul.mubr.bf16.gmra.mxu1 %v21197_v60 }
 0x434   : > { %v19125_v59 = vadd.f32 %v14447_v32, %v14335_v1  ;;  %8374 = vmatprep.mubr.bf16.mxu1 %v21199_v61  ;;  %v14452_v41 = vpop.f32.mrf.mxu0 }
 0x435   : > { %v14337_v58 = vpop.f32.mrf.mxu1  ;;  %v14453_v5 = vadd.f32 %v14452_v41, %v14451_v30  ;;  %v21203_v30 = vld [vmem:[#allocation16_spill] sm:$0xff] }
 0x436   : > { %21198 = vst [vmem:[#allocation47_spill] sm:$0xff] %v19125_v59  ;;  %v14338_v3 = vadd.f32 %v14337_v58, %v14336_v16 }
 0x437   : > { %v14339_v49 = vpop.f32.mrf.mxu1  ;;  %v14454_v35 = vpop.f32.mrf.mxu0  ;;  %13940 = vmatmul.mubr.msk.bf16.gmra.mxu0 %vm18591_vm7, %v21162_v46 }
 0x438   : > { %v19128_v10 = vadd.f32 %v14450_v55, %v14338_v3  ;;  %13943 = vmatprep.mubr.msk.bf16.mxu0 %vm18591_vm7, %v18569_v12 }
 0x439   : > { %v14340_v22 = vpop.f32.mrf.mxu1  ;;  %v14455_v32 = vpop.f32.mrf.mxu0 }
 0x43a   : > { %21200 = vst [vmem:[#allocation11_spill] sm:$0xff] %v19128_v10  ;;  %v14341_v42 = vadd.f32 %v14340_v22, %v14339_v49  ;;  %v14456_v27 = vadd.f32 %v14455_v32, %v14454_v35  ;;  %v21205_v32 = vld [vmem:[#allocation33_spill] sm:$0xff] }
 0x43b   : > { %v14342_v1 = vpop.f32.mrf.mxu1  ;;  %8375 = vmatmul.mubr.bf16.gmra.mxu1 %v21201_v25  ;;  %v14457_v55 = vpop.f32.mrf.mxu0 }
 0x43c   : > { %v19137_v16 = vadd.f32 %v14453_v5, %v14341_v42  ;;  %8382 = vmatprep.mubr.bf16.mxu1 %v21203_v30 }
 0x43d   : > { %v14343_v58 = vpop.f32.mrf.mxu1  ;;  %v14458_v41 = vpop.f32.mrf.mxu0 }
 0x43e   : > { %21202 = vst [vmem:[#allocation10_spill] sm:$0xff] %v19137_v16  ;;  %v14344_v3 = vadd.f32 %v14343_v58, %v14342_v1  ;;  %v14459_v46 = vadd.f32 %v14458_v41, %v14457_v55  ;;  %v21207_v55 = vld [vmem:[#allocation74_spill] sm:$0xff] }
 0x43f   : > { %v14345_v53 = vpop.f32.mrf.mxu1  ;;  %v14588_v59 = vpop.f32.mrf.mxu0  ;;  %13946 = vmatmul.mubr.msk.bf16.gmra.mxu0 %vm18591_vm7, %v21165_v38 }
 0x440   : > { %v19140_v10 = vadd.f32 %v14456_v27, %v14344_v3  ;;  %13949 = vmatprep.mubr.msk.bf16.mxu0 %vm18591_vm7, %v18574_v19 }
 0x441   : > { %v14346_v49 = vpop.f32.mrf.mxu1  ;;  %v14589_v35 = vpop.f32.mrf.mxu0 }
 0x442   : > { %21204 = vst [vmem:[#allocation14_spill] sm:$0xff] %v19140_v10  ;;  %v14347_v5 = vadd.f32 %v14346_v49, %v14345_v53  ;;  %v14590_v22 = vadd.f32 %v14589_v35, %v14588_v59 }
 0x443   : > { %v14476_v42 = vpop.f32.mrf.mxu1  ;;  %8383 = vmatmul.mubr.bf16.gmra.mxu1 %v21205_v32  ;;  %v14591_v27 = vpop.f32.mrf.mxu0 }
 0x444   : > { %v19149_v1 = vadd.f32 %v14459_v46, %v14347_v5  ;;  %8390 = vmatprep.mubr.bf16.mxu1 %v21207_v55 }
 0x445   : > { %v14477_v58 = vpop.f32.mrf.mxu1  ;;  %v14592_v41 = vpop.f32.mrf.mxu0 }
 0x446   : > { %21206 = vst [vmem:[#allocation61_spill] sm:$0xff] %v19149_v1  ;;  %v14478_v3 = vadd.f32 %v14477_v58, %v14476_v42  ;;  %v14593_v38 = vadd.f32 %v14592_v41, %v14591_v27  ;;  %v21208_v42 = vld [vmem:[#allocation19_spill] sm:$0xff] }
 0x447   : > { %v14479_v12 = vpop.f32.mrf.mxu1  ;;  %v14594_v16 = vpop.f32.mrf.mxu0  ;;  %13952 = vmatmul.mubr.msk.bf16.gmra.mxu0 %vm18591_vm7, %v18228_v54  ;;  %v21209_v58 = vld [vmem:[#allocation83_spill] sm:$0xff] }
 0x448   : > { %v7231_v10 = vadd.f32 %v14478_v3, %v18842_v14  ;;  %13955 = vmatprep.mubr.msk.bf16.mxu0 %vm18591_vm7, %v18578_v50 }
 0x449   : > { %v14480_v53 = vpop.f32.mrf.mxu1  ;;  %v14595_v59 = vpop.f32.mrf.mxu0 }
 0x44a   : > { %v14481_v46 = vadd.f32 %v14480_v53, %v14479_v12  ;;  %v19159_v49 = vadd.f32 %v14590_v22, %v7231_v10  ;;  %v14596_v5 = vadd.f32 %v14595_v59, %v14594_v16 }
 0x44b   : > { %v14482_v35 = vpop.f32.mrf.mxu1  ;;  %8391 = vmatmul.mubr.bf16.gmra.mxu1 %v21208_v42  ;;  %v14597_v27 = vpop.f32.mrf.mxu0 }
 0x44c   : > { %v7234_v14 = vadd.f32 %v14481_v46, %v18850_v36  ;;  %8398 = vmatprep.mubr.bf16.mxu1 %v21209_v58 }
 0x44d   : > { %v14483_v3 = vpop.f32.mrf.mxu1  ;;  %v14598_v54 = vpop.f32.mrf.mxu0 }
 0x44e   : > { %v14484_v41 = vadd.f32 %v14483_v3, %v14482_v35  ;;  %v19164_v19 = vadd.f32 %v14593_v38, %v7234_v14  ;;  %v14599_v1 = vadd.f32 %v14598_v54, %v14597_v27  ;;  %v21210_v54 = vld [vmem:[#allocation56_spill] sm:$0xff]  ;;  %v21211_v35 = vld [vmem:[#allocation42_spill] sm:$0xff] }
 0x44f   : > { %v14485_v50 = vpop.f32.mrf.mxu1  ;;  %v14600_v10 = vpop.f32.mrf.mxu0  ;;  %13958 = vmatmul.mubr.msk.bf16.gmra.mxu0 %vm18591_vm7, %v21167_v44 }
 0x450   : > { %v7239_v12 = vadd.f32 %v14484_v41, %v18858_v48  ;;  %13961 = vmatprep.mubr.msk.bf16.mxu0 %vm18591_vm7, %v18596_v56 }
 0x451   : > { %v14486_v16 = vpop.f32.mrf.mxu1  ;;  %v14601_v22 = vpop.f32.mrf.mxu0 }
 0x452   : > { %v14487_v36 = vadd.f32 %v14486_v16, %v14485_v50  ;;  %v19173_v53 = vadd.f32 %v14596_v5, %v7239_v12  ;;  %v14602_v38 = vadd.f32 %v14601_v22, %v14600_v10  ;;  %v21212_v22 = vld [vmem:[#allocation40_spill] sm:$0xff] }
 0x453   : > { %v14488_v46 = vpop.f32.mrf.mxu1  ;;  %8399 = vmatmul.mubr.bf16.gmra.mxu1 %v21210_v54  ;;  %v14603_v59 = vpop.f32.mrf.mxu0 }
 0x454   : > { %v7242_v48 = vadd.f32 %v14487_v36, %v18869_v9  ;;  %8406 = vmatprep.mubr.bf16.mxu1 %v21211_v35 }
 0x455   : > { %v14489_v14 = vpop.f32.mrf.mxu1  ;;  %v14604_v3 = vpop.f32.mrf.mxu0 }
 0x456   : > { %v14490_v27 = vadd.f32 %v14489_v14, %v14488_v46  ;;  %v19178_v41 = vadd.f32 %v14599_v1, %v7242_v48  ;;  %v14605_v44 = vadd.f32 %v14604_v3, %v14603_v59  ;;  %v21213_v48 = vld [vmem:[#allocation50_spill] sm:$0xff] }
 0x457   : > { %v14491_v56 = vpop.f32.mrf.mxu1  ;;  %v14606_v5 = vpop.f32.mrf.mxu0  ;;  %13964 = vmatmul.mubr.msk.bf16.gmra.mxu0 %vm18591_vm7, %v21170_v18 }
 0x458   : > { %v7247_v50 = vadd.f32 %v14490_v27, %v18874_v0  ;;  %13967 = vmatprep.mubr.msk.bf16.mxu0 %vm18591_vm7, %v18601_v6 }
 0x459   : > { %v14492_v12 = vpop.f32.mrf.mxu1  ;;  %v14607_v10 = vpop.f32.mrf.mxu0 }
 0x45a   : > { %v14493_v9 = vadd.f32 %v14492_v12, %v14491_v56  ;;  %v19187_v16 = vadd.f32 %v14602_v38, %v7247_v50  ;;  %v14608_v1 = vadd.f32 %v14607_v10, %v14606_v5  ;;  %v21214_v10 = vld [vmem:[#allocation45_spill] sm:$0xff] }
 0x45b   : > { %v14494_v36 = vpop.f32.mrf.mxu1  ;;  %8407 = vmatmul.mubr.bf16.gmra.mxu1 %v21212_v22  ;;  %v14609_v46 = vpop.f32.mrf.mxu0 }
 0x45c   : > { %v7250_v0 = vadd.f32 %v14493_v9, %v18885_v31  ;;  %8414 = vmatprep.mubr.bf16.mxu1 %v21213_v48 }
 0x45d   : > { %v14495_v59 = vpop.f32.mrf.mxu1  ;;  %v14610_v27 = vpop.f32.mrf.mxu0 }
 0x45e   : > { %v14496_v14 = vadd.f32 %v14495_v59, %v14494_v36  ;;  %v19192_v3 = vadd.f32 %v14605_v44, %v7250_v0  ;;  %v14611_v18 = vadd.f32 %v14610_v27, %v14609_v46  ;;  %v21215_v0 = vld [vmem:[#allocation73_spill] sm:$0xff] }
 0x45f   : > { %v14497_v6 = vpop.f32.mrf.mxu1  ;;  %v14612_v38 = vpop.f32.mrf.mxu0  ;;  %13970 = vmatmul.mubr.msk.bf16.gmra.mxu0 %vm18591_vm7, %v21171_v15 }
 0x460   : > { %v7255_v56 = vadd.f32 %v14496_v14, %v18890_v29  ;;  %13973 = vmatprep.mubr.msk.bf16.mxu0 %vm18591_vm7, %v18603_v34 }
 0x461   : > { %v14498_v50 = vpop.f32.mrf.mxu1  ;;  %v14613_v5 = vpop.f32.mrf.mxu0 }
 0x462   : > { %v14499_v31 = vadd.f32 %v14498_v50, %v14497_v6  ;;  %v19201_v12 = vadd.f32 %v14608_v1, %v7255_v56  ;;  %v14614_v44 = vadd.f32 %v14613_v5, %v14612_v38  ;;  %v21216_v5 = vld [vmem:[#allocation67_spill] sm:$0xff] }
 0x463   : > { %v14500_v9 = vpop.f32.mrf.mxu1  ;;  %8415 = vmatmul.mubr.bf16.gmra.mxu1 %v21214_v10  ;;  %v14615_v36 = vpop.f32.mrf.mxu0 }
 0x464   : > { %v7258_v29 = vadd.f32 %v14499_v31, %v18904_v33  ;;  %8422 = vmatprep.mubr.bf16.mxu1 %v21215_v0 }
 0x465   : > { %v14501_v46 = vpop.f32.mrf.mxu1  ;;  %v14616_v14 = vpop.f32.mrf.mxu0 }
 0x466   : > { %v14502_v59 = vadd.f32 %v14501_v46, %v14500_v9  ;;  %v19206_v27 = vadd.f32 %v14611_v18, %v7258_v29  ;;  %v14617_v15 = vadd.f32 %v14616_v14, %v14615_v36  ;;  %v21217_v29 = vld [vmem:[#allocation66_spill] sm:$0xff] }
 0x467   : > { %v14503_v34 = vpop.f32.mrf.mxu1  ;;  %v14618_v1 = vpop.f32.mrf.mxu0  ;;  %13976 = vmatmul.mubr.msk.bf16.gmra.mxu0 %vm18591_vm7, %v21173_v47 }
 0x468   : > { %v7263_v6 = vadd.f32 %v14502_v59, %v18909_v62  ;;  %13979 = vmatprep.mubr.msk.bf16.mxu0 %vm18591_vm7, %v18605_v37 }
 0x469   : > { %v14504_v56 = vpop.f32.mrf.mxu1  ;;  %v14619_v38 = vpop.f32.mrf.mxu0 }
 0x46a   : > { %v14505_v33 = vadd.f32 %v14504_v56, %v14503_v34  ;;  %v19215_v50 = vadd.f32 %v14614_v44, %v7263_v6  ;;  %v14620_v18 = vadd.f32 %v14619_v38, %v14618_v1  ;;  %v21218_v38 = vld [vmem:[#allocation64_spill] sm:$0xff] }
 0x46b   : > { %v14506_v31 = vpop.f32.mrf.mxu1  ;;  %8423 = vmatmul.mubr.bf16.gmra.mxu1 %v21216_v5  ;;  %v14621_v9 = vpop.f32.mrf.mxu0 }
 0x46c   : > { %v7266_v62 = vadd.f32 %v14505_v33, %v18920_v11  ;;  %8430 = vmatprep.mubr.bf16.mxu1 %v21217_v29 }
 0x46d   : > { %v14507_v36 = vpop.f32.mrf.mxu1  ;;  %v14622_v59 = vpop.f32.mrf.mxu0 }
 0x46e   : > { %v14508_v46 = vadd.f32 %v14507_v36, %v14506_v31  ;;  %v19220_v14 = vadd.f32 %v14617_v15, %v7266_v62  ;;  %v14623_v47 = vadd.f32 %v14622_v59, %v14621_v9  ;;  %v21219_v62 = vld [vmem:[#allocation32_spill] sm:$0xff] }
 0x46f   : > { %v14509_v37 = vpop.f32.mrf.mxu1  ;;  %v14624_v44 = vpop.f32.mrf.mxu0  ;;  %13982 = vmatmul.mubr.msk.bf16.gmra.mxu0 %vm18591_vm7, %v21175_v43 }
 0x470   : > { %v7271_v34 = vadd.f32 %v14508_v46, %v18925_v21  ;;  %13985 = vmatprep.mubr.msk.bf16.mxu0 %vm18591_vm7, %v18611_v23 }
 0x471   : > { %v14510_v6 = vpop.f32.mrf.mxu1  ;;  %v14625_v1 = vpop.f32.mrf.mxu0 }
 0x472   : > { %v14511_v11 = vadd.f32 %v14510_v6, %v14509_v37  ;;  %v19229_v56 = vadd.f32 %v14620_v18, %v7271_v34  ;;  %v14626_v15 = vadd.f32 %v14625_v1, %v14624_v44 }
 0x473   : > { %v14512_v33 = vpop.f32.mrf.mxu1  ;;  %8431 = vmatmul.mubr.bf16.gmra.mxu1 %v21218_v38  ;;  %v14627_v31 = vpop.f32.mrf.mxu0 }
 0x474   : > { %v7274_v21 = vadd.f32 %v14511_v11, %v18936_v40  ;;  %8438 = vmatprep.mubr.bf16.mxu1 %v21219_v62 }
 0x475   : > { %v14513_v9 = vpop.f32.mrf.mxu1  ;;  %v14628_v46 = vpop.f32.mrf.mxu0 }
 0x476   : > { %v14514_v36 = vadd.f32 %v14513_v9, %v14512_v33  ;;  %v19234_v59 = vadd.f32 %v14623_v47, %v7274_v21  ;;  %v14629_v43 = vadd.f32 %v14628_v46, %v14627_v31  ;;  %v21220_v47 = vld [vmem:[#allocation72_spill] sm:$0xff] }
 0x477   : > { %v14515_v23 = vpop.f32.mrf.mxu1  ;;  %v14630_v18 = vpop.f32.mrf.mxu0  ;;  %13988 = vmatmul.mubr.msk.bf16.gmra.mxu0 %vm18591_vm7, %v18522_v52 }
 0x478   : > { %v7279_v37 = vadd.f32 %v14514_v36, %v18941_v45  ;;  %9763 = vmatprep.mubr.bf16.mxu0 %v21179_v24  ;;  %v21221_v45 = vld [vmem:[#allocation7_spill] sm:$0xff] }
 0x479   : > { %v14516_v34 = vpop.f32.mrf.mxu1  ;;  %v14631_v44 = vpop.f32.mrf.mxu0 }
 0x47a   : > { %v14517_v40 = vadd.f32 %v14516_v34, %v14515_v23  ;;  %v19241_v6 = vadd.f32 %v14626_v15, %v7279_v37  ;;  %v14632_v11 = vadd.f32 %v14631_v44, %v14630_v18  ;;  %v15835_v34 = vld [vmem:[%s20646_s5 + $0x470] sm:$0xff]  }
 0x47b   : > { %v14518_v1 = vpop.f32.mrf.mxu1  ;;  %8439 = vmatmul.mubr.bf16.gmra.mxu1 %v21220_v47  ;;  %v14633_v21 = vpop.f32.mrf.mxu0 }
 0x47c   : > { %v7282_v33 = vadd.f32 %v14517_v40, %v18950_v17  ;;  %13992 = vmatprep.mubr.msk.bf16.mxu1 %vm17694_vm6, %v21221_v45  ;;  %v15834_v17 = vld [vmem:[%s20646_s5 + $0x438] sm:$0xff]   ;;  %v21223_v45 = vld [vmem:[#allocation8_spill] sm:$0xff] }
 0x47d   : > { %v14519_v31 = vpop.f32.mrf.mxu1  ;;  %v14634_v36 = vpop.f32.mrf.mxu0 }
 0x47e   : > { %v14520_v9 = vadd.f32 %v14519_v31, %v14518_v1  ;;  %v19248_v46 = vadd.f32 %v14629_v43, %v7282_v33  ;;  %v14635_v24 = vadd.f32 %v14634_v36, %v14633_v21  ;;  %v21222_v33 = vld [vmem:[#allocation34_spill] sm:$0xff]  ;;  %v15837_v31 = vld [vmem:[%s20646_s5 + $0x468] sm:$0xff]  }
 0x47f   : > { %v14521_v23 = vpop.f32.mrf.mxu1  ;;  %v14636_v37 = vpop.f32.mrf.mxu0  ;;  %9764 = vmatmul.mubr.bf16.vlgmr.msra.gmra.mxu0 %v21181_v13 }
 0x480   : > { %v7287_v15 = vadd.f32 %v14520_v9, %v18959_v8  ;;  %9771 = vmatprep.mubr.bf16.mxu0 %v21183_v51  ;;  %v15836_v51 = vld [vmem:[%s20646_s5 + $0x430] sm:$0xff]  }
 0x481   : > { %v14522_v18 = vpop.f32.mrf.mxu1  ;;  %v14637_v40 = vpop.f32.mrf.mxu0 }
 0x482   : > { %v14523_v43 = vadd.f32 %v14522_v18, %v14521_v23  ;;  %v19259_v44 = vadd.f32 %v14632_v11, %v7287_v15  ;;  %v14638_v1 = vadd.f32 %v14637_v40, %v14636_v37  ;;  %v15838_v18 = vld [vmem:[%s20646_s5 + $0x428] sm:$0xff]  }
 0x483   : > { %v14524_v8 = vpop.f32.mrf.mxu1  ;;  %13996 = vmatmul.mubr.msk.bf16.vlgmr.msra.gmra.mxu1 %vm17694_vm6, %v21222_v33  ;;  %v14639_v21 = vpop.f32.mrf.mxu0 }
 0x484   : > { %v7290_v13 = vadd.f32 %v14523_v43, %v18978_v26  ;;  %15133 = vmatpush3.bf16.msra.mxu1 %v15834_v17  ;;  %14000 = vmatprep.mubr.msk.bf16.mxu1 %vm17694_vm6, %v21223_v45  ;;  %v21224_v43 = vld [vmem:[#allocation44_spill] sm:$0xff] }
 0x485   : > { %v14525_v11 = vpop.f32.mrf.mxu1  ;;  %15134 = vmatprep.subr.bf16.mxu1 %v15835_v34  ;;  %v14640_v36 = vpop.f32.mrf.mxu0 }
 0x486   : > { %v14526_v9 = vadd.f32 %v14525_v11, %v14524_v8  ;;  %v19274_v23 = vadd.f32 %v14635_v24, %v7290_v13  ;;  %v14641_v26 = vadd.f32 %v14640_v36, %v14639_v21  ;;  %v15839_v24 = vld [vmem:[%s20646_s5 + $0x460] sm:$0xff]   ;;  %v21226_v21 = vld [vmem:[#allocation31_spill] sm:$0xff] }
 0x487   : > { %v14527_v15 = vpop.f32.mrf.mxu1  ;;  %v14642_v17 = vpop.f32.mrf.mxu0  ;;  %9772 = vmatmul.mubr.bf16.gmra.mxu0 %v21185_v63  ;;  %v21225_v63 = vld [vmem:[#allocation39_spill] sm:$0xff]  ;;  %v21227_v11 = vld [vmem:[#allocation46_spill] sm:$0xff] }
 0x488   : > { %v7295_v37 = vadd.f32 %v14526_v9, %v18993_v2  ;;  %15135 = vmatpush3.bf16.msra.mxu1 %v15836_v51  ;;  %9779 = vmatprep.mubr.bf16.mxu0 %v21224_v43  ;;  %v15841_v9 = vld [vmem:[%s20646_s5 + $0x458] sm:$0xff]   ;;  %v21228_v43 = vld [vmem:[#allocation38_spill] sm:$0xff] }
 0x489   : > { %v14528_v34 = vpop.f32.mrf.mxu1  ;;  %15136 = vmatprep.subr.bf16.mxu1 %v15837_v31  ;;  %v14643_v8 = vpop.f32.mrf.mxu0  ;;  %v15840_v31 = vld [vmem:[%s20646_s5 + $0x420] sm:$0xff]  }
 0x48a   : > { %v14529_v40 = vadd.f32 %v14528_v34, %v14527_v15  ;;  %v19285_v33 = vadd.f32 %v14638_v1, %v7295_v37  ;;  %v14644_v2 = vadd.f32 %v14643_v8, %v14642_v17 }
 0x48b   : > { %v14530_v13 = vpop.f32.mrf.mxu1  ;;  %14004 = vmatmul.mubr.msk.bf16.gmra.mxu1 %vm17694_vm6, %v21225_v63  ;;  %v14645_v51 = vpop.f32.mrf.mxu0 }
 0x48c   : > { %v7298_v45 = vadd.f32 %v14529_v40, %v21226_v21  ;;  %14008 = vmatprep.mubr.msk.bf16.mxu1 %vm17694_vm6, %v21227_v11  ;;  %15137 = vmatpush3.bf16.msra.mxu1 %v15838_v18  ;;  %v15842_v18 = vld [vmem:[%s20646_s5 + $0x418] sm:$0xff]  }
 0x48d   : > { %v14531_v1 = vpop.f32.mrf.mxu1  ;;  %15138 = vmatprep.subr.bf16.mxu1 %v15839_v24  ;;  %v14646_v15 = vpop.f32.mrf.mxu0  ;;  %v21230_v11 = vld [vmem:[#allocation5_spill] sm:$0xff] }
 0x48e   : > { %v14532_v36 = vadd.f32 %v14531_v1, %v14530_v13  ;;  %v19300_v37 = vadd.f32 %v14641_v26, %v7298_v45  ;;  %v14647_v17 = vadd.f32 %v14646_v15, %v14645_v51  ;;  %v15843_v26 = vld [vmem:[%s20646_s5 + $0x450] sm:$0xff]  }
 0x48f   : > { %v14533_v34 = vpop.f32.mrf.mxu1  ;;  %v14648_v8 = vpop.f32.mrf.mxu0  ;;  %9780 = vmatmul.mubr.bf16.gmra.mxu0 %v21189_v4  ;;  %v21229_v4 = vld [vmem:[#allocation13_spill] sm:$0xff] }
 0x490   : > { %v7303_v40 = vadd.f32 %v14532_v36, %v21228_v43  ;;  %15139 = vmatpush3.bf16.msra.mxu1 %v15840_v31  ;;  %9787 = vmatprep.mubr.bf16.mxu0 %v21191_v20  ;;  %v21231_v36 = vld [vmem:[#allocation23_spill] sm:$0xff]  ;;  %v15844_v20 = vld [vmem:[%s20646_s5 + $0x410] sm:$0xff]  }
 0x491   : > { %v14534_v24 = vpop.f32.mrf.mxu1  ;;  %15140 = vmatprep.subr.bf16.mxu1 %v15841_v9  ;;  %v14649_v63 = vpop.f32.mrf.mxu0  ;;  %v15845_v9 = vld [vmem:[%s20646_s5 + $0x448] sm:$0xff]  }
 0x492   : > { %v14535_v13 = vadd.f32 %v14534_v24, %v14533_v34  ;;  %v19311_v21 = vadd.f32 %v14644_v2, %v7303_v40  ;;  %v14650_v45 = vadd.f32 %v14649_v63, %v14648_v8  ;;  %v21232_v24 = vld [vmem:[#allocation25_spill] sm:$0xff] }
 0x493   : > { %v14536_v51 = vpop.f32.mrf.mxu1  ;;  %14012 = vmatmul.mubr.msk.bf16.gmra.mxu1 %vm17694_vm6, %v21229_v4  ;;  %v14651_v1 = vpop.f32.mrf.mxu0 }
 0x494   : > { %v7306_v31 = vadd.f32 %v14535_v13, %v21230_v11  ;;  %14016 = vmatprep.mubr.msk.bf16.mxu1 %vm17694_vm6, %v21231_v36  ;;  %15141 = vmatpush3.bf16.msra.mxu1 %v15842_v18  ;;  %v15846_v18 = vld [vmem:[%s20646_s5 + $0x408] sm:$0xff]   ;;  %v21234_v36 = vld [vmem:[#allocation26_spill] sm:$0xff] }
 0x495   : > { %v14537_v2 = vpop.f32.mrf.mxu1  ;;  %15142 = vmatprep.subr.bf16.mxu1 %v15843_v26  ;;  %v14652_v34 = vpop.f32.mrf.mxu0 }
 0x496   : > { %v14538_v15 = vadd.f32 %v14537_v2, %v14536_v51  ;;  %v19326_v43 = vadd.f32 %v14647_v17, %v7306_v31  ;;  %v14653_v40 = vadd.f32 %v14652_v34, %v14651_v1  ;;  %v15847_v17 = vld [vmem:[%s20646_s5 + $0x440] sm:$0xff]  }
 0x497   : > { %v14539_v8 = vpop.f32.mrf.mxu1  ;;  %v14654_v63 = vpop.f32.mrf.mxu0  ;;  %9788 = vmatmul.mubr.bf16.gmra.mxu0 %v21193_v57  ;;  %v21233_v57 = vld [vmem:[#allocation28_spill] sm:$0xff] }
 0x498   : > { %v7311_v13 = vadd.f32 %v14538_v15, %v21232_v24  ;;  %15143 = vmatpush3.bf16.msra.mxu1 %v15844_v20  ;;  %9795 = vmatprep.mubr.bf16.mxu0 %v21195_v7  ;;  %v21235_v15 = vld [vmem:[#allocation12_spill] sm:$0xff]  ;;  %v15848_v7 = vld [vmem:[%s20646_s5 + $0x400] sm:$0xff]  }
 0x499   : > { %v14540_v26 = vpop.f32.mrf.mxu1  ;;  %15144 = vmatprep.subr.bf16.mxu1 %v15845_v9  ;;  %v14655_v4 = vpop.f32.mrf.mxu0 }
 0x49a   : > { %v14541_v51 = vadd.f32 %v14540_v26, %v14539_v8  ;;  %v19337_v11 = vadd.f32 %v14650_v45, %v7311_v13  ;;  %v14656_v31 = vadd.f32 %v14655_v4, %v14654_v63  ;;  %v21236_v63 = vld [vmem:[#allocation29_spill] sm:$0xff] }
 0x49b   : > { %v14542_v1 = vpop.f32.mrf.mxu1  ;;  %14020 = vmatmul.mubr.msk.bf16.gmra.mxu1 %vm17694_vm6, %v21233_v57  ;;  %v14657_v2 = vpop.f32.mrf.mxu0 }
 0x49c   : > { %v7314_v20 = vadd.f32 %v14541_v51, %v21234_v36  ;;  %14024 = vmatprep.mubr.msk.bf16.mxu1 %vm17694_vm6, %v21235_v15  ;;  %15145 = vmatpush3.bf16.msra.mxu1 %v15846_v18  ;;  %v21237_v15 = vld [vmem:[#allocation30_spill] sm:$0xff] }
 0x49d   : > { %v14543_v45 = vpop.f32.mrf.mxu1  ;;  %15146 = vmatprep.subr.bf16.mxu1 %v15847_v17  ;;  %v14658_v34 = vpop.f32.mrf.mxu0 }
 0x49e   : > { %v14544_v9 = vadd.f32 %v14543_v45, %v14542_v1  ;;  %v19349_v8 = vadd.f32 %v14653_v40, %v7314_v20  ;;  %v14659_v24 = vadd.f32 %v14658_v34, %v14657_v2  ;;  %v21238_v40 = vld [vmem:[#allocation17_spill] sm:$0xff]  ;;  %v21239_v45 = vld [vmem:[#allocation43_spill] sm:$0xff] }
 0x49f   : > { %v14545_v13 = vpop.f32.mrf.mxu1  ;;  %v14660_v51 = vpop.f32.mrf.mxu0  ;;  %9796 = vmatmul.mubr.bf16.gmra.mxu0 %v21197_v60 }
 0x4a0   : > { %v7319_v26 = vadd.f32 %v14544_v9, %v21236_v63  ;;  %15147 = vmatpush3.bf16.msra.mxu1 %v15848_v7  ;;  %9803 = vmatprep.mubr.bf16.mxu0 %v21199_v61 }
 0x4a1   : > { %v14546_v4 = vpop.f32.mrf.mxu1  ;;  %v14661_v57 = vpop.f32.mrf.mxu0 }
 0x4a2   : > { %v14547_v18 = vadd.f32 %v14546_v4, %v14545_v13  ;;  %v19354_v36 = vadd.f32 %v14656_v31, %v7319_v26  ;;  %v14662_v17 = vadd.f32 %v14661_v57, %v14660_v51  ;;  %v21240_v13 = vld [vmem:[#allocation36_spill] sm:$0xff] }
 0x4a3   : > { %v14548_v1 = vpop.f32.mrf.mxu1  ;;  %14028 = vmatmul.mubr.msk.bf16.gmra.mxu1 %vm17694_vm6, %v21237_v15  ;;  %v14663_v2 = vpop.f32.mrf.mxu0 }
 0x4a4   : > { %v7322_v20 = vadd.f32 %v14547_v18, %v21238_v40  ;;  %14032 = vmatprep.mubr.msk.bf16.mxu1 %vm17694_vm6, %v21239_v45  ;;  %v21243_v45 = vld [vmem:[#allocation52_spill] sm:$0xff] }
 0x4a5   : > { %v14549_v60 = vpop.f32.mrf.mxu1  ;;  %v14664_v61 = vpop.f32.mrf.mxu0 }
 0x4a6   : > { %v14550_v7 = vadd.f32 %v14549_v60, %v14548_v1  ;;  %v19363_v9 = vadd.f32 %v14659_v24, %v7322_v20  ;;  %v14665_v31 = vadd.f32 %v14664_v61, %v14663_v2  ;;  %v21241_v1 = vld [vmem:[#allocation15_spill] sm:$0xff]  ;;  %v21242_v24 = vld [vmem:[#allocation9_spill] sm:$0xff] }
 0x4a7   : > { %v14551_v34 = vpop.f32.mrf.mxu1  ;;  %v14666_v26 = vpop.f32.mrf.mxu0  ;;  %9804 = vmatmul.mubr.bf16.gmra.mxu0 %v21201_v25 }
 0x4a8   : > { %v7327_v63 = vadd.f32 %v14550_v7, %v21240_v13  ;;  %9811 = vmatprep.mubr.bf16.mxu0 %v21203_v30 }
 0x4a9   : > { %v14552_v51 = vpop.f32.mrf.mxu1  ;;  %v14667_v18 = vpop.f32.mrf.mxu0 }
 0x4aa   : > { %v14553_v4 = vadd.f32 %v14552_v51, %v14551_v34  ;;  %v19368_v57 = vadd.f32 %v14662_v17, %v7327_v63  ;;  %v14668_v15 = vadd.f32 %v14667_v18, %v14666_v26  ;;  %v21244_v34 = vld [vmem:[#allocation48_spill] sm:$0xff] }
 0x4ab   : > { %v14554_v40 = vpop.f32.mrf.mxu1  ;;  %14036 = vmatmul.mubr.msk.bf16.gmra.mxu1 %vm17694_vm6, %v21241_v1  ;;  %v14669_v2 = vpop.f32.mrf.mxu0 }
 0x4ac   : > { %v7330_v20 = vadd.f32 %v14553_v4, %v21242_v24  ;;  %14040 = vmatprep.mubr.msk.bf16.mxu1 %vm17694_vm6, %v21243_v45  ;;  %v21247_v45 = vld [vmem:[#allocation77_spill] sm:$0xff] }
 0x4ad   : > { %v14555_v25 = vpop.f32.mrf.mxu1  ;;  %v14670_v30 = vpop.f32.mrf.mxu0 }
 0x4ae   : > { %v14556_v60 = vadd.f32 %v14555_v25, %v14554_v40  ;;  %v19377_v7 = vadd.f32 %v14665_v31, %v7330_v20  ;;  %v14671_v17 = vadd.f32 %v14670_v30, %v14669_v2  ;;  %v21245_v40 = vld [vmem:[#allocation71_spill] sm:$0xff] }
 0x4af   : > { %v14557_v61 = vpop.f32.mrf.mxu1  ;;  %v14672_v63 = vpop.f32.mrf.mxu0  ;;  %9812 = vmatmul.mubr.bf16.gmra.mxu0 %v21205_v32  ;;  %v21246_v31 = vld [vmem:[#allocation47_spill] sm:$0xff] }
 0x4b0   : > { %v7335_v13 = vadd.f32 %v14556_v60, %v21244_v34  ;;  %9819 = vmatprep.mubr.bf16.mxu0 %v21207_v55 }
 0x4b1   : > { %v14558_v26 = vpop.f32.mrf.mxu1  ;;  %v14673_v4 = vpop.f32.mrf.mxu0 }
 0x4b2   : > { %v14559_v51 = vadd.f32 %v14558_v26, %v14557_v61  ;;  %v19382_v18 = vadd.f32 %v14668_v15, %v7335_v13  ;;  %v14674_v1 = vadd.f32 %v14673_v4, %v14672_v63  ;;  %v21248_v61 = vld [vmem:[#allocation11_spill] sm:$0xff] }
 0x4b3   : > { %v14560_v24 = vpop.f32.mrf.mxu1  ;;  %14044 = vmatmul.mubr.msk.bf16.gmra.mxu1 %vm17694_vm6, %v21245_v40  ;;  %v14675_v2 = vpop.f32.mrf.mxu0 }
 0x4b4   : > { %v7338_v20 = vadd.f32 %v14559_v51, %v21246_v31  ;;  %14048 = vmatprep.mubr.msk.bf16.mxu1 %vm17694_vm6, %v21247_v45  ;;  %v21251_v45 = vld [vmem:[#allocation86_spill] sm:$0xff] }
 0x4b5   : > { %v14561_v32 = vpop.f32.mrf.mxu1  ;;  %v14676_v55 = vpop.f32.mrf.mxu0 }
 0x4b6   : > { %v14562_v25 = vadd.f32 %v14561_v32, %v14560_v24  ;;  %v19391_v60 = vadd.f32 %v14671_v17, %v7338_v20  ;;  %v14677_v15 = vadd.f32 %v14676_v55, %v14675_v2  ;;  %v21249_v24 = vld [vmem:[#allocation20_spill] sm:$0xff]  ;;  %v21250_v17 = vld [vmem:[#allocation10_spill] sm:$0xff] }
 0x4b7   : > { %v14563_v30 = vpop.f32.mrf.mxu1  ;;  %v14678_v13 = vpop.f32.mrf.mxu0  ;;  %9820 = vmatmul.mubr.bf16.gmra.mxu0 %v21208_v42 }
 0x4b8   : > { %v7343_v34 = vadd.f32 %v14562_v25, %v21248_v61  ;;  %9827 = vmatprep.mubr.bf16.mxu0 %v21209_v58 }
 0x4b9   : > { %v14564_v63 = vpop.f32.mrf.mxu1  ;;  %v14679_v51 = vpop.f32.mrf.mxu0 }
 0x4ba   : > { %v14565_v26 = vadd.f32 %v14564_v63, %v14563_v30  ;;  %v19396_v4 = vadd.f32 %v14674_v1, %v7343_v34  ;;  %v14680_v40 = vadd.f32 %v14679_v51, %v14678_v13  ;;  %v21252_v30 = vld [vmem:[#allocation14_spill] sm:$0xff] }
 0x4bb   : > { %v14566_v31 = vpop.f32.mrf.mxu1  ;;  %14052 = vmatmul.mubr.msk.bf16.gmra.mxu1 %vm17694_vm6, %v21249_v24  ;;  %v14681_v2 = vpop.f32.mrf.mxu0 }
 0x4bc   : > { %v7346_v20 = vadd.f32 %v14565_v26, %v21250_v17  ;;  %14056 = vmatprep.mubr.msk.bf16.mxu1 %vm17694_vm6, %v21251_v45  ;;  %v21255_v45 = vld [vmem:[#allocation93_spill] sm:$0xff] }
 0x4bd   : > { %v14567_v42 = vpop.f32.mrf.mxu1  ;;  %v14682_v58 = vpop.f32.mrf.mxu0 }
 0x4be   : > { %v14568_v32 = vadd.f32 %v14567_v42, %v14566_v31  ;;  %v19405_v25 = vadd.f32 %v14677_v15, %v7346_v20  ;;  %v14683_v1 = vadd.f32 %v14682_v58, %v14681_v2  ;;  %v21253_v31 = vld [vmem:[#allocation21_spill] sm:$0xff] }
 0x4bf   : > { %v14569_v55 = vpop.f32.mrf.mxu1  ;;  %v14812_v34 = vpop.f32.mrf.mxu0  ;;  %9828 = vmatmul.mubr.bf16.gmra.mxu0 %v21210_v54  ;;  %v21254_v15 = vld [vmem:[#allocation61_spill] sm:$0xff] }
 0x4c0   : > { %v7351_v61 = vadd.f32 %v14568_v32, %v21252_v30  ;;  %9835 = vmatprep.mubr.bf16.mxu0 %v21211_v35 }
 0x4c1   : > { %v14570_v13 = vpop.f32.mrf.mxu1  ;;  %v14813_v26 = vpop.f32.mrf.mxu0 }
 0x4c2   : > { %v14571_v63 = vadd.f32 %v14570_v13, %v14569_v55  ;;  %v19410_v51 = vadd.f32 %v14680_v40, %v7351_v61  ;;  %v14814_v24 = vadd.f32 %v14813_v26, %v14812_v34 }
 0x4c3   : > { %v14700_v17 = vpop.f32.mrf.mxu1  ;;  %14060 = vmatmul.mubr.msk.bf16.gmra.mxu1 %vm17694_vm6, %v21253_v31  ;;  %v14815_v2 = vpop.f32.mrf.mxu0 }
 0x4c4   : > { %v7354_v20 = vadd.f32 %v14571_v63, %v21254_v15  ;;  %14064 = vmatprep.mubr.msk.bf16.mxu1 %vm17694_vm6, %v21255_v45 }
 0x4c5   : > { %v14701_v54 = vpop.f32.mrf.mxu1  ;;  %v14816_v35 = vpop.f32.mrf.mxu0 }
 0x4c6   : > { %v14702_v42 = vadd.f32 %v14701_v54, %v14700_v17  ;;  %v19419_v32 = vadd.f32 %v14683_v1, %v7354_v20  ;;  %v14817_v40 = vadd.f32 %v14816_v35, %v14815_v2  ;;  %v21257_v17 = vld [vmem:[#allocation4_spill] sm:$0xff] }
 0x4c7   : > { %v14703_v58 = vpop.f32.mrf.mxu1  ;;  %v14818_v30 = vpop.f32.mrf.mxu0  ;;  %9836 = vmatmul.mubr.bf16.gmra.mxu0 %v21212_v22 }
 0x4c8   : > { %v8321_v55 = vadd.f32 %v14702_v42, %v19159_v49  ;;  %9843 = vmatprep.mubr.bf16.mxu0 %v21213_v48  ;;  %v21258_v49 = vld [vmem:[#allocation53_spill] sm:$0xff] }
 0x4c9   : > { %v14704_v61 = vpop.f32.mrf.mxu1  ;;  %v14819_v63 = vpop.f32.mrf.mxu0 }
 0x4ca   : > { %v19424_v34 = vadd.f32 %v14814_v24, %v8321_v55  ;;  %v14705_v13 = vadd.f32 %v14704_v61, %v14703_v58  ;;  %v14820_v26 = vadd.f32 %v14819_v63, %v14818_v30 }
 0x4cb   : > { %v14706_v31 = vpop.f32.mrf.mxu1  ;;  %14068 = vmatmul.mubr.msk.bf16.gmra.mxu1 %vm17694_vm6, %v21257_v17  ;;  %v14821_v15 = vpop.f32.mrf.mxu0 }
 0x4cc   : > { %21256 = vst [vmem:[#allocation16_spill] sm:$0xff] %v19424_v34  ;;  %v8324_v1 = vadd.f32 %v14705_v13, %v19164_v19  ;;  %14072 = vmatprep.mubr.msk.bf16.mxu1 %vm17694_vm6, %v21258_v49 }
 0x4cd   : > { %v14707_v22 = vpop.f32.mrf.mxu1  ;;  %v14822_v24 = vpop.f32.mrf.mxu0 }
 0x4ce   : > { %v19433_v20 = vadd.f32 %v14817_v40, %v8324_v1  ;;  %v14708_v48 = vadd.f32 %v14707_v22, %v14706_v31  ;;  %v14823_v2 = vadd.f32 %v14822_v24, %v14821_v15  ;;  %v21261_v40 = vld [vmem:[#allocation54_spill] sm:$0xff] }
 0x4cf   : > { %v14709_v45 = vpop.f32.mrf.mxu1  ;;  %v14824_v42 = vpop.f32.mrf.mxu0  ;;  %9844 = vmatmul.mubr.bf16.gmra.mxu0 %v21214_v10 }
 0x4d0   : > { %21259 = vst [vmem:[#allocation33_spill] sm:$0xff] %v19433_v20  ;;  %v8329_v54 = vadd.f32 %v14708_v48, %v19173_v53  ;;  %9851 = vmatprep.mubr.bf16.mxu0 %v21215_v0  ;;  %v21262_v53 = vld [vmem:[#allocation59_spill] sm:$0xff] }
 0x4d1   : > { %v14710_v35 = vpop.f32.mrf.mxu1  ;;  %v14825_v55 = vpop.f32.mrf.mxu0 }
 0x4d2   : > { %v19438_v19 = vadd.f32 %v14820_v26, %v8329_v54  ;;  %v14711_v58 = vadd.f32 %v14710_v35, %v14709_v45  ;;  %v14826_v30 = vadd.f32 %v14825_v55, %v14824_v42 }
 0x4d3   : > { %v14712_v61 = vpop.f32.mrf.mxu1  ;;  %14076 = vmatmul.mubr.msk.bf16.gmra.mxu1 %vm17694_vm6, %v21261_v40  ;;  %v14827_v63 = vpop.f32.mrf.mxu0 }
 0x4d4   : > { %21260 = vst [vmem:[#allocation74_spill] sm:$0xff] %v19438_v19  ;;  %v8332_v13 = vadd.f32 %v14711_v58, %v19178_v41  ;;  %14080 = vmatprep.mubr.msk.bf16.mxu1 %vm17694_vm6, %v21262_v53 }
 0x4d5   : > { %v14713_v10 = vpop.f32.mrf.mxu1  ;;  %v14828_v26 = vpop.f32.mrf.mxu0 }
 0x4d6   : > { %v19447_v31 = vadd.f32 %v14823_v2, %v8332_v13  ;;  %v14714_v0 = vadd.f32 %v14713_v10, %v14712_v61  ;;  %v14829_v17 = vadd.f32 %v14828_v26, %v14827_v63  ;;  %v21265_v2 = vld [vmem:[#allocation60_spill] sm:$0xff] }
 0x4d7   : > { %v14715_v1 = vpop.f32.mrf.mxu1  ;;  %v14830_v49 = vpop.f32.mrf.mxu0  ;;  %9852 = vmatmul.mubr.bf16.gmra.mxu0 %v21216_v5 }
 0x4d8   : > { %21263 = vst [vmem:[#allocation19_spill] sm:$0xff] %v19447_v31  ;;  %v8337_v15 = vadd.f32 %v14714_v0, %v19187_v16  ;;  %9859 = vmatprep.mubr.bf16.mxu0 %v21217_v29  ;;  %v21266_v16 = vld [vmem:[#allocation69_spill] sm:$0xff] }
 0x4d9   : > { %v14716_v22 = vpop.f32.mrf.mxu1  ;;  %v14831_v24 = vpop.f32.mrf.mxu0 }
 0x4da   : > { %v19452_v41 = vadd.f32 %v14826_v30, %v8337_v15  ;;  %v14717_v48 = vadd.f32 %v14716_v22, %v14715_v1  ;;  %v14832_v45 = vadd.f32 %v14831_v24, %v14830_v49 }
 0x4db   : > { %v14718_v54 = vpop.f32.mrf.mxu1  ;;  %14084 = vmatmul.mubr.msk.bf16.gmra.mxu1 %vm17694_vm6, %v21265_v2  ;;  %v14833_v35 = vpop.f32.mrf.mxu0 }
 0x4dc   : > { %21264 = vst [vmem:[#allocation83_spill] sm:$0xff] %v19452_v41  ;;  %v8340_v42 = vadd.f32 %v14717_v48, %v19192_v3  ;;  %14088 = vmatprep.mubr.msk.bf16.mxu1 %vm17694_vm6, %v21266_v16 }
 0x4dd   : > { %v14719_v5 = vpop.f32.mrf.mxu1  ;;  %v14834_v55 = vpop.f32.mrf.mxu0 }
 0x4de   : > { %v19461_v58 = vadd.f32 %v14829_v17, %v8340_v42  ;;  %v14720_v29 = vadd.f32 %v14719_v5, %v14718_v54  ;;  %v14835_v30 = vadd.f32 %v14834_v55, %v14833_v35  ;;  %v21269_v17 = vld [vmem:[#allocation70_spill] sm:$0xff]  ;;  %v21274_v55 = vld [vmem:[#allocation79_spill] sm:$0xff] }
 0x4df   : > { %v14721_v61 = vpop.f32.mrf.mxu1  ;;  %v14836_v13 = vpop.f32.mrf.mxu0  ;;  %9860 = vmatmul.mubr.bf16.gmra.mxu0 %v21218_v38  ;;  %v21272_v42 = vld [vmem:[#allocation78_spill] sm:$0xff] }
 0x4e0   : > { %21267 = vst [vmem:[#allocation56_spill] sm:$0xff] %v19461_v58  ;;  %v8345_v40 = vadd.f32 %v14720_v29, %v19201_v12  ;;  %9867 = vmatprep.mubr.bf16.mxu0 %v21219_v62  ;;  %v21270_v12 = vld [vmem:[#allocation75_spill] sm:$0xff] }
 0x4e1   : > { %v14722_v63 = vpop.f32.mrf.mxu1  ;;  %v14837_v10 = vpop.f32.mrf.mxu0 }
 0x4e2   : > { %v19466_v3 = vadd.f32 %v14832_v45, %v8345_v40  ;;  %v14723_v53 = vadd.f32 %v14722_v63, %v14721_v61  ;;  %v14838_v0 = vadd.f32 %v14837_v10, %v14836_v13 }
 0x4e3   : > { %v14724_v26 = vpop.f32.mrf.mxu1  ;;  %14092 = vmatmul.mubr.msk.bf16.gmra.mxu1 %vm17694_vm6, %v21269_v17  ;;  %v14839_v15 = vpop.f32.mrf.mxu0  ;;  %v21277_v17 = vld [vmem:[#allocation76_spill] sm:$0xff] }
 0x4e4   : > { %21268 = vst [vmem:[#allocation42_spill] sm:$0xff] %v19466_v3  ;;  %v8348_v1 = vadd.f32 %v14723_v53, %v19206_v27  ;;  %14096 = vmatprep.mubr.msk.bf16.mxu1 %vm17694_vm6, %v21270_v12 }
 0x4e5   : > { %v14725_v38 = vpop.f32.mrf.mxu1  ;;  %v14840_v22 = vpop.f32.mrf.mxu0 }
 0x4e6   : > { %v19475_v49 = vadd.f32 %v14835_v30, %v8348_v1  ;;  %v14726_v62 = vadd.f32 %v14725_v38, %v14724_v26  ;;  %v14841_v48 = vadd.f32 %v14840_v22, %v14839_v15  ;;  %v21278_v15 = vld [vmem:[#allocation35_spill] sm:$0xff] }
 0x4e7   : > { %v14727_v24 = vpop.f32.mrf.mxu1  ;;  %v14842_v54 = vpop.f32.mrf.mxu0  ;;  %9868 = vmatmul.mubr.bf16.gmra.mxu0 %v21220_v47 }
 0x4e8   : > { %21271 = vst [vmem:[#allocation40_spill] sm:$0xff] %v19475_v49  ;;  %v8353_v45 = vadd.f32 %v14726_v62, %v19215_v50  ;;  %9875 = vmatprep.mubr.bf16.mxu0 %v21272_v42  ;;  %v21275_v50 = vld [vmem:[#allocation84_spill] sm:$0xff] }
 0x4e9   : > { %v14728_v2 = vpop.f32.mrf.mxu1  ;;  %v14843_v16 = vpop.f32.mrf.mxu0 }
 0x4ea   : > { %v19480_v27 = vadd.f32 %v14838_v0, %v8353_v45  ;;  %v14729_v35 = vadd.f32 %v14728_v2, %v14727_v24  ;;  %v14844_v5 = vadd.f32 %v14843_v16, %v14842_v54 }
 0x4eb   : > { %v14730_v29 = vpop.f32.mrf.mxu1  ;;  %14100 = vmatmul.mubr.msk.bf16.gmra.mxu1 %vm17694_vm6, %v21274_v55  ;;  %v14845_v61 = vpop.f32.mrf.mxu0  ;;  %v21282_v55 = vld [vmem:[#allocation97_spill] sm:$0xff] }
 0x4ec   : > { %21273 = vst [vmem:[#allocation50_spill] sm:$0xff] %v19480_v27  ;;  %v8356_v30 = vadd.f32 %v14729_v35, %v19220_v14  ;;  %14104 = vmatprep.mubr.msk.bf16.mxu1 %vm17694_vm6, %v21275_v50 }
 0x4ed   : > { %v14731_v47 = vpop.f32.mrf.mxu1  ;;  %v14846_v63 = vpop.f32.mrf.mxu0 }
 0x4ee   : > { %v19489_v40 = vadd.f32 %v14841_v48, %v8356_v30  ;;  %v14732_v13 = vadd.f32 %v14731_v47, %v14730_v29  ;;  %v14847_v53 = vadd.f32 %v14846_v63, %v14845_v61  ;;  %v21280_v48 = vld [vmem:[#allocation81_spill] sm:$0xff] }
 0x4ef   : > { %v14733_v10 = vpop.f32.mrf.mxu1  ;;  %v14848_v26 = vpop.f32.mrf.mxu0  ;;  %9876 = vmatmul.mubr.bf16.gmra.mxu0 %v21277_v17 }
 0x4f0   : > { %21276 = vst [vmem:[#allocation45_spill] sm:$0xff] %v19489_v40  ;;  %v8361_v0 = vadd.f32 %v14732_v13, %v19229_v56  ;;  %9883 = vmatprep.mubr.bf16.mxu0 %v21278_v15 }
 0x4f1   : > { %v14734_v1 = vpop.f32.mrf.mxu1  ;;  %v14849_v38 = vpop.f32.mrf.mxu0 }
 0x4f2   : > { %v19494_v14 = vadd.f32 %v14844_v5, %v8361_v0  ;;  %v14735_v12 = vadd.f32 %v14734_v1, %v14733_v10  ;;  %v14850_v62 = vadd.f32 %v14849_v38, %v14848_v26 }
 0x4f3   : > { %v14736_v22 = vpop.f32.mrf.mxu1  ;;  %14108 = vmatmul.mubr.msk.bf16.gmra.mxu1 %vm17694_vm6, %v21280_v48  ;;  %v14851_v45 = vpop.f32.mrf.mxu0 }
 0x4f4   : > { %21279 = vst [vmem:[#allocation73_spill] sm:$0xff] %v19494_v14  ;;  %v8364_v24 = vadd.f32 %v14735_v12, %v19234_v59  ;;  %9722 = vmatprep.mubr.bf16.mxu1 %v21278_v15 }
 0x4f5   : > { %v14737_v56 = vpop.f32.mrf.mxu1  ;;  %v14852_v42 = vpop.f32.mrf.mxu0 }
 0x4f6   : > { %v19501_v54 = vadd.f32 %v14847_v53, %v8364_v24  ;;  %v14738_v2 = vadd.f32 %v14737_v56, %v14736_v22  ;;  %v14853_v35 = vadd.f32 %v14852_v42, %v14851_v45  ;;  %v21284_v53 = vld [vmem:[#allocation80_spill] sm:$0xff]  ;;  %v21287_v56 = vld [vmem:[#allocation6_spill] sm:$0xff] }
 0x4f7   : > { %v14739_v16 = vpop.f32.mrf.mxu1  ;;  %v14854_v29 = vpop.f32.mrf.mxu0  ;;  %9884 = vmatmul.mubr.bf16.gmra.mxu0 %v21282_v55 }
 0x4f8   : > { %21281 = vst [vmem:[#allocation67_spill] sm:$0xff] %v19501_v54  ;;  %v8369_v5 = vadd.f32 %v14738_v2, %v19241_v6 }
 0x4f9   : > { %v14740_v30 = vpop.f32.mrf.mxu1  ;;  %v14855_v59 = vpop.f32.mrf.mxu0 }
 0x4fa   : > { %v19505_v39 = vadd.f32 %v14850_v62, %v8369_v5  ;;  %v14741_v61 = vadd.f32 %v14740_v30, %v14739_v16  ;;  %v14856_v50 = vadd.f32 %v14855_v59, %v14854_v29 }
 0x4fb   : > { %v14742_v47 = vpop.f32.mrf.mxu1  ;;  %9723 = vmatmul.mubr.bf16.gmra.mxu1 %v21282_v55  ;;  %v14857_v63 = vpop.f32.mrf.mxu0 }
 0x4fc   : > { %21283 = vst [vmem:[#allocation66_spill] sm:$0xff] %v19505_v39  ;;  %v8372_v13 = vadd.f32 %v14741_v61, %v19248_v46  ;;  %14111 = vmatprep.mubr.msk.bf16.mxu1 %vm18591_vm7, %v21284_v53 }
 0x4fd   : > { %v14743_v6 = vpop.f32.mrf.mxu1  ;;  %v14858_v26 = vpop.f32.mrf.mxu0 }
 0x4fe   : > { %v19512_v10 = vadd.f32 %v14853_v35, %v8372_v13  ;;  %v14744_v0 = vadd.f32 %v14743_v6, %v14742_v47  ;;  %v14859_v17 = vadd.f32 %v14858_v26, %v14857_v63  ;;  %v21288_v35 = vld [vmem:[#allocation55_spill] sm:$0xff] }
 0x4ff   : > { %v14745_v1 = vpop.f32.mrf.mxu1  ;;  %v14860_v38 = vpop.f32.mrf.mxu0 }
 0x500   : > { %21285 = vst [vmem:[#allocation64_spill] sm:$0xff] %v19512_v10  ;;  %v8377_v12 = vadd.f32 %v14744_v0, %v19259_v44  ;;  %v21291_v0 = vld [vmem:[#allocation22_spill] sm:$0xff] }
 0x501   : > { %v14746_v62 = vpop.f32.mrf.mxu1  ;;  %v14861_v46 = vpop.f32.mrf.mxu0 }
 0x502   : > { %v19515_v22 = vadd.f32 %v14856_v50, %v8377_v12  ;;  %v14747_v48 = vadd.f32 %v14746_v62, %v14745_v1  ;;  %v14862_v24 = vadd.f32 %v14861_v46, %v14860_v38  ;;  %v21292_v1 = vld [vmem:[#allocation41_spill] sm:$0xff] }
 0x503   : > { %v14748_v45 = vpop.f32.mrf.mxu1  ;;  %14114 = vmatmul.mubr.msk.bf16.vlgmr.msra.gmra.mxu1 %vm18591_vm7, %v21287_v56  ;;  %v14863_v42 = vpop.f32.mrf.mxu0 }
 0x504   : > { %21286 = vst [vmem:[#allocation32_spill] sm:$0xff] %v19515_v22  ;;  %v8380_v2 = vadd.f32 %v14747_v48, %v19274_v23  ;;  %14117 = vmatprep.mubr.msk.bf16.mxu1 %vm18591_vm7, %v21288_v35 }
 0x505   : > { %v14749_v44 = vpop.f32.mrf.mxu1  ;;  %v14864_v29 = vpop.f32.mrf.mxu0 }
 0x506   : > { %v19524_v16 = vadd.f32 %v14859_v17, %v8380_v2  ;;  %v14750_v5 = vadd.f32 %v14749_v44, %v14748_v45  ;;  %v14865_v30 = vadd.f32 %v14864_v29, %v14863_v42 }
 0x507   : > { %v14751_v61 = vpop.f32.mrf.mxu1  ;;  %v14866_v50 = vpop.f32.mrf.mxu0 }
 0x508   : > { %21289 = vst [vmem:[#allocation72_spill] sm:$0xff] %v19524_v16  ;;  %v8385_v59 = vadd.f32 %v14750_v5, %v19285_v33  ;;  %v21295_v5 = vld [vmem:[#allocation24_spill] sm:$0xff] }
 0x509   : > { %v14752_v47 = vpop.f32.mrf.mxu1  ;;  %v14867_v23 = vpop.f32.mrf.mxu0 }
 0x50a   : > { %v19527_v13 = vadd.f32 %v14862_v24, %v8385_v59  ;;  %v14753_v63 = vadd.f32 %v14752_v47, %v14751_v61  ;;  %v14868_v53 = vadd.f32 %v14867_v23, %v14866_v50  ;;  %v21296_v61 = vld [vmem:[#allocation99_spill] sm:$0xff] }
 0x50b   : > { %v14754_v6 = vpop.f32.mrf.mxu1  ;;  %14120 = vmatmul.mubr.msk.bf16.gmra.mxu1 %vm18591_vm7, %v21291_v0  ;;  %v14869_v17 = vpop.f32.mrf.mxu0 }
 0x50c   : > { %21290 = vst [vmem:[#allocation7_spill] sm:$0xff] %v19527_v13  ;;  %v8388_v26 = vadd.f32 %v14753_v63, %v19300_v37  ;;  %14123 = vmatprep.mubr.msk.bf16.mxu1 %vm18591_vm7, %v21292_v1  ;;  %v21331_v13 = vld [vmem:[#allocation85_spill] sm:$0xff] }
 0x50d   : > { %v14755_v33 = vpop.f32.mrf.mxu1  ;;  %v14870_v62 = vpop.f32.mrf.mxu0 }
 0x50e   : > { %v19536_v12 = vadd.f32 %v14865_v30, %v8388_v26  ;;  %v14756_v38 = vadd.f32 %v14755_v33, %v14754_v6  ;;  %v14871_v48 = vadd.f32 %v14870_v62, %v14869_v17 }
 0x50f   : > { %v14757_v46 = vpop.f32.mrf.mxu1  ;;  %v14872_v45 = vpop.f32.mrf.mxu0 }
 0x510   : > { %21293 = vst [vmem:[#allocation34_spill] sm:$0xff] %v19536_v12  ;;  %v8393_v24 = vadd.f32 %v14756_v38, %v19311_v21  ;;  %v21299_v38 = vld [vmem:[#allocation18_spill] sm:$0xff] }
 0x511   : > { %v14758_v56 = vpop.f32.mrf.mxu1  ;;  %v14873_v37 = vpop.f32.mrf.mxu0 }
 0x512   : > { %v19539_v2 = vadd.f32 %v14868_v53, %v8393_v24  ;;  %v14759_v42 = vadd.f32 %v14758_v56, %v14757_v46  ;;  %v14874_v35 = vadd.f32 %v14873_v37, %v14872_v45  ;;  %v21300_v46 = vld [vmem:[#allocation27_spill] sm:$0xff] }
 0x513   : > { %v14760_v44 = vpop.f32.mrf.mxu1  ;;  %14126 = vmatmul.mubr.msk.bf16.gmra.mxu1 %vm18591_vm7, %v21295_v5  ;;  %v14875_v30 = vpop.f32.mrf.mxu0 }
 0x514   : > { %21294 = vst [vmem:[#allocation8_spill] sm:$0xff] %v19539_v2  ;;  %v8396_v29 = vadd.f32 %v14759_v42, %v19326_v43  ;;  %14129 = vmatprep.mubr.msk.bf16.mxu1 %vm18591_vm7, %v21296_v61 }
 0x515   : > { %v14761_v21 = vpop.f32.mrf.mxu1  ;;  %v14876_v47 = vpop.f32.mrf.mxu0 }
 0x516   : > { %v19548_v59 = vadd.f32 %v14871_v48, %v8396_v29  ;;  %v14762_v50 = vadd.f32 %v14761_v21, %v14760_v44  ;;  %v14877_v63 = vadd.f32 %v14876_v47, %v14875_v30 }
 0x517   : > { %v14763_v23 = vpop.f32.mrf.mxu1  ;;  %v14878_v6 = vpop.f32.mrf.mxu0 }
 0x518   : > { %21297 = vst [vmem:[#allocation44_spill] sm:$0xff] %v19548_v59  ;;  %v8401_v53 = vadd.f32 %v14762_v50, %v19337_v11  ;;  %v21303_v50 = vld [vmem:[#allocation57_spill] sm:$0xff] }
 0x519   : > { %v14764_v0 = vpop.f32.mrf.mxu1  ;;  %v14879_v43 = vpop.f32.mrf.mxu0 }
 0x51a   : > { %v19551_v26 = vadd.f32 %v14874_v35, %v8401_v53  ;;  %v14765_v17 = vadd.f32 %v14764_v0, %v14763_v23  ;;  %v14880_v1 = vadd.f32 %v14879_v43, %v14878_v6  ;;  %v21304_v23 = vld [vmem:[#allocation49_spill] sm:$0xff] }
 0x51b   : > { %v14766_v33 = vpop.f32.mrf.mxu1  ;;  %14132 = vmatmul.mubr.msk.bf16.gmra.mxu1 %vm18591_vm7, %v21299_v38  ;;  %v14881_v48 = vpop.f32.mrf.mxu0 }
 0x51c   : > { %21298 = vst [vmem:[#allocation39_spill] sm:$0xff] %v19551_v26  ;;  %v8404_v62 = vadd.f32 %v14765_v17, %v19349_v8  ;;  %14135 = vmatprep.mubr.msk.bf16.mxu1 %vm18591_vm7, %v21300_v46 }
 0x51d   : > { %v14767_v11 = vpop.f32.mrf.mxu1  ;;  %v14882_v56 = vpop.f32.mrf.mxu0 }
 0x51e   : > { %v19560_v24 = vadd.f32 %v14877_v63, %v8404_v62  ;;  %v14768_v45 = vadd.f32 %v14767_v11, %v14766_v33  ;;  %v14883_v42 = vadd.f32 %v14882_v56, %v14881_v48 }
 0x51f   : > { %v14769_v37 = vpop.f32.mrf.mxu1  ;;  %v14884_v44 = vpop.f32.mrf.mxu0 }
 0x520   : > { %21301 = vst [vmem:[#allocation31_spill] sm:$0xff] %v19560_v24  ;;  %v8409_v35 = vadd.f32 %v14768_v45, %v19354_v36  ;;  %v21307_v45 = vld [vmem:[#allocation63_spill] sm:$0xff] }
 0x521   : > { %v14770_v5 = vpop.f32.mrf.mxu1  ;;  %v14885_v8 = vpop.f32.mrf.mxu0 }
 0x522   : > { %v19563_v29 = vadd.f32 %v14880_v1, %v8409_v35  ;;  %v14771_v30 = vadd.f32 %v14770_v5, %v14769_v37  ;;  %v14886_v61 = vadd.f32 %v14885_v8, %v14884_v44  ;;  %v21308_v37 = vld [vmem:[#allocation82_spill] sm:$0xff] }
 0x523   : > { %v14772_v21 = vpop.f32.mrf.mxu1  ;;  %14138 = vmatmul.mubr.msk.bf16.gmra.mxu1 %vm18591_vm7, %v21303_v50  ;;  %v14887_v63 = vpop.f32.mrf.mxu0 }
 0x524   : > { %21302 = vst [vmem:[#allocation46_spill] sm:$0xff] %v19563_v29  ;;  %v8412_v47 = vadd.f32 %v14771_v30, %v19363_v9  ;;  %14141 = vmatprep.mubr.msk.bf16.mxu1 %vm18591_vm7, %v21304_v23 }
 0x525   : > { %v14773_v36 = vpop.f32.mrf.mxu1  ;;  %v14888_v0 = vpop.f32.mrf.mxu0 }
 0x526   : > { %v19572_v53 = vadd.f32 %v14883_v42, %v8412_v47  ;;  %v14774_v6 = vadd.f32 %v14773_v36, %v14772_v21  ;;  %v14889_v17 = vadd.f32 %v14888_v0, %v14887_v63 }
 0x527   : > { %v14775_v43 = vpop.f32.mrf.mxu1  ;;  %v14890_v33 = vpop.f32.mrf.mxu0 }
 0x528   : > { %21305 = vst [vmem:[#allocation38_spill] sm:$0xff] %v19572_v53  ;;  %v8417_v1 = vadd.f32 %v14774_v6, %v19368_v57  ;;  %v21311_v6 = vld [vmem:[#allocation68_spill] sm:$0xff] }
 0x529   : > { %v14776_v38 = vpop.f32.mrf.mxu1  ;;  %v14891_v9 = vpop.f32.mrf.mxu0 }
 0x52a   : > { %v19575_v62 = vadd.f32 %v14886_v61, %v8417_v1  ;;  %v14777_v48 = vadd.f32 %v14776_v38, %v14775_v43  ;;  %v14892_v46 = vadd.f32 %v14891_v9, %v14890_v33  ;;  %v21312_v43 = vld [vmem:[#allocation92_spill] sm:$0xff] }
 0x52b   : > { %v14778_v11 = vpop.f32.mrf.mxu1  ;;  %14144 = vmatmul.mubr.msk.bf16.gmra.mxu1 %vm18591_vm7, %v21307_v45  ;;  %v14893_v42 = vpop.f32.mrf.mxu0 }
 0x52c   : > { %21306 = vst [vmem:[#allocation13_spill] sm:$0xff] %v19575_v62  ;;  %v8420_v56 = vadd.f32 %v14777_v48, %v19377_v7  ;;  %14147 = vmatprep.mubr.msk.bf16.mxu1 %vm18591_vm7, %v21308_v37 }
 0x52d   : > { %v14779_v57 = vpop.f32.mrf.mxu1  ;;  %v14894_v5 = vpop.f32.mrf.mxu0 }
 0x52e   : > { %v19584_v35 = vadd.f32 %v14889_v17, %v8420_v56  ;;  %v14780_v44 = vadd.f32 %v14779_v57, %v14778_v11  ;;  %v14895_v30 = vadd.f32 %v14894_v5, %v14893_v42 }
 0x52f   : > { %v14781_v8 = vpop.f32.mrf.mxu1  ;;  %v14896_v21 = vpop.f32.mrf.mxu0 }
 0x530   : > { %21309 = vst [vmem:[#allocation5_spill] sm:$0xff] %v19584_v35  ;;  %v8425_v61 = vadd.f32 %v14780_v44, %v19382_v18  ;;  %v21315_v44 = vld [vmem:[#allocation37_spill] sm:$0xff] }
 0x531   : > { %v14782_v50 = vpop.f32.mrf.mxu1  ;;  %v14897_v7 = vpop.f32.mrf.mxu0 }
 0x532   : > { %v19587_v47 = vadd.f32 %v14892_v46, %v8425_v61  ;;  %v14783_v63 = vadd.f32 %v14782_v50, %v14781_v8  ;;  %v14898_v23 = vadd.f32 %v14897_v7, %v14896_v21  ;;  %v21316_v8 = vld [vmem:[#allocation87_spill] sm:$0xff] }
 0x533   : > { %v14784_v36 = vpop.f32.mrf.mxu1  ;;  %14150 = vmatmul.mubr.msk.bf16.gmra.mxu1 %vm18591_vm7, %v21311_v6  ;;  %v14899_v17 = vpop.f32.mrf.mxu0 }
 0x534   : > { %21310 = vst [vmem:[#allocation23_spill] sm:$0xff] %v19587_v47  ;;  %v8428_v0 = vadd.f32 %v14783_v63, %v19391_v60  ;;  %14153 = vmatprep.mubr.msk.bf16.mxu1 %vm18591_vm7, %v21312_v43 }
 0x535   : > { %v14785_v18 = vpop.f32.mrf.mxu1  ;;  %v14900_v38 = vpop.f32.mrf.mxu0 }
 0x536   : > { %v19596_v1 = vadd.f32 %v14895_v30, %v8428_v0  ;;  %v14786_v33 = vadd.f32 %v14785_v18, %v14784_v36  ;;  %v14901_v48 = vadd.f32 %v14900_v38, %v14899_v17  ;;  %v21319_v18 = vld [vmem:[#allocation62_spill] sm:$0xff] }
 0x537   : > { %v14787_v9 = vpop.f32.mrf.mxu1  ;;  %v14902_v11 = vpop.f32.mrf.mxu0 }
 0x538   : > { %21313 = vst [vmem:[#allocation25_spill] sm:$0xff] %v19596_v1  ;;  %v8433_v46 = vadd.f32 %v14786_v33, %v19396_v4  ;;  %v21328_v1 = vld [vmem:[#allocation65_spill] sm:$0xff] }
 0x539   : > { %v14788_v45 = vpop.f32.mrf.mxu1  ;;  %v14903_v60 = vpop.f32.mrf.mxu0 }
 0x53a   : > { %v19599_v56 = vadd.f32 %v14898_v23, %v8433_v46  ;;  %v14789_v42 = vadd.f32 %v14788_v45, %v14787_v9  ;;  %v14904_v37 = vadd.f32 %v14903_v60, %v14902_v11 }
 0x53b   : > { %v14790_v57 = vpop.f32.mrf.mxu1  ;;  %14156 = vmatmul.mubr.msk.bf16.gmra.mxu1 %vm18591_vm7, %v21315_v44  ;;  %v14905_v30 = vpop.f32.mrf.mxu0  ;;  %v21322_v44 = vld [vmem:[#allocation90_spill] sm:$0xff] }
 0x53c   : > { %21314 = vst [vmem:[#allocation28_spill] sm:$0xff] %v19599_v56  ;;  %v8436_v5 = vadd.f32 %v14789_v42, %v19405_v25  ;;  %14159 = vmatprep.mubr.msk.bf16.mxu1 %vm18591_vm7, %v21316_v8 }
 0x53d   : > { %v14791_v4 = vpop.f32.mrf.mxu1  ;;  %v14906_v50 = vpop.f32.mrf.mxu0 }
 0x53e   : > { %v19608_v61 = vadd.f32 %v14901_v48, %v8436_v5  ;;  %v14792_v21 = vadd.f32 %v14791_v4, %v14790_v57  ;;  %v14907_v63 = vadd.f32 %v14906_v50, %v14905_v30  ;;  %v21320_v48 = vld [vmem:[#allocation89_spill] sm:$0xff]  ;;  %v21323_v30 = vld [vmem:[#allocation91_spill] sm:$0xff] }
 0x53f   : > { %v14793_v7 = vpop.f32.mrf.mxu1  ;;  %v19611_v36 = vpop.f32.mrf.mxu0 }
 0x540   : > { %21317 = vst [vmem:[#allocation26_spill] sm:$0xff] %v19608_v61  ;;  %v8441_v23 = vadd.f32 %v14792_v21, %v19410_v51 }
 0x541   : > { %v14794_v6 = vpop.f32.mrf.mxu1  ;;  %v19615_v17 = vpop.f32.mrf.mxu0 }
 0x542   : > { %v19613_v0 = vadd.f32 %v14904_v37, %v8441_v23  ;;  %v14795_v25 = vadd.f32 %v14794_v6, %v14793_v7 }
 0x543   : > { %v14924_v43 = vpop.f32.mrf.mxu1  ;;  %14162 = vmatmul.mubr.msk.bf16.gmra.mxu1 %vm18591_vm7, %v21319_v18  ;;  %v19621_v38 = vpop.f32.mrf.mxu0 }
 0x544   : > { %21318 = vst [vmem:[#allocation12_spill] sm:$0xff] %v19613_v0  ;;  %v8444_v33 = vadd.f32 %v14795_v25, %v19419_v32  ;;  %14165 = vmatprep.mubr.msk.bf16.mxu1 %vm18591_vm7, %v21320_v48 }
 0x545   : > { %v14925_v51 = vpop.f32.mrf.mxu1  ;;  %v19630_v11 = vpop.f32.mrf.mxu0 }
 0x546   : > { %v19626_v9 = vadd.f32 %v14907_v63, %v8444_v33  ;;  %v19628_v46 = vadd.f32 %v14925_v51, %v14924_v43  ;;  %v21324_v43 = vld [vmem:[#allocation51_spill] sm:$0xff]  ;;  %v21325_v33 = vld [vmem:[#allocation94_spill] sm:$0xff] }
 0x547   : > { %v14927_v45 = vpop.f32.mrf.mxu1  ;;  %v19632_v42 = vpop.f32.mrf.mxu0 }
 0x548   : > { %21321 = vst [vmem:[#allocation29_spill] sm:$0xff] %v19626_v9 }
 0x549   : > { %v14928_v60 = vpop.f32.mrf.mxu1  ;;  %v19636_v32 = vpop.f32.mrf.mxu0 }
 0x54a   : > { %v19634_v37 = vadd.f32 %v14928_v60, %v14927_v45 }
 0x54b   : > { %v14930_v57 = vpop.f32.mrf.mxu1  ;;  %14168 = vmatmul.mubr.msk.bf16.gmra.mxu1 %vm18591_vm7, %v21322_v44  ;;  %v19641_v5 = vpop.f32.mrf.mxu0 }
 0x54c   : > { %14171 = vmatprep.mubr.msk.bf16.mxu1 %vm18591_vm7, %v21323_v30 }
 0x54d   : > { %v14931_v8 = vpop.f32.mrf.mxu1  ;;  %v19648_v21 = vpop.f32.mrf.mxu0 }
 0x54e   : > { %v19646_v4 = vadd.f32 %v14931_v8, %v14930_v57 }
 0x54f   : > { %v14933_v50 = vpop.f32.mrf.mxu1  ;;  %v19650_v63 = vpop.f32.mrf.mxu0 }
 0x551   : > { %v14934_v7 = vpop.f32.mrf.mxu1  ;;  %v19654_v6 = vpop.f32.mrf.mxu0 }
 0x552   : > { %v19652_v23 = vadd.f32 %v14934_v7, %v14933_v50  ;;  %v21326_v7 = vld [vmem:[#allocation58_spill] sm:$0xff] }
 0x553   : > { %v14936_v25 = vpop.f32.mrf.mxu1  ;;  %14174 = vmatmul.mubr.msk.bf16.gmra.mxu1 %vm18591_vm7, %v21324_v43  ;;  %v19659_v18 = vpop.f32.mrf.mxu0 }
 0x554   : > { %14177 = vmatprep.mubr.msk.bf16.mxu1 %vm18591_vm7, %v21325_v33  ;;  %v21327_v33 = vld [vmem:[#allocation95_spill] sm:$0xff] }
 0x555   : > { %v14937_v48 = vpop.f32.mrf.mxu1  ;;  %v19666_v45 = vpop.f32.mrf.mxu0 }
 0x556   : > { %v19664_v51 = vadd.f32 %v14937_v48, %v14936_v25 }
 0x557   : > { %v14939_v60 = vpop.f32.mrf.mxu1  ;;  %v19668_v57 = vpop.f32.mrf.mxu0 }
 0x559   : > { %v14940_v44 = vpop.f32.mrf.mxu1  ;;  %v19672_v8 = vpop.f32.mrf.mxu0 }
 0x55a   : > { %v19670_v30 = vadd.f32 %v14940_v44, %v14939_v60 }
 0x55b   : > { %v14942_v50 = vpop.f32.mrf.mxu1  ;;  %14180 = vmatmul.mubr.msk.bf16.gmra.mxu1 %vm18591_vm7, %v21326_v7  ;;  %v19677_v43 = vpop.f32.mrf.mxu0 }
 0x55c   : > { %14183 = vmatprep.mubr.msk.bf16.mxu1 %vm18591_vm7, %v21327_v33  ;;  %v21329_v33 = vld [vmem:[#allocation96_spill] sm:$0xff] }
 0x55d   : > { %v14943_v25 = vpop.f32.mrf.mxu1  ;;  %v19684_v9 = vpop.f32.mrf.mxu0 }
 0x55e   : > { %v19682_v48 = vadd.f32 %v14943_v25, %v14942_v50 }
 0x55f   : > { %v14945_v60 = vpop.f32.mrf.mxu1  ;;  %v19686_v44 = vpop.f32.mrf.mxu0 }
 0x561   : > { %v14946_v0 = vpop.f32.mrf.mxu1  ;;  %v19690_v56 = vpop.f32.mrf.mxu0 }
 0x562   : > { %v19688_v61 = vadd.f32 %v14946_v0, %v14945_v60 }
 0x563   : > { %v14948_v7 = vpop.f32.mrf.mxu1  ;;  %14186 = vmatmul.mubr.msk.bf16.gmra.mxu1 %vm18591_vm7, %v21328_v1  ;;  %v19695_v47 = vpop.f32.mrf.mxu0 }
 0x564   : > { %14189 = vmatprep.mubr.msk.bf16.mxu1 %vm18591_vm7, %v21329_v33  ;;  %v21330_v33 = vld [vmem:[#allocation98_spill] sm:$0xff] }
 0x565   : > { %v14949_v50 = vpop.f32.mrf.mxu1  ;;  %v19702_v35 = vpop.f32.mrf.mxu0 }
 0x566   : > { %v19700_v25 = vadd.f32 %v14949_v50, %v14948_v7 }
 0x567   : > { %v14951_v0 = vpop.f32.mrf.mxu1  ;;  %v19704_v60 = vpop.f32.mrf.mxu0 }
 0x569   : > { %v14952_v62 = vpop.f32.mrf.mxu1  ;;  %v19708_v29 = vpop.f32.mrf.mxu0 }
 0x56a   : > { %v19706_v53 = vadd.f32 %v14952_v62, %v14951_v0 }
 0x56b   : > { %v14954_v1 = vpop.f32.mrf.mxu1  ;;  %14192 = vmatmul.mubr.msk.bf16.gmra.mxu1 %vm18591_vm7, %v18522_v52  ;;  %v19713_v24 = vpop.f32.mrf.mxu0 }
 0x56c   : > { %14195 = vmatprep.mubr.msk.bf16.mxu1 %vm18591_vm7, %v21330_v33 }
 0x56d   : > { %v14955_v7 = vpop.f32.mrf.mxu1  ;;  %v19720_v26 = vpop.f32.mrf.mxu0 }
 0x56e   : > { %v19718_v50 = vadd.f32 %v14955_v7, %v14954_v1 }
 0x56f   : > { %v14957_v62 = vpop.f32.mrf.mxu1  ;;  %v19722_v0 = vpop.f32.mrf.mxu0 }
 0x571   : > { %v14958_v59 = vpop.f32.mrf.mxu1  ;;  %v19726_v12 = vpop.f32.mrf.mxu0 }
 0x572   : > { %v19724_v2 = vadd.f32 %v14958_v59, %v14957_v62 }
 0x573   : > { %v14960_v52 = vpop.f32.mrf.mxu1  ;;  %14198 = vmatmul.mubr.msk.bf16.gmra.mxu1 %vm18591_vm7, %v21331_v13  ;;  %v19731_v16 = vpop.f32.mrf.mxu0 }
 0x574   : > { %10044 = vmatprep.mubr.bf16.mxu1 %v21278_v15 }
 0x575   : > { %v14961_v1 = vpop.f32.mrf.mxu1  ;;  %v19736_v7 = vpop.f32.mrf.mxu0 }
 0x576   : > { %v19734_v33 = vadd.f32 %v14961_v1, %v14960_v52 }
 0x577   : > { %v14963_v22 = vpop.f32.mrf.mxu1  ;;  %v19738_v10 = vpop.f32.mrf.mxu0 }
 0x579   : > { %v14964_v59 = vpop.f32.mrf.mxu1  ;;  %v19742_v39 = vpop.f32.mrf.mxu0 }
 0x57a   : > { %v19740_v62 = vadd.f32 %v14964_v59, %v14963_v22 }
 0x57b   : > { %v14966_v54 = vpop.f32.mrf.mxu1  ;;  %10045 = vmatmul.mubr.bf16.gmra.mxu1 %v21282_v55  ;;  %v19745_v28 = vpop.f32.mrf.mxu0 }
 0x57d   : > { %v14967_v13 = vpop.f32.mrf.mxu1  ;;  %v19749_v52 = vpop.f32.mrf.mxu0 }
 0x57e   : > { %v19747_v15 = vadd.f32 %v14967_v13, %v14966_v54 }
 0x57f   : > { %v14969_v1 = vpop.f32.mrf.mxu1  ;;  %v19751_v14 = vpop.f32.mrf.mxu0 }
 0x580   : > { %21332 = vst [vmem:[#allocation30_spill] sm:$0xff] %v19747_v15 }
 0x581   : > { %v14970_v40 = vpop.f32.mrf.mxu1  ;;  %v19755_v22 = vpop.f32.mrf.mxu0 }
 0x582   : > { %v19753_v27 = vadd.f32 %v14970_v40, %v14969_v1 }
 0x583   : > { %v14972_v59 = vpop.f32.mrf.mxu1  ;;  %v19757_v49 = vpop.f32.mrf.mxu0 }
 0x584   : > { %21333 = vst [vmem:[#allocation17_spill] sm:$0xff] %v19753_v27  ;;  %21334 = vst [vmem:[#allocation43_spill] sm:$0xff] %v19757_v49 }
 0x585   : > { %v14973_v3 = vpop.f32.mrf.mxu1  ;;  %v19761_v58 = vpop.f32.mrf.mxu0 }
 0x586   : > { %v19759_v55 = vadd.f32 %v14973_v3, %v14972_v59  ;;  %21336 = vst [vmem:[#allocation15_spill] sm:$0xff] %v19761_v58 }
 0x587   : > { %v14975_v54 = vpop.f32.mrf.mxu1  ;;  %v19763_v13 = vpop.f32.mrf.mxu0 }
 0x588   : > { %21335 = vst [vmem:[#allocation36_spill] sm:$0xff] %v19759_v55  ;;  %21337 = vst [vmem:[#allocation9_spill] sm:$0xff] %v19763_v13 }
 0x589   : > { %v14976_v41 = vpop.f32.mrf.mxu1  ;;  %v19767_v19 = vpop.f32.mrf.mxu0 }
 0x58a   : > { %v19765_v31 = vadd.f32 %v14976_v41, %v14975_v54  ;;  %21339 = vst [vmem:[#allocation48_spill] sm:$0xff] %v19767_v19 }
 0x58b   : > { %v14978_v40 = vpop.f32.mrf.mxu1  ;;  %v19769_v1 = vpop.f32.mrf.mxu0 }
 0x58c   : > { %21338 = vst [vmem:[#allocation52_spill] sm:$0xff] %v19765_v31  ;;  %21340 = vst [vmem:[#allocation71_spill] sm:$0xff] %v19769_v1 }
 0x58d   : > { %v14979_v20 = vpop.f32.mrf.mxu1  ;;  %v19773_v49 = vpop.f32.mrf.mxu0 }
 0x58e   : > { %v19771_v34 = vadd.f32 %v14979_v20, %v14978_v40  ;;  %21342 = vst [vmem:[#allocation77_spill] sm:$0xff] %v19773_v49 }
 0x58f   : > { %v14981_v3 = vpop.f32.mrf.mxu1  ;;  %v19775_v59 = vpop.f32.mrf.mxu0 }
 0x590   : > { %21341 = vst [vmem:[#allocation47_spill] sm:$0xff] %v19771_v34  ;;  %21343 = vst [vmem:[#allocation11_spill] sm:$0xff] %v19775_v59 }
 0x591   : > { %v14982_v55 = vpop.f32.mrf.mxu1  ;;  %v19779_v13 = vpop.f32.mrf.mxu0 }
 0x592   : > { %v19777_v58 = vadd.f32 %v14982_v55, %v14981_v3  ;;  %21345 = vst [vmem:[#allocation10_spill] sm:$0xff] %v19779_v13 }
 0x593   : > { %v14984_v41 = vpop.f32.mrf.mxu1  ;;  %v19781_v54 = vpop.f32.mrf.mxu0 }
 0x594   : > { %21344 = vst [vmem:[#allocation20_spill] sm:$0xff] %v19777_v58  ;;  %21346 = vst [vmem:[#allocation86_spill] sm:$0xff] %v19781_v54 }
 0x595   : > { %v14985_v31 = vpop.f32.mrf.mxu1  ;;  %v19785_v27 = vpop.f32.mrf.mxu0 }
 0x596   : > { %v19783_v19 = vadd.f32 %v14985_v31, %v14984_v41  ;;  %21348 = vst [vmem:[#allocation21_spill] sm:$0xff] %v19785_v27 }
 0x597   : > { %v14987_v1 = vpop.f32.mrf.mxu1  ;;  %v19789_v49 = vpop.f32.mrf.mxu0 }
 0x598   : > { %21347 = vst [vmem:[#allocation14_spill] sm:$0xff] %v19783_v19  ;;  %21350 = vst [vmem:[#allocation93_spill] sm:$0xff] %v19789_v49 }
 0x599   : > { %v14988_v20 = vpop.f32.mrf.mxu1  ;;  %v19793_v58 = vpop.f32.mrf.mxu0 }
 0x59a   : > { %v19787_v40 = vadd.f32 %v14988_v20, %v14987_v1  ;;  %21352 = vst [vmem:[#allocation53_spill] sm:$0xff] %v19793_v58 }
 0x59b   : > { %v14990_v34 = vpop.f32.mrf.mxu1  ;;  %v19797_v41 = vpop.f32.mrf.mxu0 }
 0x59c   : > { %21349 = vst [vmem:[#allocation61_spill] sm:$0xff] %v19787_v40  ;;  %21354 = vst [vmem:[#allocation59_spill] sm:$0xff] %v19797_v41 }
 0x59d   : > { %v14991_v59 = vpop.f32.mrf.mxu1  ;;  %v19801_v20 = vpop.f32.mrf.mxu0 }
 0x59e   : > { %v19791_v55 = vadd.f32 %v14991_v59, %v14990_v34  ;;  %21356 = vst [vmem:[#allocation69_spill] sm:$0xff] %v19801_v20 }
 0x59f   : > { %v14993_v3 = vpop.f32.mrf.mxu1  ;;  %v19805_v59 = vpop.f32.mrf.mxu0 }
 0x5a0   : > { %21351 = vst [vmem:[#allocation4_spill] sm:$0xff] %v19791_v55  ;;  %21358 = vst [vmem:[#allocation75_spill] sm:$0xff] %v19805_v59 }
 0x5a1   : > { %v14994_v13 = vpop.f32.mrf.mxu1 }
 0x5a2   : > { %v19795_v54 = vadd.f32 %v14994_v13, %v14993_v3  ;;  %v19809_v3 = vpop.f32.mrf.mxu0 }
 0x5a3   : > { %v14996_v31 = vpop.f32.mrf.mxu1  ;;  %21360 = vst [vmem:[#allocation79_spill] sm:$0xff] %v19809_v3 }
 0x5a4   : > { %21353 = vst [vmem:[#allocation54_spill] sm:$0xff] %v19795_v54 }
 0x5a5   : > { %v14997_v19 = vpop.f32.mrf.mxu1 }
 0x5a6   : > { %v19799_v27 = vadd.f32 %v14997_v19, %v14996_v31  ;;  %v19813_v31 = vpop.f32.mrf.mxu0 }
 0x5a7   : > { %v14999_v1 = vpop.f32.mrf.mxu1 }
 0x5a8   : > { %21355 = vst [vmem:[#allocation60_spill] sm:$0xff] %v19799_v27 }
 0x5a9   : > { %v15000_v40 = vpop.f32.mrf.mxu1 }
 0x5aa   : > { %v19803_v49 = vadd.f32 %v15000_v40, %v14999_v1  ;;  %v19817_v1 = vpop.f32.mrf.mxu0 }
 0x5ab   : > { %v15002_v34 = vpop.f32.mrf.mxu1 }
 0x5ac   : > { %21357 = vst [vmem:[#allocation70_spill] sm:$0xff] %v19803_v49 }
 0x5ad   : > { %v15003_v55 = vpop.f32.mrf.mxu1 }
 0x5ae   : > { %v19807_v58 = vadd.f32 %v15003_v55, %v15002_v34  ;;  %v19821_v34 = vpop.f32.mrf.mxu0 }
 0x5af   : > { %v15005_v13 = vpop.f32.mrf.mxu1 }
 0x5b0   : > { %21359 = vst [vmem:[#allocation78_spill] sm:$0xff] %v19807_v58  ;;  %v15867_v58 = vmov 1983009808  }
 0x5b1   : > { %v15006_v54 = vpop.f32.mrf.mxu1  ;;  %v10190_v3 = vunpack.c.l.s4 %v15867_v58 }
 0x5b2   : > { %v19811_v41 = vadd.f32 %v15006_v54, %v15005_v13  ;;  %v15038_v13 = vadd.f32 %v19615_v17, %v19611_v36  ;;  %v15050_v17 = vadd.f32 %v19654_v6, %v19650_v63  ;;  %v15065_v63 = vadd.f32 %v19702_v35, %v19695_v47  ;;  %v21366_v6 = vld [vmem:[#allocation88_spill] sm:$0xff] }
 0x5b3   : > { %v15008_v19 = vpop.f32.mrf.mxu1  ;;  %v15071_v47 = vadd.f32 %v19720_v26, %v19713_v24  ;;  %v15086_v24 = vadd.f32 %v19755_v22, %v19751_v14  ;;  %v21373_v22 = vld [vmem:[#allocation48_spill] sm:$0xff] }
 0x5b4   : > { %21361 = vst [vmem:[#allocation84_spill] sm:$0xff] %v19811_v41  ;;  %v19880_v35 = vadd.f32 %v15065_v63, %v19706_v53  ;;  %v15083_v53 = vadd.f32 %v19749_v52, %v19745_v28  ;;  %v21371_v28 = vld [vmem:[#allocation36_spill] sm:$0xff] }
 0x5b5   : > { %v15009_v27 = vpop.f32.mrf.mxu1  ;;  %v19896_v26 = vadd.f32 %v15071_v47, %v19724_v2  ;;  %v21370_v2 = vld [vmem:[#allocation15_spill] sm:$0xff]  ;;  %v19920_v52 = vadd.f32 %v15086_v24, %v21371_v28  ;;  %v21384_v47 = vld [vmem:[#allocation53_spill] sm:$0xff]  ;;  %v21386_v24 = vld [vmem:[#allocation14_spill] sm:$0xff] }
 0x5b6   : > { %v19815_v20 = vadd.f32 %v15009_v27, %v15008_v19  ;;  %v15041_v27 = vadd.f32 %v19630_v11, %v19621_v38  ;;  %v15053_v38 = vadd.f32 %v19666_v45, %v19659_v18  ;;  %v15068_v45 = vadd.f32 %v19708_v29, %v19704_v60  ;;  %v21368_v60 = vld [vmem:[#allocation17_spill] sm:$0xff]  ;;  %v21390_v28 = vld [vmem:[#allocation4_spill] sm:$0xff] }
 0x5b7   : > { %v15011_v40 = vpop.f32.mrf.mxu1  ;;  %v15080_v29 = vadd.f32 %v19742_v39, %v19738_v10  ;;  %v21367_v39 = vld [vmem:[#allocation30_spill] sm:$0xff] }
 0x5b8   : > { %21362 = vst [vmem:[#allocation76_spill] sm:$0xff] %v19815_v20  ;;  %v15044_v20 = vadd.f32 %v19636_v32, %v19632_v42  ;;  %v9769_v58 = vadd.f32 %v15041_v27, %v19634_v37  ;;  %v15059_v37 = vadd.f32 %v19684_v9, %v19677_v43  ;;  %v15062_v32 = vadd.f32 %v19690_v56, %v19686_v44  ;;  %v21375_v27 = vld [vmem:[#allocation52_spill] sm:$0xff] }
 0x5b9   : > { %v15012_v49 = vpop.f32.mrf.mxu1  ;;  %v15077_v43 = vadd.f32 %v19736_v7, %v19731_v16  ;;  %v19907_v10 = vadd.f32 %v15080_v29, %v21367_v39  ;;  %v21387_v39 = vld [vmem:[#allocation61_spill] sm:$0xff] }
 0x5ba   : > { %v19819_v59 = vadd.f32 %v15012_v49, %v15011_v40  ;;  %v19831_v49 = vpop.f32.mrf.mxu0  ;;  %v10191_v40 = vunpack.c.0.s8 %v10190_v3  ;;  %v19838_v36 = vadd.f32 %v15044_v20, %v19646_v4  ;;  %v19856_v4 = vadd.f32 %v15050_v17, %v19664_v51  ;;  %v21378_v17 = vld [vmem:[#allocation11_spill] sm:$0xff] }
 0x5bb   : > { %v15014_v55 = vpop.f32.mrf.mxu1  ;;  %v19872_v56 = vadd.f32 %v15059_v37, %v19688_v61  ;;  %v19875_v51 = vadd.f32 %v15062_v32, %v19700_v25  ;;  %v19887_v61 = vadd.f32 %v15068_v45, %v19718_v50  ;;  %v19904_v16 = vadd.f32 %v15077_v43, %v19740_v62  ;;  %v21372_v62 = vld [vmem:[#allocation9_spill] sm:$0xff]  ;;  %v21380_v37 = vld [vmem:[#allocation86_spill] sm:$0xff] }
 0x5bc   : > { %21363 = vst [vmem:[#allocation35_spill] sm:$0xff] %v19819_v59  ;;  %v9766_v59 = vadd.f32 %v15038_v13, %v19628_v46  ;;  %v15056_v46 = vadd.f32 %v19672_v8, %v19668_v57  ;;  %v19866_v18 = vsub.s32 %v10191_v40, %v21366_v6  ;;  %v19910_v50 = vadd.f32 %v15083_v53, %v21368_v60  ;;  %v21376_v40 = vld [vmem:[#allocation71_spill] sm:$0xff]  ;;  %v21381_v32 = vld [vmem:[#allocation21_spill] sm:$0xff]  ;;  %v21385_v53 = vld [vmem:[#allocation20_spill] sm:$0xff] }
 0x5bd   : > { %v15015_v15 = vpop.f32.mrf.mxu1  ;;  %v15092_v20 = vadd.f32 %v21373_v22, %v21372_v62  ;;  %v21382_v6 = vld [vmem:[#allocation47_spill] sm:$0xff] }
 0x5be   : > { %v19823_v54 = vadd.f32 %v15015_v15, %v15014_v55  ;;  %v15047_v15 = vadd.f32 %v19648_v21, %v19641_v5  ;;  %v19859_v21 = vadd.f32 %v15053_v38, %v19670_v30  ;;  %v19869_v9 = vadd.f32 %v15056_v46, %v19682_v48  ;;  %v21379_v38 = vld [vmem:[#allocation10_spill] sm:$0xff] }
 0x5bf   : > { %v15017_v19 = vpop.f32.mrf.mxu1  ;;  %v15074_v30 = vadd.f32 %v19726_v12, %v19722_v0  ;;  %v21369_v0 = vld [vmem:[#allocation43_spill] sm:$0xff]  ;;  %v15098_v46 = vadd.f32 %v21379_v38, %v21378_v17  ;;  %v19935_v45 = vadd.f32 %v15092_v20, %v21382_v6  ;;  %v21391_v20 = vld [vmem:[#allocation33_spill] sm:$0xff]  ;;  %v15116_v17 = vadd.f32 %v19831_v49, %v19821_v34  ;;  %v21396_v6 = vld [vmem:[#allocation60_spill] sm:$0xff] }
 0x5c0   : > { %21364 = vst [vmem:[#allocation81_spill] sm:$0xff] %v19823_v54  ;;  %v19847_v42 = vadd.f32 %v15047_v15, %v19652_v23  ;;  %v19863_v23 = vpop.f32.mrf.mxu0  ;;  %v15089_v7 = vadd.f32 %v21370_v2, %v21369_v0  ;;  %v21377_v15 = vld [vmem:[#allocation77_spill] sm:$0xff]  ;;  %v21388_v0 = vld [vmem:[#allocation59_spill] sm:$0xff] }
 0x5c1   : > { %v15018_v55 = vpop.f32.mrf.mxu1  ;;  %v19899_v12 = vadd.f32 %v15074_v30, %v19734_v33  ;;  %v19917_v33 = vld [vmem:[%s20647_s6] ss:$0 sm:$0xff]  ;;  %v21389_v2 = vld [vmem:[#allocation69_spill] sm:$0xff] }
 0x5c2   : > { %v19844_v11 = vadd.f32 %v15018_v55, %v15017_v19  ;;  %v15118_v44 = vpop.f32.mrf.mxu0  ;;  %v19926_v19 = vadd.f32 %v15089_v7, %v21375_v27  ;;  %v15095_v55 = vadd.f32 %v21377_v15, %v21376_v40  ;;  %v15107_v7 = vadd.f32 %v21389_v2, %v21388_v0  ;;  %v21394_v27 = vld [vmem:[#allocation75_spill] sm:$0xff]  ;;  %v21404_v0 = vld [vmem:[#allocation74_spill] sm:$0xff] }
 0x5c3   : > { %v15148_v5 = vpop.f32.mrf.mxu1  ;;  %v21395_v40 = vld [vmem:[#allocation79_spill] sm:$0xff] }
 0x5c4   : > { %21365 = vst [vmem:[#allocation97_spill] sm:$0xff] %v19844_v11  ;;  %v15110_v15 = vadd.f32 %v21395_v40, %v21394_v27 }
 0x5c5   : > { %v15149_v57 = vpop.f32.mrf.mxu1 }
 0x5c6   : > { %v15150_v8 = vadd.f32 %v15149_v57, %v15148_v5  ;;  %v15101_v5 = vadd.f32 %v21381_v32, %v21380_v37  ;;  %v21383_v57 = vld [vmem:[#allocation93_spill] sm:$0xff] }
 0x5c7   : > { %v15151_v48 = vpop.f32.mrf.mxu1  ;;  %v15104_v30 = vadd.f32 %v21384_v47, %v21383_v57  ;;  %v19968_v57 = vadd.f32 %v15110_v15, %v21396_v6  ;;  %v21398_v47 = vld [vmem:[#allocation70_spill] sm:$0xff] }
 0x5c8   : > { %v9927_v25 = vadd.f32 %v15150_v8, %v9766_v59  ;;  %v21374_v59 = vld [vmem:[#allocation16_spill] sm:$0xff]  ;;  %v15120_v8 = vpop.f32.mrf.mxu0  ;;  %v19947_v60 = vadd.f32 %v15101_v5, %v21387_v39 }
 0x5c9   : > { %v15152_v14 = vpop.f32.mrf.mxu1  ;;  %v19952_v62 = vadd.f32 %v15104_v30, %v21390_v28  ;;  %21397 = vst [vmem:[#allocation6_spill] sm:$0xff] %v19968_v57 }
 0x5ca   : > { %v10053_v3 = vadd.f32 %v9927_v25, %v21374_v59  ;;  %v15153_v13 = vadd.f32 %v15152_v14, %v15151_v48  ;;  %v19941_v48 = vadd.f32 %v15095_v55, %v21385_v53  ;;  %v19944_v25 = vadd.f32 %v15098_v46, %v21386_v24  ;;  %v15121_v46 = vpop.f32.mrf.mxu0 }
 0x5cb   : > { %v15154_v63 = vpop.f32.mrf.mxu1  ;;  %v15113_v55 = vadd.f32 %v19817_v1, %v19813_v31  ;;  %v19977_v1 = vadd.f32 %v15118_v44, %v19863_v23 }
 0x5cc   : > { %v10092_v43 = vadd.f32 %v19917_v33, %v10053_v3  ;;  %v9930_v29 = vadd.f32 %v15153_v13, %v9769_v58  ;;  %v21392_v3 = vld [vmem:[#allocation54_spill] sm:$0xff] }
 0x5cd   : > { %v15155_v14 = vpop.f32.mrf.mxu1  ;;  %v19956_v13 = vadd.f32 %v15107_v7, %v21392_v3  ;;  %v19971_v30 = vadd.f32 %v15113_v55, %v21398_v47  ;;  %21402 = vst [vmem:[#allocation41_spill] sm:$0xff] %v19977_v1 }
 0x5ce   : > { %v10124_v22 = vmax.f32 %v10092_v43, 0.0  ;;  %v10054_v59 = vadd.f32 %v9930_v29, %v21391_v20  ;;  %v15156_v58 = vadd.f32 %v15155_v14, %v15154_v63  ;;  %v21400_v43 = vld [vmem:[#allocation78_spill] sm:$0xff] }
 0x5cf   : > { %21393 = vst [vmem:[#allocation80_spill] sm:$0xff] %v19956_v13  ;;  %v15157_v38 = vpop.f32.mrf.mxu1  ;;  %21399 = vst [vmem:[#allocation55_spill] sm:$0xff] %v19971_v30  ;;  %v19974_v31 = vadd.f32 %v15116_v17, %v21400_v43 }
 0x5d0   : > { %v10188_v37 = vcombine.high %v10124_v22, %v10124_v22  ;;  %v10195_v32 = vrot.slane %v10124_v22, %v19866_v18  ;;  %v10093_v5 = vadd.f32 %v19917_v33, %v10054_v59  ;;  %v9935_v63 = vadd.f32 %v15156_v58, %v19838_v36 }
 0x5d1   : > { %21401 = vst [vmem:[#allocation22_spill] sm:$0xff] %v19974_v31  ;;  %v15158_v34 = vpop.f32.mrf.mxu1  ;;  %v19981_v36 = vadd.f32 %v15121_v46, %v15120_v8 }
 0x5d2   : > { %v10202_v49 = vrot.slane %v10188_v37, %v19866_v18  ;;  %v10203_v29 = vcombine.high %v10195_v32, %v10195_v32  ;;  %v10861_v53 = vsel %vm10860_vm8, %v10195_v32, -inf  ;;  %v10125_v24 = vmax.f32 %v10093_v5, 0.0 }
 0x5d3   : > { %21403 = vst [vmem:[#allocation24_spill] sm:$0xff] %v19981_v36  ;;  %v10862_v39 = vrot.slane %v10861_v53, 4  ;;  %v10055_v2 = vadd.f32 %v9935_v63, %v21404_v0  ;;  %v15159_v7 = vadd.f32 %v15158_v34, %v15157_v38  ;;  %v19984_v14 = vpop.f32.mrf.mxu1 }
 0x5d4   : > { %v10204_v28 = vcombine.high %v10202_v49, %v10202_v49  ;;  %v10868_v22 = vsel %vm10860_vm8, %v10203_v29, -inf  ;;  %v10875_v23 = vsel %vm10860_vm8, %v10202_v49, -inf  ;;  %v10205_v44 = vcombine.high %v10125_v24, %v10125_v24 }
 0x5d5   : > { %v10863_v20 = vmax.f32 %v10861_v53, %v10862_v39  ;;  %v10869_v59 = vrot.slane %v10868_v22, 4  ;;  %v10876_v58 = vrot.slane %v10875_v23, 4  ;;  %v10212_v3 = vrot.slane %v10125_v24, %v19866_v18  ;;  %v19989_v27 = vpop.f32.mrf.mxu1 }
 0x5d6   : > { %v10882_v8 = vsel %vm10860_vm8, %v10204_v28, -inf  ;;  %v10219_v40 = vrot.slane %v10205_v44, %v19866_v18  ;;  %v10094_v15 = vadd.f32 %v19917_v33, %v10055_v2  ;;  %v9938_v55 = vadd.f32 %v15159_v7, %v19847_v42 }
 0x5d7   : > { %v10864_v17 = vrot.slane %v10863_v20, 2  ;;  %v10870_v38 = vmax.f32 %v10868_v22, %v10869_v59  ;;  %v10877_v46 = vmax.f32 %v10875_v23, %v10876_v58  ;;  %v10883_v37 = vrot.slane %v10882_v8, 4  ;;  %v19995_v32 = vpop.f32.mrf.mxu1 }
 0x5d8   : > { %v10220_v5 = vcombine.high %v10212_v3, %v10212_v3  ;;  %v10221_v63 = vcombine.high %v10219_v40, %v10219_v40  ;;  %v10889_v6 = vsel %vm10860_vm8, %v10212_v3, -inf  ;;  %v10903_v47 = vsel %vm10860_vm8, %v10219_v40, -inf }
 0x5d9   : > { %v10865_v43 = vmax.f32 %v10863_v20, %v10864_v17  ;;  %v10871_v34 = vrot.slane %v10870_v38, 2  ;;  %v10878_v49 = vrot.slane %v10877_v46, 2  ;;  %v10884_v29 = vmax.f32 %v10882_v8, %v10883_v37  ;;  %v19999_v53 = vpop.f32.mrf.mxu1 }
 0x5da   : > { %v10890_v24 = vrot.slane %v10889_v6, 4  ;;  %v10896_v42 = vsel %vm10860_vm8, %v10220_v5, -inf  ;;  %v10904_v39 = vrot.slane %v10903_v47, 4  ;;  %v10910_v0 = vsel %vm10860_vm8, %v10221_v63, -inf }
 0x5db   : > { %v10866_v2 = vrot.slane %v10865_v43, 1  ;;  %v10872_v7 = vmax.f32 %v10870_v38, %v10871_v34  ;;  %v10879_v28 = vmax.f32 %v10877_v46, %v10878_v49  ;;  %v10885_v22 = vrot.slane %v10884_v29, 2  ;;  %v20003_v23 = vpop.f32.mrf.mxu1 }
 0x5dc   : > { %v10891_v44 = vmax.f32 %v10889_v6, %v10890_v24  ;;  %v10897_v59 = vrot.slane %v10896_v42, 4  ;;  %v10905_v20 = vmax.f32 %v10903_v47, %v10904_v39  ;;  %v10911_v58 = vrot.slane %v10910_v0, 4 }
 0x5dd   : > { %v20005_v3 = vmax.f32 %v10865_v43, %v10866_v2  ;;  %v10873_v8 = vrot.slane %v10872_v7, 1  ;;  %v10880_v40 = vrot.slane %v10879_v28, 1  ;;  %v10886_v17 = vmax.f32 %v10884_v29, %v10885_v22  ;;  %v20007_v37 = vpop.f32.mrf.mxu1  ;;  %v21405_v22 = vld [vmem:[#allocation19_spill] sm:$0xff] }
 0x5de   : > { %v10892_v5 = vrot.slane %v10891_v44, 2  ;;  %v10898_v11 = vmax.f32 %v10896_v42, %v10897_v59  ;;  %v10906_v63 = vrot.slane %v10905_v20, 2  ;;  %v10912_v54 = vmax.f32 %v10910_v0, %v10911_v58 }
 0x5df   : > { %v20009_v38 = vmax.f32 %v10872_v7, %v10873_v8  ;;  %v20011_v46 = vmax.f32 %v10879_v28, %v10880_v40  ;;  %v10887_v34 = vrot.slane %v10886_v17, 1  ;;  %v10126_v6 = vmax.f32 %v10094_v15, 0.0  ;;  %v20017_v42 = vpop.f32.mrf.mxu1 }
 0x5e0   : > { %v10893_v49 = vmax.f32 %v10891_v44, %v10892_v5  ;;  %v10899_v47 = vrot.slane %v10898_v11, 2  ;;  %v10907_v24 = vmax.f32 %v10905_v20, %v10906_v63  ;;  %v10913_v43 = vrot.slane %v10912_v54, 2 }
 0x5e1   : > { %v20013_v39 = vmax.f32 %v10886_v17, %v10887_v34  ;;  %v10222_v2 = vcombine.high %v10126_v6, %v10126_v6  ;;  %v10229_v29 = vrot.slane %v10126_v6, %v19866_v18  ;;  %v10056_v36 = vadd.f32 %v9938_v55, %v21405_v22 }
 0x5e2   : > { %v10894_v0 = vrot.slane %v10893_v49, 1  ;;  %v10900_v7 = vmax.f32 %v10898_v11, %v10899_v47  ;;  %v10908_v59 = vrot.slane %v10907_v24, 1  ;;  %v10914_v28 = vmax.f32 %v10912_v54, %v10913_v43  ;;  %v20028_v54 = vpop.f32.mrf.mxu1 }
 0x5e3   : > { %v10236_v58 = vrot.slane %v10222_v2, %v19866_v18  ;;  %v10237_v15 = vcombine.high %v10229_v29, %v10229_v29  ;;  %v10917_v44 = vsel %vm10860_vm8, %v10229_v29, -inf  ;;  %v10095_v20 = vadd.f32 %v19917_v33, %v10056_v36 }
 0x5e4   : > { %v20022_v8 = vmax.f32 %v10893_v49, %v10894_v0  ;;  %v10901_v40 = vrot.slane %v10900_v7, 1  ;;  %v20024_v17 = vmax.f32 %v10907_v24, %v10908_v59  ;;  %v10915_v5 = vrot.slane %v10914_v28, 1 }
 0x5e5   : > { %v10238_v55 = vcombine.high %v10236_v58, %v10236_v58  ;;  %v10918_v63 = vrot.slane %v10917_v44, 4  ;;  %v10924_v34 = vsel %vm10860_vm8, %v10237_v15, -inf  ;;  %v10931_v11 = vsel %vm10860_vm8, %v10236_v58, -inf }
 0x5e6   : > { %v20030_v6 = vmax.f32 %v10900_v7, %v10901_v40  ;;  %v20032_v47 = vmax.f32 %v10914_v28, %v10915_v5  ;;  %v10925_v43 = vrot.slane %v10924_v34, 4  ;;  %v10932_v36 = vrot.slane %v10931_v11, 4 }
 0x5e7   : > { %v10919_v49 = vmax.f32 %v10917_v44, %v10918_v63  ;;  %v10938_v2 = vsel %vm10860_vm8, %v10238_v55, -inf  ;;  %v10127_v24 = vmax.f32 %v10095_v20, 0.0  ;;  %v15162_v29 = vadd.f32 %v19989_v27, %v19984_v14  ;;  %v20041_v44 = vpop.f32.mrf.mxu1 }
 0x5e8   : > { %v10926_v22 = vmax.f32 %v10924_v34, %v10925_v43  ;;  %v10933_v0 = vmax.f32 %v10931_v11, %v10932_v36  ;;  %v10939_v59 = vrot.slane %v10938_v2, 4  ;;  %v15165_v58 = vadd.f32 %v19999_v53, %v19995_v32 }
 0x5e9   : > { %v10920_v15 = vrot.slane %v10919_v49, 2  ;;  %v10239_v7 = vcombine.high %v10127_v24, %v10127_v24  ;;  %v10246_v28 = vrot.slane %v10127_v24, %v19866_v18  ;;  %v9943_v40 = vadd.f32 %v15162_v29, %v19856_v4 }
 0x5ea   : > { %v10927_v5 = vrot.slane %v10926_v22, 2  ;;  %v10934_v20 = vrot.slane %v10933_v0, 2  ;;  %v10940_v55 = vmax.f32 %v10938_v2, %v10939_v59  ;;  %v9946_v14 = vadd.f32 %v15165_v58, %v19859_v21  ;;  %v20048_v59 = vpop.f32.mrf.mxu1 }
 0x5eb   : > { %v10921_v27 = vmax.f32 %v10919_v49, %v10920_v15  ;;  %v10253_v63 = vrot.slane %v10239_v7, %v19866_v18  ;;  %v10254_v34 = vcombine.high %v10246_v28, %v10246_v28  ;;  %v10945_v32 = vsel %vm10860_vm8, %v10246_v28, -inf }
 0x5ec   : > { %v10928_v53 = vmax.f32 %v10926_v22, %v10927_v5  ;;  %v10935_v11 = vmax.f32 %v10933_v0, %v10934_v20  ;;  %v10941_v43 = vrot.slane %v10940_v55, 2  ;;  %v10946_v36 = vrot.slane %v10945_v32, 4  ;;  %v20052_v1 = vpop.f32.mrf.mxu1 }
 0x5ed   : > { %v10922_v4 = vrot.slane %v10921_v27, 1  ;;  %v10255_v24 = vcombine.high %v10253_v63, %v10253_v63  ;;  %v10952_v29 = vsel %vm10860_vm8, %v10254_v34, -inf  ;;  %v10959_v2 = vsel %vm10860_vm8, %v10253_v63, -inf }
 0x5ee   : > { %v10929_v21 = vrot.slane %v10928_v53, 1  ;;  %v10936_v49 = vrot.slane %v10935_v11, 1  ;;  %v10942_v58 = vmax.f32 %v10940_v55, %v10941_v43  ;;  %v10947_v15 = vmax.f32 %v10945_v32, %v10946_v36 }
 0x5ef   : > { %v10923_v7 = vmax.f32 %v10921_v27, %v10922_v4  ;;  %v10953_v31 = vrot.slane %v10952_v29, 4  ;;  %v10960_v28 = vrot.slane %v10959_v2, 4  ;;  %v10966_v22 = vsel %vm10860_vm8, %v10255_v24, -inf }
 0x5f0   : > { %v10930_v0 = vmax.f32 %v10928_v53, %v10929_v21  ;;  %v10937_v5 = vmax.f32 %v10935_v11, %v10936_v49  ;;  %v10943_v20 = vrot.slane %v10942_v58, 1  ;;  %v10948_v30 = vrot.slane %v10947_v15, 2  ;;  %v21406_v11 = vld [vmem:[#allocation83_spill] sm:$0xff]  ;;  %v20061_v49 = vpop.f32.mrf.mxu1 }
 0x5f1   : > { %v11757_v34 = vmax.f32 %v20005_v3, %v10923_v7  ;;  %v10954_v57 = vmax.f32 %v10952_v29, %v10953_v31  ;;  %v10961_v63 = vmax.f32 %v10959_v2, %v10960_v28  ;;  %v10967_v13 = vrot.slane %v10966_v22, 4  ;;  %v21407_v29 = vld [vmem:[#allocation56_spill] sm:$0xff] }
 0x5f2   : > { %v10944_v41 = vmax.f32 %v10942_v58, %v10943_v20  ;;  %v11758_v55 = vmax.f32 %v20009_v38, %v10930_v0  ;;  %v11759_v27 = vmax.f32 %v20011_v46, %v10937_v5  ;;  %v10949_v32 = vmax.f32 %v10947_v15, %v10948_v30 }
 0x5f3   : > { %v10955_v43 = vrot.slane %v10954_v57, 2  ;;  %v10962_v36 = vrot.slane %v10961_v63, 2  ;;  %v10968_v53 = vmax.f32 %v10966_v22, %v10967_v13  ;;  %v10057_v4 = vadd.f32 %v9943_v40, %v21406_v11 }
 0x5f4   : > { %v11760_v3 = vmax.f32 %v20013_v39, %v10944_v41  ;;  %v11886_v31 = vsel %vm11885_vm9, %v11758_v55, %v11757_v34  ;;  %v10950_v24 = vrot.slane %v10949_v32, 1  ;;  %v10058_v2 = vadd.f32 %v9946_v14, %v21407_v29  ;;  %v20076_v55 = vpop.f32.mrf.mxu1 }
 0x5f5   : > { %v11888_v38 = vsel %vm11887_vm10, %v11759_v27, %v11886_v31  ;;  %v10956_v21 = vmax.f32 %v10954_v57, %v10955_v43  ;;  %v10963_v46 = vmax.f32 %v10961_v63, %v10962_v36  ;;  %v10969_v30 = vrot.slane %v10968_v53, 2 }
 0x5f6   : > { %v10951_v58 = vmax.f32 %v10949_v32, %v10950_v24  ;;  %v11890_v13 = vsel %vm11889_vm11, %v11760_v3, %v11888_v38  ;;  %v10096_v40 = vadd.f32 %v19917_v33, %v10057_v4  ;;  %v10097_v41 = vadd.f32 %v19917_v33, %v10058_v2  ;;  %v20094_v31 = vpop.f32.mrf.mxu1 }
 0x5f7   : > { %v10957_v39 = vrot.slane %v10956_v21, 1  ;;  %v10964_v15 = vrot.slane %v10963_v46, 1  ;;  %v10970_v7 = vmax.f32 %v10968_v53, %v10969_v30  ;;  %v15168_v14 = vadd.f32 %v20007_v37, %v20003_v23 }
 0x5f8   : > { %v11761_v57 = vmax.f32 %v20022_v8, %v10951_v58  ;;  %v10128_v28 = vmax.f32 %v10096_v40, 0.0  ;;  %v10129_v22 = vmax.f32 %v10097_v41, 0.0  ;;  %v20071_v0 = vadd.f32 %v20028_v54, %v20017_v42 }
 0x5f9   : > { %v10958_v5 = vmax.f32 %v10956_v21, %v10957_v39  ;;  %v10965_v20 = vmax.f32 %v10963_v46, %v10964_v15  ;;  %v10971_v34 = vrot.slane %v10970_v7, 1  ;;  %v20074_v63 = vadd.f32 %v15168_v14, %v19869_v9 }
 0x5fa   : > { %v11892_v27 = vsel %vm11891_vm12, %v11761_v57, %v11890_v13  ;;  %v10256_v23 = vcombine.high %v10128_v28, %v10128_v28  ;;  %v10263_v37 = vrot.slane %v10128_v28, %v19866_v18  ;;  %v10273_v8 = vcombine.high %v10129_v22, %v10129_v22  ;;  %v15181_v57 = vpop.f32.mrf.mxu1 }
 0x5fb   : > { %v10972_v32 = vmax.f32 %v10970_v7, %v10971_v34  ;;  %v11762_v43 = vmax.f32 %v20030_v6, %v10958_v5  ;;  %v11763_v42 = vmax.f32 %v20024_v17, %v10965_v20  ;;  %v10280_v54 = vrot.slane %v10129_v22, %v19866_v18 }
 0x5fc   : > { %v10270_v36 = vrot.slane %v10256_v23, %v19866_v18  ;;  %v10271_v9 = vcombine.high %v10263_v37, %v10263_v37  ;;  %v10973_v53 = vsel %vm10860_vm8, %v10263_v37, -inf  ;;  %v10287_v11 = vrot.slane %v10273_v8, %v19866_v18 }
 0x5fd   : > { %v11764_v4 = vmax.f32 %v20032_v47, %v10972_v32  ;;  %v11894_v6 = vsel %vm11893_vm13, %v11762_v43, %v11892_v27  ;;  %v10974_v17 = vrot.slane %v10973_v53, 4  ;;  %v10288_v3 = vcombine.high %v10280_v54, %v10280_v54 }
 0x5fe   : > { %v11896_v24 = vsel %vm11895_vm14, %v11763_v42, %v11894_v6  ;;  %v10272_v29 = vcombine.high %v10270_v36, %v10270_v36  ;;  %v10980_v2 = vsel %vm10860_vm8, %v10271_v9, -inf  ;;  %v10987_v38 = vsel %vm10860_vm8, %v10270_v36, -inf }
 0x5ff   : > { %v11898_v21 = vsel %vm11897_vm15, %v11764_v4, %v11896_v24  ;;  %v10975_v46 = vmax.f32 %v10973_v53, %v10974_v17  ;;  %v10981_v30 = vrot.slane %v10980_v2, 4  ;;  %v10988_v58 = vrot.slane %v10987_v38, 4  ;;  %v15182_v4 = vpop.f32.mrf.mxu1 }
 0x600   : > { %11956 = vst [vmem:[%s20090_s14] sm:$0xff] %v11898_v21  ;;  %v10994_v47 = vsel %vm10860_vm8, %v10272_v29, -inf  ;;  %v10289_v13 = vcombine.high %v10287_v11, %v10287_v11  ;;  %v11001_v40 = vsel %vm10860_vm8, %v10280_v54, -inf  ;;  %v11008_v41 = vsel %vm10860_vm8, %v10288_v3, -inf }
 0x601   : > { %v10976_v39 = vrot.slane %v10975_v46, 2  ;;  %v10982_v15 = vmax.f32 %v10980_v2, %v10981_v30  ;;  %v10989_v7 = vmax.f32 %v10987_v38, %v10988_v58  ;;  %v10995_v14 = vrot.slane %v10994_v47, 4 }
 0x602   : > { %v11002_v28 = vrot.slane %v11001_v40, 4  ;;  %v11009_v22 = vrot.slane %v11008_v41, 4  ;;  %v11015_v5 = vsel %vm10860_vm8, %v10287_v11, -inf  ;;  %v11022_v20 = vsel %vm10860_vm8, %v10289_v13, -inf }
 0x603   : > { %v10977_v34 = vmax.f32 %v10975_v46, %v10976_v39  ;;  %v10983_v27 = vrot.slane %v10982_v15, 2  ;;  %v10990_v23 = vrot.slane %v10989_v7, 2  ;;  %v10996_v37 = vmax.f32 %v10994_v47, %v10995_v14 }
 0x604   : > { %v11003_v8 = vmax.f32 %v11001_v40, %v11002_v28  ;;  %v11010_v32 = vmax.f32 %v11008_v41, %v11009_v22  ;;  %v11016_v43 = vrot.slane %v11015_v5, 4  ;;  %v11023_v42 = vrot.slane %v11022_v20, 4  ;;  %v21408_v41 = vld [vmem:[#allocation42_spill] sm:$0xff] }
 0x605   : > { %v10978_v54 = vrot.slane %v10977_v34, 1  ;;  %v10984_v36 = vmax.f32 %v10982_v15, %v10983_v27  ;;  %v10991_v9 = vmax.f32 %v10989_v7, %v10990_v23  ;;  %v10997_v53 = vrot.slane %v10996_v37, 2  ;;  %v15184_v15 = vpop.f32.mrf.mxu1 }
 0x606   : > { %v11004_v6 = vrot.slane %v11003_v8, 2  ;;  %v11011_v17 = vrot.slane %v11010_v32, 2  ;;  %v11017_v3 = vmax.f32 %v11015_v5, %v11016_v43  ;;  %v11024_v24 = vmax.f32 %v11022_v20, %v11023_v42  ;;  %v21409_v43 = vld [vmem:[#allocation40_spill] sm:$0xff] }
 0x607   : > { %v20106_v11 = vmax.f32 %v10977_v34, %v10978_v54  ;;  %v10985_v29 = vrot.slane %v10984_v36, 1  ;;  %v10992_v2 = vrot.slane %v10991_v9, 1  ;;  %v10998_v38 = vmax.f32 %v10996_v37, %v10997_v53 }
 0x608   : > { %v11005_v21 = vmax.f32 %v11003_v8, %v11004_v6  ;;  %v11012_v46 = vmax.f32 %v11010_v32, %v11011_v17  ;;  %v11018_v30 = vrot.slane %v11017_v3, 2  ;;  %v11025_v58 = vrot.slane %v11024_v24, 2 }
 0x609   : > { %v20108_v47 = vmax.f32 %v10984_v36, %v10985_v29  ;;  %v20110_v13 = vmax.f32 %v10991_v9, %v10992_v2  ;;  %v10999_v40 = vrot.slane %v10998_v38, 1  ;;  %v10059_v39 = vadd.f32 %v20074_v63, %v21408_v41  ;;  %v15185_v9 = vpop.f32.mrf.mxu1 }
 0x60a   : > { %v11006_v7 = vrot.slane %v11005_v21, 1  ;;  %v11013_v14 = vrot.slane %v11012_v46, 1  ;;  %v11019_v28 = vmax.f32 %v11017_v3, %v11018_v30  ;;  %v11026_v22 = vmax.f32 %v11024_v24, %v11025_v58  ;;  %v21410_v3 = vld [vmem:[#allocation50_spill] sm:$0xff]  ;;  %v21412_v30 = vld [vmem:[#allocation73_spill] sm:$0xff] }
 0x60b   : > { %v20114_v5 = vmax.f32 %v10998_v38, %v10999_v40  ;;  %v10098_v20 = vadd.f32 %v19917_v33, %v10059_v39  ;;  %v9954_v34 = vadd.f32 %v20071_v0, %v19872_v56  ;;  %v15174_v27 = vadd.f32 %v20048_v59, %v20041_v44 }
 0x60c   : > { %v20121_v23 = vmax.f32 %v11005_v21, %v11006_v7  ;;  %v20123_v37 = vmax.f32 %v11012_v46, %v11013_v14  ;;  %v11020_v63 = vrot.slane %v11019_v28, 1  ;;  %v11027_v8 = vrot.slane %v11026_v22, 1  ;;  %v21411_v21 = vld [vmem:[#allocation45_spill] sm:$0xff] }
 0x60d   : > { %v10130_v32 = vmax.f32 %v10098_v20, 0.0  ;;  %v10060_v42 = vadd.f32 %v9954_v34, %v21409_v43  ;;  %v9959_v54 = vadd.f32 %v15174_v27, %v19875_v51  ;;  %v15177_v36 = vadd.f32 %v20061_v49, %v20052_v1 }
 0x60e   : > { %v20129_v53 = vmax.f32 %v11019_v28, %v11020_v63  ;;  %v20131_v56 = vmax.f32 %v11026_v22, %v11027_v8  ;;  %v15180_v44 = vadd.f32 %v20094_v31, %v20076_v55  ;;  %v15183_v59 = vadd.f32 %v15182_v4, %v15181_v57 }
 0x60f   : > { %v10290_v0 = vcombine.high %v10130_v32, %v10130_v32  ;;  %v10297_v6 = vrot.slane %v10130_v32, %v19866_v18  ;;  %v10099_v17 = vadd.f32 %v19917_v33, %v10060_v42  ;;  %v10061_v24 = vadd.f32 %v9959_v54, %v21410_v3 }
 0x610   : > { %v9962_v51 = vadd.f32 %v15177_v36, %v19880_v35  ;;  %v9967_v1 = vadd.f32 %v15180_v44, %v19887_v61  ;;  %v20141_v49 = vadd.f32 %v15183_v59, %v19896_v26  ;;  %v20143_v29 = vadd.f32 %v15185_v9, %v15184_v15 }
 0x611   : > { %v10304_v2 = vrot.slane %v10290_v0, %v19866_v18  ;;  %v10305_v55 = vcombine.high %v10297_v6, %v10297_v6  ;;  %v11029_v31 = vsel %vm10860_vm8, %v10297_v6, -inf  ;;  %v10131_v57 = vmax.f32 %v10099_v17, 0.0 }
 0x612   : > { %v11030_v4 = vrot.slane %v11029_v31, 4  ;;  %v10100_v38 = vadd.f32 %v19917_v33, %v10061_v24  ;;  %v10062_v46 = vadd.f32 %v9962_v51, %v21411_v21  ;;  %v20150_v35 = vadd.f32 %v9967_v1, %v21412_v30 }
 0x613   : > { %v10306_v61 = vcombine.high %v10304_v2, %v10304_v2  ;;  %v11036_v26 = vsel %vm10860_vm8, %v10305_v55, -inf  ;;  %v11043_v58 = vsel %vm10860_vm8, %v10304_v2, -inf  ;;  %v10307_v40 = vcombine.high %v10131_v57, %v10131_v57 }
 0x614   : > { %v11031_v41 = vmax.f32 %v11029_v31, %v11030_v4  ;;  %v11037_v39 = vrot.slane %v11036_v26, 4  ;;  %v11044_v15 = vrot.slane %v11043_v58, 4  ;;  %v10314_v7 = vrot.slane %v10131_v57, %v19866_v18 }
 0x615   : > { %v11050_v14 = vsel %vm10860_vm8, %v10306_v61, -inf  ;;  %v10321_v28 = vrot.slane %v10307_v40, %v19866_v18  ;;  %v10132_v22 = vmax.f32 %v10100_v38, 0.0  ;;  %v20158_v20 = vadd.f32 %v19917_v33, %v10062_v46 }
 0x616   : > { %v11032_v34 = vrot.slane %v11031_v41, 2  ;;  %v11038_v27 = vmax.f32 %v11036_v26, %v11037_v39  ;;  %v11045_v63 = vmax.f32 %v11043_v58, %v11044_v15  ;;  %v11051_v8 = vrot.slane %v11050_v14, 4 }
 0x617   : > { %v10322_v32 = vcombine.high %v10314_v7, %v10314_v7  ;;  %v10323_v43 = vcombine.high %v10321_v28, %v10321_v28  ;;  %v11057_v42 = vsel %vm10860_vm8, %v10314_v7, -inf  ;;  %v11071_v54 = vsel %vm10860_vm8, %v10321_v28, -inf }
 0x618   : > { %v11033_v36 = vmax.f32 %v11031_v41, %v11032_v34  ;;  %v11039_v9 = vrot.slane %v11038_v27, 2  ;;  %v11046_v44 = vrot.slane %v11045_v63, 2  ;;  %v11052_v59 = vmax.f32 %v11050_v14, %v11051_v8 }
 0x619   : > { %v11058_v0 = vrot.slane %v11057_v42, 4  ;;  %v11064_v6 = vsel %vm10860_vm8, %v10322_v32, -inf  ;;  %v11072_v17 = vrot.slane %v11071_v54, 4  ;;  %v11078_v3 = vsel %vm10860_vm8, %v10323_v43, -inf }
 0x61a   : > { %v11034_v24 = vrot.slane %v11033_v36, 1  ;;  %v11040_v51 = vmax.f32 %v11038_v27, %v11039_v9  ;;  %v11047_v1 = vmax.f32 %v11045_v63, %v11046_v44  ;;  %v11053_v2 = vrot.slane %v11052_v59, 2 }
 0x61b   : > { %v11059_v55 = vmax.f32 %v11057_v42, %v11058_v0  ;;  %v11065_v31 = vrot.slane %v11064_v6, 4  ;;  %v11073_v57 = vmax.f32 %v11071_v54, %v11072_v17  ;;  %v11079_v4 = vrot.slane %v11078_v3, 4 }
 0x61c   : > { %v11035_v38 = vmax.f32 %v11033_v36, %v11034_v24  ;;  %v11041_v21 = vrot.slane %v11040_v51, 1  ;;  %v11048_v46 = vrot.slane %v11047_v1, 1  ;;  %v11054_v30 = vmax.f32 %v11052_v59, %v11053_v2 }
 0x61d   : > { %v11060_v61 = vrot.slane %v11059_v55, 2  ;;  %v11066_v26 = vmax.f32 %v11064_v6, %v11065_v31  ;;  %v11074_v58 = vrot.slane %v11073_v57, 2  ;;  %v11080_v40 = vmax.f32 %v11078_v3, %v11079_v4 }
 0x61e   : > { %v11042_v41 = vmax.f32 %v11040_v51, %v11041_v21  ;;  %v11049_v39 = vmax.f32 %v11047_v1, %v11048_v46  ;;  %v11055_v15 = vrot.slane %v11054_v30, 1  ;;  %v11765_v7 = vmax.f32 %v20106_v11, %v11035_v38 }
 0x61f   : > { %v11061_v14 = vmax.f32 %v11059_v55, %v11060_v61  ;;  %v11067_v28 = vrot.slane %v11066_v26, 2  ;;  %v11075_v34 = vmax.f32 %v11073_v57, %v11074_v58  ;;  %v11081_v27 = vrot.slane %v11080_v40, 2 }
 0x620   : > { %v11056_v63 = vmax.f32 %v11054_v30, %v11055_v15  ;;  %v11766_v8 = vmax.f32 %v20108_v47, %v11042_v41  ;;  %v11767_v32 = vmax.f32 %v20110_v13, %v11049_v39  ;;  %v10324_v43 = vcombine.high %v10132_v22, %v10132_v22 }
 0x621   : > { %v11062_v42 = vrot.slane %v11061_v14, 1  ;;  %v11068_v54 = vmax.f32 %v11066_v26, %v11067_v28  ;;  %v11076_v36 = vrot.slane %v11075_v34, 1  ;;  %v11082_v9 = vmax.f32 %v11080_v40, %v11081_v27 }
 0x622   : > { %v11768_v44 = vmax.f32 %v20114_v5, %v11056_v63  ;;  %v11899_v59 = vsel %vm11885_vm9, %v11766_v8, %v11765_v7  ;;  %v10331_v11 = vrot.slane %v10132_v22, %v19866_v18  ;;  %v10338_v0 = vrot.slane %v10324_v43, %v19866_v18 }
 0x623   : > { %v11900_v6 = vsel %vm11887_vm10, %v11767_v32, %v11899_v59  ;;  %v11063_v17 = vmax.f32 %v11061_v14, %v11062_v42  ;;  %v11069_v3 = vrot.slane %v11068_v54, 1  ;;  %v11077_v47 = vmax.f32 %v11075_v34, %v11076_v36 }
 0x624   : > { %v11083_v24 = vrot.slane %v11082_v9, 1  ;;  %v11901_v13 = vsel %vm11889_vm11, %v11768_v44, %v11900_v6  ;;  %v10339_v51 = vcombine.high %v10331_v11, %v10331_v11  ;;  %v10340_v1 = vcombine.high %v10338_v0, %v10338_v0  ;;  %v15187_v6 = vpop.f32.mrf.mxu1 }
 0x625   : > { %v11070_v2 = vmax.f32 %v11068_v54, %v11069_v3  ;;  %v11769_v55 = vmax.f32 %v20121_v23, %v11063_v17  ;;  %v11771_v5 = vmax.f32 %v20129_v53, %v11077_v47  ;;  %v11085_v31 = vsel %vm10860_vm8, %v10331_v11, -inf }
 0x626   : > { %v11084_v22 = vmax.f32 %v11082_v9, %v11083_v24  ;;  %v11086_v57 = vrot.slane %v11085_v31, 4  ;;  %v11092_v4 = vsel %vm10860_vm8, %v10339_v51, -inf  ;;  %v11099_v38 = vsel %vm10860_vm8, %v10338_v0, -inf }
 0x627   : > { %v11770_v21 = vmax.f32 %v20123_v37, %v11070_v2  ;;  %v11902_v46 = vsel %vm11891_vm12, %v11769_v55, %v11901_v13  ;;  %v11093_v30 = vrot.slane %v11092_v4, 4  ;;  %v11100_v61 = vrot.slane %v11099_v38, 4 }
 0x628   : > { %v11772_v26 = vmax.f32 %v20131_v56, %v11084_v22  ;;  %v11087_v23 = vmax.f32 %v11085_v31, %v11086_v57  ;;  %v11106_v53 = vsel %vm10860_vm8, %v10340_v1, -inf  ;;  %v10133_v58 = vmax.f32 %v20158_v20, 0.0 }
 0x629   : > { %v11903_v40 = vsel %vm11893_vm13, %v11770_v21, %v11902_v46  ;;  %v11094_v41 = vmax.f32 %v11092_v4, %v11093_v30  ;;  %v11101_v39 = vmax.f32 %v11099_v38, %v11100_v61  ;;  %v11107_v15 = vrot.slane %v11106_v53, 4  ;;  %v15188_v46 = vpop.f32.mrf.mxu1 }
 0x62a   : > { %v11904_v7 = vsel %vm11895_vm14, %v11771_v5, %v11903_v40  ;;  %v11088_v37 = vrot.slane %v11087_v23, 2  ;;  %v10341_v14 = vcombine.high %v10133_v58, %v10133_v58  ;;  %v10348_v28 = vrot.slane %v10133_v58, %v19866_v18 }
 0x62b   : > { %v11905_v34 = vsel %vm11897_vm15, %v11772_v26, %v11904_v7  ;;  %v11095_v56 = vrot.slane %v11094_v41, 2  ;;  %v11102_v27 = vrot.slane %v11101_v39, 2  ;;  %v11108_v63 = vmax.f32 %v11106_v53, %v11107_v15  ;;  %v21413_v26 = vld [vmem:[#allocation67_spill] sm:$0xff] }
 0x62c   : > { %11957 = vst [vmem:[%s20090_s14 + $0x8] sm:$0xff] %v11905_v34  ;;  %v11089_v8 = vmax.f32 %v11087_v23, %v11088_v37  ;;  %v10355_v20 = vrot.slane %v10341_v14, %v19866_v18  ;;  %v10356_v32 = vcombine.high %v10348_v28, %v10348_v28  ;;  %v11113_v43 = vsel %vm10860_vm8, %v10348_v28, -inf  ;;  %v21414_v37 = vld [vmem:[#allocation66_spill] sm:$0xff] }
 0x62d   : > { %v11096_v42 = vmax.f32 %v11094_v41, %v11095_v56  ;;  %v11103_v54 = vmax.f32 %v11101_v39, %v11102_v27  ;;  %v11109_v36 = vrot.slane %v11108_v63, 2  ;;  %v11114_v9 = vrot.slane %v11113_v43, 4 }
 0x62e   : > { %v11090_v44 = vrot.slane %v11089_v8, 1  ;;  %v10357_v59 = vcombine.high %v10355_v20, %v10355_v20  ;;  %v11120_v11 = vsel %vm10860_vm8, %v10356_v32, -inf  ;;  %v11127_v0 = vsel %vm10860_vm8, %v10355_v20, -inf }
 0x62f   : > { %v11097_v17 = vrot.slane %v11096_v42, 1  ;;  %v11104_v3 = vrot.slane %v11103_v54, 1  ;;  %v11110_v47 = vmax.f32 %v11108_v63, %v11109_v36  ;;  %v11115_v24 = vmax.f32 %v11113_v43, %v11114_v9 }
 0x630   : > { %v20192_v13 = vmax.f32 %v11089_v8, %v11090_v44  ;;  %v11121_v51 = vrot.slane %v11120_v11, 4  ;;  %v11128_v1 = vrot.slane %v11127_v0, 4  ;;  %v11134_v2 = vsel %vm10860_vm8, %v10357_v59, -inf }
 0x631   : > { %v20195_v55 = vmax.f32 %v11096_v42, %v11097_v17  ;;  %v20197_v5 = vmax.f32 %v11103_v54, %v11104_v3  ;;  %v11111_v31 = vrot.slane %v11110_v47, 1  ;;  %v11116_v22 = vrot.slane %v11115_v24, 2 }
 0x632   : > { %v11122_v57 = vmax.f32 %v11120_v11, %v11121_v51  ;;  %v11129_v4 = vmax.f32 %v11127_v0, %v11128_v1  ;;  %v11135_v38 = vrot.slane %v11134_v2, 4  ;;  %v10102_v21 = vadd.f32 %v19917_v33, %v20150_v35 }
 0x633   : > { %v20201_v30 = vmax.f32 %v11110_v47, %v11111_v31  ;;  %v11117_v61 = vmax.f32 %v11115_v24, %v11116_v22  ;;  %v10064_v23 = vadd.f32 %v20141_v49, %v21413_v26  ;;  %v9975_v53 = vadd.f32 %v20143_v29, %v19899_v12 }
 0x634   : > { %v11123_v58 = vrot.slane %v11122_v57, 2  ;;  %v11130_v40 = vrot.slane %v11129_v4, 2  ;;  %v11136_v41 = vmax.f32 %v11134_v2, %v11135_v38  ;;  %v10134_v39 = vmax.f32 %v10102_v21, 0.0 }
 0x635   : > { %v11118_v15 = vrot.slane %v11117_v61, 1  ;;  %v10103_v7 = vadd.f32 %v19917_v33, %v10064_v23  ;;  %v10065_v14 = vadd.f32 %v9975_v53, %v21414_v37  ;;  %v20209_v35 = vadd.f32 %v15188_v46, %v15187_v6 }
 0x636   : > { %v11124_v28 = vmax.f32 %v11122_v57, %v11123_v58  ;;  %v11131_v34 = vmax.f32 %v11129_v4, %v11130_v40  ;;  %v11137_v56 = vrot.slane %v11136_v41, 2  ;;  %v10358_v27 = vcombine.high %v10134_v39, %v10134_v39 }
 0x637   : > { %v20211_v63 = vmax.f32 %v11117_v61, %v11118_v15  ;;  %v10365_v49 = vrot.slane %v10134_v39, %v19866_v18  ;;  %v10135_v12 = vmax.f32 %v10103_v7, 0.0  ;;  %v20215_v29 = vadd.f32 %v19917_v33, %v10065_v14 }
 0x638   : > { %v11125_v8 = vrot.slane %v11124_v28, 1  ;;  %v11132_v20 = vrot.slane %v11131_v34, 1  ;;  %v11138_v32 = vmax.f32 %v11136_v41, %v11137_v56  ;;  %v10372_v43 = vrot.slane %v10358_v27, %v19866_v18 }
 0x639   : > { %v10373_v42 = vcombine.high %v10365_v49, %v10365_v49  ;;  %v11141_v54 = vsel %vm10860_vm8, %v10365_v49, -inf  ;;  %v10375_v36 = vcombine.high %v10135_v12, %v10135_v12  ;;  %v10382_v9 = vrot.slane %v10135_v12, %v19866_v18 }
 0x63a   : > { %v20220_v44 = vmax.f32 %v11124_v28, %v11125_v8  ;;  %v20222_v59 = vmax.f32 %v11131_v34, %v11132_v20  ;;  %v11139_v11 = vrot.slane %v11138_v32, 1  ;;  %v10374_v0 = vcombine.high %v10372_v43, %v10372_v43 }
 0x63b   : > { %v11142_v6 = vrot.slane %v11141_v54, 4  ;;  %v11148_v33 = vsel %vm10860_vm8, %v10373_v42, -inf  ;;  %v11155_v17 = vsel %vm10860_vm8, %v10372_v43, -inf  ;;  %v10389_v3 = vrot.slane %v10375_v36, %v19866_v18 }
 0x63c   : > { %v20227_v47 = vmax.f32 %v11138_v32, %v11139_v11  ;;  %v11149_v24 = vrot.slane %v11148_v33, 4  ;;  %v11156_v51 = vrot.slane %v11155_v17, 4  ;;  %v11162_v1 = vsel %vm10860_vm8, %v10374_v0, -inf  ;;  %v15190_v32 = vpop.f32.mrf.mxu1 }
 0x63d   : > { %v11143_v2 = vmax.f32 %v11141_v54, %v11142_v6  ;;  %v11163_v31 = vrot.slane %v11162_v1, 4  ;;  %v10390_v22 = vcombine.high %v10382_v9, %v10382_v9  ;;  %v10391_v57 = vcombine.high %v10389_v3, %v10389_v3 }
 0x63e   : > { %v11150_v4 = vmax.f32 %v11148_v33, %v11149_v24  ;;  %v11157_v38 = vmax.f32 %v11155_v17, %v11156_v51  ;;  %v11169_v21 = vsel %vm10860_vm8, %v10382_v9, -inf  ;;  %v11183_v46 = vsel %vm10860_vm8, %v10389_v3, -inf }
 0x63f   : > { %v11144_v61 = vrot.slane %v11143_v2, 2  ;;  %v11164_v26 = vmax.f32 %v11162_v1, %v11163_v31  ;;  %v11170_v23 = vrot.slane %v11169_v21, 4  ;;  %v11176_v53 = vsel %vm10860_vm8, %v10390_v22, -inf  ;;  %v15191_v22 = vpop.f32.mrf.mxu1 }
 0x640   : > { %v11151_v58 = vrot.slane %v11150_v4, 2  ;;  %v11158_v40 = vrot.slane %v11157_v38, 2  ;;  %v11177_v41 = vrot.slane %v11176_v53, 4  ;;  %v11184_v39 = vrot.slane %v11183_v46, 4 }
 0x641   : > { %v11145_v15 = vmax.f32 %v11143_v2, %v11144_v61  ;;  %v11165_v7 = vrot.slane %v11164_v26, 2  ;;  %v11171_v37 = vmax.f32 %v11169_v21, %v11170_v23  ;;  %v11190_v14 = vsel %vm10860_vm8, %v10391_v57, -inf }
 0x642   : > { %v11152_v28 = vmax.f32 %v11150_v4, %v11151_v58  ;;  %v11159_v34 = vmax.f32 %v11157_v38, %v11158_v40  ;;  %v11178_v56 = vmax.f32 %v11176_v53, %v11177_v41  ;;  %v11185_v27 = vmax.f32 %v11183_v46, %v11184_v39 }
 0x643   : > { %v11146_v49 = vrot.slane %v11145_v15, 1  ;;  %v11166_v12 = vmax.f32 %v11164_v26, %v11165_v7  ;;  %v11172_v8 = vrot.slane %v11171_v37, 2  ;;  %v11191_v20 = vrot.slane %v11190_v14, 4 }
 0x644   : > { %v11153_v43 = vrot.slane %v11152_v28, 1  ;;  %v11160_v42 = vrot.slane %v11159_v34, 1  ;;  %v11179_v54 = vrot.slane %v11178_v56, 2  ;;  %v11186_v36 = vrot.slane %v11185_v27, 2 }
 0x645   : > { %v11147_v9 = vmax.f32 %v11145_v15, %v11146_v49  ;;  %v11167_v11 = vrot.slane %v11166_v12, 1  ;;  %v11173_v0 = vmax.f32 %v11171_v37, %v11172_v8  ;;  %v11192_v6 = vmax.f32 %v11190_v14, %v11191_v20  ;;  %v15193_v15 = vpop.f32.mrf.mxu1 }
 0x646   : > { %v11154_v33 = vmax.f32 %v11152_v28, %v11153_v43  ;;  %v11161_v17 = vmax.f32 %v11159_v34, %v11160_v42  ;;  %v11180_v3 = vmax.f32 %v11178_v56, %v11179_v54  ;;  %v11187_v24 = vmax.f32 %v11185_v27, %v11186_v36  ;;  %v20260_v54 = vld [vmem:[%s20647_s6] ss:$0 sm:$0xff] }
 0x647   : > { %v11168_v51 = vmax.f32 %v11166_v12, %v11167_v11  ;;  %v11773_v1 = vmax.f32 %v20192_v13, %v11147_v9  ;;  %v11174_v2 = vrot.slane %v11173_v0, 1  ;;  %v11193_v31 = vrot.slane %v11192_v6, 2  ;;  %v15194_v20 = vpop.f32.mrf.mxu1 }
 0x648   : > { %v11774_v57 = vmax.f32 %v20195_v55, %v11154_v33  ;;  %v11775_v4 = vmax.f32 %v20197_v5, %v11161_v17  ;;  %v11181_v38 = vrot.slane %v11180_v3, 1  ;;  %v11188_v21 = vrot.slane %v11187_v24, 1  ;;  %v21416_v17 = vld [vmem:[#allocation32_spill] sm:$0xff] }
 0x649   : > { %v11776_v46 = vmax.f32 %v20201_v30, %v11168_v51  ;;  %v11175_v61 = vmax.f32 %v11173_v0, %v11174_v2  ;;  %v11194_v26 = vmax.f32 %v11192_v6, %v11193_v31  ;;  %v10136_v23 = vmax.f32 %v20215_v29, 0.0 }
 0x64a   : > { %v11906_v53 = vsel %vm11885_vm9, %v11774_v57, %v11773_v1  ;;  %v11182_v58 = vmax.f32 %v11180_v3, %v11181_v38  ;;  %v11189_v40 = vmax.f32 %v11187_v24, %v11188_v21  ;;  %v9978_v13 = vadd.f32 %v20209_v35, %v19904_v16  ;;  %v21415_v35 = vld [vmem:[#allocation64_spill] sm:$0xff] }
 0x64b   : > { %v11907_v41 = vsel %vm11887_vm10, %v11775_v4, %v11906_v53  ;;  %v11195_v55 = vrot.slane %v11194_v26, 1  ;;  %v11777_v5 = vmax.f32 %v20211_v63, %v11175_v61  ;;  %v10392_v39 = vcombine.high %v10136_v23, %v10136_v23 }
 0x64c   : > { %v11778_v30 = vmax.f32 %v20220_v44, %v11182_v58  ;;  %v11779_v7 = vmax.f32 %v20222_v59, %v11189_v40  ;;  %v11908_v29 = vsel %vm11889_vm11, %v11776_v46, %v11907_v41  ;;  %v10399_v37 = vrot.slane %v10136_v23, %v19866_v18 }
 0x64d   : > { %v11196_v14 = vmax.f32 %v11194_v26, %v11195_v55  ;;  %v11909_v28 = vsel %vm11891_vm12, %v11777_v5, %v11908_v29  ;;  %v10406_v16 = vrot.slane %v10392_v39, %v19866_v18  ;;  %v10066_v34 = vadd.f32 %v9978_v13, %v21415_v35  ;;  %v15196_v5 = vpop.f32.mrf.mxu1 }
 0x64e   : > { %v11910_v56 = vsel %vm11893_vm13, %v11778_v30, %v11909_v28  ;;  %v10407_v63 = vcombine.high %v10399_v37, %v10399_v37  ;;  %v11197_v27 = vsel %vm10860_vm8, %v10399_v37, -inf  ;;  %v15192_v44 = vadd.f32 %v15191_v22, %v15190_v32 }
 0x64f   : > { %v11780_v59 = vmax.f32 %v20227_v47, %v11196_v14  ;;  %v11911_v49 = vsel %vm11895_vm14, %v11779_v7, %v11910_v56  ;;  %v10408_v12 = vcombine.high %v10406_v16, %v10406_v16  ;;  %v11198_v8 = vrot.slane %v11197_v27, 4 }
 0x650   : > { %v11204_v43 = vsel %vm10860_vm8, %v10407_v63, -inf  ;;  %v11211_v42 = vsel %vm10860_vm8, %v10406_v16, -inf  ;;  %v10105_v36 = vadd.f32 %v20260_v54, %v10066_v34  ;;  %v9983_v32 = vadd.f32 %v15192_v44, %v19907_v10 }
 0x651   : > { %v11912_v47 = vsel %vm11897_vm15, %v11780_v59, %v11911_v49  ;;  %v11199_v9 = vmax.f32 %v11197_v27, %v11198_v8  ;;  %v11205_v11 = vrot.slane %v11204_v43, 4  ;;  %v11212_v0 = vrot.slane %v11211_v42, 4  ;;  %v15197_v59 = vpop.f32.mrf.mxu1 }
 0x652   : > { %11958 = vst [vmem:[%s20090_s14 + $0x10] sm:$0xff] %v11912_v47  ;;  %v11218_v6 = vsel %vm10860_vm8, %v10408_v12, -inf  ;;  %v10137_v33 = vmax.f32 %v10105_v36, 0.0  ;;  %v10067_v3 = vadd.f32 %v9983_v32, %v21416_v17  ;;  %v15195_v24 = vadd.f32 %v15194_v20, %v15193_v15  ;;  %v21417_v32 = vld [vmem:[#allocation72_spill] sm:$0xff] }
 0x653   : > { %v11200_v51 = vrot.slane %v11199_v9, 2  ;;  %v11206_v1 = vmax.f32 %v11204_v43, %v11205_v11  ;;  %v11213_v2 = vmax.f32 %v11211_v42, %v11212_v0  ;;  %v11219_v31 = vrot.slane %v11218_v6, 4 }
 0x654   : > { %v10409_v22 = vcombine.high %v10137_v33, %v10137_v33  ;;  %v10416_v57 = vrot.slane %v10137_v33, %v19866_v18  ;;  %v10106_v10 = vadd.f32 %v20260_v54, %v10067_v3  ;;  %v9986_v4 = vadd.f32 %v15195_v24, %v19910_v50 }
 0x655   : > { %v11201_v38 = vmax.f32 %v11199_v9, %v11200_v51  ;;  %v11207_v21 = vrot.slane %v11206_v1, 2  ;;  %v11214_v46 = vrot.slane %v11213_v2, 2  ;;  %v11220_v61 = vmax.f32 %v11218_v6, %v11219_v31  ;;  %v15199_v51 = vpop.f32.mrf.mxu1 }
 0x656   : > { %v10423_v26 = vrot.slane %v10409_v22, %v19866_v18  ;;  %v10424_v23 = vcombine.high %v10416_v57, %v10416_v57  ;;  %v11225_v53 = vsel %vm10860_vm8, %v10416_v57, -inf  ;;  %v10138_v58 = vmax.f32 %v10106_v10, 0.0 }
 0x657   : > { %v11202_v40 = vrot.slane %v11201_v38, 1  ;;  %v11208_v13 = vmax.f32 %v11206_v1, %v11207_v21  ;;  %v11215_v41 = vmax.f32 %v11213_v2, %v11214_v46  ;;  %v11221_v55 = vrot.slane %v11220_v61, 2 }
 0x658   : > { %v10425_v39 = vcombine.high %v10423_v26, %v10423_v26  ;;  %v11226_v15 = vrot.slane %v11225_v53, 4  ;;  %v11232_v30 = vsel %vm10860_vm8, %v10424_v23, -inf  ;;  %v11239_v50 = vsel %vm10860_vm8, %v10423_v26, -inf }
 0x659   : > { %v20275_v7 = vmax.f32 %v11201_v38, %v11202_v40  ;;  %v11209_v29 = vrot.slane %v11208_v13, 1  ;;  %v11216_v37 = vrot.slane %v11215_v41, 1  ;;  %v11222_v14 = vmax.f32 %v11220_v61, %v11221_v55 }
 0x65a   : > { %v11227_v28 = vmax.f32 %v11225_v53, %v11226_v15  ;;  %v11233_v16 = vrot.slane %v11232_v30, 4  ;;  %v11240_v35 = vrot.slane %v11239_v50, 4  ;;  %v11246_v34 = vsel %vm10860_vm8, %v10425_v39, -inf }
 0x65b   : > { %v20278_v56 = vmax.f32 %v11208_v13, %v11209_v29  ;;  %v20280_v63 = vmax.f32 %v11215_v41, %v11216_v37  ;;  %v11223_v27 = vrot.slane %v11222_v14, 1  ;;  %v11247_v44 = vrot.slane %v11246_v34, 4  ;;  %v15200_v13 = vpop.f32.mrf.mxu1 }
 0x65c   : > { %v11228_v49 = vrot.slane %v11227_v28, 2  ;;  %v11234_v12 = vmax.f32 %v11232_v30, %v11233_v16  ;;  %v11241_v8 = vmax.f32 %v11239_v50, %v11240_v35  ;;  %v10426_v20 = vcombine.high %v10138_v58, %v10138_v58 }
 0x65d   : > { %v20282_v43 = vmax.f32 %v11222_v14, %v11223_v27  ;;  %v11248_v42 = vmax.f32 %v11246_v34, %v11247_v44  ;;  %v10433_v36 = vrot.slane %v10138_v58, %v19866_v18  ;;  %v10068_v47 = vadd.f32 %v9986_v4, %v21417_v32 }
 0x65e   : > { %v11229_v9 = vmax.f32 %v11227_v28, %v11228_v49  ;;  %v11235_v11 = vrot.slane %v11234_v12, 2  ;;  %v11242_v0 = vrot.slane %v11241_v8, 2  ;;  %v10440_v6 = vrot.slane %v10426_v20, %v19866_v18 }
 0x65f   : > { %v11249_v33 = vrot.slane %v11248_v42, 2  ;;  %v10441_v17 = vcombine.high %v10433_v36, %v10433_v36  ;;  %v11253_v3 = vsel %vm10860_vm8, %v10433_v36, -inf  ;;  %v10107_v24 = vadd.f32 %v20260_v54, %v10068_v47 }
 0x660   : > { %v11230_v1 = vrot.slane %v11229_v9, 1  ;;  %v11236_v2 = vmax.f32 %v11234_v12, %v11235_v11  ;;  %v11243_v31 = vmax.f32 %v11241_v8, %v11242_v0  ;;  %v10442_v22 = vcombine.high %v10440_v6, %v10440_v6 }
 0x661   : > { %v11250_v57 = vmax.f32 %v11248_v42, %v11249_v33  ;;  %v11254_v10 = vrot.slane %v11253_v3, 4  ;;  %v11260_v4 = vsel %vm10860_vm8, %v10441_v17, -inf  ;;  %v11267_v38 = vsel %vm10860_vm8, %v10440_v6, -inf }
 0x662   : > { %v20291_v21 = vmax.f32 %v11229_v9, %v11230_v1  ;;  %v11237_v46 = vrot.slane %v11236_v2, 1  ;;  %v11244_v61 = vrot.slane %v11243_v31, 1  ;;  %v11261_v26 = vrot.slane %v11260_v4, 4 }
 0x663   : > { %v11251_v23 = vrot.slane %v11250_v57, 1  ;;  %v11255_v53 = vmax.f32 %v11253_v3, %v11254_v10  ;;  %v11268_v58 = vrot.slane %v11267_v38, 4  ;;  %v11274_v40 = vsel %vm10860_vm8, %v10442_v22, -inf }
 0x664   : > { %v20294_v41 = vmax.f32 %v11236_v2, %v11237_v46  ;;  %v20296_v55 = vmax.f32 %v11243_v31, %v11244_v61  ;;  %v11262_v39 = vmax.f32 %v11260_v4, %v11261_v26  ;;  %v11275_v15 = vrot.slane %v11274_v40, 4 }
 0x665   : > { %v20298_v30 = vmax.f32 %v11250_v57, %v11251_v23  ;;  %v11256_v50 = vrot.slane %v11255_v53, 2  ;;  %v11269_v29 = vmax.f32 %v11267_v38, %v11268_v58  ;;  %v10139_v37 = vmax.f32 %v10107_v24, 0.0 }
 0x666   : > { %v11263_v14 = vrot.slane %v11262_v39, 2  ;;  %v11276_v28 = vmax.f32 %v11274_v40, %v11275_v15  ;;  %v15198_v16 = vadd.f32 %v15197_v59, %v15196_v5  ;;  %v15201_v35 = vadd.f32 %v15200_v13, %v15199_v51  ;;  %v21418_v59 = vld [vmem:[#allocation7_spill] sm:$0xff]  ;;  %v15202_v51 = vpop.f32.mrf.mxu1 }
 0x667   : > { %v11257_v34 = vmax.f32 %v11255_v53, %v11256_v50  ;;  %v11270_v27 = vrot.slane %v11269_v29, 2  ;;  %v10443_v44 = vcombine.high %v10139_v37, %v10139_v37  ;;  %v10450_v49 = vrot.slane %v10139_v37, %v19866_v18 }
 0x668   : > { %v11264_v12 = vmax.f32 %v11262_v39, %v11263_v14  ;;  %v11277_v8 = vrot.slane %v11276_v28, 2  ;;  %v9991_v20 = vadd.f32 %v15198_v16, %v19920_v52  ;;  %v9994_v42 = vadd.f32 %v15201_v35, %v19926_v19  ;;  %v15203_v40 = vpop.f32.mrf.mxu1  ;;  %v21419_v16 = vld [vmem:[#allocation34_spill] sm:$0xff] }
 0x669   : > { %v11258_v36 = vrot.slane %v11257_v34, 1  ;;  %v11271_v32 = vmax.f32 %v11269_v29, %v11270_v27  ;;  %v10457_v47 = vrot.slane %v10443_v44, %v19866_v18  ;;  %v10458_v9 = vcombine.high %v10450_v49, %v10450_v49 }
 0x66a   : > { %v11265_v11 = vrot.slane %v11264_v12, 1  ;;  %v11278_v0 = vmax.f32 %v11276_v28, %v11277_v8  ;;  %v11281_v5 = vsel %vm10860_vm8, %v10450_v49, -inf  ;;  %v10069_v6 = vadd.f32 %v9991_v20, %v21418_v59  ;;  %v15205_v49 = vpop.f32.mrf.mxu1 }
 0x66b   : > { %v11259_v33 = vmax.f32 %v11257_v34, %v11258_v36  ;;  %v11272_v17 = vrot.slane %v11271_v32, 1  ;;  %v10459_v3 = vcombine.high %v10457_v47, %v10457_v47  ;;  %v11282_v24 = vrot.slane %v11281_v5, 4 }
 0x66c   : > { %v11266_v1 = vmax.f32 %v11264_v12, %v11265_v11  ;;  %v11279_v52 = vrot.slane %v11278_v0, 1  ;;  %v11288_v19 = vsel %vm10860_vm8, %v10458_v9, -inf  ;;  %v11295_v2 = vsel %vm10860_vm8, %v10457_v47, -inf }
 0x66d   : > { %v11273_v31 = vmax.f32 %v11271_v32, %v11272_v17  ;;  %v11781_v22 = vmax.f32 %v20275_v7, %v11259_v33  ;;  %v11283_v57 = vmax.f32 %v11281_v5, %v11282_v24  ;;  %v11289_v10 = vrot.slane %v11288_v19, 4  ;;  %v15206_v24 = vpop.f32.mrf.mxu1 }
 0x66e   : > { %v11280_v4 = vmax.f32 %v11278_v0, %v11279_v52  ;;  %v11782_v38 = vmax.f32 %v20278_v56, %v11266_v1  ;;  %v11296_v46 = vrot.slane %v11295_v2, 4  ;;  %v11302_v61 = vsel %vm10860_vm8, %v10459_v3, -inf }
 0x66f   : > { %v11783_v26 = vmax.f32 %v20280_v63, %v11273_v31  ;;  %v11284_v23 = vrot.slane %v11283_v57, 2  ;;  %v11290_v53 = vmax.f32 %v11288_v19, %v11289_v10  ;;  %v11303_v58 = vrot.slane %v11302_v61, 4 }
 0x670   : > { %v11784_v13 = vmax.f32 %v20282_v43, %v11280_v4  ;;  %v11913_v39 = vsel %vm11885_vm9, %v11782_v38, %v11781_v22  ;;  %v11297_v15 = vmax.f32 %v11295_v2, %v11296_v46  ;;  %v10108_v7 = vadd.f32 %v20260_v54, %v10069_v6 }
 0x671   : > { %v11914_v50 = vsel %vm11887_vm10, %v11783_v26, %v11913_v39  ;;  %v11285_v29 = vmax.f32 %v11283_v57, %v11284_v23  ;;  %v11291_v56 = vrot.slane %v11290_v53, 2  ;;  %v11304_v37 = vmax.f32 %v11302_v61, %v11303_v58  ;;  %v20332_v23 = vpop.f32.mrf.mxu1 }
 0x672   : > { %v11298_v14 = vrot.slane %v11297_v15, 2  ;;  %v11915_v28 = vsel %vm11889_vm11, %v11784_v13, %v11914_v50  ;;  %v10140_v63 = vmax.f32 %v10108_v7, 0.0  ;;  %v10070_v35 = vadd.f32 %v9994_v42, %v21419_v16 }
 0x673   : > { %v11286_v34 = vrot.slane %v11285_v29, 1  ;;  %v11292_v27 = vmax.f32 %v11290_v53, %v11291_v56  ;;  %v11305_v44 = vrot.slane %v11304_v37, 2  ;;  %v15204_v43 = vadd.f32 %v15203_v40, %v15202_v51  ;;  %v20340_v16 = vpop.f32.mrf.mxu1 }
 0x674   : > { %v11299_v12 = vmax.f32 %v11297_v15, %v11298_v14  ;;  %v10460_v8 = vcombine.high %v10140_v63, %v10140_v63  ;;  %v10467_v20 = vrot.slane %v10140_v63, %v19866_v18  ;;  %v10109_v36 = vadd.f32 %v20260_v54, %v10070_v35  ;;  %v21420_v15 = vld [vmem:[#allocation8_spill] sm:$0xff] }
 0x675   : > { %v11287_v32 = vmax.f32 %v11285_v29, %v11286_v34  ;;  %v11293_v47 = vrot.slane %v11292_v27, 1  ;;  %v11306_v9 = vmax.f32 %v11304_v37, %v11305_v44  ;;  %v9999_v11 = vadd.f32 %v15204_v43, %v19935_v45 }
 0x676   : > { %v11300_v0 = vrot.slane %v11299_v12, 1  ;;  %v10474_v5 = vrot.slane %v10460_v8, %v19866_v18  ;;  %v10475_v42 = vcombine.high %v10467_v20, %v10467_v20  ;;  %v11309_v59 = vsel %vm10860_vm8, %v10467_v20, -inf }
 0x677   : > { %v11294_v6 = vmax.f32 %v11292_v27, %v11293_v47  ;;  %v11307_v33 = vrot.slane %v11306_v9, 1  ;;  %v11785_v17 = vmax.f32 %v20291_v21, %v11287_v32  ;;  %v11310_v3 = vrot.slane %v11309_v59, 4 }
 0x678   : > { %v11301_v51 = vmax.f32 %v11299_v12, %v11300_v0  ;;  %v10476_v1 = vcombine.high %v10474_v5, %v10474_v5  ;;  %v11316_v52 = vsel %vm10860_vm8, %v10475_v42, -inf  ;;  %v11323_v19 = vsel %vm10860_vm8, %v10474_v5, -inf  ;;  %v15211_v42 = vpop.f32.mrf.mxu1 }
 0x679   : > { %v11308_v2 = vmax.f32 %v11306_v9, %v11307_v33  ;;  %v11786_v45 = vmax.f32 %v20294_v41, %v11294_v6  ;;  %v11916_v31 = vsel %vm11891_vm12, %v11785_v17, %v11915_v28  ;;  %v11311_v22 = vmax.f32 %v11309_v59, %v11310_v3 }
 0x67a   : > { %v11787_v57 = vmax.f32 %v20296_v55, %v11301_v51  ;;  %v11317_v10 = vrot.slane %v11316_v52, 4  ;;  %v11324_v4 = vrot.slane %v11323_v19, 4  ;;  %v11330_v21 = vsel %vm10860_vm8, %v10476_v1, -inf }
 0x67b   : > { %v11788_v38 = vmax.f32 %v20298_v30, %v11308_v2  ;;  %v11917_v46 = vsel %vm11893_vm13, %v11786_v45, %v11916_v31  ;;  %v11312_v61 = vrot.slane %v11311_v22, 2  ;;  %v11331_v26 = vrot.slane %v11330_v21, 4 }
 0x67c   : > { %v11918_v41 = vsel %vm11895_vm14, %v11787_v57, %v11917_v46  ;;  %v11318_v53 = vmax.f32 %v11316_v52, %v11317_v10  ;;  %v11325_v58 = vmax.f32 %v11323_v19, %v11324_v4  ;;  %v10141_v40 = vmax.f32 %v10109_v36, 0.0  ;;  %v15212_v4 = vpop.f32.mrf.mxu1 }
 0x67d   : > { %v11919_v55 = vsel %vm11897_vm15, %v11788_v38, %v11918_v41  ;;  %v11313_v13 = vmax.f32 %v11311_v22, %v11312_v61  ;;  %v11332_v39 = vmax.f32 %v11330_v21, %v11331_v26  ;;  %v10071_v7 = vadd.f32 %v9999_v11, %v21420_v15 }
 0x67e   : > { %11959 = vst [vmem:[%s20090_s14 + $0x18] sm:$0xff] %v11919_v55  ;;  %v11319_v50 = vrot.slane %v11318_v53, 2  ;;  %v11326_v30 = vrot.slane %v11325_v58, 2  ;;  %v10477_v29 = vcombine.high %v10141_v40, %v10141_v40  ;;  %v10484_v56 = vrot.slane %v10141_v40, %v19866_v18 }
 0x67f   : > { %v11314_v37 = vrot.slane %v11313_v13, 1  ;;  %v11333_v14 = vrot.slane %v11332_v39, 2  ;;  %v10110_v28 = vadd.f32 %v20260_v54, %v10071_v7  ;;  %v15207_v63 = vadd.f32 %v15206_v24, %v15205_v49 }
 0x680   : > { %v11320_v35 = vmax.f32 %v11318_v53, %v11319_v50  ;;  %v11327_v34 = vmax.f32 %v11325_v58, %v11326_v30  ;;  %v10491_v27 = vrot.slane %v10477_v29, %v19866_v18  ;;  %v10492_v44 = vcombine.high %v10484_v56, %v10484_v56  ;;  %v15214_v30 = vpop.f32.mrf.mxu1 }
 0x681   : > { %v20343_v43 = vmax.f32 %v11313_v13, %v11314_v37  ;;  %v11334_v12 = vmax.f32 %v11332_v39, %v11333_v14  ;;  %v11337_v8 = vsel %vm10860_vm8, %v10484_v56, -inf  ;;  %v10142_v20 = vmax.f32 %v10110_v28, 0.0 }
 0x682   : > { %v11321_v36 = vrot.slane %v11320_v35, 1  ;;  %v11328_v32 = vrot.slane %v11327_v34, 1  ;;  %v10493_v47 = vcombine.high %v10491_v27, %v10491_v27  ;;  %v11338_v9 = vrot.slane %v11337_v8, 4 }
 0x683   : > { %v11335_v11 = vrot.slane %v11334_v12, 1  ;;  %v11344_v49 = vsel %vm10860_vm8, %v10492_v44, -inf  ;;  %v11351_v0 = vsel %vm10860_vm8, %v10491_v27, -inf  ;;  %v10494_v5 = vcombine.high %v10142_v20, %v10142_v20 }
 0x684   : > { %v20348_v59 = vmax.f32 %v11320_v35, %v11321_v36  ;;  %v20350_v6 = vmax.f32 %v11327_v34, %v11328_v32  ;;  %v11339_v33 = vmax.f32 %v11337_v8, %v11338_v9  ;;  %v11345_v17 = vrot.slane %v11344_v49, 4  ;;  %v21421_v8 = vld [vmem:[#allocation44_spill] sm:$0xff] }
 0x685   : > { %v20352_v3 = vmax.f32 %v11334_v12, %v11335_v11  ;;  %v11352_v24 = vrot.slane %v11351_v0, 4  ;;  %v11358_v51 = vsel %vm10860_vm8, %v10493_v47, -inf  ;;  %v10501_v1 = vrot.slane %v10142_v20, %v19866_v18  ;;  %v15215_v11 = vpop.f32.mrf.mxu1 }
 0x686   : > { %v11340_v52 = vrot.slane %v11339_v33, 2  ;;  %v11346_v19 = vmax.f32 %v11344_v49, %v11345_v17  ;;  %v11359_v2 = vrot.slane %v11358_v51, 4  ;;  %v10508_v45 = vrot.slane %v10494_v5, %v19866_v18 }
 0x687   : > { %v11353_v31 = vmax.f32 %v11351_v0, %v11352_v24  ;;  %v10509_v22 = vcombine.high %v10501_v1, %v10501_v1  ;;  %v11365_v57 = vsel %vm10860_vm8, %v10501_v1, -inf  ;;  %v10002_v10 = vadd.f32 %v15207_v63, %v19941_v48 }
 0x688   : > { %v11341_v21 = vmax.f32 %v11339_v33, %v11340_v52  ;;  %v11347_v38 = vrot.slane %v11346_v19, 2  ;;  %v11360_v46 = vmax.f32 %v11358_v51, %v11359_v2  ;;  %v10510_v61 = vcombine.high %v10508_v45, %v10508_v45 }
 0x689   : > { %v11354_v26 = vrot.slane %v11353_v31, 2  ;;  %v11366_v41 = vrot.slane %v11365_v57, 4  ;;  %v11372_v53 = vsel %vm10860_vm8, %v10509_v22, -inf  ;;  %v11379_v58 = vsel %vm10860_vm8, %v10508_v45, -inf }
 0x68a   : > { %v11342_v40 = vrot.slane %v11341_v21, 1  ;;  %v11348_v55 = vmax.f32 %v11346_v19, %v11347_v38  ;;  %v11361_v13 = vrot.slane %v11360_v46, 2  ;;  %v11373_v39 = vrot.slane %v11372_v53, 4 }
 0x68b   : > { %v11355_v15 = vmax.f32 %v11353_v31, %v11354_v26  ;;  %v11367_v7 = vmax.f32 %v11365_v57, %v11366_v41  ;;  %v11380_v50 = vrot.slane %v11379_v58, 4  ;;  %v11386_v48 = vsel %vm10860_vm8, %v10510_v61, -inf  ;;  %v21422_v61 = vld [vmem:[#allocation39_spill] sm:$0xff] }
 0x68c   : > { %v20362_v29 = vmax.f32 %v11341_v21, %v11342_v40  ;;  %v11349_v56 = vrot.slane %v11348_v55, 1  ;;  %v11362_v37 = vmax.f32 %v11360_v46, %v11361_v13  ;;  %v11374_v14 = vmax.f32 %v11372_v53, %v11373_v39 }
 0x68d   : > { %v11356_v28 = vrot.slane %v11355_v15, 1  ;;  %v11368_v63 = vrot.slane %v11367_v7, 2  ;;  %v11381_v35 = vmax.f32 %v11379_v58, %v11380_v50  ;;  %v11387_v34 = vrot.slane %v11386_v48, 4 }
 0x68e   : > { %v20364_v27 = vmax.f32 %v11348_v55, %v11349_v56  ;;  %v11363_v44 = vrot.slane %v11362_v37, 1  ;;  %v11375_v12 = vrot.slane %v11374_v14, 2  ;;  %v10072_v20 = vadd.f32 %v10002_v10, %v21421_v8 }
 0x68f   : > { %v20367_v36 = vmax.f32 %v11355_v15, %v11356_v28  ;;  %v11369_v32 = vmax.f32 %v11367_v7, %v11368_v63  ;;  %v11382_v47 = vrot.slane %v11381_v35, 2  ;;  %v11388_v9 = vmax.f32 %v11386_v48, %v11387_v34 }
 0x690   : > { %v20369_v49 = vmax.f32 %v11362_v37, %v11363_v44  ;;  %v11376_v0 = vmax.f32 %v11374_v14, %v11375_v12  ;;  %v10111_v5 = vadd.f32 %v20260_v54, %v10072_v20  ;;  %v15210_v33 = vadd.f32 %v20340_v16, %v20332_v23  ;;  %v20393_v12 = vpop.f32.mrf.mxu1 }
 0x691   : > { %v11370_v17 = vrot.slane %v11369_v32, 1  ;;  %v11383_v24 = vmax.f32 %v11381_v35, %v11382_v47  ;;  %v11389_v51 = vrot.slane %v11388_v9, 2  ;;  %v15213_v1 = vadd.f32 %v15212_v4, %v15211_v42  ;;  %v21423_v4 = vld [vmem:[#allocation31_spill] sm:$0xff] }
 0x692   : > { %v11377_v52 = vrot.slane %v11376_v0, 1  ;;  %v10143_v19 = vmax.f32 %v10111_v5, 0.0  ;;  %v10007_v2 = vadd.f32 %v15210_v33, %v19944_v25  ;;  %v15216_v45 = vadd.f32 %v15215_v11, %v15214_v30 }
 0x693   : > { %v11371_v31 = vmax.f32 %v11369_v32, %v11370_v17  ;;  %v11384_v22 = vrot.slane %v11383_v24, 1  ;;  %v11390_v57 = vmax.f32 %v11388_v9, %v11389_v51  ;;  %v10010_v10 = vadd.f32 %v15213_v1, %v19947_v60 }
 0x694   : > { %v11378_v21 = vmax.f32 %v11376_v0, %v11377_v52  ;;  %v10511_v38 = vcombine.high %v10143_v19, %v10143_v19  ;;  %v10518_v46 = vrot.slane %v10143_v19, %v19866_v18  ;;  %v10073_v23 = vadd.f32 %v10007_v2, %v21422_v61  ;;  %v20399_v2 = vpop.f32.mrf.mxu1 }
 0x695   : > { %v11385_v16 = vmax.f32 %v11383_v24, %v11384_v22  ;;  %v11391_v26 = vrot.slane %v11390_v57, 1  ;;  %v11789_v42 = vmax.f32 %v20343_v43, %v11371_v31  ;;  %v10074_v41 = vadd.f32 %v10010_v10, %v21423_v4 }
 0x696   : > { %v11790_v25 = vmax.f32 %v20348_v59, %v11378_v21  ;;  %v10525_v53 = vrot.slane %v10511_v38, %v19866_v18  ;;  %v10526_v58 = vcombine.high %v10518_v46, %v10518_v46  ;;  %v11393_v40 = vsel %vm10860_vm8, %v10518_v46, -inf }
 0x697   : > { %v11392_v60 = vmax.f32 %v11390_v57, %v11391_v26  ;;  %v11791_v55 = vmax.f32 %v20350_v6, %v11385_v16  ;;  %v11394_v13 = vrot.slane %v11393_v40, 4  ;;  %v10112_v39 = vadd.f32 %v20260_v54, %v10073_v23 }
 0x698   : > { %v11920_v15 = vsel %vm11885_vm9, %v11790_v25, %v11789_v42  ;;  %v10527_v7 = vcombine.high %v10525_v53, %v10525_v53  ;;  %v11400_v43 = vsel %vm10860_vm8, %v10526_v58, -inf  ;;  %v11407_v50 = vsel %vm10860_vm8, %v10525_v53, -inf  ;;  %v15220_v25 = vpop.f32.mrf.mxu1 }
 0x699   : > { %v11792_v59 = vmax.f32 %v20352_v3, %v11392_v60  ;;  %v11921_v48 = vsel %vm11887_vm10, %v11791_v55, %v11920_v15  ;;  %v11395_v30 = vmax.f32 %v11393_v40, %v11394_v13  ;;  %v11401_v56 = vrot.slane %v11400_v43, 4 }
 0x69a   : > { %v11408_v37 = vrot.slane %v11407_v50, 4  ;;  %v11414_v14 = vsel %vm10860_vm8, %v10527_v7, -inf  ;;  %v10144_v6 = vmax.f32 %v10112_v39, 0.0  ;;  %v10113_v28 = vadd.f32 %v20260_v54, %v10074_v41 }
 0x69b   : > { %v11396_v63 = vrot.slane %v11395_v30, 2  ;;  %v11402_v35 = vmax.f32 %v11400_v43, %v11401_v56  ;;  %v11415_v34 = vrot.slane %v11414_v14, 4  ;;  %v11922_v44 = vsel %vm11889_vm11, %v11792_v59, %v11921_v48 }
 0x69c   : > { %v11409_v8 = vmax.f32 %v11407_v50, %v11408_v37  ;;  %v10528_v20 = vcombine.high %v10144_v6, %v10144_v6  ;;  %v10535_v3 = vrot.slane %v10144_v6, %v19866_v18  ;;  %v10145_v32 = vmax.f32 %v10113_v28, 0.0  ;;  %v15221_v37 = vpop.f32.mrf.mxu1 }
 0x69d   : > { %v11397_v47 = vmax.f32 %v11395_v30, %v11396_v63  ;;  %v11403_v9 = vrot.slane %v11402_v35, 2  ;;  %v11416_v11 = vmax.f32 %v11414_v14, %v11415_v34  ;;  %v10015_v0 = vadd.f32 %v15216_v45, %v19952_v62  ;;  %v21424_v63 = vld [vmem:[#allocation84_spill] sm:$0xff] }
 0x69e   : > { %v11410_v5 = vrot.slane %v11409_v8, 2  ;;  %v10542_v33 = vrot.slane %v10528_v20, %v19866_v18  ;;  %v10543_v17 = vcombine.high %v10535_v3, %v10535_v3  ;;  %v11421_v24 = vsel %vm10860_vm8, %v10535_v3, -inf }
 0x69f   : > { %v11398_v51 = vrot.slane %v11397_v47, 1  ;;  %v11404_v1 = vmax.f32 %v11402_v35, %v11403_v9  ;;  %v11417_v52 = vrot.slane %v11416_v11, 2  ;;  %v11422_v19 = vrot.slane %v11421_v24, 4  ;;  %v21425_v35 = vld [vmem:[#allocation41_spill] sm:$0xff] }
 0x6a0   : > { %v11411_v31 = vmax.f32 %v11409_v8, %v11410_v5  ;;  %v10544_v22 = vcombine.high %v10542_v33, %v10542_v33  ;;  %v11428_v57 = vsel %vm10860_vm8, %v10543_v17, -inf  ;;  %v11435_v10 = vsel %vm10860_vm8, %v10542_v33, -inf }
 0x6a1   : > { %v11399_v21 = vmax.f32 %v11397_v47, %v11398_v51  ;;  %v11405_v62 = vrot.slane %v11404_v1, 1  ;;  %v11418_v45 = vmax.f32 %v11416_v11, %v11417_v52  ;;  %v11423_v38 = vmax.f32 %v11421_v24, %v11422_v19  ;;  %v21426_v47 = vld [vmem:[#allocation46_spill] sm:$0xff]  ;;  %v15223_v24 = vpop.f32.mrf.mxu1 }
 0x6a2   : > { %v11412_v46 = vrot.slane %v11411_v31, 1  ;;  %v11429_v61 = vrot.slane %v11428_v57, 4  ;;  %v11436_v23 = vrot.slane %v11435_v10, 4  ;;  %v11442_v16 = vsel %vm10860_vm8, %v10544_v22, -inf }
 0x6a3   : > { %v11406_v26 = vmax.f32 %v11404_v1, %v11405_v62  ;;  %v11419_v42 = vrot.slane %v11418_v45, 1  ;;  %v11793_v4 = vmax.f32 %v20362_v29, %v11399_v21  ;;  %v11424_v41 = vrot.slane %v11423_v38, 2 }
 0x6a4   : > { %v11413_v53 = vmax.f32 %v11411_v31, %v11412_v46  ;;  %v11430_v58 = vmax.f32 %v11428_v57, %v11429_v61  ;;  %v11437_v40 = vmax.f32 %v11435_v10, %v11436_v23  ;;  %v11443_v60 = vrot.slane %v11442_v16, 4  ;;  %v15224_v23 = vpop.f32.mrf.mxu1 }
 0x6a5   : > { %v11420_v55 = vmax.f32 %v11418_v45, %v11419_v42  ;;  %v11794_v13 = vmax.f32 %v20364_v27, %v11406_v26  ;;  %v11923_v39 = vsel %vm11891_vm12, %v11793_v4, %v11922_v44  ;;  %v11425_v15 = vmax.f32 %v11423_v38, %v11424_v41 }
 0x6a6   : > { %v11795_v7 = vmax.f32 %v20367_v36, %v11413_v53  ;;  %v11431_v43 = vrot.slane %v11430_v58, 2  ;;  %v11438_v50 = vrot.slane %v11437_v40, 2  ;;  %v11444_v59 = vmax.f32 %v11442_v16, %v11443_v60 }
 0x6a7   : > { %v11796_v29 = vmax.f32 %v20369_v49, %v11420_v55  ;;  %v11924_v48 = vsel %vm11893_vm13, %v11794_v13, %v11923_v39  ;;  %v11426_v30 = vrot.slane %v11425_v15, 1  ;;  %v10545_v56 = vcombine.high %v10145_v32, %v10145_v32 }
 0x6a8   : > { %v11925_v14 = vsel %vm11895_vm14, %v11795_v7, %v11924_v48  ;;  %v11432_v6 = vmax.f32 %v11430_v58, %v11431_v43  ;;  %v11439_v27 = vmax.f32 %v11437_v40, %v11438_v50  ;;  %v11445_v28 = vrot.slane %v11444_v59, 2  ;;  %v21427_v40 = vld [vmem:[#allocation80_spill] sm:$0xff]  ;;  %v15226_v50 = vpop.f32.mrf.mxu1 }
 0x6a9   : > { %v20413_v34 = vadd.f32 %v21425_v35, %v21424_v63  ;;  %v11926_v36 = vsel %vm11897_vm15, %v11796_v29, %v11925_v14  ;;  %v10552_v44 = vrot.slane %v10145_v32, %v19866_v18  ;;  %v10559_v49 = vrot.slane %v10545_v56, %v19866_v18 }
 0x6aa   : > { %11960 = vst [vmem:[%s20090_s14 + $0x20] sm:$0xff] %v11926_v36  ;;  %v11433_v8 = vrot.slane %v11432_v6, 1  ;;  %v11440_v20 = vrot.slane %v11439_v27, 1  ;;  %v11446_v3 = vmax.f32 %v11444_v59, %v11445_v28  ;;  %v10075_v9 = vadd.f32 %v10015_v0, %v21426_v47 }
 0x6ab   : > { %v10560_v11 = vcombine.high %v10552_v44, %v10552_v44  ;;  %v10561_v5 = vcombine.high %v10559_v49, %v10559_v49  ;;  %v11449_v33 = vsel %vm10860_vm8, %v10552_v44, -inf  ;;  %v11463_v17 = vsel %vm10860_vm8, %v10559_v49, -inf }
 0x6ac   : > { %v20422_v51 = vmax.f32 %v11425_v15, %v11426_v30  ;;  %v20424_v1 = vmax.f32 %v11432_v6, %v11433_v8  ;;  %v11447_v32 = vrot.slane %v11446_v3, 1  ;;  %v11450_v52 = vrot.slane %v11449_v33, 4  ;;  %v21428_v15 = vld [vmem:[#allocation6_spill] sm:$0xff] }
 0x6ad   : > { %v11456_v19 = vsel %vm10860_vm8, %v10560_v11, -inf  ;;  %v11464_v31 = vrot.slane %v11463_v17, 4  ;;  %v11470_v22 = vsel %vm10860_vm8, %v10561_v5, -inf  ;;  %v10114_v0 = vadd.f32 %v20260_v54, %v10075_v9 }
 0x6ae   : > { %v20429_v57 = vmax.f32 %v11439_v27, %v11440_v20  ;;  %v11451_v10 = vmax.f32 %v11449_v33, %v11450_v52  ;;  %v11457_v21 = vrot.slane %v11456_v19, 4  ;;  %v11471_v62 = vrot.slane %v11470_v22, 4  ;;  %v15227_v20 = vpop.f32.mrf.mxu1  ;;  %v21430_v52 = vld [vmem:[#allocation13_spill] sm:$0xff] }
 0x6af   : > { %v11465_v45 = vmax.f32 %v11463_v17, %v11464_v31  ;;  %v10146_v38 = vmax.f32 %v10114_v0, 0.0  ;;  %v15219_v46 = vadd.f32 %v20399_v2, %v20393_v12  ;;  %v15222_v61 = vadd.f32 %v15221_v37, %v15220_v25  ;;  %v21429_v17 = vld [vmem:[#allocation38_spill] sm:$0xff] }
 0x6b0   : > { %v20433_v16 = vmax.f32 %v11446_v3, %v11447_v32  ;;  %v11452_v26 = vrot.slane %v11451_v10, 2  ;;  %v11458_v42 = vmax.f32 %v11456_v19, %v11457_v21  ;;  %v11472_v4 = vmax.f32 %v11470_v22, %v11471_v62  ;;  %v21431_v22 = vld [vmem:[#allocation55_spill] sm:$0xff] }
 0x6b1   : > { %v11466_v41 = vrot.slane %v11465_v45, 2  ;;  %v10562_v53 = vcombine.high %v10146_v38, %v10146_v38  ;;  %v10569_v58 = vrot.slane %v10146_v38, %v19866_v18  ;;  %v10018_v60 = vadd.f32 %v15219_v46, %v21427_v40 }
 0x6b2   : > { %v11453_v55 = vmax.f32 %v11451_v10, %v11452_v26  ;;  %v11459_v13 = vrot.slane %v11458_v42, 2  ;;  %v11473_v39 = vrot.slane %v11472_v4, 2  ;;  %v10023_v7 = vadd.f32 %v15222_v61, %v21428_v15 }
 0x6b3   : > { %v11467_v43 = vmax.f32 %v11465_v45, %v11466_v41  ;;  %v10576_v12 = vrot.slane %v10562_v53, %v19866_v18  ;;  %v10577_v2 = vcombine.high %v10569_v58, %v10569_v58  ;;  %v11477_v25 = vsel %vm10860_vm8, %v10569_v58, -inf }
 0x6b4   : > { %v11454_v59 = vrot.slane %v11453_v55, 1  ;;  %v11460_v29 = vmax.f32 %v11458_v42, %v11459_v13  ;;  %v20440_v48 = vmax.f32 %v11472_v4, %v11473_v39  ;;  %v11478_v30 = vrot.slane %v11477_v25, 4  ;;  %v21433_v42 = vld [vmem:[#allocation22_spill] sm:$0xff]  ;;  %v21434_v39 = vld [vmem:[#allocation23_spill] sm:$0xff] }
 0x6b5   : > { %v11468_v56 = vrot.slane %v11467_v43, 1  ;;  %v10578_v37 = vcombine.high %v10576_v12, %v10576_v12  ;;  %v11484_v14 = vsel %vm10860_vm8, %v10577_v2, -inf  ;;  %v11491_v6 = vsel %vm10860_vm8, %v10576_v12, -inf }
 0x6b6   : > { %v20444_v27 = vmax.f32 %v11453_v55, %v11454_v59  ;;  %v11461_v28 = vrot.slane %v11460_v29, 1  ;;  %v11479_v63 = vmax.f32 %v11477_v25, %v11478_v30  ;;  %v15225_v35 = vadd.f32 %v15224_v23, %v15223_v24  ;;  %v21432_v23 = vld [vmem:[#allocation5_spill] sm:$0xff] }
 0x6b7   : > { %v11475_v36 = vrot.slane %v20440_v48, 1  ;;  %v11485_v44 = vrot.slane %v11484_v14, 4  ;;  %v11492_v49 = vrot.slane %v11491_v6, 4  ;;  %v11498_v8 = vsel %vm10860_vm8, %v10578_v37, -inf }
 0x6b8   : > { %v20448_v3 = vmax.f32 %v11460_v29, %v11461_v28  ;;  %v20450_v47 = vmax.f32 %v11467_v43, %v11468_v56  ;;  %v11480_v9 = vrot.slane %v11479_v63, 2  ;;  %v11499_v11 = vrot.slane %v11498_v8, 4 }
 0x6b9   : > { %v11486_v5 = vmax.f32 %v11484_v14, %v11485_v44  ;;  %v11493_v33 = vmax.f32 %v11491_v6, %v11492_v49  ;;  %v10076_v32 = vadd.f32 %v10018_v60, %v21429_v17  ;;  %v10077_v19 = vadd.f32 %v10023_v7, %v21430_v52 }
 0x6ba   : > { %v11481_v24 = vmax.f32 %v11479_v63, %v11480_v9  ;;  %v11500_v31 = vmax.f32 %v11498_v8, %v11499_v11  ;;  %v10026_v0 = vadd.f32 %v15225_v35, %v21431_v22  ;;  %v15228_v10 = vadd.f32 %v15227_v20, %v15226_v50 }
 0x6bb   : > { %v11487_v21 = vrot.slane %v11486_v5, 2  ;;  %v11494_v62 = vrot.slane %v11493_v33, 2  ;;  %v10115_v45 = vadd.f32 %v20260_v54, %v10076_v32  ;;  %v10116_v38 = vadd.f32 %v20260_v54, %v10077_v19 }
 0x6bc   : > { %v11482_v46 = vrot.slane %v11481_v24, 1  ;;  %v11501_v61 = vrot.slane %v11500_v31, 2  ;;  %v10078_v26 = vadd.f32 %v10026_v0, %v21432_v23  ;;  %v10031_v4 = vadd.f32 %v15228_v10, %v21433_v42 }
 0x6bd   : > { %v11488_v41 = vmax.f32 %v11486_v5, %v11487_v21  ;;  %v11495_v53 = vmax.f32 %v11493_v33, %v11494_v62  ;;  %v10147_v58 = vmax.f32 %v10115_v45, 0.0  ;;  %v10148_v40 = vmax.f32 %v10116_v38, 0.0  ;;  %v15123_v45 = vpop.f32.mrf.mxu0 }
 0x6be   : > { %v11483_v60 = vmax.f32 %v11481_v24, %v11482_v46  ;;  %v11502_v55 = vmax.f32 %v11500_v31, %v11501_v61  ;;  %v20460_v13 = vadd.f32 %v20260_v54, %v10078_v26  ;;  %v20463_v15 = vadd.f32 %v10031_v4, %v21434_v39  ;;  %v15229_v26 = vpop.f32.mrf.mxu1 }
 0x6bf   : > { %v11489_v7 = vrot.slane %v11488_v41, 1  ;;  %v11496_v43 = vrot.slane %v11495_v53, 1  ;;  %v10579_v12 = vcombine.high %v10147_v58, %v10147_v58  ;;  %v10586_v2 = vrot.slane %v10147_v58, %v19866_v18 }
 0x6c0   : > { %v11503_v25 = vrot.slane %v11502_v55, 1  ;;  %v11797_v50 = vmax.f32 %v20422_v51, %v11483_v60  ;;  %v10596_v59 = vcombine.high %v10148_v40, %v10148_v40  ;;  %v10603_v29 = vrot.slane %v10148_v40, %v19866_v18 }
 0x6c1   : > { %v11490_v30 = vmax.f32 %v11488_v41, %v11489_v7  ;;  %v11497_v56 = vmax.f32 %v11495_v53, %v11496_v43  ;;  %v10593_v37 = vrot.slane %v10579_v12, %v19866_v18  ;;  %v10594_v54 = vcombine.high %v10586_v2, %v10586_v2 }
 0x6c2   : > { %v11504_v14 = vmax.f32 %v11502_v55, %v11503_v25  ;;  %v11505_v6 = vsel %vm10860_vm8, %v10586_v2, -inf  ;;  %v10610_v28 = vrot.slane %v10596_v59, %v19866_v18  ;;  %v10611_v63 = vcombine.high %v10603_v29, %v10603_v29  ;;  %v15124_v2 = vpop.f32.mrf.mxu0 }
 0x6c3   : > { %v11798_v35 = vmax.f32 %v20424_v1, %v11490_v30  ;;  %v11799_v44 = vmax.f32 %v20429_v57, %v11497_v56  ;;  %v10595_v49 = vcombine.high %v10593_v37, %v10593_v37  ;;  %v11506_v51 = vrot.slane %v11505_v6, 4  ;;  %v15230_v30 = vpop.f32.mrf.mxu1 }
 0x6c4   : > { %v11800_v8 = vmax.f32 %v20433_v16, %v11504_v14  ;;  %v11512_v20 = vsel %vm10860_vm8, %v10594_v54, -inf  ;;  %v11519_v9 = vsel %vm10860_vm8, %v10593_v37, -inf  ;;  %v10612_v11 = vcombine.high %v10610_v28, %v10610_v28 }
 0x6c5   : > { %v11927_v5 = vsel %vm11885_vm9, %v11798_v35, %v11797_v50  ;;  %v11507_v33 = vmax.f32 %v11505_v6, %v11506_v51  ;;  %v11513_v17 = vrot.slane %v11512_v20, 4  ;;  %v11520_v32 = vrot.slane %v11519_v9, 4 }
 0x6c6   : > { %v11928_v52 = vsel %vm11887_vm10, %v11799_v44, %v11927_v5  ;;  %v11526_v1 = vsel %vm10860_vm8, %v10595_v49, -inf  ;;  %v11533_v57 = vsel %vm10860_vm8, %v10603_v29, -inf  ;;  %v11540_v19 = vsel %vm10860_vm8, %v10611_v63, -inf }
 0x6c7   : > { %v11508_v24 = vrot.slane %v11507_v33, 2  ;;  %v11514_v16 = vmax.f32 %v11512_v20, %v11513_v17  ;;  %v11521_v31 = vmax.f32 %v11519_v9, %v11520_v32  ;;  %v11527_v22 = vrot.slane %v11526_v1, 4  ;;  %v21435_v17 = vld [vmem:[#allocation76_spill] sm:$0xff] }
 0x6c8   : > { %v11929_v0 = vsel %vm11889_vm11, %v11800_v8, %v11928_v52  ;;  %v11534_v10 = vrot.slane %v11533_v57, 4  ;;  %v11541_v21 = vrot.slane %v11540_v19, 4  ;;  %v11547_v62 = vsel %vm10860_vm8, %v10610_v28, -inf  ;;  %v21436_v32 = vld [vmem:[#allocation24_spill] sm:$0xff] }
 0x6c9   : > { %v11509_v38 = vmax.f32 %v11507_v33, %v11508_v24  ;;  %v11515_v46 = vrot.slane %v11514_v16, 2  ;;  %v11522_v61 = vrot.slane %v11521_v31, 2  ;;  %v11528_v23 = vmax.f32 %v11526_v1, %v11527_v22  ;;  %v15232_v33 = vpop.f32.mrf.mxu1  ;;  %v21437_v24 = vld [vmem:[#allocation35_spill] sm:$0xff] }
 0x6ca   : > { %v11535_v42 = vmax.f32 %v11533_v57, %v11534_v10  ;;  %v11542_v4 = vmax.f32 %v11540_v19, %v11541_v21  ;;  %v11548_v41 = vrot.slane %v11547_v62, 4  ;;  %v11554_v53 = vsel %vm10860_vm8, %v10612_v11, -inf }
 0x6cb   : > { %v11510_v58 = vrot.slane %v11509_v38, 1  ;;  %v11516_v40 = vmax.f32 %v11514_v16, %v11515_v46  ;;  %v11523_v60 = vmax.f32 %v11521_v31, %v11522_v61  ;;  %v11529_v55 = vrot.slane %v11528_v23, 2 }
 0x6cc   : > { %v11536_v39 = vrot.slane %v11535_v42, 2  ;;  %v11543_v7 = vrot.slane %v11542_v4, 2  ;;  %v11549_v43 = vmax.f32 %v11547_v62, %v11548_v41  ;;  %v11555_v12 = vrot.slane %v11554_v53, 4 }
 0x6cd   : > { %v11511_v25 = vmax.f32 %v11509_v38, %v11510_v58  ;;  %v11517_v50 = vrot.slane %v11516_v40, 1  ;;  %v11524_v59 = vrot.slane %v11523_v60, 1  ;;  %v11530_v29 = vmax.f32 %v11528_v23, %v11529_v55  ;;  %v21438_v58 = vld [vmem:[#allocation25_spill] sm:$0xff] }
 0x6ce   : > { %v11537_v56 = vmax.f32 %v11535_v42, %v11536_v39  ;;  %v11544_v37 = vmax.f32 %v11542_v4, %v11543_v7  ;;  %v11550_v54 = vrot.slane %v11549_v43, 2  ;;  %v11556_v14 = vmax.f32 %v11554_v53, %v11555_v12 }
 0x6cf   : > { %v11518_v6 = vmax.f32 %v11516_v40, %v11517_v50  ;;  %v11525_v28 = vmax.f32 %v11523_v60, %v11524_v59  ;;  %v11531_v63 = vrot.slane %v11530_v29, 1  ;;  %v11801_v35 = vmax.f32 %v20444_v27, %v11511_v25 }
 0x6d0   : > { %v15125_v44 = vadd.f32 %v15124_v2, %v15123_v45  ;;  %v11476_v49 = vmax.f32 %v20440_v48, %v11475_v36  ;;  %v11538_v51 = vrot.slane %v11537_v56, 1  ;;  %v11557_v8 = vrot.slane %v11556_v14, 2  ;;  %v15233_v45 = vpop.f32.mrf.mxu1 }
 0x6d1   : > { %v11532_v20 = vmax.f32 %v11530_v29, %v11531_v63  ;;  %v11802_v9 = vmax.f32 %v20448_v3, %v11518_v6  ;;  %v11803_v11 = vmax.f32 %v20450_v47, %v11525_v28  ;;  %v11930_v5 = vsel %vm11891_vm12, %v11801_v35, %v11929_v0  ;;  %v20502_v3 = vld [vmem:[%s20647_s6] ss:$0 sm:$0xff] }
 0x6d2   : > { %v20493_v52 = vadd.f32 %v21436_v32, %v21435_v17  ;;  %v11545_v27 = vrot.slane %v11544_v37, 1  ;;  %v11551_v1 = vmax.f32 %v11549_v43, %v11550_v54  ;;  %v20495_v57 = vmax.f32 %v11556_v14, %v11557_v8 }
 0x6d3   : > { %v11804_v48 = vmax.f32 %v11476_v49, %v11532_v20  ;;  %v11931_v36 = vsel %vm11893_vm13, %v11802_v9, %v11930_v5  ;;  %v10149_v19 = vmax.f32 %v20460_v13, 0.0  ;;  %v10118_v47 = vadd.f32 %v20502_v3, %v20463_v15 }
 0x6d4   : > { %v20507_v16 = vadd.f32 %v15125_v44, %v21437_v24  ;;  %v11932_v31 = vsel %vm11895_vm14, %v11803_v11, %v11931_v36  ;;  %v20510_v22 = vmax.f32 %v11537_v56, %v11538_v51  ;;  %v15231_v0 = vadd.f32 %v15230_v30, %v15229_v26  ;;  %v15235_v56 = vpop.f32.mrf.mxu1 }
 0x6d5   : > { %v11933_v10 = vsel %vm11897_vm15, %v11804_v48, %v11932_v31  ;;  %v10613_v21 = vcombine.high %v10149_v19, %v10149_v19  ;;  %v10620_v13 = vrot.slane %v10149_v19, %v19866_v18  ;;  %v10150_v62 = vmax.f32 %v10118_v47, 0.0 }
 0x6d6   : > { %11961 = vst [vmem:[%s20090_s14 + $0x28] sm:$0xff] %v11933_v10  ;;  %v20515_v38 = vmax.f32 %v11544_v37, %v11545_v27  ;;  %v11552_v46 = vrot.slane %v11551_v1, 1  ;;  %v11559_v15 = vrot.slane %v20495_v57, 1  ;;  %v10034_v61 = vadd.f32 %v15231_v0, %v20413_v34  ;;  %v15236_v17 = vpop.f32.mrf.mxu1 }
 0x6d7   : > { %v10627_v23 = vrot.slane %v10613_v21, %v19866_v18  ;;  %v10628_v42 = vcombine.high %v10620_v13, %v10620_v13  ;;  %v11561_v26 = vsel %vm10860_vm8, %v10620_v13, -inf  ;;  %v10630_v4 = vcombine.high %v10150_v62, %v10150_v62 }
 0x6d8   : > { %v11562_v41 = vrot.slane %v11561_v26, 4  ;;  %v10637_v53 = vrot.slane %v10150_v62, %v19866_v18  ;;  %v10080_v40 = vadd.f32 %v10034_v61, %v21438_v58  ;;  %v15234_v60 = vadd.f32 %v15233_v45, %v15232_v33 }
 0x6d9   : > { %v10629_v55 = vcombine.high %v10627_v23, %v10627_v23  ;;  %v11568_v39 = vsel %vm10860_vm8, %v10628_v42, -inf  ;;  %v11575_v7 = vsel %vm10860_vm8, %v10627_v23, -inf  ;;  %v10644_v43 = vrot.slane %v10630_v4, %v19866_v18 }
 0x6da   : > { %v11563_v34 = vmax.f32 %v11561_v26, %v11562_v41  ;;  %v11569_v12 = vrot.slane %v11568_v39, 4  ;;  %v11576_v2 = vrot.slane %v11575_v7, 4  ;;  %v10645_v25 = vcombine.high %v10637_v53, %v10637_v53 }
 0x6db   : > { %v11582_v50 = vsel %vm10860_vm8, %v10629_v55, -inf  ;;  %v10646_v59 = vcombine.high %v10644_v43, %v10644_v43  ;;  %v11589_v29 = vsel %vm10860_vm8, %v10637_v53, -inf  ;;  %v11603_v30 = vsel %vm10860_vm8, %v10644_v43, -inf }
 0x6dc   : > { %v11564_v37 = vrot.slane %v11563_v34, 2  ;;  %v11570_v54 = vmax.f32 %v11568_v39, %v11569_v12  ;;  %v11577_v14 = vmax.f32 %v11575_v7, %v11576_v2  ;;  %v11583_v6 = vrot.slane %v11582_v50, 4 }
 0x6dd   : > { %v11590_v28 = vrot.slane %v11589_v29, 4  ;;  %v11596_v63 = vsel %vm10860_vm8, %v10645_v25, -inf  ;;  %v11604_v35 = vrot.slane %v11603_v30, 4  ;;  %v11610_v44 = vsel %vm10860_vm8, %v10646_v59, -inf  ;;  %v21440_v25 = vld [vmem:[#allocation26_spill] sm:$0xff] }
 0x6de   : > { %v11565_v49 = vmax.f32 %v11563_v34, %v11564_v37  ;;  %v11571_v51 = vrot.slane %v11570_v54, 2  ;;  %v11578_v8 = vrot.slane %v11577_v14, 2  ;;  %v11584_v20 = vmax.f32 %v11582_v50, %v11583_v6  ;;  %v15126_v6 = vpop.f32.mrf.mxu0 }
 0x6df   : > { %v11591_v9 = vmax.f32 %v11589_v29, %v11590_v28  ;;  %v11597_v11 = vrot.slane %v11596_v63, 4  ;;  %v11605_v5 = vmax.f32 %v11603_v30, %v11604_v35  ;;  %v11611_v33 = vrot.slane %v11610_v44, 4 }
 0x6e0   : > { %v11553_v32 = vmax.f32 %v11551_v1, %v11552_v46  ;;  %v11566_v27 = vrot.slane %v11565_v49, 1  ;;  %v11572_v48 = vmax.f32 %v11570_v54, %v11571_v51  ;;  %v20531_v36 = vmax.f32 %v11577_v14, %v11578_v8 }
 0x6e1   : > { %v11592_v19 = vrot.slane %v11591_v9, 2  ;;  %v11598_v47 = vmax.f32 %v11596_v63, %v11597_v11  ;;  %v11606_v24 = vrot.slane %v11605_v5, 2  ;;  %v11612_v31 = vmax.f32 %v11610_v44, %v11611_v33 }
 0x6e2   : > { %v11560_v0 = vmax.f32 %v20495_v57, %v11559_v15  ;;  %v11585_v10 = vrot.slane %v11584_v20, 2  ;;  %v10039_v21 = vadd.f32 %v15234_v60, %v20493_v52  ;;  %v15237_v13 = vadd.f32 %v15236_v17, %v15235_v56  ;;  %v21439_v52 = vld [vmem:[#allocation28_spill] sm:$0xff] }
 0x6e3   : > { %v11593_v62 = vmax.f32 %v11591_v9, %v11592_v19  ;;  %v11599_v45 = vrot.slane %v11598_v47, 2  ;;  %v11607_v61 = vmax.f32 %v11605_v5, %v11606_v24  ;;  %v11613_v23 = vrot.slane %v11612_v31, 2 }
 0x6e4   : > { %v20535_v42 = vmax.f32 %v11565_v49, %v11566_v27  ;;  %v11573_v1 = vrot.slane %v11572_v48, 1  ;;  %v11580_v46 = vrot.slane %v20531_v36, 1  ;;  %v10119_v26 = vadd.f32 %v20502_v3, %v10080_v40  ;;  %v15127_v27 = vpop.f32.mrf.mxu0 }
 0x6e5   : > { %v11594_v4 = vrot.slane %v11593_v62, 1  ;;  %v11600_v41 = vmax.f32 %v11598_v47, %v11599_v45  ;;  %v11608_v53 = vrot.slane %v11607_v61, 1  ;;  %v11614_v58 = vmax.f32 %v11612_v31, %v11613_v23  ;;  %v15238_v31 = vpop.f32.mrf.mxu1 }
 0x6e6   : > { %v20539_v57 = vmax.f32 %v11584_v20, %v11585_v10  ;;  %v10151_v15 = vmax.f32 %v10119_v26, 0.0  ;;  %v10081_v60 = vadd.f32 %v10039_v21, %v21439_v52  ;;  %v10042_v55 = vadd.f32 %v15237_v13, %v20507_v16 }
 0x6e7   : > { %v11595_v39 = vmax.f32 %v11593_v62, %v11594_v4  ;;  %v11601_v7 = vrot.slane %v11600_v41, 1  ;;  %v11609_v43 = vmax.f32 %v11607_v61, %v11608_v53  ;;  %v11615_v34 = vrot.slane %v11614_v58, 1  ;;  %v15129_v53 = vpop.f32.mrf.mxu0 }
 0x6e8   : > { %v10647_v12 = vcombine.high %v10151_v15, %v10151_v15  ;;  %v10654_v2 = vrot.slane %v10151_v15, %v19866_v18  ;;  %v10120_v40 = vadd.f32 %v20502_v3, %v10081_v60  ;;  %v10082_v50 = vadd.f32 %v10042_v55, %v21440_v25  ;;  %v15239_v55 = vpop.f32.mrf.mxu1 }
 0x6e9   : > { %v11602_v59 = vmax.f32 %v11600_v41, %v11601_v7  ;;  %v11616_v29 = vmax.f32 %v11614_v58, %v11615_v34  ;;  %v11805_v30 = vmax.f32 %v20510_v22, %v11595_v39  ;;  %v11807_v56 = vmax.f32 %v11553_v32, %v11609_v43 }
 0x6ea   : > { %v10661_v37 = vrot.slane %v10647_v12, %v19866_v18  ;;  %v10662_v54 = vcombine.high %v10654_v2, %v10654_v2  ;;  %v11617_v16 = vsel %vm10860_vm8, %v10654_v2, -inf  ;;  %v10152_v14 = vmax.f32 %v10120_v40, 0.0 }
 0x6eb   : > { %v20549_v28 = vmax.f32 %v11572_v48, %v11573_v1  ;;  %v11806_v63 = vmax.f32 %v20515_v38, %v11602_v59  ;;  %v11808_v35 = vmax.f32 %v11560_v0, %v11616_v29  ;;  %v11618_v44 = vrot.slane %v11617_v16, 4 }
 0x6ec   : > { %v10663_v49 = vcombine.high %v10661_v37, %v10661_v37  ;;  %v11624_v51 = vsel %vm10860_vm8, %v10662_v54, -inf  ;;  %v11631_v8 = vsel %vm10860_vm8, %v10661_v37, -inf  ;;  %v10664_v22 = vcombine.high %v10152_v14, %v10152_v14  ;;  %v15130_v37 = vpop.f32.mrf.mxu0 }
 0x6ed   : > { %v11934_v20 = vsel %vm11885_vm9, %v11806_v63, %v11805_v30  ;;  %v11619_v9 = vmax.f32 %v11617_v16, %v11618_v44  ;;  %v11625_v11 = vrot.slane %v11624_v51, 4  ;;  %v11632_v5 = vrot.slane %v11631_v8, 4 }
 0x6ee   : > { %v11935_v33 = vsel %vm11887_vm10, %v11807_v56, %v11934_v20  ;;  %v11638_v17 = vsel %vm10860_vm8, %v10663_v49, -inf  ;;  %v10671_v32 = vrot.slane %v10152_v14, %v19866_v18  ;;  %v10678_v38 = vrot.slane %v10664_v22, %v19866_v18 }
 0x6ef   : > { %v11620_v48 = vrot.slane %v11619_v9, 2  ;;  %v11626_v19 = vmax.f32 %v11624_v51, %v11625_v11  ;;  %v11633_v47 = vmax.f32 %v11631_v8, %v11632_v5  ;;  %v11639_v24 = vrot.slane %v11638_v17, 4 }
 0x6f0   : > { %v11936_v0 = vsel %vm11889_vm11, %v11808_v35, %v11935_v33  ;;  %v10679_v10 = vcombine.high %v10671_v32, %v10671_v32  ;;  %v10680_v21 = vcombine.high %v10678_v38, %v10678_v38  ;;  %v11645_v13 = vsel %vm10860_vm8, %v10671_v32, -inf  ;;  %v15241_v35 = vpop.f32.mrf.mxu1  ;;  %v21441_v32 = vld [vmem:[#allocation81_spill] sm:$0xff] }
 0x6f1   : > { %v11621_v62 = vmax.f32 %v11619_v9, %v11620_v48  ;;  %v11627_v45 = vrot.slane %v11626_v19, 2  ;;  %v11634_v61 = vrot.slane %v11633_v47, 2  ;;  %v11640_v23 = vmax.f32 %v11638_v17, %v11639_v24  ;;  %v21442_v24 = vld [vmem:[#allocation97_spill] sm:$0xff] }
 0x6f2   : > { %v11646_v1 = vrot.slane %v11645_v13, 4  ;;  %v11652_v26 = vsel %vm10860_vm8, %v10679_v10, -inf  ;;  %v11659_v4 = vsel %vm10860_vm8, %v10678_v38, -inf  ;;  %v11666_v41 = vsel %vm10860_vm8, %v10680_v21, -inf }
 0x6f3   : > { %v11622_v58 = vrot.slane %v11621_v62, 1  ;;  %v11628_v15 = vmax.f32 %v11626_v19, %v11627_v45  ;;  %v11635_v52 = vmax.f32 %v11633_v47, %v11634_v61  ;;  %v11641_v60 = vrot.slane %v11640_v23, 2 }
 0x6f4   : > { %v11587_v39 = vrot.slane %v20539_v57, 1  ;;  %v11653_v7 = vrot.slane %v11652_v26, 4  ;;  %v11660_v43 = vrot.slane %v11659_v4, 4  ;;  %v11667_v34 = vrot.slane %v11666_v41, 4 }
 0x6f5   : > { %v11623_v12 = vmax.f32 %v11621_v62, %v11622_v58  ;;  %v11629_v2 = vrot.slane %v11628_v15, 1  ;;  %v11636_v40 = vrot.slane %v11635_v52, 1  ;;  %v11642_v25 = vmax.f32 %v11640_v23, %v11641_v60 }
 0x6f6   : > { %v11581_v59 = vmax.f32 %v20531_v36, %v11580_v46  ;;  %v11647_v29 = vmax.f32 %v11645_v13, %v11646_v1  ;;  %v11654_v30 = vmax.f32 %v11652_v26, %v11653_v7  ;;  %v10121_v56 = vadd.f32 %v20502_v3, %v10082_v50  ;;  %v21443_v26 = vld [vmem:[#allocation12_spill] sm:$0xff] }
 0x6f7   : > { %v11630_v54 = vmax.f32 %v11628_v15, %v11629_v2  ;;  %v11637_v16 = vmax.f32 %v11635_v52, %v11636_v40  ;;  %v11643_v14 = vrot.slane %v11642_v25, 1  ;;  %v11809_v63 = vmax.f32 %v20535_v42, %v11623_v12  ;;  %v21444_v12 = vld [vmem:[#allocation29_spill] sm:$0xff] }
 0x6f8   : > { %v15128_v44 = vadd.f32 %v15127_v27, %v15126_v6  ;;  %v11588_v49 = vmax.f32 %v20539_v57, %v11587_v39  ;;  %v11661_v51 = vmax.f32 %v11659_v4, %v11660_v43  ;;  %v11668_v8 = vmax.f32 %v11666_v41, %v11667_v34  ;;  %v15242_v6 = vpop.f32.mrf.mxu1 }
 0x6f9   : > { %v11644_v22 = vmax.f32 %v11642_v25, %v11643_v14  ;;  %v11810_v20 = vmax.f32 %v20549_v28, %v11630_v54  ;;  %v11811_v36 = vmax.f32 %v11581_v59, %v11637_v16  ;;  %v11937_v46 = vsel %vm11891_vm12, %v11809_v63, %v11936_v0 }
 0x6fa   : > { %v15131_v9 = vadd.f32 %v15130_v37, %v15129_v53  ;;  %v11648_v50 = vrot.slane %v11647_v29, 2  ;;  %v11655_v11 = vrot.slane %v11654_v30, 2  ;;  %v10153_v42 = vmax.f32 %v10121_v56, 0.0 }
 0x6fb   : > { %v11812_v5 = vmax.f32 %v11588_v49, %v11644_v22  ;;  %v11938_v33 = vsel %vm11893_vm13, %v11810_v20, %v11937_v46  ;;  %v15240_v17 = vadd.f32 %v15239_v55, %v15238_v31  ;;  %v9886_v57 = vadd.f32 %v15128_v44, %v21441_v32 }
 0x6fc   : > { %v11939_v38 = vsel %vm11895_vm14, %v11811_v36, %v11938_v33  ;;  %v11662_v27 = vrot.slane %v11661_v51, 2  ;;  %v11669_v48 = vrot.slane %v11668_v8, 2  ;;  %v10681_v19 = vcombine.high %v10153_v42, %v10153_v42 }
 0x6fd   : > { %v11940_v28 = vsel %vm11897_vm15, %v11812_v5, %v11939_v38  ;;  %v10688_v47 = vrot.slane %v10153_v42, %v19866_v18  ;;  %v9889_v0 = vadd.f32 %v15131_v9, %v21442_v24  ;;  %v11649_v10 = vmax.f32 %v11647_v29, %v11648_v50 }
 0x6fe   : > { %11962 = vst [vmem:[%s20090_s14 + $0x30] sm:$0xff] %v11940_v28  ;;  %v10047_v21 = vadd.f32 %v15240_v17, %v9886_v57  ;;  %v15243_v13 = vadd.f32 %v15242_v6, %v15241_v35  ;;  %v11656_v62 = vmax.f32 %v11654_v30, %v11655_v11  ;;  %v10695_v31 = vrot.slane %v10681_v19, %v19866_v18 }
 0x6ff   : > { %v10696_v45 = vcombine.high %v10688_v47, %v10688_v47  ;;  %v11673_v61 = vsel %vm10860_vm8, %v10688_v47, -inf  ;;  %v11663_v23 = vmax.f32 %v11661_v51, %v11662_v27  ;;  %v11670_v53 = vmax.f32 %v11668_v8, %v11669_v48 }
 0x700   : > { %v11674_v1 = vrot.slane %v11673_v61, 4  ;;  %v10083_v4 = vadd.f32 %v10047_v21, %v21443_v26  ;;  %v10050_v41 = vadd.f32 %v15243_v13, %v9889_v0  ;;  %v10697_v58 = vcombine.high %v10695_v31, %v10695_v31 }
 0x701   : > { %v11680_v15 = vsel %vm10860_vm8, %v10696_v45, -inf  ;;  %v11687_v52 = vsel %vm10860_vm8, %v10695_v31, -inf  ;;  %v11650_v43 = vrot.slane %v11649_v10, 1  ;;  %v11657_v30 = vrot.slane %v11656_v62, 1 }
 0x702   : > { %v11675_v60 = vmax.f32 %v11673_v61, %v11674_v1  ;;  %v11681_v55 = vrot.slane %v11680_v15, 4  ;;  %v11688_v39 = vrot.slane %v11687_v52, 4  ;;  %v10122_v7 = vadd.f32 %v20502_v3, %v10083_v4 }
 0x703   : > { %v11694_v34 = vsel %vm10860_vm8, %v10697_v58, -inf  ;;  %v10084_v2 = vadd.f32 %v10050_v41, %v21444_v12  ;;  %v11664_v56 = vrot.slane %v11663_v23, 1  ;;  %v11671_v16 = vrot.slane %v11670_v53, 1 }
 0x704   : > { %v11676_v40 = vrot.slane %v11675_v60, 2  ;;  %v11682_v25 = vmax.f32 %v11680_v15, %v11681_v55  ;;  %v11689_v59 = vmax.f32 %v11687_v52, %v11688_v39  ;;  %v11695_v29 = vrot.slane %v11694_v34, 4 }
 0x705   : > { %v10154_v37 = vmax.f32 %v10122_v7, 0.0  ;;  %v10123_v54 = vadd.f32 %v20502_v3, %v10084_v2  ;;  %v20590_v8 = vmax.f32 %v11649_v10, %v11650_v43  ;;  %v20594_v46 = vmax.f32 %v11656_v62, %v11657_v30 }
 0x706   : > { %v11677_v14 = vmax.f32 %v11675_v60, %v11676_v40  ;;  %v11683_v63 = vrot.slane %v11682_v25, 2  ;;  %v11696_v35 = vmax.f32 %v11694_v34, %v11695_v29  ;;  %v11690_v36 = vrot.slane %v11689_v59, 2 }
 0x707   : > { %v10698_v44 = vcombine.high %v10154_v37, %v10154_v37  ;;  %v10705_v49 = vrot.slane %v10154_v37, %v19866_v18  ;;  %v10155_v51 = vmax.f32 %v10123_v54, 0.0  ;;  %v20598_v11 = vmax.f32 %v11663_v23, %v11664_v56 }
 0x708   : > { %v11678_v22 = vrot.slane %v11677_v14, 1  ;;  %v20592_v20 = vmax.f32 %v11682_v25, %v11683_v63  ;;  %v20600_v5 = vmax.f32 %v11670_v53, %v11671_v16  ;;  %v11697_v33 = vrot.slane %v11696_v35, 2 }
 0x709   : > { %v10712_v9 = vrot.slane %v10698_v44, %v19866_v18  ;;  %v10713_v50 = vcombine.high %v10705_v49, %v10705_v49  ;;  %v11701_v3 = vsel %vm10860_vm8, %v10705_v49, -inf  ;;  %v10715_v42 = vcombine.high %v10155_v51, %v10155_v51 }
 0x70a   : > { %v11702_v6 = vrot.slane %v11701_v3, 4  ;;  %v20604_v38 = vmax.f32 %v11677_v14, %v11678_v22  ;;  %v11685_v27 = vrot.slane %v20592_v20, 1  ;;  %v20607_v28 = vmax.f32 %v11689_v59, %v11690_v36 }
 0x70b   : > { %v10714_v17 = vcombine.high %v10712_v9, %v10712_v9  ;;  %v11708_v32 = vsel %vm10860_vm8, %v10713_v50, -inf  ;;  %v11715_v57 = vsel %vm10860_vm8, %v10712_v9, -inf  ;;  %v10722_v0 = vrot.slane %v10155_v51, %v19866_v18 }
 0x70c   : > { %v11709_v48 = vrot.slane %v11708_v32, 4  ;;  %v11703_v19 = vmax.f32 %v11701_v3, %v11702_v6  ;;  %v11716_v47 = vrot.slane %v11715_v57, 4  ;;  %v20611_v10 = vmax.f32 %v11696_v35, %v11697_v33 }
 0x70d   : > { %v11722_v24 = vsel %vm10860_vm8, %v10714_v17, -inf  ;;  %v10729_v62 = vrot.slane %v10715_v42, %v19866_v18  ;;  %v10730_v61 = vcombine.high %v10722_v0, %v10722_v0  ;;  %v11729_v23 = vsel %vm10860_vm8, %v10722_v0, -inf }
 0x70e   : > { %v11710_v21 = vmax.f32 %v11708_v32, %v11709_v48  ;;  %v11723_v13 = vrot.slane %v11722_v24, 4  ;;  %v11704_v31 = vrot.slane %v11703_v19, 2  ;;  %v11717_v45 = vmax.f32 %v11715_v57, %v11716_v47 }
 0x70f   : > { %v10731_v4 = vcombine.high %v10729_v62, %v10729_v62  ;;  %v11730_v41 = vrot.slane %v11729_v23, 4  ;;  %v11736_v15 = vsel %vm10860_vm8, %v10730_v61, -inf  ;;  %v11743_v52 = vsel %vm10860_vm8, %v10729_v62, -inf }
 0x710   : > { %v11711_v1 = vrot.slane %v11710_v21, 2  ;;  %v11724_v26 = vmax.f32 %v11722_v24, %v11723_v13  ;;  %v11705_v53 = vmax.f32 %v11703_v19, %v11704_v31  ;;  %v11718_v58 = vrot.slane %v11717_v45, 2 }
 0x711   : > { %v11731_v39 = vmax.f32 %v11729_v23, %v11730_v41  ;;  %v11737_v7 = vrot.slane %v11736_v15, 4  ;;  %v11744_v34 = vrot.slane %v11743_v52, 4  ;;  %v11750_v12 = vsel %vm10860_vm8, %v10731_v4, -inf }
 0x712   : > { %v11712_v60 = vmax.f32 %v11710_v21, %v11711_v1  ;;  %v11725_v55 = vrot.slane %v11724_v26, 2  ;;  %v11706_v18 = vrot.slane %v11705_v53, 1  ;;  %v11719_v43 = vmax.f32 %v11717_v45, %v11718_v58 }
 0x713   : > { %v11732_v25 = vrot.slane %v11731_v39, 2  ;;  %v11738_v59 = vmax.f32 %v11736_v15, %v11737_v7  ;;  %v11745_v56 = vmax.f32 %v11743_v52, %v11744_v34  ;;  %v11751_v37 = vrot.slane %v11750_v12, 4 }
 0x714   : > { %v11713_v2 = vrot.slane %v11712_v60, 1  ;;  %v11726_v40 = vmax.f32 %v11724_v26, %v11725_v55  ;;  %v11707_v29 = vmax.f32 %v11705_v53, %v11706_v18  ;;  %v11720_v30 = vrot.slane %v11719_v43, 1 }
 0x715   : > { %v11733_v14 = vmax.f32 %v11731_v39, %v11732_v25  ;;  %v11739_v63 = vrot.slane %v11738_v59, 2  ;;  %v11746_v49 = vrot.slane %v11745_v56, 2  ;;  %v11752_v51 = vmax.f32 %v11750_v12, %v11751_v37 }
 0x716   : > { %v11714_v54 = vmax.f32 %v11712_v60, %v11713_v2  ;;  %v11727_v16 = vrot.slane %v11726_v40, 1  ;;  %v11721_v35 = vmax.f32 %v11719_v43, %v11720_v30  ;;  %v11813_v44 = vmax.f32 %v20590_v8, %v11707_v29 }
 0x717   : > { %v11734_v9 = vrot.slane %v11733_v14, 1  ;;  %v11740_v50 = vmax.f32 %v11738_v59, %v11739_v63  ;;  %v11692_v3 = vrot.slane %v20607_v28, 1  ;;  %v11747_v42 = vmax.f32 %v11745_v56, %v11746_v49 }
 0x718   : > { %v11728_v22 = vmax.f32 %v11726_v40, %v11727_v16  ;;  %v11814_v36 = vmax.f32 %v20594_v46, %v11714_v54  ;;  %v11815_v33 = vmax.f32 %v20598_v11, %v11721_v35  ;;  %v11753_v17 = vrot.slane %v11752_v51, 2 }
 0x719   : > { %v11735_v57 = vmax.f32 %v11733_v14, %v11734_v9  ;;  %v11741_v48 = vrot.slane %v11740_v50, 1  ;;  %v11699_v8 = vrot.slane %v20611_v10, 1  ;;  %v11748_v47 = vrot.slane %v11747_v42, 1 }
 0x71a   : > { %v11816_v6 = vmax.f32 %v20600_v5, %v11728_v22  ;;  %v11941_v32 = vsel %vm11885_vm9, %v11814_v36, %v11813_v44  ;;  %v11754_v46 = vmax.f32 %v11752_v51, %v11753_v17  ;;  %v11686_v24 = vmax.f32 %v20592_v20, %v11685_v27 }
 0x71b   : > { %v11942_v19 = vsel %vm11887_vm10, %v11815_v33, %v11941_v32  ;;  %v11742_v11 = vmax.f32 %v11740_v50, %v11741_v48  ;;  %v11817_v0 = vmax.f32 %v20604_v38, %v11735_v57  ;;  %v11693_v21 = vmax.f32 %v20607_v28, %v11692_v3 }
 0x71c   : > { %v11943_v5 = vsel %vm11889_vm11, %v11816_v6, %v11942_v19  ;;  %v11749_v13 = vmax.f32 %v11747_v42, %v11748_v47  ;;  %v11755_v62 = vrot.slane %v11754_v46, 1  ;;  %v11700_v61 = vmax.f32 %v20611_v10, %v11699_v8 }
 0x71d   : > { %v11818_v31 = vmax.f32 %v11686_v24, %v11742_v11  ;;  %v11944_v45 = vsel %vm11891_vm12, %v11817_v0, %v11943_v5 }
 0x71e   : > { %v11756_v23 = vmax.f32 %v11754_v46, %v11755_v62  ;;  %v11819_v1 = vmax.f32 %v11693_v21, %v11749_v13 }
 0x71f   : > { %v11945_v26 = vsel %vm11893_vm13, %v11818_v31, %v11944_v45 }
 0x720   : > { %v11820_v20 = vmax.f32 %v11700_v61, %v11756_v23  ;;  %v11946_v27 = vsel %vm11895_vm14, %v11819_v1, %v11945_v26 }
 0x722   : > { %v11947_v38 = vsel %vm11897_vm15, %v11820_v20, %v11946_v27 }
 0x723   : > { %11963 = vst [vmem:[%s20090_s14 + $0x38] sm:$0xff] %v11947_v38 }
 0x724 PF: > { %s17_s24 = sadd.s32 1, %s15863_s24  }
 0x725   : > { %p14_p4 = scmp.ge.s32.totalorder %s17_s24, 4  }
 0x727   :  { %16 = sbr.rel (!%p14_p4) target bundleno = 1 (0x1), region = 88 }

</bundles_post_ra>
